<compile_context>
chip_gen: v5e
topology: v5e:2x2
jax: 0.10.0
libtpu: 0.0.40
codegen_flags: <defaults>
</compile_context>

<pallas_src>
import functools
import math

import jax
import jax.numpy as jnp
from jax import lax
from jax.experimental import pallas as pl
from jax.experimental.pallas import tpu as pltpu

LANES = 128          # lane-dense padded feature width of all intermediates
ASRC_ROWS = 8        # sublane-aligned row count for the lane-major a_src array
MASK_NEG = -1e30     # additive mask value for non-edges (finite, exp() -> 0)


def _round_up(x, m):
    return ((x + m - 1) // m) * m


def _default_vmem_limit():
    """~3/4 of physical VMEM: 48 MiB on v7x (64 MiB), 96 MiB on v5e/v6e (128 MiB)."""
    try:
        cap = pltpu.get_tpu_info().vmem_capacity_bytes
    except Exception:
        cap = 64 * 1024 * 1024
    return int(min(cap * 3 // 4, 112 * 1024 * 1024))


VMEM_LIMIT_BYTES = _default_vmem_limit()


# -----------------------------------------------------------------------------
# Kernel 1: fused input projection  xp = x @ w_aug   (bf16 MXU, f32 accumulate)
#   w_aug columns: [0:H*C] = W, [H*C:H*C+H] = W@a_src (per head),
#                  [H*C+H:H*C+2H] = W@a_dst (per head), rest zero-padding.
# -----------------------------------------------------------------------------
def input_proj_kernel(x_ref, w_ref, out_ref):
    out_ref[...] = jnp.dot(
        x_ref[...].astype(jnp.bfloat16), w_ref[...],
        preferred_element_type=jnp.float32).astype(out_ref.dtype)


def input_projection(x, w_aug, *, tile_n):
    n_pad, f_in = x.shape
    return pl.pallas_call(
        input_proj_kernel,
        out_shape=jax.ShapeDtypeStruct((n_pad, LANES), jnp.bfloat16),
        grid=(n_pad // tile_n,),
        in_specs=[pl.BlockSpec((tile_n, f_in), lambda i: (i, 0)),
                  pl.BlockSpec((f_in, LANES), lambda i: (0, 0))],
        out_specs=pl.BlockSpec((tile_n, LANES), lambda i: (i, 0)),
        compiler_params=pltpu.CompilerParams(
            dimension_semantics=("parallel",),
            vmem_limit_bytes=VMEM_LIMIT_BYTES),
    )(x, w_aug)


# -----------------------------------------------------------------------------
# Kernel 2: GAT attention layer (online softmax over src tiles), fused with
#           BN(eval) + conv bias + ReLU and the NEXT layer's projection.
#
#   grid = (n_dst_tiles ["parallel"], n_src_tiles ["arbitrary"])
#
#   asrc   : [8, S]    lane-major per-head src attention scores (f32, rows 0..H-1)
#   xp_src : [S, 128]  projected src features = value matrix, all heads (bf16)
#   xp_dst : [T, 128]  projected dst features, carries a_dst columns (bf16)
#   noedge : [T, S]    int8, 1 where there is NO edge (self loops are edges)
#   scale  : [1, 128]  BN scale gamma/sqrt(var+eps), zero in padding lanes
#   shift  : [1, 128]  conv_bias*scale + (beta - mean*scale), zero-padded
#   w_post : [128,128] fused next-layer projection (bf16)
#   out    : [T, 128]  relu(bn(gat(x))) @ w_post  (bf16)
# -----------------------------------------------------------------------------
def gat_attn_kernel(asrc_ref, xp_src_ref, xp_dst_ref, noedge_ref, scale_ref,
                    shift_ref, wpost_ref, out_ref, m_sc, l_sc, acc_sc, *,
                    heads, head_dim):
    d = heads * head_dim
    j = pl.program_id(1)

    @pl.when(j == 0)
    def _():
        m_sc[...] = jnp.full(m_sc.shape, MASK_NEG, jnp.float32)
        l_sc[...] = jnp.zeros(l_sc.shape, jnp.float32)
        acc_sc[...] = jnp.zeros(acc_sc.shape, jnp.float32)

    v = xp_src_ref[...]                                      # [S, 128] bf16
    asrc = asrc_ref[...]                                     # [8, S]  f32
    xp_dst = xp_dst_ref[...]                                 # [T, 128] bf16
    # Additive mask expanded once per tile (int8 -> f32), shared across heads.
    neg = noedge_ref[...].astype(jnp.float32) * MASK_NEG     # [T, S]
    col = lax.broadcasted_iota(jnp.int32, (1, LANES), 1)

    for h in range(heads):
        a_dst = xp_dst[:, d + heads + h: d + heads + h + 1].astype(jnp.float32)
        e = a_dst + asrc[h:h + 1, :]                         # [T, S]
        e = jnp.maximum(e, 0.2 * e)                          # LeakyReLU(0.2)
        e = e + neg                                          # mask non-edges
        m_prev = m_sc[h]                                     # [T, 1]
        m_new = jnp.maximum(m_prev, jnp.max(e, axis=-1, keepdims=True))
        alpha = jnp.exp(m_prev - m_new)                      # rescale old state
        p = jnp.exp(e - m_new)                               # un-normalized probs
        l_sc[h] = alpha * l_sc[h] + jnp.sum(p, axis=-1, keepdims=True)
        m_sc[h] = m_new
        # NOTE(v5e): slicing v to this head's [S, head_dim] lanes would cut the
        # MXU work 4x there; on v6e/v7x the MXU has slack so full width is kept.
        oh = jnp.dot(p.astype(jnp.bfloat16), v,
                     preferred_element_type=jnp.float32)     # [T, 128]
        sel = (col >= h * head_dim) & (col < (h + 1) * head_dim)
        acc_sc[...] = (acc_sc[...] * jnp.where(sel, alpha, 1.0)
                       + jnp.where(sel, oh, 0.0))

    @pl.when(j == pl.num_programs(1) - 1)
    def _():
        # Deferred softmax normalization (EUP approx reciprocal) per head lane
        # block, then BN(eval)+bias+ReLU and the fused next-layer projection.
        # Dropout(p=0.2) is identity in eval mode.
        r = jnp.zeros(acc_sc.shape, jnp.float32)
        for h in range(heads):
            sel = (col >= h * head_dim) & (col < (h + 1) * head_dim)
            r = r + jnp.where(sel, pl.reciprocal(l_sc[h], approx=True), 0.0)
        y = acc_sc[...] * r
        y = jnp.maximum(y * scale_ref[...] + shift_ref[...], 0.0)
        out_ref[...] = jnp.dot(
            y.astype(jnp.bfloat16), wpost_ref[...],
            preferred_element_type=jnp.float32).astype(out_ref.dtype)


def gat_attention_layer(xp, asrcT, noedge, scale, shift, w_post, *, heads,
                        head_dim, tile_dst, tile_src):
    n_pad = xp.shape[0]
    kern = functools.partial(gat_attn_kernel, heads=heads, head_dim=head_dim)
    return pl.pallas_call(
        kern,
        out_shape=jax.ShapeDtypeStruct((n_pad, LANES), jnp.bfloat16),
        grid=(n_pad // tile_dst, n_pad // tile_src),
        in_specs=[
            pl.BlockSpec((ASRC_ROWS, tile_src), lambda i, j: (0, j)),  # a_src rows
            pl.BlockSpec((tile_src, LANES), lambda i, j: (j, 0)),      # value tile
            pl.BlockSpec((tile_dst, LANES), lambda i, j: (i, 0)),      # dst tile
            pl.BlockSpec((tile_dst, tile_src), lambda i, j: (i, j)),   # int8 mask
            pl.BlockSpec((1, LANES), lambda i, j: (0, 0)),             # BN scale
            pl.BlockSpec((1, LANES), lambda i, j: (0, 0)),             # BN shift
            pl.BlockSpec((LANES, LANES), lambda i, j: (0, 0)),         # next weight
        ],
        out_specs=pl.BlockSpec((tile_dst, LANES), lambda i, j: (i, 0)),
        scratch_shapes=[
            pltpu.VMEM((heads, tile_dst, 1), jnp.float32),   # running max
            pltpu.VMEM((heads, tile_dst, 1), jnp.float32),   # running sum
            pltpu.VMEM((tile_dst, LANES), jnp.float32),      # lane-dense acc
        ],
        compiler_params=pltpu.CompilerParams(
            dimension_semantics=("parallel", "arbitrary"),
            vmem_limit_bytes=VMEM_LIMIT_BYTES),
    )(asrcT, xp, xp, noedge, scale, shift, w_post)


# -----------------------------------------------------------------------------
# Kernel 3: global_mean_pool (reduction grid over node tiles) + classifier tail
#           (Linear1 already fused upstream with BN3 folded) + log_softmax.
# -----------------------------------------------------------------------------
def pool_classifier_kernel(z_ref, pool_ref, cb1_ref, w2_ref, b2_ref, out_ref,
                           acc_sc):
    k = pl.program_id(0)

    @pl.when(k == 0)
    def _():
        acc_sc[...] = jnp.zeros(acc_sc.shape, jnp.float32)

    acc_sc[...] += jnp.dot(pool_ref[...].astype(jnp.bfloat16), z_ref[...],
                           preferred_element_type=jnp.float32)

    @pl.when(k == pl.num_programs(0) - 1)
    def _():
        # Dropout(p=0.5) is identity in eval mode.
        h = jnp.maximum(acc_sc[...] + cb1_ref[...], 0.0)
        logits = jnp.dot(h.astype(jnp.bfloat16), w2_ref[...],
                         preferred_element_type=jnp.float32) + b2_ref[...]
        m = jnp.max(logits, axis=-1, keepdims=True)
        zc = logits - m
        lse = jnp.log(jnp.sum(jnp.exp(zc), axis=-1, keepdims=True))
        out_ref[...] = zc - lse


def pool_and_classify(z, pool_mat, cb1, w2, b2, *, tile_n):
    n_pad = z.shape[0]
    g = pool_mat.shape[0]
    k = w2.shape[1]
    return pl.pallas_call(
        pool_classifier_kernel,
        out_shape=jax.ShapeDtypeStruct((g, k), jnp.float32),
        grid=(n_pad // tile_n,),
        in_specs=[
            pl.BlockSpec((tile_n, LANES), lambda s: (s, 0)),
            pl.BlockSpec((g, tile_n), lambda s: (0, s)),
            pl.BlockSpec((1, LANES), lambda s: (0, 0)),
            pl.BlockSpec((LANES, k), lambda s: (0, 0)),
            pl.BlockSpec((1, k), lambda s: (0, 0)),
        ],
        out_specs=pl.BlockSpec((g, k), lambda s: (0, 0)),
        scratch_shapes=[pltpu.VMEM((g, LANES), jnp.float32)],
        compiler_params=pltpu.CompilerParams(
            dimension_semantics=("arbitrary",),
            vmem_limit_bytes=VMEM_LIMIT_BYTES),
    )(z, pool_mat, cb1, w2, b2)


# -----------------------------------------------------------------------------
# Host-side preparation (once per graph / per parameter set)
# -----------------------------------------------------------------------------
def build_graph_inputs(x, edge_index, batch, num_graphs, tile_dst, tile_src):
    """Padded node features, int8 'no-edge' mask and mean-pool matrix."""
    n, f_in = x.shape
    tile = (tile_dst * tile_src) // math.gcd(tile_dst, tile_src)
    n_pad = _round_up(n, tile)
    f_pad = _round_up(f_in, 8)
    x_pad = jnp.zeros((n_pad, f_pad), jnp.float32).at[:n, :f_in].set(x)

    src, dst = edge_index[0], edge_index[1]
    adj = jnp.zeros((n_pad, n_pad), jnp.float32).at[dst, src].set(1.0)
    # Self loops (PyG GATConv default).  Padded nodes get one too so every
    # softmax row stays finite; their garbage rows are excluded by `pool`.
    idx = jnp.arange(n_pad)
    adj = adj.at[idx, idx].set(1.0)
    noedge = (adj == 0).astype(jnp.int8)          # 1 byte / entry of HBM traffic

    onehot = (batch[None, :] == jnp.arange(num_graphs)[:, None]).astype(jnp.float32)
    counts = jnp.maximum(jnp.sum(onehot, axis=1, keepdims=True), 1.0)
    pool = jnp.zeros((num_graphs, n_pad), jnp.float32).at[:, :n].set(onehot / counts)
    return x_pad, noedge, pool


def _fold_bn(gamma, beta, mean, var, eps=1e-5):
    s = gamma / jnp.sqrt(var + eps)
    t = beta - mean * s
    return s, t


def _build_w_aug(w, att_src, att_dst, in_pad, heads, head_dim):
    f_in, d = w.shape
    a_src_cols = jnp.concatenate(
        [w[:, h * head_dim:(h + 1) * head_dim] @ att_src[h][:, None]
         for h in range(heads)], axis=1)                           # [f_in, H]
    a_dst_cols = jnp.concatenate(
        [w[:, h * head_dim:(h + 1) * head_dim] @ att_dst[h][:, None]
         for h in range(heads)], axis=1)
    w_aug = jnp.zeros((in_pad, LANES), jnp.float32)
    w_aug = w_aug.at[:f_in, :d].set(w)
    w_aug = w_aug.at[:f_in, d:d + heads].set(a_src_cols)
    w_aug = w_aug.at[:f_in, d + heads:d + 2 * heads].set(a_dst_cols)
    return w_aug.astype(jnp.bfloat16)


def prepare_params(params, heads, head_dim, f_in_pad):
    d = heads * head_dim

    def pad_row(v):
        return jnp.zeros((1, LANES), jnp.float32).at[0, :d].set(v)

    s1, t1 = _fold_bn(*params["bn1"])
    s2, t2 = _fold_bn(*params["bn2"])
    s3, t3 = _fold_bn(*params["bn3"])

    w_aug1 = _build_w_aug(params["w1"], params["asrc1"], params["adst1"],
                          f_in_pad, heads, head_dim)
    w_aug2 = _build_w_aug(params["w2"], params["asrc2"], params["adst2"],
                          LANES, heads, head_dim)

    scale1 = pad_row(s1)
    shift1 = pad_row(params["gbias1"].reshape(-1) * s1 + t1)
    scale2 = pad_row(s2)
    shift2 = pad_row(params["gbias2"].reshape(-1) * s2 + t2)

    # Classifier Linear1 with BN3 folded: (p@cw1 + cb1)*s3 + t3.
    cw1f = params["cw1"] * s3[None, :]
    cb1f = params["cb1"].reshape(-1) * s3 + t3
    cw1f_pad = jnp.zeros((LANES, LANES), jnp.float32).at[:d, :d].set(cw1f)
    k = params["cw2"].shape[1]
    cw2_pad = jnp.zeros((LANES, k), jnp.float32).at[:d, :].set(params["cw2"])

    return dict(w_aug1=w_aug1, w_aug2=w_aug2,
                scale1=scale1, shift1=shift1, scale2=scale2, shift2=shift2,
                cw1f=cw1f_pad.astype(jnp.bfloat16), cb1f=pad_row(cb1f),
                cw2=cw2_pad.astype(jnp.bfloat16),
                cb2=params["cb2"].reshape(1, k).astype(jnp.float32))


def _src_scores_lane_major(xp, heads, head_dim):
    """Tiny [8, N_pad] f32 lane-major layout of the per-head a_src scores."""
    d = heads * head_dim
    a = jnp.transpose(xp[:, d:d + heads]).astype(jnp.float32)      # [H, N]
    return jnp.zeros((ASRC_ROWS, xp.shape[0]), jnp.float32).at[:heads].set(a)


def gat_classifier_forward(x_pad, noedge, pool_mat, prep, *, heads, head_dim,
                           tile_dst, tile_src):
    # Layer-1 projection with folded attention coefficients.
    xp1 = input_projection(x_pad, prep["w_aug1"], tile_n=tile_dst)
    asrc1 = _src_scores_lane_major(xp1, heads, head_dim)
    # GAT layer 1 + BN1(eval) + ReLU, fused with the layer-2 projection.
    xp2 = gat_attention_layer(xp1, asrc1, noedge, prep["scale1"], prep["shift1"],
                              prep["w_aug2"], heads=heads, head_dim=head_dim,
                              tile_dst=tile_dst, tile_src=tile_src)
    asrc2 = _src_scores_lane_major(xp2, heads, head_dim)
    # GAT layer 2 + BN2(eval) + ReLU, fused with classifier Linear1 (BN3 folded).
    z = gat_attention_layer(xp2, asrc2, noedge, prep["scale2"], prep["shift2"],
                            prep["cw1f"], heads=heads, head_dim=head_dim,
                            tile_dst=tile_dst, tile_src=tile_src)
    # global_mean_pool + (bias, ReLU, Linear2) + log_softmax.
    return pool_and_classify(z, pool_mat, prep["cb1f"], prep["cw2"], prep["cb2"],
                             tile_n=tile_src)


# -----------------------------------------------------------------------------
# Pure-JAX f32 reference of the PyTorch module in eval mode.
# -----------------------------------------------------------------------------
def reference_forward(x, adj, batch, num_graphs, params, heads, head_dim,
                      eps=1e-5):
    def bn(v, p):
        g, b, m, var = p
        return (v - m) / jnp.sqrt(var + eps) * g + b

    def gat(v, w, asrc, adst):
        xp = v @ w
        outs = []
        for h in range(heads):
            xh = xp[:, h * head_dim:(h + 1) * head_dim]
            a_s = xh @ asrc[h]
            a_d = xh @ adst[h]
            e = a_d[:, None] + a_s[None, :]
            e = jnp.where(e > 0, e, 0.2 * e)
            e = jnp.where(adj > 0, e, -jnp.inf)
            p = jax.nn.softmax(e, axis=-1)
            outs.append(p @ xh)
        return jnp.concatenate(outs, axis=1)

    x1 = jax.nn.relu(bn(gat(x, params["w1"], params["asrc1"], params["adst1"])
                        + params["gbias1"], params["bn1"]))
    x2 = jax.nn.relu(bn(gat(x1, params["w2"], params["asrc2"], params["adst2"])
                        + params["gbias2"], params["bn2"]))
    onehot = (batch[None, :] == jnp.arange(num_graphs)[:, None]).astype(jnp.float32)
    pooled = (onehot @ x2) / jnp.maximum(onehot.sum(1, keepdims=True), 1.0)
    h1 = jax.nn.relu(bn(pooled @ params["cw1"] + params["cb1"], params["bn3"]))
    logits = h1 @ params["cw2"] + params["cb2"]
    return jax.nn.log_softmax(logits, axis=1)


if __name__ == "__main__":
    num_features = 16
    num_classes = 8
    hidden_dim = 64
    num_heads = 4
    head_dim = hidden_dim // num_heads
    N = 200          # nodes
    E = 800          # edges
    G = 4            # graphs
    # Demo tiles (small graph): both grid axes get >= 2 steps (exercises the
    # pipeline and v7x's two TensorCores).  For production graph sizes raise to
    # TILE_DST=256 and TILE_SRC=256..512 (within the VMEM budget).
    TILE_DST = 128
    TILE_SRC = 128

    key = jax.random.PRNGKey(0)
    ks = jax.random.split(key, 30)

    x = jax.random.normal(ks[0], (N, num_features), jnp.float32)
    edge_index = jax.random.randint(ks[1], (2, E), 0, N, jnp.int32)
    batch = jnp.repeat(jnp.arange(G, dtype=jnp.int32), N // G)

    def rand(k, shape, scale=0.1):
        return scale * jax.random.normal(k, shape, jnp.float32)

    params = {
        "w1": rand(ks[2], (num_features, hidden_dim)),
        "asrc1": rand(ks[3], (num_heads, head_dim)),
        "adst1": rand(ks[4], (num_heads, head_dim)),
        "gbias1": rand(ks[5], (1, hidden_dim)),
        "w2": rand(ks[6], (hidden_dim, hidden_dim)),
        "asrc2": rand(ks[7], (num_heads, head_dim)),
        "adst2": rand(ks[8], (num_heads, head_dim)),
        "gbias2": rand(ks[9], (1, hidden_dim)),
        "bn1": (1.0 + rand(ks[10], (hidden_dim,)), rand(ks[11], (hidden_dim,)),
                rand(ks[12], (hidden_dim,)),
                1.0 + jnp.abs(rand(ks[13], (hidden_dim,)))),
        "bn2": (1.0 + rand(ks[14], (hidden_dim,)), rand(ks[15], (hidden_dim,)),
                rand(ks[16], (hidden_dim,)),
                1.0 + jnp.abs(rand(ks[17], (hidden_dim,)))),
        "cw1": rand(ks[18], (hidden_dim, hidden_dim)),
        "cb1": rand(ks[19], (1, hidden_dim)),
        "bn3": (1.0 + rand(ks[20], (hidden_dim,)), rand(ks[21], (hidden_dim,)),
                rand(ks[22], (hidden_dim,)),
                1.0 + jnp.abs(rand(ks[23], (hidden_dim,)))),
        "cw2": rand(ks[24], (hidden_dim, num_classes)),
        "cb2": rand(ks[25], (1, num_classes)),
    }

    # Graph-structure tensors and folded/padded parameters are built once,
    # outside the jitted forward (cached per graph / per checkpoint).
    x_pad, noedge, pool_mat = build_graph_inputs(x, edge_index, batch, G,
                                                 TILE_DST, TILE_SRC)
    prep = prepare_params(params, num_heads, head_dim, x_pad.shape[1])

    fwd = jax.jit(functools.partial(gat_classifier_forward, heads=num_heads,
                                    head_dim=head_dim, tile_dst=TILE_DST,
                                    tile_src=TILE_SRC))
    log_probs = fwd(x_pad, noedge, pool_mat, prep)
    jax.block_until_ready(log_probs)

    # Pure-JAX f32 reference (same dense-adjacency, dedup'd self-loop semantics).
    adj_ref = jnp.zeros((N, N), jnp.float32).at[edge_index[1], edge_index[0]].set(1.0)
    adj_ref = adj_ref.at[jnp.arange(N), jnp.arange(N)].set(1.0)
    ref = reference_forward(x, adj_ref, batch, G, params, num_heads, head_dim)

    assert log_probs.shape == (G, num_classes)
    assert bool(jnp.all(jnp.isfinite(log_probs)))
    assert jnp.allclose(jnp.sum(jnp.exp(log_probs), axis=1), 1.0, atol=1e-3)
    max_err = float(jnp.max(jnp.abs(log_probs.astype(jnp.float32) - ref)))
    assert max_err < 5e-2, f"kernel vs reference max abs err {max_err}"
    print("KERNEL_OK")
</pallas_src>

<mosaic_0001>
module attributes {stable_mosaic.version = 11 : i64} {
  func.func @input_proj_kernel(%arg0: i32, %arg1: memref<128x16xf32, #tpu.memory_space<vmem>>, %arg2: memref<16x128xbf16, #tpu.memory_space<vmem>>, %arg3: memref<128x128xbf16, #tpu.memory_space<vmem>>) attributes {dimension_semantics = [#tpu.dimension_semantics<parallel>], iteration_bounds = array<i64: 2>, scalar_prefetch = 0 : i64, scratch_operands = 0 : i64, tpu.core_type = #tpu.core_type<tc>, window_params = [{transform_indices = @transform_0, window_bounds = array<i64: 128, 16>}, {pipeline_mode = #tpu.pipeline_mode<synchronous>, transform_indices = @transform_1, window_bounds = array<i64: 16, 128>}, {transform_indices = @transform_2, window_bounds = array<i64: 128, 128>}]} {
    %c0 = arith.constant 0 : index
    %c0_0 = arith.constant 0 : index
    %0 = vector.load %arg1[%c0, %c0_0] : memref<128x16xf32, #tpu.memory_space<vmem>>, vector<128x16xf32>
    %1 = arith.truncf %0 : vector<128x16xf32> to vector<128x16xbf16>
    %c0_1 = arith.constant 0 : index
    %c0_2 = arith.constant 0 : index
    %2 = vector.load %arg2[%c0_1, %c0_2] : memref<16x128xbf16, #tpu.memory_space<vmem>>, vector<16x128xbf16>
    %cst = arith.constant dense<0.000000e+00> : vector<128x128xf32>
    %3 = tpu.matmul %1, %2, %cst {dimension_numbers = #tpu.dot_dimension_numbers<[1], [0], [0], [1], [0, 0, 1, 1], [], []>} : vector<128x16xbf16>, vector<16x128xbf16>, vector<128x128xf32> -> vector<128x128xf32>
    %4 = arith.truncf %3 : vector<128x128xf32> to vector<128x128xbf16>
    %c0_3 = arith.constant 0 : index
    %c0_4 = arith.constant 0 : index
    %5 = vector.load %arg3[%c0_3, %c0_4] : memref<128x128xbf16, #tpu.memory_space<vmem>>, vector<128x128xbf16>
    tpu.vector_store %arg3[%c0_3, %c0_4], %4 {strides = array<i32>} : memref<128x128xbf16, #tpu.memory_space<vmem>>, vector<128x128xbf16>,
    return
  }
  func.func @transform_0(%arg0: i32) -> (i32, i32) {
    %c0_i32 = arith.constant 0 : i32
    %c0_i32_0 = arith.constant 0 : i32
    return %arg0, %c0_i32 : i32, i32
  }
  func.func @transform_1(%arg0: i32) -> (i32, i32) {
    %c0_i32 = arith.constant 0 : i32
    %c0_i32_0 = arith.constant 0 : i32
    %c0_i32_1 = arith.constant 0 : i32
    return %c0_i32, %c0_i32_0 : i32, i32
  }
  func.func @transform_2(%arg0: i32) -> (i32, i32) {
    %c0_i32 = arith.constant 0 : i32
    %c0_i32_0 = arith.constant 0 : i32
    return %arg0, %c0_i32 : i32, i32
  }
}

module attributes {stable_mosaic.version = 11 : i64} {
  func.func @gat_attn_kernel(%arg0: i32, %arg1: i32, %arg2: memref<8x128xf32, #tpu.memory_space<vmem>>, %arg3: memref<128x128xbf16, #tpu.memory_space<vmem>>, %arg4: memref<128x128xbf16, #tpu.memory_space<vmem>>, %arg5: memref<128x128xi8, #tpu.memory_space<vmem>>, %arg6: memref<1x128xf32, #tpu.memory_space<vmem>>, %arg7: memref<1x128xf32, #tpu.memory_space<vmem>>, %arg8: memref<128x128xbf16, #tpu.memory_space<vmem>>, %arg9: memref<128x128xbf16, #tpu.memory_space<vmem>>, %arg10: memref<4x128x1xf32, #tpu.memory_space<vmem>>, %arg11: memref<4x128x1xf32, #tpu.memory_space<vmem>>, %arg12: memref<128x128xf32, #tpu.memory_space<vmem>>) attributes {dimension_semantics = [#tpu.dimension_semantics<parallel>, #tpu.dimension_semantics<arbitrary>], iteration_bounds = array<i64: 2, 2>, scalar_prefetch = 0 : i64, scratch_operands = 3 : i64, tpu.core_type = #tpu.core_type<tc>, window_params = [{transform_indices = @transform_0, window_bounds = array<i64: 8, 128>}, {transform_indices = @transform_1, window_bounds = array<i64: 128, 128>}, {transform_indices = @transform_2, window_bounds = array<i64: 128, 128>}, {transform_indices = @transform_3, window_bounds = array<i64: 128, 128>}, {pipeline_mode = #tpu.pipeline_mode<synchronous>, transform_indices = @transform_4, window_bounds = array<i64: 1, 128>}, {pipeline_mode = #tpu.pipeline_mode<synchronous>, transform_indices = @transform_5, window_bounds = array<i64: 1, 128>}, {pipeline_mode = #tpu.pipeline_mode<synchronous>, transform_indices = @transform_6, window_bounds = array<i64: 128, 128>}, {transform_indices = @transform_7, window_bounds = array<i64: 128, 128>}]} {
    %c0_i32 = arith.constant 0 : i32
    %0 = arith.cmpi eq, %arg1, %c0_i32 : i32
    %1 = arith.extui %0 : i1 to i32
    %c0_i32_0 = arith.constant 0 : i32
    %2 = arith.cmpi ne, %1, %c0_i32_0 : i32
    scf.if %2 {
      %cst_98 = arith.constant -1.000000e+30 : f32
      %226 = vector.broadcast %cst_98 : f32 to vector<4x128x1xf32>
      %c0_99 = arith.constant 0 : index
      %c0_100 = arith.constant 0 : index
      %c0_101 = arith.constant 0 : index
      %227 = vector.load %arg10[%c0_99, %c0_100, %c0_101] : memref<4x128x1xf32, #tpu.memory_space<vmem>>, vector<4x128x1xf32>
      tpu.vector_store %arg10[%c0_99, %c0_100, %c0_101], %226 {strides = array<i32>} : memref<4x128x1xf32, #tpu.memory_space<vmem>>, vector<4x128x1xf32>,
      %cst_102 = arith.constant 0.000000e+00 : f32
      %228 = vector.broadcast %cst_102 : f32 to vector<4x128x1xf32>
      %c0_103 = arith.constant 0 : index
      %c0_104 = arith.constant 0 : index
      %c0_105 = arith.constant 0 : index
      %229 = vector.load %arg11[%c0_103, %c0_104, %c0_105] : memref<4x128x1xf32, #tpu.memory_space<vmem>>, vector<4x128x1xf32>
      tpu.vector_store %arg11[%c0_103, %c0_104, %c0_105], %228 {strides = array<i32>} : memref<4x128x1xf32, #tpu.memory_space<vmem>>, vector<4x128x1xf32>,
      %cst_106 = arith.constant 0.000000e+00 : f32
      %230 = vector.broadcast %cst_106 : f32 to vector<128x128xf32>
      %c0_107 = arith.constant 0 : index
      %c0_108 = arith.constant 0 : index
      %231 = vector.load %arg12[%c0_107, %c0_108] : memref<128x128xf32, #tpu.memory_space<vmem>>, vector<128x128xf32>
      tpu.vector_store %arg12[%c0_107, %c0_108], %230 {strides = array<i32>} : memref<128x128xf32, #tpu.memory_space<vmem>>, vector<128x128xf32>,
    } else {
    }
    %c0 = arith.constant 0 : index
    %c0_1 = arith.constant 0 : index
    %3 = vector.load %arg3[%c0, %c0_1] : memref<128x128xbf16, #tpu.memory_space<vmem>>, vector<128x128xbf16>
    %c0_2 = arith.constant 0 : index
    %c0_3 = arith.constant 0 : index
    %4 = vector.load %arg2[%c0_2, %c0_3] : memref<8x128xf32, #tpu.memory_space<vmem>>, vector<8x128xf32>
    %c0_4 = arith.constant 0 : index
    %c0_5 = arith.constant 0 : index
    %5 = vector.load %arg4[%c0_4, %c0_5] : memref<128x128xbf16, #tpu.memory_space<vmem>>, vector<128x128xbf16>
    %c0_6 = arith.constant 0 : index
    %c0_7 = arith.constant 0 : index
    %6 = vector.load %arg5[%c0_6, %c0_7] : memref<128x128xi8, #tpu.memory_space<vmem>>, vector<128x128xi8>
    %7 = arith.sitofp %6 : vector<128x128xi8> to vector<128x128xf32>
    %cst = arith.constant -1.000000e+30 : f32
    %8 = vector.broadcast %cst : f32 to vector<128x128xf32>
    %9 = arith.mulf %7, %8 : vector<128x128xf32>
    %10 = tpu.iota {dimensions = array<i32: 1>} : vector<1x128xi32>
    %11 = vector.extract_strided_slice %5 {offsets = [0, 68], sizes = [128, 1], strides = [1, 1]} : vector<128x128xbf16> to vector<128x1xbf16>
    %12 = arith.extf %11 : vector<128x1xbf16> to vector<128x1xf32>
    %13 = vector.extract_strided_slice %4 {offsets = [0, 0], sizes = [1, 128], strides = [1, 1]} : vector<8x128xf32> to vector<1x128xf32>
    %14 = vector.broadcast %12 : vector<128x1xf32> to vector<128x128xf32>
    %15 = vector.broadcast %13 : vector<1x128xf32> to vector<128x128xf32>
    %16 = arith.addf %14, %15 : vector<128x128xf32>
    %cst_8 = arith.constant 2.000000e-01 : f32
    %17 = vector.broadcast %cst_8 : f32 to vector<128x128xf32>
    %18 = arith.mulf %17, %16 : vector<128x128xf32>
    %19 = arith.maximumf %16, %18 : vector<128x128xf32>
    %20 = arith.addf %19, %9 : vector<128x128xf32>
    %c0_9 = arith.constant 0 : index
    %c0_10 = arith.constant 0 : index
    %c0_11 = arith.constant 0 : index
    %21 = vector.load %arg10[%c0_9, %c0_10, %c0_11] : memref<4x128x1xf32, #tpu.memory_space<vmem>>, vector<1x128x1xf32>
    %22 = vector.shape_cast %21 : vector<1x128x1xf32> to vector<128x1xf32>
    %cst_12 = arith.constant dense<0xFF800000> : vector<128xf32>
    %23 = vector.multi_reduction <maximumf>, %20, %cst_12 [1] : vector<128x128xf32> to vector<128xf32>
    %24 = vector.shape_cast %23 : vector<128xf32> to vector<128x1xf32>
    %25 = arith.maximumf %22, %24 : vector<128x1xf32>
    %26 = arith.subf %22, %25 : vector<128x1xf32>
    %27 = math.exp %26 : vector<128x1xf32>
    %28 = vector.broadcast %25 : vector<128x1xf32> to vector<128x128xf32>
    %29 = arith.subf %20, %28 : vector<128x128xf32>
    %30 = math.exp %29 : vector<128x128xf32>
    %c0_13 = arith.constant 0 : index
    %c0_14 = arith.constant 0 : index
    %c0_15 = arith.constant 0 : index
    %31 = vector.load %arg11[%c0_13, %c0_14, %c0_15] : memref<4x128x1xf32, #tpu.memory_space<vmem>>, vector<1x128x1xf32>
    %32 = vector.shape_cast %31 : vector<1x128x1xf32> to vector<128x1xf32>
    %33 = arith.mulf %27, %32 : vector<128x1xf32>
    %cst_16 = arith.constant dense<0.000000e+00> : vector<128xf32>
    %34 = vector.multi_reduction <add>, %30, %cst_16 [1] : vector<128x128xf32> to vector<128xf32>
    %35 = vector.shape_cast %34 : vector<128xf32> to vector<128x1xf32>
    %36 = arith.addf %33, %35 : vector<128x1xf32>
    %c0_17 = arith.constant 0 : index
    %c0_18 = arith.constant 0 : index
    %c0_19 = arith.constant 0 : index
    %37 = vector.load %arg11[%c0_17, %c0_18, %c0_19] : memref<4x128x1xf32, #tpu.memory_space<vmem>>, vector<1x128x1xf32>
    %38 = vector.shape_cast %37 : vector<1x128x1xf32> to vector<128x1xf32>
    %39 = vector.shape_cast %36 : vector<128x1xf32> to vector<1x128x1xf32>
    tpu.vector_store %arg11[%c0_17, %c0_18, %c0_19], %39 {strides = array<i32>} : memref<4x128x1xf32, #tpu.memory_space<vmem>>, vector<1x128x1xf32>,
    %c0_20 = arith.constant 0 : index
    %c0_21 = arith.constant 0 : index
    %c0_22 = arith.constant 0 : index
    %40 = vector.load %arg10[%c0_20, %c0_21, %c0_22] : memref<4x128x1xf32, #tpu.memory_space<vmem>>, vector<1x128x1xf32>
    %41 = vector.shape_cast %40 : vector<1x128x1xf32> to vector<128x1xf32>
    %42 = vector.shape_cast %25 : vector<128x1xf32> to vector<1x128x1xf32>
    tpu.vector_store %arg10[%c0_20, %c0_21, %c0_22], %42 {strides = array<i32>} : memref<4x128x1xf32, #tpu.memory_space<vmem>>, vector<1x128x1xf32>,
    %43 = arith.truncf %30 : vector<128x128xf32> to vector<128x128xbf16>
    %cst_23 = arith.constant dense<0.000000e+00> : vector<128x128xf32>
    %44 = tpu.matmul %43, %3, %cst_23 {dimension_numbers = #tpu.dot_dimension_numbers<[1], [0], [0], [1], [0, 0, 1, 1], [], []>} : vector<128x128xbf16>, vector<128x128xbf16>, vector<128x128xf32> -> vector<128x128xf32>
    %c0_i32_24 = arith.constant 0 : i32
    %45 = vector.broadcast %c0_i32_24 : i32 to vector<1x128xi32>
    %46 = arith.cmpi sge, %10, %45 : vector<1x128xi32>
    %c16_i32 = arith.constant 16 : i32
    %47 = vector.broadcast %c16_i32 : i32 to vector<1x128xi32>
    %48 = arith.cmpi slt, %10, %47 : vector<1x128xi32>
    %49 = arith.andi %46, %48 : vector<1x128xi1>
    %c0_25 = arith.constant 0 : index
    %c0_26 = arith.constant 0 : index
    %50 = vector.load %arg12[%c0_25, %c0_26] : memref<128x128xf32, #tpu.memory_space<vmem>>, vector<128x128xf32>
    %cst_27 = arith.constant 1.000000e+00 : f32
    %51 = vector.shape_cast %49 : vector<1x128xi1> to vector<1x128xi1>
    %52 = vector.broadcast %51 : vector<1x128xi1> to vector<128x128xi1>
    %53 = vector.shape_cast %27 : vector<128x1xf32> to vector<128x1xf32>
    %54 = vector.broadcast %53 : vector<128x1xf32> to vector<128x128xf32>
    %55 = vector.broadcast %cst_27 : f32 to vector<128x128xf32>
    %56 = arith.select %52, %54, %55 : vector<128x128xi1>, vector<128x128xf32>
    %57 = arith.mulf %50, %56 : vector<128x128xf32>
    %cst_28 = arith.constant 0.000000e+00 : f32
    %58 = vector.shape_cast %49 : vector<1x128xi1> to vector<1x128xi1>
    %59 = vector.broadcast %58 : vector<1x128xi1> to vector<128x128xi1>
    %60 = vector.broadcast %cst_28 : f32 to vector<128x128xf32>
    %61 = arith.select %59, %44, %60 : vector<128x128xi1>, vector<128x128xf32>
    %62 = arith.addf %57, %61 : vector<128x128xf32>
    %c0_29 = arith.constant 0 : index
    %c0_30 = arith.constant 0 : index
    %63 = vector.load %arg12[%c0_29, %c0_30] : memref<128x128xf32, #tpu.memory_space<vmem>>, vector<128x128xf32>
    tpu.vector_store %arg12[%c0_29, %c0_30], %62 {strides = array<i32>} : memref<128x128xf32, #tpu.memory_space<vmem>>, vector<128x128xf32>,
    %64 = vector.extract_strided_slice %5 {offsets = [0, 69], sizes = [128, 1], strides = [1, 1]} : vector<128x128xbf16> to vector<128x1xbf16>
    %65 = arith.extf %64 : vector<128x1xbf16> to vector<128x1xf32>
    %66 = vector.extract_strided_slice %4 {offsets = [1, 0], sizes = [1, 128], strides = [1, 1]} : vector<8x128xf32> to vector<1x128xf32>
    %67 = vector.broadcast %65 : vector<128x1xf32> to vector<128x128xf32>
    %68 = vector.broadcast %66 : vector<1x128xf32> to vector<128x128xf32>
    %69 = arith.addf %67, %68 : vector<128x128xf32>
    %cst_31 = arith.constant 2.000000e-01 : f32
    %70 = vector.broadcast %cst_31 : f32 to vector<128x128xf32>
    %71 = arith.mulf %70, %69 : vector<128x128xf32>
    %72 = arith.maximumf %69, %71 : vector<128x128xf32>
    %73 = arith.addf %72, %9 : vector<128x128xf32>
    %c1 = arith.constant 1 : index
    %c0_32 = arith.constant 0 : index
    %c0_33 = arith.constant 0 : index
    %74 = vector.load %arg10[%c1, %c0_32, %c0_33] : memref<4x128x1xf32, #tpu.memory_space<vmem>>, vector<1x128x1xf32>
    %75 = vector.shape_cast %74 : vector<1x128x1xf32> to vector<128x1xf32>
    %cst_34 = arith.constant dense<0xFF800000> : vector<128xf32>
    %76 = vector.multi_reduction <maximumf>, %73, %cst_34 [1] : vector<128x128xf32> to vector<128xf32>
    %77 = vector.shape_cast %76 : vector<128xf32> to vector<128x1xf32>
    %78 = arith.maximumf %75, %77 : vector<128x1xf32>
    %79 = arith.subf %75, %78 : vector<128x1xf32>
    %80 = math.exp %79 : vector<128x1xf32>
    %81 = vector.broadcast %78 : vector<128x1xf32> to vector<128x128xf32>
    %82 = arith.subf %73, %81 : vector<128x128xf32>
    %83 = math.exp %82 : vector<128x128xf32>
    %c1_35 = arith.constant 1 : index
    %c0_36 = arith.constant 0 : index
    %c0_37 = arith.constant 0 : index
    %84 = vector.load %arg11[%c1_35, %c0_36, %c0_37] : memref<4x128x1xf32, #tpu.memory_space<vmem>>, vector<1x128x1xf32>
    %85 = vector.shape_cast %84 : vector<1x128x1xf32> to vector<128x1xf32>
    %86 = arith.mulf %80, %85 : vector<128x1xf32>
    %cst_38 = arith.constant dense<0.000000e+00> : vector<128xf32>
    %87 = vector.multi_reduction <add>, %83, %cst_38 [1] : vector<128x128xf32> to vector<128xf32>
    %88 = vector.shape_cast %87 : vector<128xf32> to vector<128x1xf32>
    %89 = arith.addf %86, %88 : vector<128x1xf32>
    %c1_39 = arith.constant 1 : index
    %c0_40 = arith.constant 0 : index
    %c0_41 = arith.constant 0 : index
    %90 = vector.load %arg11[%c1_39, %c0_40, %c0_41] : memref<4x128x1xf32, #tpu.memory_space<vmem>>, vector<1x128x1xf32>
    %91 = vector.shape_cast %90 : vector<1x128x1xf32> to vector<128x1xf32>
    %92 = vector.shape_cast %89 : vector<128x1xf32> to vector<1x128x1xf32>
    tpu.vector_store %arg11[%c1_39, %c0_40, %c0_41], %92 {strides = array<i32>} : memref<4x128x1xf32, #tpu.memory_space<vmem>>, vector<1x128x1xf32>,
    %c1_42 = arith.constant 1 : index
    %c0_43 = arith.constant 0 : index
    %c0_44 = arith.constant 0 : index
    %93 = vector.load %arg10[%c1_42, %c0_43, %c0_44] : memref<4x128x1xf32, #tpu.memory_space<vmem>>, vector<1x128x1xf32>
    %94 = vector.shape_cast %93 : vector<1x128x1xf32> to vector<128x1xf32>
    %95 = vector.shape_cast %78 : vector<128x1xf32> to vector<1x128x1xf32>
    tpu.vector_store %arg10[%c1_42, %c0_43, %c0_44], %95 {strides = array<i32>} : memref<4x128x1xf32, #tpu.memory_space<vmem>>, vector<1x128x1xf32>,
    %96 = arith.truncf %83 : vector<128x128xf32> to vector<128x128xbf16>
    %cst_45 = arith.constant dense<0.000000e+00> : vector<128x128xf32>
    %97 = tpu.matmul %96, %3, %cst_45 {dimension_numbers = #tpu.dot_dimension_numbers<[1], [0], [0], [1], [0, 0, 1, 1], [], []>} : vector<128x128xbf16>, vector<128x128xbf16>, vector<128x128xf32> -> vector<128x128xf32>
    %c16_i32_46 = arith.constant 16 : i32
    %98 = vector.broadcast %c16_i32_46 : i32 to vector<1x128xi32>
    %99 = arith.cmpi sge, %10, %98 : vector<1x128xi32>
    %c32_i32 = arith.constant 32 : i32
    %100 = vector.broadcast %c32_i32 : i32 to vector<1x128xi32>
    %101 = arith.cmpi slt, %10, %100 : vector<1x128xi32>
    %102 = arith.andi %99, %101 : vector<1x128xi1>
    %c0_47 = arith.constant 0 : index
    %c0_48 = arith.constant 0 : index
    %103 = vector.load %arg12[%c0_47, %c0_48] : memref<128x128xf32, #tpu.memory_space<vmem>>, vector<128x128xf32>
    %cst_49 = arith.constant 1.000000e+00 : f32
    %104 = vector.shape_cast %102 : vector<1x128xi1> to vector<1x128xi1>
    %105 = vector.broadcast %104 : vector<1x128xi1> to vector<128x128xi1>
    %106 = vector.shape_cast %80 : vector<128x1xf32> to vector<128x1xf32>
    %107 = vector.broadcast %106 : vector<128x1xf32> to vector<128x128xf32>
    %108 = vector.broadcast %cst_49 : f32 to vector<128x128xf32>
    %109 = arith.select %105, %107, %108 : vector<128x128xi1>, vector<128x128xf32>
    %110 = arith.mulf %103, %109 : vector<128x128xf32>
    %cst_50 = arith.constant 0.000000e+00 : f32
    %111 = vector.shape_cast %102 : vector<1x128xi1> to vector<1x128xi1>
    %112 = vector.broadcast %111 : vector<1x128xi1> to vector<128x128xi1>
    %113 = vector.broadcast %cst_50 : f32 to vector<128x128xf32>
    %114 = arith.select %112, %97, %113 : vector<128x128xi1>, vector<128x128xf32>
    %115 = arith.addf %110, %114 : vector<128x128xf32>
    %c0_51 = arith.constant 0 : index
    %c0_52 = arith.constant 0 : index
    %116 = vector.load %arg12[%c0_51, %c0_52] : memref<128x128xf32, #tpu.memory_space<vmem>>, vector<128x128xf32>
    tpu.vector_store %arg12[%c0_51, %c0_52], %115 {strides = array<i32>} : memref<128x128xf32, #tpu.memory_space<vmem>>, vector<128x128xf32>,
    %117 = vector.extract_strided_slice %5 {offsets = [0, 70], sizes = [128, 1], strides = [1, 1]} : vector<128x128xbf16> to vector<128x1xbf16>
    %118 = arith.extf %117 : vector<128x1xbf16> to vector<128x1xf32>
    %119 = vector.extract_strided_slice %4 {offsets = [2, 0], sizes = [1, 128], strides = [1, 1]} : vector<8x128xf32> to vector<1x128xf32>
    %120 = vector.broadcast %118 : vector<128x1xf32> to vector<128x128xf32>
    %121 = vector.broadcast %119 : vector<1x128xf32> to vector<128x128xf32>
    %122 = arith.addf %120, %121 : vector<128x128xf32>
    %cst_53 = arith.constant 2.000000e-01 : f32
    %123 = vector.broadcast %cst_53 : f32 to vector<128x128xf32>
    %124 = arith.mulf %123, %122 : vector<128x128xf32>
    %125 = arith.maximumf %122, %124 : vector<128x128xf32>
    %126 = arith.addf %125, %9 : vector<128x128xf32>
    %c2 = arith.constant 2 : index
    %c0_54 = arith.constant 0 : index
    %c0_55 = arith.constant 0 : index
    %127 = vector.load %arg10[%c2, %c0_54, %c0_55] : memref<4x128x1xf32, #tpu.memory_space<vmem>>, vector<1x128x1xf32>
    %128 = vector.shape_cast %127 : vector<1x128x1xf32> to vector<128x1xf32>
    %cst_56 = arith.constant dense<0xFF800000> : vector<128xf32>
    %129 = vector.multi_reduction <maximumf>, %126, %cst_56 [1] : vector<128x128xf32> to vector<128xf32>
    %130 = vector.shape_cast %129 : vector<128xf32> to vector<128x1xf32>
    %131 = arith.maximumf %128, %130 : vector<128x1xf32>
    %132 = arith.subf %128, %131 : vector<128x1xf32>
    %133 = math.exp %132 : vector<128x1xf32>
    %134 = vector.broadcast %131 : vector<128x1xf32> to vector<128x128xf32>
    %135 = arith.subf %126, %134 : vector<128x128xf32>
    %136 = math.exp %135 : vector<128x128xf32>
    %c2_57 = arith.constant 2 : index
    %c0_58 = arith.constant 0 : index
    %c0_59 = arith.constant 0 : index
    %137 = vector.load %arg11[%c2_57, %c0_58, %c0_59] : memref<4x128x1xf32, #tpu.memory_space<vmem>>, vector<1x128x1xf32>
    %138 = vector.shape_cast %137 : vector<1x128x1xf32> to vector<128x1xf32>
    %139 = arith.mulf %133, %138 : vector<128x1xf32>
    %cst_60 = arith.constant dense<0.000000e+00> : vector<128xf32>
    %140 = vector.multi_reduction <add>, %136, %cst_60 [1] : vector<128x128xf32> to vector<128xf32>
    %141 = vector.shape_cast %140 : vector<128xf32> to vector<128x1xf32>
    %142 = arith.addf %139, %141 : vector<128x1xf32>
    %c2_61 = arith.constant 2 : index
    %c0_62 = arith.constant 0 : index
    %c0_63 = arith.constant 0 : index
    %143 = vector.load %arg11[%c2_61, %c0_62, %c0_63] : memref<4x128x1xf32, #tpu.memory_space<vmem>>, vector<1x128x1xf32>
    %144 = vector.shape_cast %143 : vector<1x128x1xf32> to vector<128x1xf32>
    %145 = vector.shape_cast %142 : vector<128x1xf32> to vector<1x128x1xf32>
    tpu.vector_store %arg11[%c2_61, %c0_62, %c0_63], %145 {strides = array<i32>} : memref<4x128x1xf32, #tpu.memory_space<vmem>>, vector<1x128x1xf32>,
    %c2_64 = arith.constant 2 : index
    %c0_65 = arith.constant 0 : index
    %c0_66 = arith.constant 0 : index
    %146 = vector.load %arg10[%c2_64, %c0_65, %c0_66] : memref<4x128x1xf32, #tpu.memory_space<vmem>>, vector<1x128x1xf32>
    %147 = vector.shape_cast %146 : vector<1x128x1xf32> to vector<128x1xf32>
    %148 = vector.shape_cast %131 : vector<128x1xf32> to vector<1x128x1xf32>
    tpu.vector_store %arg10[%c2_64, %c0_65, %c0_66], %148 {strides = array<i32>} : memref<4x128x1xf32, #tpu.memory_space<vmem>>, vector<1x128x1xf32>,
    %149 = arith.truncf %136 : vector<128x128xf32> to vector<128x128xbf16>
    %cst_67 = arith.constant dense<0.000000e+00> : vector<128x128xf32>
    %150 = tpu.matmul %149, %3, %cst_67 {dimension_numbers = #tpu.dot_dimension_numbers<[1], [0], [0], [1], [0, 0, 1, 1], [], []>} : vector<128x128xbf16>, vector<128x128xbf16>, vector<128x128xf32> -> vector<128x128xf32>
    %c32_i32_68 = arith.constant 32 : i32
    %151 = vector.broadcast %c32_i32_68 : i32 to vector<1x128xi32>
    %152 = arith.cmpi sge, %10, %151 : vector<1x128xi32>
    %c48_i32 = arith.constant 48 : i32
    %153 = vector.broadcast %c48_i32 : i32 to vector<1x128xi32>
    %154 = arith.cmpi slt, %10, %153 : vector<1x128xi32>
    %155 = arith.andi %152, %154 : vector<1x128xi1>
    %c0_69 = arith.constant 0 : index
    %c0_70 = arith.constant 0 : index
    %156 = vector.load %arg12[%c0_69, %c0_70] : memref<128x128xf32, #tpu.memory_space<vmem>>, vector<128x128xf32>
    %cst_71 = arith.constant 1.000000e+00 : f32
    %157 = vector.shape_cast %155 : vector<1x128xi1> to vector<1x128xi1>
    %158 = vector.broadcast %157 : vector<1x128xi1> to vector<128x128xi1>
    %159 = vector.shape_cast %133 : vector<128x1xf32> to vector<128x1xf32>
    %160 = vector.broadcast %159 : vector<128x1xf32> to vector<128x128xf32>
    %161 = vector.broadcast %cst_71 : f32 to vector<128x128xf32>
    %162 = arith.select %158, %160, %161 : vector<128x128xi1>, vector<128x128xf32>
    %163 = arith.mulf %156, %162 : vector<128x128xf32>
    %cst_72 = arith.constant 0.000000e+00 : f32
    %164 = vector.shape_cast %155 : vector<1x128xi1> to vector<1x128xi1>
    %165 = vector.broadcast %164 : vector<1x128xi1> to vector<128x128xi1>
    %166 = vector.broadcast %cst_72 : f32 to vector<128x128xf32>
    %167 = arith.select %165, %150, %166 : vector<128x128xi1>, vector<128x128xf32>
    %168 = arith.addf %163, %167 : vector<128x128xf32>
    %c0_73 = arith.constant 0 : index
    %c0_74 = arith.constant 0 : index
    %169 = vector.load %arg12[%c0_73, %c0_74] : memref<128x128xf32, #tpu.memory_space<vmem>>, vector<128x128xf32>
    tpu.vector_store %arg12[%c0_73, %c0_74], %168 {strides = array<i32>} : memref<128x128xf32, #tpu.memory_space<vmem>>, vector<128x128xf32>,
    %170 = vector.extract_strided_slice %5 {offsets = [0, 71], sizes = [128, 1], strides = [1, 1]} : vector<128x128xbf16> to vector<128x1xbf16>
    %171 = arith.extf %170 : vector<128x1xbf16> to vector<128x1xf32>
    %172 = vector.extract_strided_slice %4 {offsets = [3, 0], sizes = [1, 128], strides = [1, 1]} : vector<8x128xf32> to vector<1x128xf32>
    %173 = vector.broadcast %171 : vector<128x1xf32> to vector<128x128xf32>
    %174 = vector.broadcast %172 : vector<1x128xf32> to vector<128x128xf32>
    %175 = arith.addf %173, %174 : vector<128x128xf32>
    %cst_75 = arith.constant 2.000000e-01 : f32
    %176 = vector.broadcast %cst_75 : f32 to vector<128x128xf32>
    %177 = arith.mulf %176, %175 : vector<128x128xf32>
    %178 = arith.maximumf %175, %177 : vector<128x128xf32>
    %179 = arith.addf %178, %9 : vector<128x128xf32>
    %c3 = arith.constant 3 : index
    %c0_76 = arith.constant 0 : index
    %c0_77 = arith.constant 0 : index
    %180 = vector.load %arg10[%c3, %c0_76, %c0_77] : memref<4x128x1xf32, #tpu.memory_space<vmem>>, vector<1x128x1xf32>
    %181 = vector.shape_cast %180 : vector<1x128x1xf32> to vector<128x1xf32>
    %cst_78 = arith.constant dense<0xFF800000> : vector<128xf32>
    %182 = vector.multi_reduction <maximumf>, %179, %cst_78 [1] : vector<128x128xf32> to vector<128xf32>
    %183 = vector.shape_cast %182 : vector<128xf32> to vector<128x1xf32>
    %184 = arith.maximumf %181, %183 : vector<128x1xf32>
    %185 = arith.subf %181, %184 : vector<128x1xf32>
    %186 = math.exp %185 : vector<128x1xf32>
    %187 = vector.broadcast %184 : vector<128x1xf32> to vector<128x128xf32>
    %188 = arith.subf %179, %187 : vector<128x128xf32>
    %189 = math.exp %188 : vector<128x128xf32>
    %c3_79 = arith.constant 3 : index
    %c0_80 = arith.constant 0 : index
    %c0_81 = arith.constant 0 : index
    %190 = vector.load %arg11[%c3_79, %c0_80, %c0_81] : memref<4x128x1xf32, #tpu.memory_space<vmem>>, vector<1x128x1xf32>
    %191 = vector.shape_cast %190 : vector<1x128x1xf32> to vector<128x1xf32>
    %192 = arith.mulf %186, %191 : vector<128x1xf32>
    %cst_82 = arith.constant dense<0.000000e+00> : vector<128xf32>
    %193 = vector.multi_reduction <add>, %189, %cst_82 [1] : vector<128x128xf32> to vector<128xf32>
    %194 = vector.shape_cast %193 : vector<128xf32> to vector<128x1xf32>
    %195 = arith.addf %192, %194 : vector<128x1xf32>
    %c3_83 = arith.constant 3 : index
    %c0_84 = arith.constant 0 : index
    %c0_85 = arith.constant 0 : index
    %196 = vector.load %arg11[%c3_83, %c0_84, %c0_85] : memref<4x128x1xf32, #tpu.memory_space<vmem>>, vector<1x128x1xf32>
    %197 = vector.shape_cast %196 : vector<1x128x1xf32> to vector<128x1xf32>
    %198 = vector.shape_cast %195 : vector<128x1xf32> to vector<1x128x1xf32>
    tpu.vector_store %arg11[%c3_83, %c0_84, %c0_85], %198 {strides = array<i32>} : memref<4x128x1xf32, #tpu.memory_space<vmem>>, vector<1x128x1xf32>,
    %c3_86 = arith.constant 3 : index
    %c0_87 = arith.constant 0 : index
    %c0_88 = arith.constant 0 : index
    %199 = vector.load %arg10[%c3_86, %c0_87, %c0_88] : memref<4x128x1xf32, #tpu.memory_space<vmem>>, vector<1x128x1xf32>
    %200 = vector.shape_cast %199 : vector<1x128x1xf32> to vector<128x1xf32>
    %201 = vector.shape_cast %184 : vector<128x1xf32> to vector<1x128x1xf32>
    tpu.vector_store %arg10[%c3_86, %c0_87, %c0_88], %201 {strides = array<i32>} : memref<4x128x1xf32, #tpu.memory_space<vmem>>, vector<1x128x1xf32>,
    %202 = arith.truncf %189 : vector<128x128xf32> to vector<128x128xbf16>
    %cst_89 = arith.constant dense<0.000000e+00> : vector<128x128xf32>
    %203 = tpu.matmul %202, %3, %cst_89 {dimension_numbers = #tpu.dot_dimension_numbers<[1], [0], [0], [1], [0, 0, 1, 1], [], []>} : vector<128x128xbf16>, vector<128x128xbf16>, vector<128x128xf32> -> vector<128x128xf32>
    %c48_i32_90 = arith.constant 48 : i32
    %204 = vector.broadcast %c48_i32_90 : i32 to vector<1x128xi32>
    %205 = arith.cmpi sge, %10, %204 : vector<1x128xi32>
    %c64_i32 = arith.constant 64 : i32
    %206 = vector.broadcast %c64_i32 : i32 to vector<1x128xi32>
    %207 = arith.cmpi slt, %10, %206 : vector<1x128xi32>
    %208 = arith.andi %205, %207 : vector<1x128xi1>
    %c0_91 = arith.constant 0 : index
    %c0_92 = arith.constant 0 : index
    %209 = vector.load %arg12[%c0_91, %c0_92] : memref<128x128xf32, #tpu.memory_space<vmem>>, vector<128x128xf32>
    %cst_93 = arith.constant 1.000000e+00 : f32
    %210 = vector.shape_cast %208 : vector<1x128xi1> to vector<1x128xi1>
    %211 = vector.broadcast %210 : vector<1x128xi1> to vector<128x128xi1>
    %212 = vector.shape_cast %186 : vector<128x1xf32> to vector<128x1xf32>
    %213 = vector.broadcast %212 : vector<128x1xf32> to vector<128x128xf32>
    %214 = vector.broadcast %cst_93 : f32 to vector<128x128xf32>
    %215 = arith.select %211, %213, %214 : vector<128x128xi1>, vector<128x128xf32>
    %216 = arith.mulf %209, %215 : vector<128x128xf32>
    %cst_94 = arith.constant 0.000000e+00 : f32
    %217 = vector.shape_cast %208 : vector<1x128xi1> to vector<1x128xi1>
    %218 = vector.broadcast %217 : vector<1x128xi1> to vector<128x128xi1>
    %219 = vector.broadcast %cst_94 : f32 to vector<128x128xf32>
    %220 = arith.select %218, %203, %219 : vector<128x128xi1>, vector<128x128xf32>
    %221 = arith.addf %216, %220 : vector<128x128xf32>
    %c0_95 = arith.constant 0 : index
    %c0_96 = arith.constant 0 : index
    %222 = vector.load %arg12[%c0_95, %c0_96] : memref<128x128xf32, #tpu.memory_space<vmem>>, vector<128x128xf32>
    tpu.vector_store %arg12[%c0_95, %c0_96], %221 {strides = array<i32>} : memref<128x128xf32, #tpu.memory_space<vmem>>, vector<128x128xf32>,
    %c1_i32 = arith.constant 1 : i32
    %223 = arith.cmpi eq, %arg1, %c1_i32 : i32
    %224 = arith.extui %223 : i1 to i32
    %c0_i32_97 = arith.constant 0 : i32
    %225 = arith.cmpi ne, %224, %c0_i32_97 : i32
    scf.if %225 {
      %cst_98 = arith.constant 0.000000e+00 : f32
      %226 = vector.broadcast %cst_98 : f32 to vector<128x128xf32>
      %c0_i32_99 = arith.constant 0 : i32
      %227 = vector.broadcast %c0_i32_99 : i32 to vector<1x128xi32>
      %228 = arith.cmpi sge, %10, %227 : vector<1x128xi32>
      %c16_i32_100 = arith.constant 16 : i32
      %229 = vector.broadcast %c16_i32_100 : i32 to vector<1x128xi32>
      %230 = arith.cmpi slt, %10, %229 : vector<1x128xi32>
      %231 = arith.andi %228, %230 : vector<1x128xi1>
      %c0_101 = arith.constant 0 : index
      %c0_102 = arith.constant 0 : index
      %c0_103 = arith.constant 0 : index
      %232 = vector.load %arg11[%c0_101, %c0_102, %c0_103] : memref<4x128x1xf32, #tpu.memory_space<vmem>>, vector<1x128x1xf32>
      %233 = vector.shape_cast %232 : vector<1x128x1xf32> to vector<128x1xf32>
      %234 = tpu.reciprocal %233 {approx = true} : vector<128x1xf32> -> vector<128x1xf32>
      %cst_104 = arith.constant 0.000000e+00 : f32
      %235 = vector.shape_cast %231 : vector<1x128xi1> to vector<1x128xi1>
      %236 = vector.broadcast %235 : vector<1x128xi1> to vector<128x128xi1>
      %237 = vector.shape_cast %234 : vector<128x1xf32> to vector<128x1xf32>
      %238 = vector.broadcast %237 : vector<128x1xf32> to vector<128x128xf32>
      %239 = vector.broadcast %cst_104 : f32 to vector<128x128xf32>
      %240 = arith.select %236, %238, %239 : vector<128x128xi1>, vector<128x128xf32>
      %241 = arith.addf %226, %240 : vector<128x128xf32>
      %c16_i32_105 = arith.constant 16 : i32
      %242 = vector.broadcast %c16_i32_105 : i32 to vector<1x128xi32>
      %243 = arith.cmpi sge, %10, %242 : vector<1x128xi32>
      %c32_i32_106 = arith.constant 32 : i32
      %244 = vector.broadcast %c32_i32_106 : i32 to vector<1x128xi32>
      %245 = arith.cmpi slt, %10, %244 : vector<1x128xi32>
      %246 = arith.andi %243, %245 : vector<1x128xi1>
      %c1_107 = arith.constant 1 : index
      %c0_108 = arith.constant 0 : index
      %c0_109 = arith.constant 0 : index
      %247 = vector.load %arg11[%c1_107, %c0_108, %c0_109] : memref<4x128x1xf32, #tpu.memory_space<vmem>>, vector<1x128x1xf32>
      %248 = vector.shape_cast %247 : vector<1x128x1xf32> to vector<128x1xf32>
      %249 = tpu.reciprocal %248 {approx = true} : vector<128x1xf32> -> vector<128x1xf32>
      %cst_110 = arith.constant 0.000000e+00 : f32
      %250 = vector.shape_cast %246 : vector<1x128xi1> to vector<1x128xi1>
      %251 = vector.broadcast %250 : vector<1x128xi1> to vector<128x128xi1>
      %252 = vector.shape_cast %249 : vector<128x1xf32> to vector<128x1xf32>
      %253 = vector.broadcast %252 : vector<128x1xf32> to vector<128x128xf32>
      %254 = vector.broadcast %cst_110 : f32 to vector<128x128xf32>
      %255 = arith.select %251, %253, %254 : vector<128x128xi1>, vector<128x128xf32>
      %256 = arith.addf %241, %255 : vector<128x128xf32>
      %c32_i32_111 = arith.constant 32 : i32
      %257 = vector.broadcast %c32_i32_111 : i32 to vector<1x128xi32>
      %258 = arith.cmpi sge, %10, %257 : vector<1x128xi32>
      %c48_i32_112 = arith.constant 48 : i32
      %259 = vector.broadcast %c48_i32_112 : i32 to vector<1x128xi32>
      %260 = arith.cmpi slt, %10, %259 : vector<1x128xi32>
      %261 = arith.andi %258, %260 : vector<1x128xi1>
      %c2_113 = arith.constant 2 : index
      %c0_114 = arith.constant 0 : index
      %c0_115 = arith.constant 0 : index
      %262 = vector.load %arg11[%c2_113, %c0_114, %c0_115] : memref<4x128x1xf32, #tpu.memory_space<vmem>>, vector<1x128x1xf32>
      %263 = vector.shape_cast %262 : vector<1x128x1xf32> to vector<128x1xf32>
      %264 = tpu.reciprocal %263 {approx = true} : vector<128x1xf32> -> vector<128x1xf32>
      %cst_116 = arith.constant 0.000000e+00 : f32
      %265 = vector.shape_cast %261 : vector<1x128xi1> to vector<1x128xi1>
      %266 = vector.broadcast %265 : vector<1x128xi1> to vector<128x128xi1>
      %267 = vector.shape_cast %264 : vector<128x1xf32> to vector<128x1xf32>
      %268 = vector.broadcast %267 : vector<128x1xf32> to vector<128x128xf32>
      %269 = vector.broadcast %cst_116 : f32 to vector<128x128xf32>
      %270 = arith.select %266, %268, %269 : vector<128x128xi1>, vector<128x128xf32>
      %271 = arith.addf %256, %270 : vector<128x128xf32>
      %c48_i32_117 = arith.constant 48 : i32
      %272 = vector.broadcast %c48_i32_117 : i32 to vector<1x128xi32>
      %273 = arith.cmpi sge, %10, %272 : vector<1x128xi32>
      %c64_i32_118 = arith.constant 64 : i32
      %274 = vector.broadcast %c64_i32_118 : i32 to vector<1x128xi32>
      %275 = arith.cmpi slt, %10, %274 : vector<1x128xi32>
      %276 = arith.andi %273, %275 : vector<1x128xi1>
      %c3_119 = arith.constant 3 : index
      %c0_120 = arith.constant 0 : index
      %c0_121 = arith.constant 0 : index
      %277 = vector.load %arg11[%c3_119, %c0_120, %c0_121] : memref<4x128x1xf32, #tpu.memory_space<vmem>>, vector<1x128x1xf32>
      %278 = vector.shape_cast %277 : vector<1x128x1xf32> to vector<128x1xf32>
      %279 = tpu.reciprocal %278 {approx = true} : vector<128x1xf32> -> vector<128x1xf32>
      %cst_122 = arith.constant 0.000000e+00 : f32
      %280 = vector.shape_cast %276 : vector<1x128xi1> to vector<1x128xi1>
      %281 = vector.broadcast %280 : vector<1x128xi1> to vector<128x128xi1>
      %282 = vector.shape_cast %279 : vector<128x1xf32> to vector<128x1xf32>
      %283 = vector.broadcast %282 : vector<128x1xf32> to vector<128x128xf32>
      %284 = vector.broadcast %cst_122 : f32 to vector<128x128xf32>
      %285 = arith.select %281, %283, %284 : vector<128x128xi1>, vector<128x128xf32>
      %286 = arith.addf %271, %285 : vector<128x128xf32>
      %c0_123 = arith.constant 0 : index
      %c0_124 = arith.constant 0 : index
      %287 = vector.load %arg12[%c0_123, %c0_124] : memref<128x128xf32, #tpu.memory_space<vmem>>, vector<128x128xf32>
      %288 = arith.mulf %287, %286 : vector<128x128xf32>
      %c0_125 = arith.constant 0 : index
      %c0_126 = arith.constant 0 : index
      %289 = vector.load %arg6[%c0_125, %c0_126] : memref<1x128xf32, #tpu.memory_space<vmem>>, vector<1x128xf32>
      %290 = vector.broadcast %289 : vector<1x128xf32> to vector<128x128xf32>
      %291 = arith.mulf %288, %290 : vector<128x128xf32>
      %c0_127 = arith.constant 0 : index
      %c0_128 = arith.constant 0 : index
      %292 = vector.load %arg7[%c0_127, %c0_128] : memref<1x128xf32, #tpu.memory_space<vmem>>, vector<1x128xf32>
      %293 = vector.broadcast %292 : vector<1x128xf32> to vector<128x128xf32>
      %294 = arith.addf %291, %293 : vector<128x128xf32>
      %cst_129 = arith.constant 0.000000e+00 : f32
      %295 = vector.broadcast %cst_129 : f32 to vector<128x128xf32>
      %296 = arith.maximumf %294, %295 : vector<128x128xf32>
      %297 = arith.truncf %296 : vector<128x128xf32> to vector<128x128xbf16>
      %c0_130 = arith.constant 0 : index
      %c0_131 = arith.constant 0 : index
      %298 = vector.load %arg8[%c0_130, %c0_131] : memref<128x128xbf16, #tpu.memory_space<vmem>>, vector<128x128xbf16>
      %cst_132 = arith.constant dense<0.000000e+00> : vector<128x128xf32>
      %299 = tpu.matmul %297, %298, %cst_132 {dimension_numbers = #tpu.dot_dimension_numbers<[1], [0], [0], [1], [0, 0, 1, 1], [], []>} : vector<128x128xbf16>, vector<128x128xbf16>, vector<128x128xf32> -> vector<128x128xf32>
      %300 = arith.truncf %299 : vector<128x128xf32> to vector<128x128xbf16>
      %c0_133 = arith.constant 0 : index
      %c0_134 = arith.constant 0 : index
      %301 = vector.load %arg9[%c0_133, %c0_134] : memref<128x128xbf16, #tpu.memory_space<vmem>>, vector<128x128xbf16>
      tpu.vector_store %arg9[%c0_133, %c0_134], %300 {strides = array<i32>} : memref<128x128xbf16, #tpu.memory_space<vmem>>, vector<128x128xbf16>,
    } else {
    }
    return
  }
  func.func @transform_0(%arg0: i32, %arg1: i32) -> (i32, i32) {
    %c0_i32 = arith.constant 0 : i32
    %c0_i32_0 = arith.constant 0 : i32
    return %c0_i32, %arg1 : i32, i32
  }
  func.func @transform_1(%arg0: i32, %arg1: i32) -> (i32, i32) {
    %c0_i32 = arith.constant 0 : i32
    %c0_i32_0 = arith.constant 0 : i32
    return %arg1, %c0_i32 : i32, i32
  }
  func.func @transform_2(%arg0: i32, %arg1: i32) -> (i32, i32) {
    %c0_i32 = arith.constant 0 : i32
    %c0_i32_0 = arith.constant 0 : i32
    return %arg0, %c0_i32 : i32, i32
  }
  func.func @transform_3(%arg0: i32, %arg1: i32) -> (i32, i32) {
    %c0_i32 = arith.constant 0 : i32
    return %arg0, %arg1 : i32, i32
  }
  func.func @transform_4(%arg0: i32, %arg1: i32) -> (i32, i32) {
    %c0_i32 = arith.constant 0 : i32
    %c0_i32_0 = arith.constant 0 : i32
    %c0_i32_1 = arith.constant 0 : i32
    return %c0_i32, %c0_i32_0 : i32, i32
  }
  func.func @transform_5(%arg0: i32, %arg1: i32) -> (i32, i32) {
    %c0_i32 = arith.constant 0 : i32
    %c0_i32_0 = arith.constant 0 : i32
    %c0_i32_1 = arith.constant 0 : i32
    return %c0_i32, %c0_i32_0 : i32, i32
  }
  func.func @transform_6(%arg0: i32, %arg1: i32) -> (i32, i32) {
    %c0_i32 = arith.constant 0 : i32
    %c0_i32_0 = arith.constant 0 : i32
    %c0_i32_1 = arith.constant 0 : i32
    return %c0_i32, %c0_i32_0 : i32, i32
  }
  func.func @transform_7(%arg0: i32, %arg1: i32) -> (i32, i32) {
    %c0_i32 = arith.constant 0 : i32
    %c0_i32_0 = arith.constant 0 : i32
    return %arg0, %c0_i32 : i32, i32
  }
}

module attributes {stable_mosaic.version = 11 : i64} {
  func.func @pool_classifier_kernel(%arg0: i32, %arg1: memref<128x128xbf16, #tpu.memory_space<vmem>>, %arg2: memref<4x128xf32, #tpu.memory_space<vmem>>, %arg3: memref<1x128xf32, #tpu.memory_space<vmem>>, %arg4: memref<128x8xbf16, #tpu.memory_space<vmem>>, %arg5: memref<1x8xf32, #tpu.memory_space<vmem>>, %arg6: memref<4x8xf32, #tpu.memory_space<vmem>>, %arg7: memref<4x128xf32, #tpu.memory_space<vmem>>) attributes {dimension_semantics = [#tpu.dimension_semantics<arbitrary>], iteration_bounds = array<i64: 2>, scalar_prefetch = 0 : i64, scratch_operands = 1 : i64, tpu.core_type = #tpu.core_type<tc>, window_params = [{transform_indices = @transform_0, window_bounds = array<i64: 128, 128>}, {transform_indices = @transform_1, window_bounds = array<i64: 4, 128>}, {pipeline_mode = #tpu.pipeline_mode<synchronous>, transform_indices = @transform_2, window_bounds = array<i64: 1, 128>}, {pipeline_mode = #tpu.pipeline_mode<synchronous>, transform_indices = @transform_3, window_bounds = array<i64: 128, 8>}, {pipeline_mode = #tpu.pipeline_mode<synchronous>, transform_indices = @transform_4, window_bounds = array<i64: 1, 8>}, {pipeline_mode = #tpu.pipeline_mode<synchronous>, transform_indices = @transform_5, window_bounds = array<i64: 4, 8>}]} {
    %c0_i32 = arith.constant 0 : i32
    %0 = arith.cmpi eq, %arg0, %c0_i32 : i32
    %1 = arith.extui %0 : i1 to i32
    %c0_i32_0 = arith.constant 0 : i32
    %2 = arith.cmpi ne, %1, %c0_i32_0 : i32
    scf.if %2 {
      %cst_9 = arith.constant 0.000000e+00 : f32
      %13 = vector.broadcast %cst_9 : f32 to vector<4x128xf32>
      %c0_10 = arith.constant 0 : index
      %c0_11 = arith.constant 0 : index
      %14 = vector.load %arg7[%c0_10, %c0_11] : memref<4x128xf32, #tpu.memory_space<vmem>>, vector<4x128xf32>
      tpu.vector_store %arg7[%c0_10, %c0_11], %13 {strides = array<i32>} : memref<4x128xf32, #tpu.memory_space<vmem>>, vector<4x128xf32>,
    } else {
    }
    %c0 = arith.constant 0 : index
    %c0_1 = arith.constant 0 : index
    %3 = vector.load %arg7[%c0, %c0_1] : memref<4x128xf32, #tpu.memory_space<vmem>>, vector<4x128xf32>
    %c0_2 = arith.constant 0 : index
    %c0_3 = arith.constant 0 : index
    %4 = vector.load %arg2[%c0_2, %c0_3] : memref<4x128xf32, #tpu.memory_space<vmem>>, vector<4x128xf32>
    %5 = arith.truncf %4 : vector<4x128xf32> to vector<4x128xbf16>
    %c0_4 = arith.constant 0 : index
    %c0_5 = arith.constant 0 : index
    %6 = vector.load %arg1[%c0_4, %c0_5] : memref<128x128xbf16, #tpu.memory_space<vmem>>, vector<128x128xbf16>
    %cst = arith.constant dense<0.000000e+00> : vector<4x128xf32>
    %7 = tpu.matmul %5, %6, %cst {dimension_numbers = #tpu.dot_dimension_numbers<[1], [0], [0], [1], [0, 0, 1, 1], [], []>} : vector<4x128xbf16>, vector<128x128xbf16>, vector<4x128xf32> -> vector<4x128xf32>
    %8 = arith.addf %3, %7 : vector<4x128xf32>
    %c0_6 = arith.constant 0 : index
    %c0_7 = arith.constant 0 : index
    %9 = vector.load %arg7[%c0_6, %c0_7] : memref<4x128xf32, #tpu.memory_space<vmem>>, vector<4x128xf32>
    tpu.vector_store %arg7[%c0_6, %c0_7], %8 {strides = array<i32>} : memref<4x128xf32, #tpu.memory_space<vmem>>, vector<4x128xf32>,
    %c1_i32 = arith.constant 1 : i32
    %10 = arith.cmpi eq, %arg0, %c1_i32 : i32
    %11 = arith.extui %10 : i1 to i32
    %c0_i32_8 = arith.constant 0 : i32
    %12 = arith.cmpi ne, %11, %c0_i32_8 : i32
    scf.if %12 {
      %c0_9 = arith.constant 0 : index
      %c0_10 = arith.constant 0 : index
      %13 = vector.load %arg7[%c0_9, %c0_10] : memref<4x128xf32, #tpu.memory_space<vmem>>, vector<4x128xf32>
      %c0_11 = arith.constant 0 : index
      %c0_12 = arith.constant 0 : index
      %14 = vector.load %arg3[%c0_11, %c0_12] : memref<1x128xf32, #tpu.memory_space<vmem>>, vector<1x128xf32>
      %15 = vector.broadcast %14 : vector<1x128xf32> to vector<4x128xf32>
      %16 = arith.addf %13, %15 : vector<4x128xf32>
      %cst_13 = arith.constant 0.000000e+00 : f32
      %17 = vector.broadcast %cst_13 : f32 to vector<4x128xf32>
      %18 = arith.maximumf %16, %17 : vector<4x128xf32>
      %19 = arith.truncf %18 : vector<4x128xf32> to vector<4x128xbf16>
      %c0_14 = arith.constant 0 : index
      %c0_15 = arith.constant 0 : index
      %20 = vector.load %arg4[%c0_14, %c0_15] : memref<128x8xbf16, #tpu.memory_space<vmem>>, vector<128x8xbf16>
      %cst_16 = arith.constant dense<0.000000e+00> : vector<4x8xf32>
      %21 = tpu.matmul %19, %20, %cst_16 {dimension_numbers = #tpu.dot_dimension_numbers<[1], [0], [0], [1], [0, 0, 1, 1], [], []>} : vector<4x128xbf16>, vector<128x8xbf16>, vector<4x8xf32> -> vector<4x8xf32>
      %c0_17 = arith.constant 0 : index
      %c0_18 = arith.constant 0 : index
      %22 = vector.load %arg5[%c0_17, %c0_18] : memref<1x8xf32, #tpu.memory_space<vmem>>, vector<1x8xf32>
      %23 = vector.broadcast %22 : vector<1x8xf32> to vector<4x8xf32>
      %24 = arith.addf %21, %23 : vector<4x8xf32>
      %cst_19 = arith.constant dense<0xFF800000> : vector<4xf32>
      %25 = vector.multi_reduction <maximumf>, %24, %cst_19 [1] : vector<4x8xf32> to vector<4xf32>
      %26 = vector.shape_cast %25 : vector<4xf32> to vector<4x1xf32>
      %27 = vector.broadcast %26 : vector<4x1xf32> to vector<4x8xf32>
      %28 = arith.subf %24, %27 : vector<4x8xf32>
      %29 = math.exp %28 : vector<4x8xf32>
      %cst_20 = arith.constant dense<0.000000e+00> : vector<4xf32>
      %30 = vector.multi_reduction <add>, %29, %cst_20 [1] : vector<4x8xf32> to vector<4xf32>
      %31 = vector.shape_cast %30 : vector<4xf32> to vector<4x1xf32>
      %32 = math.log %31 : vector<4x1xf32>
      %33 = vector.broadcast %32 : vector<4x1xf32> to vector<4x8xf32>
      %34 = arith.subf %28, %33 : vector<4x8xf32>
      %c0_21 = arith.constant 0 : index
      %c0_22 = arith.constant 0 : index
      %35 = vector.load %arg6[%c0_21, %c0_22] : memref<4x8xf32, #tpu.memory_space<vmem>>, vector<4x8xf32>
      tpu.vector_store %arg6[%c0_21, %c0_22], %34 {strides = array<i32>} : memref<4x8xf32, #tpu.memory_space<vmem>>, vector<4x8xf32>,
    } else {
    }
    return
  }
  func.func @transform_0(%arg0: i32) -> (i32, i32) {
    %c0_i32 = arith.constant 0 : i32
    %c0_i32_0 = arith.constant 0 : i32
    return %arg0, %c0_i32 : i32, i32
  }
  func.func @transform_1(%arg0: i32) -> (i32, i32) {
    %c0_i32 = arith.constant 0 : i32
    %c0_i32_0 = arith.constant 0 : i32
    return %c0_i32, %arg0 : i32, i32
  }
  func.func @transform_2(%arg0: i32) -> (i32, i32) {
    %c0_i32 = arith.constant 0 : i32
    %c0_i32_0 = arith.constant 0 : i32
    %c0_i32_1 = arith.constant 0 : i32
    return %c0_i32, %c0_i32_0 : i32, i32
  }
  func.func @transform_3(%arg0: i32) -> (i32, i32) {
    %c0_i32 = arith.constant 0 : i32
    %c0_i32_0 = arith.constant 0 : i32
    %c0_i32_1 = arith.constant 0 : i32
    return %c0_i32, %c0_i32_0 : i32, i32
  }
  func.func @transform_4(%arg0: i32) -> (i32, i32) {
    %c0_i32 = arith.constant 0 : i32
    %c0_i32_0 = arith.constant 0 : i32
    %c0_i32_1 = arith.constant 0 : i32
    return %c0_i32, %c0_i32_0 : i32, i32
  }
  func.func @transform_5(%arg0: i32) -> (i32, i32) {
    %c0_i32 = arith.constant 0 : i32
    %c0_i32_0 = arith.constant 0 : i32
    %c0_i32_1 = arith.constant 0 : i32
    return %c0_i32, %c0_i32_0 : i32, i32
  }
}

</mosaic_0001>

<bundles_post_ra>
// kernel: gat_classifier_forward.4
= control target key start
LH: loop header
LB: loop body
LE: loop exit
PB: predicated region body
PF: predicated region fallthrough
CT: control target
= control target key end

     0   :  { %s447_s9 = smov 0   ;;  %s479_s0 = inlined_call_operand.vmem [shape: f32[256,16], index: 0, kind: input, shape index: {}]   ;;  %s480_s1 = inlined_call_operand.vmem [shape: bf16[16,128], index: 1, kind: input, shape index: {}]   ;;  %s481_s2 = inlined_call_operand.vmem [shape: bf16[256,128], index: 2, kind: output, shape index: {}]  }
   0x1 LB: > { %s342_s10 = sadd.s32 4294967295, %s430_s9   ;;  %p346_p0 = scmp.ge.s32.totalorder %s430_s9, 1  ;;  %s430_s9 = sphi %s447_s9, %s12_s9  }
   0x2   : > { %p113_p1 = scmp.lt.s32.totalorder %s430_s9, 3 }
   0x4   : > { %p114_p2 = pnand %p346_p0, %p113_p1 }
   0x5   : > { %s347_s13 = sshll.u32 (!%p114_p2), %s342_s10, 4 }
   0x6   : > { %117 = sbr.rel (%p114_p2) target bundleno = 179 (0xb3), region = 28  ;;  %p136_p3 = scmp.lt.s32.totalorder (!%p114_p2), %s347_s13, 31 }
   0xb   : > { %v365_v0 = vld [vmem:[%s480_s1] sm:$0xff]  ;;  %s483_s13 = smov (!%p136_p3, %s347_s13), 31  ;;  %vm180_vm0 = vcmask 130048  }
   0xc   : > { %212 = vmatpush.bf16.msra.mxu0 %v365_v0  ;;  %413 = vmatpush.bf16.msra.mxu1 %v365_v0  ;;  %s348_s14 = sshll.u32 %s483_s13, 3  ;;  %s350_s18 = sshll.u32 %s483_s13, 2 }
   0xd   : > { %414 = vmatpush.bf16.msra.mxu2 %v365_v0  ;;  %415 = vmatpush.bf16.msra.mxu3 %v365_v0  ;;  %s139_s17 = scalar_lea.vmem %s479_s0, %s348_s14  ;;  %s145_s21 = scalar_lea.vmem %s481_s2, %s350_s18 }
   0xe   : > { %v148_v1 = vld [vmem:[%s139_s17] sm:$0xff]  ;;  %v149_v2 = vld [vmem:[%s139_s17 + $0x8] sm:$0xff]  ;;  %v150_v13 = vld [vmem:[%s139_s17 + $0x10] sm:$0xff] }
   0xf   : > { %v152_v3 = vld [vmem:[%s139_s17 + $0x20] sm:$0xff]  ;;  %v164_v4 = vpack.c.bf16 %v149_v2, %v148_v1  ;;  %v153_v5 = vld [vmem:[%s139_s17 + $0x28] sm:$0xff]  ;;  %v151_v14 = vld [vmem:[%s139_s17 + $0x18] sm:$0xff] }
  0x10   : > { %v156_v6 = vld [vmem:[%s139_s17 + $0x40] sm:$0xff]  ;;  %v157_v7 = vld [vmem:[%s139_s17 + $0x48] sm:$0xff]  ;;  %v166_v8 = vpack.c.bf16 %v153_v5, %v152_v3  ;;  %v154_v15 = vld [vmem:[%s139_s17 + $0x30] sm:$0xff]  ;;  %v165_v21 = vpack.c.bf16 %v151_v14, %v150_v13 }
  0x11   : > { %v168_v9 = vpack.c.bf16 %v157_v7, %v156_v6  ;;  %v160_v10 = vld [vmem:[%s139_s17 + $0x60] sm:$0xff]  ;;  %v161_v11 = vld [vmem:[%s139_s17 + $0x68] sm:$0xff]  ;;  %355 = vmatmul.msk.bf16.vlgmr.msra.gmra.mxu0 %vm180_vm0, %v164_v4  ;;  %v155_v16 = vld [vmem:[%s139_s17 + $0x38] sm:$0xff] }
  0x12   : > { %v170_v12 = vpack.c.bf16 %v161_v11, %v160_v10  ;;  %357 = vmatmul.msk.bf16.vlgmr.msra.gmra.mxu1 %vm180_vm0, %v166_v8  ;;  %v158_v17 = vld [vmem:[%s139_s17 + $0x50] sm:$0xff]  ;;  %v159_v18 = vld [vmem:[%s139_s17 + $0x58] sm:$0xff]  ;;  %v167_v22 = vpack.c.bf16 %v155_v16, %v154_v15 }
  0x13   : > { %359 = vmatmul.msk.bf16.vlgmr.msra.gmra.mxu2 %vm180_vm0, %v168_v9  ;;  %v162_v19 = vld [vmem:[%s139_s17 + $0x70] sm:$0xff]  ;;  %v163_v20 = vld [vmem:[%s139_s17 + $0x78] sm:$0xff]  ;;  %v169_v23 = vpack.c.bf16 %v159_v18, %v158_v17 }
  0x14   : > { %361 = vmatmul.msk.bf16.vlgmr.msra.gmra.mxu3 %vm180_vm0, %v170_v12  ;;  %v171_v24 = vpack.c.bf16 %v163_v20, %v162_v19 }
  0x21   : > { %356 = vmatmul.msk.bf16.gmra.mxu0 %vm180_vm0, %v165_v21 }
  0x22   : > { %358 = vmatmul.msk.bf16.gmra.mxu1 %vm180_vm0, %v167_v22 }
  0x23   : > { %360 = vmatmul.msk.bf16.gmra.mxu2 %vm180_vm0, %v169_v23 }
  0x24   : > { %362 = vmatmul.msk.bf16.gmra.mxu3 %vm180_vm0, %v171_v24 }
  0x8e   : > { %v214_v25 = vpop.f32.mrf.mxu0 }
  0x8f   : > { %v224_v26 = vpop.f32.mrf.mxu1 }
  0x96   : > { %v234_v27 = vpop.f32.mrf.mxu2  ;;  %v216_v29 = vpop.f32.mrf.mxu0 }
  0x97   : > { %v244_v28 = vpop.f32.mrf.mxu3  ;;  %v369_v30 = vpack.c.bf16 %v216_v29, %v214_v25  ;;  %v226_v31 = vpop.f32.mrf.mxu1 }
  0x98   : > { %v379_v32 = vpack.c.bf16 %v226_v31, %v224_v26 }
  0x99   : > { %370 = vst [vmem:[%s145_s21] sm:$0xff] %v369_v30  }
  0x9a   : > { %407 = vst [vmem:[%s145_s21 + $0x10] sm:$0xff] %v379_v32  }
  0x9e   : > { %v236_v33 = vpop.f32.mrf.mxu2  ;;  %v219_v36 = vpop.f32.mrf.mxu0 }
  0x9f   : > { %v389_v34 = vpack.c.bf16 %v236_v33, %v234_v27  ;;  %v246_v35 = vpop.f32.mrf.mxu3  ;;  %v229_v38 = vpop.f32.mrf.mxu1 }
  0xa0   : > { %v399_v37 = vpack.c.bf16 %v246_v35, %v244_v28 }
  0xa1   : > { %409 = vst [vmem:[%s145_s21 + $0x20] sm:$0xff] %v389_v34  }
  0xa2   : > { %411 = vst [vmem:[%s145_s21 + $0x30] sm:$0xff] %v399_v37  }
  0xa6   : > { %v239_v39 = vpop.f32.mrf.mxu2  ;;  %v221_v41 = vpop.f32.mrf.mxu0 }
  0xa7   : > { %v249_v40 = vpop.f32.mrf.mxu3  ;;  %v374_v42 = vpack.c.bf16 %v221_v41, %v219_v36  ;;  %v231_v43 = vpop.f32.mrf.mxu1 }
  0xa8   : > { %v384_v44 = vpack.c.bf16 %v231_v43, %v229_v38 }
  0xa9   : > { %406 = vst [vmem:[%s145_s21 + $0x8] sm:$0xff] %v374_v42  }
  0xaa   : > { %408 = vst [vmem:[%s145_s21 + $0x18] sm:$0xff] %v384_v44  }
  0xae   : > { %v241_v45 = vpop.f32.mrf.mxu2 }
  0xaf   : > { %v394_v46 = vpack.c.bf16 %v241_v45, %v239_v39  ;;  %v251_v47 = vpop.f32.mrf.mxu3 }
  0xb0   : > { %v404_v48 = vpack.c.bf16 %v251_v47, %v249_v40 }
  0xb1   : > { %410 = vst [vmem:[%s145_s21 + $0x28] sm:$0xff] %v394_v46  }
  0xb2   : > { %412 = vst [vmem:[%s145_s21 + $0x38] sm:$0xff] %v404_v48  }
  0xb3 PF: > { %s12_s9 = sadd.s32 1, %s430_s9  }
  0xb4   : > { %p9_p4 = scmp.ge.s32.totalorder %s12_s9, 4  }
  0xb6   :  { %11 = sbr.rel (!%p9_p4) target bundleno = 1 (0x1), region = 58 }

// kernel: gat_classifier_forward.7
= control target key start
LH: loop header
LB: loop body
LE: loop exit
PB: predicated region body
PF: predicated region fallthrough
CT: control target
= control target key end

     0   :  { %10 = vsyncpa [#allocation4], 0  ;;  %s671_s18 = smov 0   ;;  %s732_s0 = inlined_call_operand.vmem [shape: bf16[256,128], index: 0, kind: input, shape index: {}]   ;;  %s733_s1 = inlined_call_operand.vmem [shape: f32[4,256], index: 1, kind: input, shape index: {}]   ;;  %s734_s2 = inlined_call_operand.vmem [shape: f32[1,128], index: 2, kind: input, shape index: {}]   ;;  %s735_s3 = inlined_call_operand.vmem [shape: bf16[128,8], index: 3, kind: input, shape index: {}]   ;;  %s736_s4 = inlined_call_operand.vmem [shape: f32[1,8], index: 4, kind: input, shape index: {}]   ;;  %s737_s5 = inlined_call_operand.hbm [shape: f32[4,8], index: 5, kind: output, shape index: {}]  }
   0x1 LB: > { %s677_s19 = sadd.s32 4294967295, %s637_s18   ;;  %p487_p0 = scmp.ge.s32.totalorder %s637_s18, 1  ;;  %s637_s18 = sphi %s671_s18, %s16_s18  }
   0x2   : > { %p193_p1 = scmp.lt.s32.totalorder %s637_s18, 3 }
   0x4   : > { %p194_p2 = pnand %p487_p0, %p193_p1 }
   0x5   : > { %s488_s20 = sshll.u32 (!%p194_p2), %s677_s19, 4  ;;  %p226_p3 = scmp.lt.s32.totalorder (!%p194_p2), %s677_s19, 1 }
   0x6   : > { %197 = sbr.rel (%p194_p2) target bundleno = 607 (0x25f), region = 40  ;;  %p221_p4 = scmp.lt.s32.totalorder (!%p194_p2), %s488_s20, 31 }
   0x7   : > { %p491_p5 = scmp.ne.s32.totalorder (!%p194_p2), %s677_s19, 0 }
   0xb   : > { %s227_s21 = scalar_select %p226_p3, %s677_s19, 1 }
   0xc   : > { %s739_s20 = smov (!%p221_p4, %s488_s20), 31  ;;  %233 = sbr.rel (%p491_p5) target bundleno = 19 (0x13), region = 44 }
   0xd   : > { %s490_s22 = sshll.u32 %s227_s21, 2  ;;  %s489_s23 = sshll.u32 %s739_s20, 2 }
   0xe   : > { %s229_s26 = scalar_lea.vmem %s733_s1, %s490_s22  ;;  %s224_s29 = scalar_lea.vmem %s732_s0, %s489_s23 }
  0x11   : > { %v639_v0 = vmov 0.0  }
  0x12   : > { %234 = vst [vmem:[#allocation2] sm:$0xf] %v639_v0 }
  0x13 PF: > { %v568_v1 = vld [vmem:[%s224_s29 + $0x38] sm:$0xff]  ;;  %v567_v2 = vld [vmem:[%s224_s29 + $0x30] sm:$0xff]  ;;  %v566_v3 = vld [vmem:[%s224_s29 + $0x28] sm:$0xff]  ;;  %p524_p6 = scmp.ne.s32.totalorder %s677_s19, 1 }
  0x14   : > { %302 = vmatpush.bf16.msra.mxu0 %v568_v1  ;;  %v565_v4 = vld [vmem:[%s224_s29 + $0x20] sm:$0xff]  ;;  %v564_v5 = vld [vmem:[%s224_s29 + $0x18] sm:$0xff]  ;;  %v563_v6 = vld [vmem:[%s224_s29 + $0x10] sm:$0xff] }
  0x15   : > { %v562_v7 = vld [vmem:[%s224_s29 + $0x8] sm:$0xff]  ;;  %v561_v8 = vld [vmem:[%s224_s29] sm:$0xff] }
  0x16   : > { %v236_v9 = vld [vmem:[%s229_s26] sm:$0xf] }
  0x17   : > { %v237_v10 = vpack.c.bf16 %v236_v9, %v236_v9 }
  0x18   : > { %303 = vmatpush.bf16.msra.mxu0 %v567_v2 }
  0x19   : > { %v235_v11 = vld [vmem:[#allocation2] sm:$0xf] }
  0x1c   : > { %304 = vmatpush.bf16.msra.mxu0 %v566_v3 }
  0x20   : > { %305 = vmatpush.bf16.msra.mxu0 %v565_v4 }
  0x24   : > { %306 = vmatpush.bf16.msra.mxu0 %v564_v5 }
  0x28   : > { %307 = vmatpush.bf16.msra.mxu0 %v563_v6 }
  0x2c   : > { %308 = vmatpush.bf16.msra.mxu0 %v562_v7 }
  0x30   : > { %309 = vmatpush.bf16.msra.mxu0 %v561_v8 }
  0x33   : > { %310 = vmatmul.bf16.vlgmr.msra.gmra.mxu0 %v237_v10 }
  0xb0   : > { %v311_v12 = vpop.f32.mrf.mxu0 }
  0xb1   : > { %v315_v13 = vadd.f32 %v311_v12, %v235_v11 }
  0xb3   : > { %316 = vst [vmem:[#allocation2] sm:$0xf] %v315_v13 }
  0xb4   : > { %320 = sbr.rel (%p524_p6) target bundleno = 602 (0x25a), region = 48 }
  0xb8   : > { %v313_v14 = vpop.f32.mrf.mxu0 }
  0xb9   : > { %v576_v15 = vld [vmem:[%s735_s3 + $0x38] sm:$0xff]  ;;  %v575_v16 = vld [vmem:[%s735_s3 + $0x30] sm:$0xff]  ;;  %v574_v17 = vld [vmem:[%s735_s3 + $0x28] sm:$0xff]  ;;  %vm410_vm0 = vcmask 60416  }
  0xba   : > { %397 = vmatpush.bf16.msra.mxu0 %v576_v15  ;;  %v573_v18 = vld [vmem:[%s735_s3 + $0x20] sm:$0xff]  ;;  %v572_v19 = vld [vmem:[%s735_s3 + $0x18] sm:$0xff]  ;;  %v571_v21 = vld [vmem:[%s735_s3 + $0x10] sm:$0xff] }
  0xbb   : > { %v593_v20 = vld [vmem:[%s734_s2] ss:$0 sm:$0xff]  ;;  %v570_v24 = vld [vmem:[%s735_s3 + $0x8] sm:$0xff] }
  0xbc   : > { %v321_v22 = vld [vmem:[#allocation2] sm:$0xf] }
  0xbd   : > { %v326_v23 = vadd.f32 %v593_v20, %v321_v22  ;;  %v569_v26 = vld [vmem:[%s735_s3] sm:$0xff] }
  0xbe   : > { %398 = vmatpush.bf16.msra.mxu0 %v575_v16  ;;  %v594_v28 = vld [vmem:[%s736_s4] ss:$0 sm:$0xff] }
  0xbf   : > { %v327_v25 = vmax.f32 %v326_v23, 0.0 }
  0xc1   : > { %v328_v27 = vpack.c.bf16 %v327_v25, %v327_v25 }
  0xc2   : > { %399 = vmatpush.bf16.msra.mxu0 %v574_v17 }
  0xc6   : > { %400 = vmatpush.bf16.msra.mxu0 %v573_v18 }
  0xca   : > { %401 = vmatpush.bf16.msra.mxu0 %v572_v19 }
  0xce   : > { %402 = vmatpush.bf16.msra.mxu0 %v571_v21 }
  0xd2   : > { %403 = vmatpush.bf16.msra.mxu0 %v570_v24 }
  0xd6   : > { %404 = vmatpush.bf16.msra.mxu0 %v569_v26 }
  0xd9   : > { %405 = vmatmul.bf16.vlgmr.msra.gmra.mxu0 %v328_v27 }
 0x156   : > { %v406_v29 = vpop.f32.mrf.mxu0 }
 0x157   : > { %v407_v30 = vadd.f32 %v594_v28, %v406_v29 }
 0x159   : > { %v411_v31 = vsel %vm410_vm0, %v407_v30, -inf }
 0x15a   : > { %412 = vmax.xlane.f32.xlu0 %v411_v31 }
 0x15e   : > { %v408_v32 = vpop.f32.mrf.mxu0 }
 0x1cd   : > { %v413_v33 = vpop.xlane.xlu0 %412 }
 0x1ce   : > { %v414_v34 = vsub.f32 %v407_v30, %v413_v33 }
 0x1d0   : > { %v415_v35 = vmul.f32 1.442695, %v414_v34 }
 0x1d2   : > { %595 = vpow2.f32 %v415_v35 }
 0x1d8   : > { %v596_v36 = vpop.eup %595 }
 0x1d9   : > { %v417_v37 = vsel %vm410_vm0, %v596_v36, 0.0 }
 0x1da   : > { %418 = vadd.xlane.f32.xlu0 %v417_v37 }
 0x24d   : > { %v419_v38 = vpop.xlane.xlu0 %418 }
 0x24e   : > { %597 = vlog2.f32 %v419_v38 }
 0x254   : > { %v598_v39 = vpop.eup %597 }
 0x255   : > { %v421_v40 = vmul.f32 0.6931472, %v598_v39 }
 0x257   : > { %v422_v41 = vsub.f32 %v414_v34, %v421_v40 }
 0x259   : > { %423 = vst.msk [vmem:[#allocation3] sm:$0xf] %vm410_vm0, %v422_v41 }
 0x25a PF: > { %p581_p7 = scmp.eq.s32.totalorder %s677_s19, 1  ;;  %s640_s27 = smov [#allocation3]  }
 0x25b   : > { %s430_s28 = sshll.u32 %s640_s27, 4  ;;  %s432_s6 = sshll.u32 %s737_s5, 4  ;;  %s431_s28 = int_to_ptr.vmem [resolvable:$true] %s430_s28  ;;  %s433_s6 = int_to_ptr.hbm [resolvable:$true] %s432_s6 }
 0x25c   : > { %578 = dma.vmem_to_hbm [thread:$0]  (%p581_p7), %s431_s28, 64, %s433_s6, [#allocation4]  }
 0x25d   : > { %632 = dma.done.wait (%p581_p7), [#allocation4], 64  }
 0x25e   : > { %634 = vsyncadd (%p581_p7), [#allocation4], 4294967232 }
 0x25f PF: > { %s16_s18 = sadd.s32 1, %s637_s18  }
 0x260   : > { %p13_p8 = scmp.ge.s32.totalorder %s16_s18, 4  }
 0x262   :  { %15 = sbr.rel (!%p13_p8) target bundleno = 1 (0x1), region = 78 }
 0x267   :  { %446 = vsyncpa [#allocation4], 1 }
 0x268   :  { %448 = vsyncpa [#allocation4 + $0x1], 1 }

// kernel: gat_classifier_forward.5
= control target key start
LH: loop header
LB: loop body
LE: loop exit
PB: predicated region body
PF: predicated region fallthrough
CT: control target
= control target key end

     0   :  { %s8389_s0 = inlined_call_operand.vmem [shape: f32[8,256], index: 0, kind: input, shape index: {}]   ;;  %s8390_s1 = inlined_call_operand.vmem [shape: bf16[256,128], index: 1, kind: input, shape index: {}, may-alias: {1,2}]   ;;  %s8391_s2 = inlined_call_operand.vmem [shape: bf16[256,128], index: 2, kind: input, shape index: {}, may-alias: {1,2}]   ;;  %s8392_s3 = inlined_call_operand.vmem [shape: s8[256,256], index: 3, kind: input, shape index: {}]   ;;  %s8393_s4 = inlined_call_operand.vmem [shape: f32[1,128], index: 4, kind: input, shape index: {}]   ;;  %s8394_s5 = inlined_call_operand.vmem [shape: f32[1,128], index: 5, kind: input, shape index: {}]   ;;  %s8395_s6 = inlined_call_operand.vmem [shape: bf16[128,128], index: 6, kind: input, shape index: {}]   ;;  %s8396_s7 = inlined_call_operand.vmem [shape: bf16[256,128], index: 7, kind: output, shape index: {}]  }
   0x1   :  { %8498 = sst [smem:[#allocation54_spill]] %s8392_s3 }
   0x2   :  { %s5490_s24 = smov 0   ;;  %s5492_s25 = smov 0  }
   0x3   :  { %s5494_s26 = smov 0   ;;  %s5496_s27 = smov 0  }
   0x4   :  { %s5498_s28 = smov 0   ;;  %s5500_s29 = smov 0  }
   0x5   :  { %s5502_s30 = smov 0  }
   0x6 LB: > { %s26_s8 = sadd.s32 1, %s5432_s28  ;;  %s29_s9 = sadd.s32 1, %s5436_s29  ;;  %s5440_s30 = sphi %s5502_s30, %s17_s30   ;;  %s5436_s29 = sphi %s5500_s29, %s8755_s29   ;;  %s5432_s28 = sphi %s5498_s28, %s8754_s28   ;;  %s5428_s27 = sphi %s5496_s27, %s8753_s27   ;;  %s5424_s26 = sphi %s5494_s26, %s8752_s26   ;;  %s5420_s25 = sphi %s5492_s25, %s8751_s25   ;;  %s5416_s24 = sphi %s5490_s24, %s8750_s24  }
   0x7   : > { %p27_p0 = scmp.ge.s32.totalorder %s26_s8, 2  ;;  %p123_p1 = scmp.ne.s32.totalorder %s5420_s25, %s5416_s24 }
   0x8   : > { %p124_p2 = scmp.eq.s32.totalorder %s5440_s30, 0  ;;  %s116_s13 = sadd.s32 1, %s5420_s25 }
   0x9   : > { %s8757_s8 = smov (%p27_p0, %s26_s8), 0  ;;  %s8759_s9 = smov (!%p27_p0, %s29_s9), %s5436_s29 }
   0xa   : > { %p125_p3 = por %p124_p2, %p123_p1  ;;  %p31_p4 = scmp.ge.s32.totalorder %s8759_s9, 2 }
   0xb   : > { %s112_s10 = ssub.s32 %s5432_s28, %s8757_s8  ;;  %p4541_p6 = scmp.ge.s32.totalorder %s5440_s30, 4 }
   0xc   : > { %s8761_s9 = smov (%p31_p4, %s8759_s9), 0 }
   0xd   : > { %8499 = sst [smem:[#allocation6_spill]] %s8761_s9  ;;  %s111_s11 = ssub.s32 %s5436_s29, %s8761_s9 }
   0xe   : > { %s113_s12 = sor.u32 %s112_s10, %s111_s11  ;;  %247 = sbr.rel (%p4541_p6) target bundleno = 33 (0x21), region = 28 }
   0xf   : > { %p114_p5 = scmp.eq.s32.totalorder %s113_s12, 0 }
  0x11   : > { %s5541_s14 = scalar_select %p114_p5, %s5420_s25, %s116_s13  }
  0x13   : > { %275 = sbr.rel (!%p125_p3) target bundleno = 33 (0x21), region = 44  ;;  %s277_s15 = sand.u32 (%p125_p3), 1, %s5420_s25  }
  0x14   : > { %s4623_s16 = sshll.u32 (%p125_p3), %s5436_s29, 3  ;;  %s4542_s17 = sshll.u32 (%p125_p3), %s277_s15, 5 }
  0x15   : > { %s282_s18 = sadd.s32 (%p125_p3), %s5432_s28, %s4623_s16  ;;  %s8500_s3 = sld [smem:[#allocation54_spill]] (%p125_p3) }
  0x16   : > { %s4545_s19 = sshll.u32 (%p125_p3), %s282_s18, 3  ;;  %s279_s23 = scalar_lea.vmem (%p125_p3), [#allocation5], %s4542_s17 }
  0x1b   : > { %s284_s22 = scalar_lea.vmem %s8500_s3, %s4545_s19 }
  0x1c   : > { %v319_v0 = vld [vmem:[%s284_s22] sm:$0xff]  ;;  %v321_v1 = vld [vmem:[%s284_s22 + $0x10] sm:$0xff] }
  0x1d   : > { %v323_v2 = vld [vmem:[%s284_s22 + $0x20] sm:$0xff]  ;;  %320 = vst [vmem:[%s279_s23] sm:$0xff] %v319_v0  ;;  %v325_v3 = vld [vmem:[%s284_s22 + $0x30] sm:$0xff] }
  0x1e   : > { %322 = vst [vmem:[%s279_s23 + $0x8] sm:$0xff] %v321_v1 }
  0x1f   : > { %324 = vst [vmem:[%s279_s23 + $0x10] sm:$0xff] %v323_v2 }
  0x20   : > { %326 = vst [vmem:[%s279_s23 + $0x18] sm:$0xff] %v325_v3 }
  0x21 PF: > { %p4546_p7 = scmp.ge.s32.totalorder %s5440_s30, 1  ;;  %p331_p8 = scmp.lt.s32.totalorder %s5440_s30, 5 }
  0x23   : > { %p332_p9 = pnand %p4546_p7, %p331_p8 }
  0x25   : > { %335 = sbr.rel (%p332_p9) target bundleno = 2593 (0xa21), region = 82 }
  0x2a   : > { %s338_s10 = sand.u32 1, %s5416_s24   ;;  %p383_p10 = scmp.lt.s32.totalorder %s5424_s26, 1 }
  0x2b   : > { %s4547_s11 = sshll.u32 %s338_s10, 5  ;;  %s4549_s12 = sshll.u32 %s5424_s26, 4 }
  0x2c   : > { %p388_p11 = scmp.lt.s32.totalorder %s4549_s12, 31  ;;  %s4551_s16 = sshll.u32 %s5428_s27, 4 }
  0x2d   : > { %s384_s13 = scalar_select %p383_p10, %s5424_s26, 1 }
  0x2e   : > { %s8763_s12 = smov (!%p388_p11, %s4549_s12), 31  ;;  %p394_p12 = scmp.lt.s32.totalorder %s4551_s16, 31 }
  0x2f   : > { %s4548_s15 = sshll.u32 %s384_s13, 3  ;;  %s4550_s20 = sshll.u32 %s8763_s12, 2 }
  0x30   : > { %s5560_s19 = scalar_lea.vmem %s8389_s0, %s4548_s15  ;;  %s5565_s23 = scalar_lea.vmem %s8390_s1, %s4550_s20 }
  0x31   : > { %s8765_s16 = smov (!%p394_p12, %s4551_s16), 31  ;;  %s5577_s15 = scalar_lea.vmem [#allocation5], %s4547_s11 }
  0x32   : > { %s4552_s24 = sshll.u32 %s8765_s16, 2  ;;  %p4555_p13 = scmp.ne.s32.totalorder %s5424_s26, 0 }
  0x33   : > { %s5570_s9 = scalar_lea.vmem %s8391_s2, %s4552_s24  ;;  %s5575_s17 = scalar_lea.vmem %s8396_s7, %s4552_s24 }
  0x34   : > { %409 = sbr.rel (%p4555_p13) target bundleno = 202 (0xca), region = 90 }
  0x39   : > { %vm410_vm0 = vcmask 7168   ;;  %v5442_v4 = vmov -1e+30   ;;  %v5443_v5 = vmov 0.0  }
  0x3a   : > { %411 = vst.msk [vmem:[#allocation2] sm:$0xff] %vm410_vm0, %v5442_v4 }
  0x3b   : > { %412 = vst.msk [vmem:[#allocation2 + $0x8] sm:$0xff] %vm410_vm0, %v5442_v4 }
  0x3c   : > { %413 = vst.msk [vmem:[#allocation2 + $0x10] sm:$0xff] %vm410_vm0, %v5442_v4 }
  0x3d   : > { %414 = vst.msk [vmem:[#allocation2 + $0x18] sm:$0xff] %vm410_vm0, %v5442_v4 }
  0x3e   : > { %415 = vst.msk [vmem:[#allocation2 + $0x20] sm:$0xff] %vm410_vm0, %v5442_v4 }
  0x3f   : > { %416 = vst.msk [vmem:[#allocation2 + $0x28] sm:$0xff] %vm410_vm0, %v5442_v4 }
  0x40   : > { %417 = vst.msk [vmem:[#allocation2 + $0x30] sm:$0xff] %vm410_vm0, %v5442_v4 }
  0x41   : > { %418 = vst.msk [vmem:[#allocation2 + $0x38] sm:$0xff] %vm410_vm0, %v5442_v4 }
  0x42   : > { %419 = vst.msk [vmem:[#allocation2 + $0x40] sm:$0xff] %vm410_vm0, %v5442_v4 }
  0x43   : > { %420 = vst.msk [vmem:[#allocation2 + $0x48] sm:$0xff] %vm410_vm0, %v5442_v4 }
  0x44   : > { %421 = vst.msk [vmem:[#allocation2 + $0x50] sm:$0xff] %vm410_vm0, %v5442_v4 }
  0x45   : > { %422 = vst.msk [vmem:[#allocation2 + $0x58] sm:$0xff] %vm410_vm0, %v5442_v4 }
  0x46   : > { %423 = vst.msk [vmem:[#allocation2 + $0x60] sm:$0xff] %vm410_vm0, %v5442_v4 }
  0x47   : > { %424 = vst.msk [vmem:[#allocation2 + $0x68] sm:$0xff] %vm410_vm0, %v5442_v4 }
  0x48   : > { %425 = vst.msk [vmem:[#allocation2 + $0x70] sm:$0xff] %vm410_vm0, %v5442_v4 }
  0x49   : > { %426 = vst.msk [vmem:[#allocation2 + $0x78] sm:$0xff] %vm410_vm0, %v5442_v4 }
  0x4a   : > { %427 = vst.msk [vmem:[#allocation2 + $0x80] sm:$0xff] %vm410_vm0, %v5442_v4 }
  0x4b   : > { %428 = vst.msk [vmem:[#allocation2 + $0x88] sm:$0xff] %vm410_vm0, %v5442_v4 }
  0x4c   : > { %429 = vst.msk [vmem:[#allocation2 + $0x90] sm:$0xff] %vm410_vm0, %v5442_v4 }
  0x4d   : > { %430 = vst.msk [vmem:[#allocation2 + $0x98] sm:$0xff] %vm410_vm0, %v5442_v4 }
  0x4e   : > { %431 = vst.msk [vmem:[#allocation2 + $0xa0] sm:$0xff] %vm410_vm0, %v5442_v4 }
  0x4f   : > { %432 = vst.msk [vmem:[#allocation2 + $0xa8] sm:$0xff] %vm410_vm0, %v5442_v4 }
  0x50   : > { %433 = vst.msk [vmem:[#allocation2 + $0xb0] sm:$0xff] %vm410_vm0, %v5442_v4 }
  0x51   : > { %434 = vst.msk [vmem:[#allocation2 + $0xb8] sm:$0xff] %vm410_vm0, %v5442_v4 }
  0x52   : > { %435 = vst.msk [vmem:[#allocation2 + $0xc0] sm:$0xff] %vm410_vm0, %v5442_v4 }
  0x53   : > { %436 = vst.msk [vmem:[#allocation2 + $0xc8] sm:$0xff] %vm410_vm0, %v5442_v4 }
  0x54   : > { %437 = vst.msk [vmem:[#allocation2 + $0xd0] sm:$0xff] %vm410_vm0, %v5442_v4 }
  0x55   : > { %438 = vst.msk [vmem:[#allocation2 + $0xd8] sm:$0xff] %vm410_vm0, %v5442_v4 }
  0x56   : > { %439 = vst.msk [vmem:[#allocation2 + $0xe0] sm:$0xff] %vm410_vm0, %v5442_v4 }
  0x57   : > { %440 = vst.msk [vmem:[#allocation2 + $0xe8] sm:$0xff] %vm410_vm0, %v5442_v4 }
  0x58   : > { %441 = vst.msk [vmem:[#allocation2 + $0xf0] sm:$0xff] %vm410_vm0, %v5442_v4 }
  0x59   : > { %442 = vst.msk [vmem:[#allocation2 + $0xf8] sm:$0xff] %vm410_vm0, %v5442_v4 }
  0x5a   : > { %443 = vst.msk [vmem:[#allocation2 + $0x100] sm:$0xff] %vm410_vm0, %v5442_v4 }
  0x5b   : > { %444 = vst.msk [vmem:[#allocation2 + $0x108] sm:$0xff] %vm410_vm0, %v5442_v4 }
  0x5c   : > { %445 = vst.msk [vmem:[#allocation2 + $0x110] sm:$0xff] %vm410_vm0, %v5442_v4 }
  0x5d   : > { %446 = vst.msk [vmem:[#allocation2 + $0x118] sm:$0xff] %vm410_vm0, %v5442_v4 }
  0x5e   : > { %447 = vst.msk [vmem:[#allocation2 + $0x120] sm:$0xff] %vm410_vm0, %v5442_v4 }
  0x5f   : > { %448 = vst.msk [vmem:[#allocation2 + $0x128] sm:$0xff] %vm410_vm0, %v5442_v4 }
  0x60   : > { %449 = vst.msk [vmem:[#allocation2 + $0x130] sm:$0xff] %vm410_vm0, %v5442_v4 }
  0x61   : > { %450 = vst.msk [vmem:[#allocation2 + $0x138] sm:$0xff] %vm410_vm0, %v5442_v4 }
  0x62   : > { %451 = vst.msk [vmem:[#allocation2 + $0x140] sm:$0xff] %vm410_vm0, %v5442_v4 }
  0x63   : > { %452 = vst.msk [vmem:[#allocation2 + $0x148] sm:$0xff] %vm410_vm0, %v5442_v4 }
  0x64   : > { %453 = vst.msk [vmem:[#allocation2 + $0x150] sm:$0xff] %vm410_vm0, %v5442_v4 }
  0x65   : > { %454 = vst.msk [vmem:[#allocation2 + $0x158] sm:$0xff] %vm410_vm0, %v5442_v4 }
  0x66   : > { %455 = vst.msk [vmem:[#allocation2 + $0x160] sm:$0xff] %vm410_vm0, %v5442_v4 }
  0x67   : > { %456 = vst.msk [vmem:[#allocation2 + $0x168] sm:$0xff] %vm410_vm0, %v5442_v4 }
  0x68   : > { %457 = vst.msk [vmem:[#allocation2 + $0x170] sm:$0xff] %vm410_vm0, %v5442_v4 }
  0x69   : > { %458 = vst.msk [vmem:[#allocation2 + $0x178] sm:$0xff] %vm410_vm0, %v5442_v4 }
  0x6a   : > { %459 = vst.msk [vmem:[#allocation2 + $0x180] sm:$0xff] %vm410_vm0, %v5442_v4 }
  0x6b   : > { %460 = vst.msk [vmem:[#allocation2 + $0x188] sm:$0xff] %vm410_vm0, %v5442_v4 }
  0x6c   : > { %461 = vst.msk [vmem:[#allocation2 + $0x190] sm:$0xff] %vm410_vm0, %v5442_v4 }
  0x6d   : > { %462 = vst.msk [vmem:[#allocation2 + $0x198] sm:$0xff] %vm410_vm0, %v5442_v4 }
  0x6e   : > { %463 = vst.msk [vmem:[#allocation2 + $0x1a0] sm:$0xff] %vm410_vm0, %v5442_v4 }
  0x6f   : > { %464 = vst.msk [vmem:[#allocation2 + $0x1a8] sm:$0xff] %vm410_vm0, %v5442_v4 }
  0x70   : > { %465 = vst.msk [vmem:[#allocation2 + $0x1b0] sm:$0xff] %vm410_vm0, %v5442_v4 }
  0x71   : > { %466 = vst.msk [vmem:[#allocation2 + $0x1b8] sm:$0xff] %vm410_vm0, %v5442_v4 }
  0x72   : > { %467 = vst.msk [vmem:[#allocation2 + $0x1c0] sm:$0xff] %vm410_vm0, %v5442_v4 }
  0x73   : > { %468 = vst.msk [vmem:[#allocation2 + $0x1c8] sm:$0xff] %vm410_vm0, %v5442_v4 }
  0x74   : > { %469 = vst.msk [vmem:[#allocation2 + $0x1d0] sm:$0xff] %vm410_vm0, %v5442_v4 }
  0x75   : > { %470 = vst.msk [vmem:[#allocation2 + $0x1d8] sm:$0xff] %vm410_vm0, %v5442_v4 }
  0x76   : > { %471 = vst.msk [vmem:[#allocation2 + $0x1e0] sm:$0xff] %vm410_vm0, %v5442_v4 }
  0x77   : > { %472 = vst.msk [vmem:[#allocation2 + $0x1e8] sm:$0xff] %vm410_vm0, %v5442_v4 }
  0x78   : > { %473 = vst.msk [vmem:[#allocation2 + $0x1f0] sm:$0xff] %vm410_vm0, %v5442_v4 }
  0x79   : > { %474 = vst.msk [vmem:[#allocation2 + $0x1f8] sm:$0xff] %vm410_vm0, %v5442_v4 }
  0x7a   : > { %475 = vst.msk [vmem:[#allocation3] sm:$0xff] %vm410_vm0, %v5443_v5 }
  0x7b   : > { %476 = vst.msk [vmem:[#allocation3 + $0x8] sm:$0xff] %vm410_vm0, %v5443_v5 }
  0x7c   : > { %477 = vst.msk [vmem:[#allocation3 + $0x10] sm:$0xff] %vm410_vm0, %v5443_v5 }
  0x7d   : > { %478 = vst.msk [vmem:[#allocation3 + $0x18] sm:$0xff] %vm410_vm0, %v5443_v5 }
  0x7e   : > { %479 = vst.msk [vmem:[#allocation3 + $0x20] sm:$0xff] %vm410_vm0, %v5443_v5 }
  0x7f   : > { %480 = vst.msk [vmem:[#allocation3 + $0x28] sm:$0xff] %vm410_vm0, %v5443_v5 }
  0x80   : > { %481 = vst.msk [vmem:[#allocation3 + $0x30] sm:$0xff] %vm410_vm0, %v5443_v5 }
  0x81   : > { %482 = vst.msk [vmem:[#allocation3 + $0x38] sm:$0xff] %vm410_vm0, %v5443_v5 }
  0x82   : > { %483 = vst.msk [vmem:[#allocation3 + $0x40] sm:$0xff] %vm410_vm0, %v5443_v5 }
  0x83   : > { %484 = vst.msk [vmem:[#allocation3 + $0x48] sm:$0xff] %vm410_vm0, %v5443_v5 }
  0x84   : > { %485 = vst.msk [vmem:[#allocation3 + $0x50] sm:$0xff] %vm410_vm0, %v5443_v5 }
  0x85   : > { %486 = vst.msk [vmem:[#allocation3 + $0x58] sm:$0xff] %vm410_vm0, %v5443_v5 }
  0x86   : > { %487 = vst.msk [vmem:[#allocation3 + $0x60] sm:$0xff] %vm410_vm0, %v5443_v5 }
  0x87   : > { %488 = vst.msk [vmem:[#allocation3 + $0x68] sm:$0xff] %vm410_vm0, %v5443_v5 }
  0x88   : > { %489 = vst.msk [vmem:[#allocation3 + $0x70] sm:$0xff] %vm410_vm0, %v5443_v5 }
  0x89   : > { %490 = vst.msk [vmem:[#allocation3 + $0x78] sm:$0xff] %vm410_vm0, %v5443_v5 }
  0x8a   : > { %491 = vst.msk [vmem:[#allocation3 + $0x80] sm:$0xff] %vm410_vm0, %v5443_v5 }
  0x8b   : > { %492 = vst.msk [vmem:[#allocation3 + $0x88] sm:$0xff] %vm410_vm0, %v5443_v5 }
  0x8c   : > { %493 = vst.msk [vmem:[#allocation3 + $0x90] sm:$0xff] %vm410_vm0, %v5443_v5 }
  0x8d   : > { %494 = vst.msk [vmem:[#allocation3 + $0x98] sm:$0xff] %vm410_vm0, %v5443_v5 }
  0x8e   : > { %495 = vst.msk [vmem:[#allocation3 + $0xa0] sm:$0xff] %vm410_vm0, %v5443_v5 }
  0x8f   : > { %496 = vst.msk [vmem:[#allocation3 + $0xa8] sm:$0xff] %vm410_vm0, %v5443_v5 }
  0x90   : > { %497 = vst.msk [vmem:[#allocation3 + $0xb0] sm:$0xff] %vm410_vm0, %v5443_v5 }
  0x91   : > { %498 = vst.msk [vmem:[#allocation3 + $0xb8] sm:$0xff] %vm410_vm0, %v5443_v5 }
  0x92   : > { %499 = vst.msk [vmem:[#allocation3 + $0xc0] sm:$0xff] %vm410_vm0, %v5443_v5 }
  0x93   : > { %500 = vst.msk [vmem:[#allocation3 + $0xc8] sm:$0xff] %vm410_vm0, %v5443_v5 }
  0x94   : > { %501 = vst.msk [vmem:[#allocation3 + $0xd0] sm:$0xff] %vm410_vm0, %v5443_v5 }
  0x95   : > { %502 = vst.msk [vmem:[#allocation3 + $0xd8] sm:$0xff] %vm410_vm0, %v5443_v5 }
  0x96   : > { %503 = vst.msk [vmem:[#allocation3 + $0xe0] sm:$0xff] %vm410_vm0, %v5443_v5 }
  0x97   : > { %504 = vst.msk [vmem:[#allocation3 + $0xe8] sm:$0xff] %vm410_vm0, %v5443_v5 }
  0x98   : > { %505 = vst.msk [vmem:[#allocation3 + $0xf0] sm:$0xff] %vm410_vm0, %v5443_v5 }
  0x99   : > { %506 = vst.msk [vmem:[#allocation3 + $0xf8] sm:$0xff] %vm410_vm0, %v5443_v5 }
  0x9a   : > { %507 = vst.msk [vmem:[#allocation3 + $0x100] sm:$0xff] %vm410_vm0, %v5443_v5 }
  0x9b   : > { %508 = vst.msk [vmem:[#allocation3 + $0x108] sm:$0xff] %vm410_vm0, %v5443_v5 }
  0x9c   : > { %509 = vst.msk [vmem:[#allocation3 + $0x110] sm:$0xff] %vm410_vm0, %v5443_v5 }
  0x9d   : > { %510 = vst.msk [vmem:[#allocation3 + $0x118] sm:$0xff] %vm410_vm0, %v5443_v5 }
  0x9e   : > { %511 = vst.msk [vmem:[#allocation3 + $0x120] sm:$0xff] %vm410_vm0, %v5443_v5 }
  0x9f   : > { %512 = vst.msk [vmem:[#allocation3 + $0x128] sm:$0xff] %vm410_vm0, %v5443_v5 }
  0xa0   : > { %513 = vst.msk [vmem:[#allocation3 + $0x130] sm:$0xff] %vm410_vm0, %v5443_v5 }
  0xa1   : > { %514 = vst.msk [vmem:[#allocation3 + $0x138] sm:$0xff] %vm410_vm0, %v5443_v5 }
  0xa2   : > { %515 = vst.msk [vmem:[#allocation3 + $0x140] sm:$0xff] %vm410_vm0, %v5443_v5 }
  0xa3   : > { %516 = vst.msk [vmem:[#allocation3 + $0x148] sm:$0xff] %vm410_vm0, %v5443_v5 }
  0xa4   : > { %517 = vst.msk [vmem:[#allocation3 + $0x150] sm:$0xff] %vm410_vm0, %v5443_v5 }
  0xa5   : > { %518 = vst.msk [vmem:[#allocation3 + $0x158] sm:$0xff] %vm410_vm0, %v5443_v5 }
  0xa6   : > { %519 = vst.msk [vmem:[#allocation3 + $0x160] sm:$0xff] %vm410_vm0, %v5443_v5 }
  0xa7   : > { %520 = vst.msk [vmem:[#allocation3 + $0x168] sm:$0xff] %vm410_vm0, %v5443_v5 }
  0xa8   : > { %521 = vst.msk [vmem:[#allocation3 + $0x170] sm:$0xff] %vm410_vm0, %v5443_v5 }
  0xa9   : > { %522 = vst.msk [vmem:[#allocation3 + $0x178] sm:$0xff] %vm410_vm0, %v5443_v5 }
  0xaa   : > { %523 = vst.msk [vmem:[#allocation3 + $0x180] sm:$0xff] %vm410_vm0, %v5443_v5 }
  0xab   : > { %524 = vst.msk [vmem:[#allocation3 + $0x188] sm:$0xff] %vm410_vm0, %v5443_v5 }
  0xac   : > { %525 = vst.msk [vmem:[#allocation3 + $0x190] sm:$0xff] %vm410_vm0, %v5443_v5 }
  0xad   : > { %526 = vst.msk [vmem:[#allocation3 + $0x198] sm:$0xff] %vm410_vm0, %v5443_v5 }
  0xae   : > { %527 = vst.msk [vmem:[#allocation3 + $0x1a0] sm:$0xff] %vm410_vm0, %v5443_v5 }
  0xaf   : > { %528 = vst.msk [vmem:[#allocation3 + $0x1a8] sm:$0xff] %vm410_vm0, %v5443_v5 }
  0xb0   : > { %529 = vst.msk [vmem:[#allocation3 + $0x1b0] sm:$0xff] %vm410_vm0, %v5443_v5 }
  0xb1   : > { %530 = vst.msk [vmem:[#allocation3 + $0x1b8] sm:$0xff] %vm410_vm0, %v5443_v5 }
  0xb2   : > { %531 = vst.msk [vmem:[#allocation3 + $0x1c0] sm:$0xff] %vm410_vm0, %v5443_v5 }
  0xb3   : > { %532 = vst.msk [vmem:[#allocation3 + $0x1c8] sm:$0xff] %vm410_vm0, %v5443_v5 }
  0xb4   : > { %533 = vst.msk [vmem:[#allocation3 + $0x1d0] sm:$0xff] %vm410_vm0, %v5443_v5 }
  0xb5   : > { %534 = vst.msk [vmem:[#allocation3 + $0x1d8] sm:$0xff] %vm410_vm0, %v5443_v5 }
  0xb6   : > { %535 = vst.msk [vmem:[#allocation3 + $0x1e0] sm:$0xff] %vm410_vm0, %v5443_v5 }
  0xb7   : > { %536 = vst.msk [vmem:[#allocation3 + $0x1e8] sm:$0xff] %vm410_vm0, %v5443_v5 }
  0xb8   : > { %537 = vst.msk [vmem:[#allocation3 + $0x1f0] sm:$0xff] %vm410_vm0, %v5443_v5 }
  0xb9   : > { %538 = vst.msk [vmem:[#allocation3 + $0x1f8] sm:$0xff] %vm410_vm0, %v5443_v5 }
  0xba   : > { %539 = vst [vmem:[#allocation4 + $0x30] sm:$0xff] %v5443_v5 }
  0xbb   : > { %540 = vst [vmem:[#allocation4] sm:$0xff] %v5443_v5 }
  0xbc   : > { %541 = vst [vmem:[#allocation4 + $0x58] sm:$0xff] %v5443_v5 }
  0xbd   : > { %542 = vst [vmem:[#allocation4 + $0x18] sm:$0xff] %v5443_v5 }
  0xbe   : > { %543 = vst [vmem:[#allocation4 + $0x50] sm:$0xff] %v5443_v5 }
  0xbf   : > { %544 = vst [vmem:[#allocation4 + $0x68] sm:$0xff] %v5443_v5 }
  0xc0   : > { %545 = vst [vmem:[#allocation4 + $0x8] sm:$0xff] %v5443_v5 }
  0xc1   : > { %546 = vst [vmem:[#allocation4 + $0x48] sm:$0xff] %v5443_v5 }
  0xc2   : > { %547 = vst [vmem:[#allocation4 + $0x40] sm:$0xff] %v5443_v5 }
  0xc3   : > { %548 = vst [vmem:[#allocation4 + $0x20] sm:$0xff] %v5443_v5 }
  0xc4   : > { %549 = vst [vmem:[#allocation4 + $0x10] sm:$0xff] %v5443_v5 }
  0xc5   : > { %550 = vst [vmem:[#allocation4 + $0x38] sm:$0xff] %v5443_v5 }
  0xc6   : > { %551 = vst [vmem:[#allocation4 + $0x60] sm:$0xff] %v5443_v5 }
  0xc7   : > { %552 = vst [vmem:[#allocation4 + $0x70] sm:$0xff] %v5443_v5 }
  0xc8   : > { %553 = vst [vmem:[#allocation4 + $0x78] sm:$0xff] %v5443_v5 }
  0xc9   : > { %554 = vst [vmem:[#allocation4 + $0x28] sm:$0xff] %v5443_v5 }
  0xca PF: > { %v4713_v6 = vld [vmem:[%s5570_s9 + $0x10] sm:$0xff]   ;;  %v4641_v7 = vld [vmem:[%s5570_s9] sm:$0xff]   ;;  %v5444_v8 = vmov 68   ;;  %v4714_v13 = vld [vmem:[%s5570_s9 + $0x18] sm:$0xff]   ;;  %v5445_v39 = vmov 69   ;;  %vm1123_vm1 = vcmask 7168  }
  0xcb   : > { %4825 = vset.pattern.permute.xlu1 %v5444_v8  ;;  %4814 = vset.pattern.permute.xlu0 %v5444_v8  ;;  %v4650_v9 = vunpack.c.l.bf16 %v4713_v6  ;;  %v4651_v10 = vunpack.c.h.bf16 %v4713_v6  ;;  %v4642_v11 = vunpack.c.l.bf16 %v4641_v7  ;;  %v4643_v12 = vunpack.c.h.bf16 %v4641_v7  ;;  %v4712_v14 = vld [vmem:[%s5570_s9 + $0x8] sm:$0xff]   ;;  %v4715_v15 = vld [vmem:[%s5570_s9 + $0x20] sm:$0xff]   ;;  %v4718_v28 = vld [vmem:[%s5570_s9 + $0x38] sm:$0xff]   ;;  %p4588_p0 = scmp.ne.s32.totalorder %s5424_s26, 1 }
  0xcc   : > { %4836 = vset.pattern.permute.xlu2 %v5444_v8  ;;  %v4654_v18 = vunpack.c.l.bf16 %v4714_v13  ;;  %v4655_v19 = vunpack.c.h.bf16 %v4714_v13  ;;  %v4646_v20 = vunpack.c.l.bf16 %v4712_v14  ;;  %v4647_v21 = vunpack.c.h.bf16 %v4712_v14  ;;  %v4716_v24 = vld [vmem:[%s5570_s9 + $0x28] sm:$0xff]   ;;  %v4717_v31 = vld [vmem:[%s5570_s9 + $0x30] sm:$0xff]   ;;  %v588_v40 = vld [vmem:[%s5577_s15] sm:$0xff] }
  0xcd   : > { %v5857_v16 = vpack.i.bf16 %v4651_v10, %v4650_v9  ;;  %v5859_v17 = vpack.i.bf16 %v4643_v12, %v4642_v11  ;;  %v4658_v22 = vunpack.c.l.bf16 %v4715_v15  ;;  %v4659_v23 = vunpack.c.h.bf16 %v4715_v15  ;;  %v5894_v41 = vld [vmem:[%s5560_s19] sm:$0xff]  ;;  %v5900_v50 = vld [vmem:[%s5577_s15 + $0x8] sm:$0xff]  ;;  %v5911_v10 = vld [vmem:[%s5577_s15 + $0x10] sm:$0xff] }
  0xce   : > { %v5866_v26 = vpack.i.bf16 %v4655_v19, %v4654_v18  ;;  %v5868_v27 = vpack.i.bf16 %v4647_v21, %v4646_v20  ;;  %v4662_v29 = vunpack.c.l.bf16 %v4716_v24  ;;  %v4663_v30 = vunpack.c.h.bf16 %v4716_v24 }
  0xcf   : > { %8501 = vst [vmem:[#allocation7_spill] sm:$0xff] %v5857_v16  ;;  %4827 = vperm.xlu1 %4825, %v5857_v16   ;;  %4816 = vperm.xlu0 %4814, %v5859_v17   ;;  %v5864_v25 = vpack.i.bf16 %v4659_v23, %v4658_v22  ;;  %v4670_v32 = vunpack.c.l.bf16 %v4718_v28  ;;  %v4671_v33 = vunpack.c.h.bf16 %v4718_v28  ;;  %v4666_v34 = vunpack.c.l.bf16 %v4717_v31 }
  0xd0   : > { %8502 = vst [vmem:[#allocation8_spill] sm:$0xff] %v5859_v17  ;;  %v4667_v35 = vunpack.c.h.bf16 %v4717_v31  ;;  %v5875_v36 = vpack.i.bf16 %v4663_v30, %v4662_v29  ;;  %v593_v42 = vunpack.c.1.s8 %v588_v40  ;;  %v592_v43 = vunpack.c.0.s8 %v588_v40 }
  0xd1   : > { %8503 = vst [vmem:[#allocation9_spill] sm:$0xff] %v5864_v25  ;;  %4838 = vperm.xlu2 %4836, %v5864_v25   ;;  %v5877_v37 = vpack.i.bf16 %v4671_v33, %v4670_v32  ;;  %v5897_v44 = vperm.slane %v5894_v41, 0  ;;  %v597_v55 = vunpack.c.1.s8 %v5900_v50  ;;  %v594_v60 = vunpack.c.2.s8 %v588_v40 }
  0xd2   : > { %8504 = vst [vmem:[#allocation10_spill] sm:$0xff] %v5866_v26  ;;  %v5879_v38 = vpack.i.bf16 %v4667_v35, %v4666_v34  ;;  %v609_v51 = vcvt.s32.f32 %v593_v42  ;;  %v608_v52 = vcvt.s32.f32 %v592_v43  ;;  %v595_v63 = vunpack.c.3.s8 %v588_v40 }
  0xd3   : > { %8505 = vst [vmem:[#allocation11_spill] sm:$0xff] %v5868_v27  ;;  %v613_v4 = vcvt.s32.f32 %v597_v55  ;;  %v610_v9 = vcvt.s32.f32 %v594_v60  ;;  %v600_v22 = vunpack.c.0.s8 %v5911_v10  ;;  %v598_v29 = vunpack.c.2.s8 %v5900_v50 }
  0xd4   : > { %8506 = vst [vmem:[#allocation12_spill] sm:$0xff] %v5875_v36  ;;  %v5906_v61 = vmul.f32 -1e+30, %v609_v51  ;;  %v5908_v62 = vmul.f32 -1e+30, %v608_v52  ;;  %v611_v14 = vcvt.s32.f32 %v595_v63  ;;  %v603_v60 = vunpack.c.3.s8 %v5911_v10 }
  0xd5   : > { %8507 = vst [vmem:[#allocation13_spill] sm:$0xff] %v5877_v37  ;;  %v5923_v20 = vmul.f32 -1e+30, %v613_v4  ;;  %v5928_v30 = vmul.f32 -1e+30, %v610_v9  ;;  %v616_v43 = vcvt.s32.f32 %v600_v22  ;;  %v591_v22 = vld [vmem:[%s5577_s15 + $0x18] sm:$0xff] }
  0xd6   : > { %8508 = vst [vmem:[#allocation14_spill] sm:$0xff] %v5879_v38  ;;  %v5930_v31 = vmul.f32 -1e+30, %v611_v14  ;;  %v619_v14 = vcvt.s32.f32 %v603_v60 }
  0xd7   : > { %4832 = vperm.xlu1 %4825, %v5866_v26   ;;  %4821 = vperm.xlu0 %4814, %v5868_v27   ;;  %8509 = vst [vmem:[#allocation15_spill] sm:$0xff] %v5906_v61 }
  0xd8   : > { %8510 = vst [vmem:[#allocation16_spill] sm:$0xff] %v5908_v62 }
  0xd9   : > { %4843 = vperm.xlu2 %4836, %v5875_v36   ;;  %8511 = vst [vmem:[#allocation17_spill] sm:$0xff] %v5923_v20 }
  0xda   : > { %8512 = vst [vmem:[#allocation18_spill] sm:$0xff] %v5928_v30 }
  0xdb   : > { %8513 = vst [vmem:[#allocation19_spill] sm:$0xff] %v5930_v31 }
  0xdf   : > { %4853 = vperm.xlu1 %4825, %v5877_v37   ;;  %4848 = vperm.xlu0 %4814, %v5879_v38  }
  0xe1   : > { %4869 = vset.pattern.permute.xlu2 %v5445_v39 }
  0xe2   : > { %4871 = vperm.xlu2 %4869, %v5857_v16  }
  0xe7   : > { %4857 = vset.pattern.permute.xlu1 %v5445_v39  ;;  %4863 = vset.pattern.permute.xlu0 %v5445_v39  ;;  %v596_v39 = vunpack.c.0.s8 %v5900_v50 }
  0xe8   : > { %4859 = vperm.xlu1 %4857, %v5859_v17   ;;  %4865 = vperm.xlu0 %4863, %v5868_v27  }
  0xea   : > { %4881 = vperm.xlu2 %4869, %v5864_v25  }
  0xf0   : > { %4876 = vperm.xlu1 %4857, %v5866_v26   ;;  %4891 = vperm.xlu0 %4863, %v5879_v38  }
  0xf2   : > { %4896 = vperm.xlu2 %4869, %v5877_v37  }
  0xf8   : > { %4886 = vperm.xlu1 %4857, %v5875_v36  }
 0x12b   : > { %v4839_v59 = vpop.permute.xlu2 %4838 }
 0x12c   : > { %v4840_v3 = vunpack.i.l.bf16 %v4839_v59 }
 0x12e   : > { %v747_v23 = vadd.f32 %v4840_v3, %v5897_v44 }
 0x133   : > { %v4844_v35 = vpop.permute.xlu2 %4843 }
 0x134   : > { %v4846_v51 = vunpack.i.h.bf16 %v4844_v35 }
 0x141   : > { %v4828_v45 = vpop.permute.xlu1 %4827  ;;  %v4817_v46 = vpop.permute.xlu0 %4816 }
 0x142   : > { %v4830_v47 = vunpack.i.h.bf16 %v4828_v45  ;;  %v4819_v48 = vunpack.i.h.bf16 %v4817_v46  ;;  %v4818_v49 = vunpack.i.l.bf16 %v4817_v46  ;;  %v4829_v15 = vunpack.i.l.bf16 %v4828_v45 }
 0x143   : > { %v763_v45 = vmul.f32 0.2, %v747_v23  ;;  %v4841_v46 = vunpack.i.h.bf16 %v4839_v59 }
 0x144   : > { %v740_v53 = vadd.f32 %v4819_v48, %v5897_v44  ;;  %v739_v54 = vadd.f32 %v4818_v49, %v5897_v44  ;;  %v744_v56 = vadd.f32 %v4830_v47, %v5897_v44  ;;  %v743_v40 = vadd.f32 %v4829_v15, %v5897_v44 }
 0x145   : > { %v614_v47 = vcvt.s32.f32 %v598_v29  ;;  %v748_v59 = vadd.f32 %v4841_v46, %v5897_v44 }
 0x146   : > { %v756_v57 = vmul.f32 0.2, %v740_v53  ;;  %v755_v58 = vmul.f32 0.2, %v739_v54  ;;  %v760_v5 = vmul.f32 0.2, %v744_v56 }
 0x147   : > { %v759_v55 = vmul.f32 0.2, %v743_v40  ;;  %v5952_v63 = vmul.f32 -1e+30, %v614_v47  ;;  %v602_v47 = vunpack.c.2.s8 %v5911_v10 }
 0x148   : > { %v772_v0 = vmax.f32 %v740_v53, %v756_v57  ;;  %v771_v1 = vmax.f32 %v739_v54, %v755_v58  ;;  %v776_v21 = vmax.f32 %v744_v56, %v760_v5  ;;  %v612_v54 = vcvt.s32.f32 %v596_v39 }
 0x149   : > { %v4822_v2 = vpop.permute.xlu0 %4821  ;;  %v4833_v6 = vpop.permute.xlu1 %4832  ;;  %v5946_v56 = vmul.f32 -1e+30, %v616_v43  ;;  %v779_v57 = vmax.f32 %v747_v23, %v763_v45  ;;  %v601_v58 = vunpack.c.1.s8 %v5911_v10  ;;  %8515 = vst [vmem:[#allocation21_spill] sm:$0xff] %v5952_v63  ;;  %v775_v5 = vmax.f32 %v743_v40, %v759_v55 }
 0x14a   : > { %v4824_v7 = vunpack.i.h.bf16 %v4822_v2  ;;  %v4823_v8 = vunpack.i.l.bf16 %v4822_v2  ;;  %v4834_v11 = vunpack.i.l.bf16 %v4833_v6  ;;  %v5914_v12 = vadd.f32 %v772_v0, %v5906_v61 }
 0x14b   : > { %v5917_v13 = vadd.f32 %v771_v1, %v5908_v62  ;;  %v5936_v42 = vadd.f32 %v776_v21, %v5923_v20  ;;  %v4835_v53 = vunpack.i.h.bf16 %v4833_v6  ;;  %8514 = vst [vmem:[#allocation20_spill] sm:$0xff] %v5946_v56  ;;  %v750_v1 = vadd.f32 %v4846_v51, %v5897_v44 }
 0x14c   : > { %v741_v18 = vadd.f32 %v4823_v8, %v5897_v44  ;;  %v742_v19 = vadd.f32 %v4824_v7, %v5897_v44  ;;  %821 = vmax.xlane.f32.xlu0 %v5914_v12  ;;  %v745_v32 = vadd.f32 %v4834_v11, %v5897_v44  ;;  %v5955_v4 = vmul.f32 -1e+30, %v612_v54 }
 0x14d   : > { %819 = vmax.xlane.f32.xlu2 %v5917_v13  ;;  %v599_v6 = vunpack.c.3.s8 %v5900_v50  ;;  %v746_v7 = vadd.f32 %v4835_v53, %v5897_v44  ;;  %v5960_v8 = vadd.f32 %v779_v57, %v5946_v56  ;;  %v617_v9 = vcvt.s32.f32 %v601_v58 }
 0x14e   : > { %v757_v24 = vmul.f32 0.2, %v741_v18  ;;  %v758_v28 = vmul.f32 0.2, %v742_v19  ;;  %v761_v52 = vmul.f32 0.2, %v745_v32  ;;  %v4845_v23 = vunpack.i.l.bf16 %v4844_v35 }
 0x14f   : > { %8516 = vst [vmem:[#allocation22_spill] sm:$0xff] %v5955_v4  ;;  %v764_v11 = vmul.f32 0.2, %v748_v59  ;;  %v766_v21 = vmul.f32 0.2, %v750_v1  ;;  %v615_v50 = vcvt.s32.f32 %v599_v6 }
 0x150   : > { %v773_v33 = vmax.f32 %v741_v18, %v757_v24  ;;  %v774_v34 = vmax.f32 %v742_v19, %v758_v28  ;;  %v777_v0 = vmax.f32 %v745_v32, %v761_v52  ;;  %v5967_v24 = vadd.f32 %v775_v5, %v5955_v4 }
 0x151   : > { %v4854_v2 = vpop.permute.xlu1 %4853  ;;  %v4849_v3 = vpop.permute.xlu0 %4848  ;;  %v762_v28 = vmul.f32 0.2, %v746_v7  ;;  %v5972_v29 = vmul.f32 -1e+30, %v617_v9  ;;  %v780_v32 = vmax.f32 %v748_v59, %v764_v11  ;;  %v5974_v39 = vmul.f32 -1e+30, %v619_v14 }
 0x152   : > { %v5939_v48 = vadd.f32 %v773_v33, %v5928_v30  ;;  %v5942_v49 = vadd.f32 %v774_v34, %v5930_v31  ;;  %v4855_v15 = vunpack.i.l.bf16 %v4854_v2  ;;  %v4850_v18 = vunpack.i.l.bf16 %v4849_v3 }
 0x153   : > { %v5963_v19 = vadd.f32 %v777_v0, %v5952_v63  ;;  %8517 = vst [vmem:[#allocation23_spill] sm:$0xff] %v5972_v29  ;;  %v604_v33 = vunpack.c.0.s8 %v591_v22  ;;  %v606_v34 = vunpack.c.2.s8 %v591_v22  ;;  %v782_v40 = vmax.f32 %v750_v1, %v766_v21 }
 0x154   : > { %823 = vmax.xlane.f32.xlu1 %v5939_v48  ;;  %829 = vmax.xlane.f32.xlu0 %v5936_v42  ;;  %8518 = vst [vmem:[#allocation24_spill] sm:$0xff] %v5974_v39  ;;  %v751_v35 = vadd.f32 %v4850_v18, %v5897_v44  ;;  %v753_v43 = vadd.f32 %v4855_v15, %v5897_v44  ;;  %v5978_v45 = vmul.f32 -1e+30, %v615_v50  ;;  %v4856_v55 = vunpack.i.h.bf16 %v4854_v2 }
 0x155   : > { %825 = vmax.xlane.f32.xlu2 %v5942_v49  ;;  %v778_v46 = vmax.f32 %v746_v7, %v762_v28  ;;  %v749_v51 = vadd.f32 %v4845_v23, %v5897_v44  ;;  %v5983_v52 = vadd.f32 %v780_v32, %v5972_v29  ;;  %v620_v53 = vcvt.s32.f32 %v604_v33 }
 0x156   : > { %8519 = vst [vmem:[#allocation25_spill] sm:$0xff] %v5978_v45  ;;  %v622_v54 = vcvt.s32.f32 %v606_v34  ;;  %v5986_v57 = vadd.f32 %v782_v40, %v5974_v39  ;;  %v767_v58 = vmul.f32 0.2, %v751_v35  ;;  %v769_v59 = vmul.f32 0.2, %v753_v43 }
 0x157   : > { %v4851_v60 = vunpack.i.h.bf16 %v4849_v3  ;;  %v5989_v0 = vadd.f32 %v778_v46, %v5978_v45  ;;  %v618_v1 = vcvt.s32.f32 %v602_v47  ;;  %v765_v5 = vmul.f32 0.2, %v749_v51 }
 0x158   : > { %v5994_v10 = vmul.f32 -1e+30, %v620_v53  ;;  %v607_v2 = vunpack.c.3.s8 %v591_v22  ;;  %v783_v6 = vmax.f32 %v751_v35, %v767_v58  ;;  %v5996_v7 = vmul.f32 -1e+30, %v622_v54 }
 0x159   : > { %v785_v9 = vmax.f32 %v753_v43, %v769_v59  ;;  %v754_v3 = vadd.f32 %v4856_v55, %v5897_v44  ;;  %v5999_v11 = vmul.f32 -1e+30, %v618_v1  ;;  %v781_v14 = vmax.f32 %v749_v51, %v765_v5 }
 0x15a   : > { %8520 = vst [vmem:[#allocation26_spill] sm:$0xff] %v5994_v10  ;;  %v605_v15 = vunpack.c.1.s8 %v591_v22  ;;  %v752_v18 = vadd.f32 %v4851_v60, %v5897_v44  ;;  %v6002_v21 = vpop.permute.xlu1 %4859  ;;  %v623_v50 = vcvt.s32.f32 %v607_v2  ;;  %v6006_v28 = vadd.f32 %v783_v6, %v5994_v10  ;;  %v6039_v60 = vpop.permute.xlu2 %4871 }
 0x15b   : > { %8521 = vst [vmem:[#allocation27_spill] sm:$0xff] %v5996_v7  ;;  %v4861_v23 = vunpack.i.l.bf16 %v6002_v21  ;;  %v6009_v32 = vadd.f32 %v785_v9, %v5996_v7  ;;  %v770_v33 = vmul.f32 0.2, %v754_v3  ;;  %v6012_v34 = vperm.slane %v5894_v41, 1  ;;  %v6044_v5 = vpop.permute.xlu0 %4865 }
 0x15c   : > { %831 = vmax.xlane.f32.xlu1 %v5963_v19  ;;  %835 = vmax.xlane.f32.xlu0 %v5960_v8  ;;  %8522 = vst [vmem:[#allocation28_spill] sm:$0xff] %v5999_v11  ;;  %v6015_v40 = vadd.f32 %v781_v14, %v5999_v11  ;;  %v621_v22 = vcvt.s32.f32 %v605_v15  ;;  %v768_v44 = vmul.f32 0.2, %v752_v18  ;;  %v6021_v43 = vmul.f32 -1e+30, %v623_v50  ;;  %v6054_v14 = vld [vmem:[#allocation2] sm:$0xff] }
 0x15d   : > { %827 = vmax.xlane.f32.xlu2 %v5967_v24  ;;  %v1507_v35 = vadd.f32 %v4861_v23, %v6012_v34  ;;  %v786_v46 = vmax.f32 %v754_v3, %v770_v33  ;;  %v8398_v59 = vmov 0   ;;  %v6052_v3 = vld [vmem:[#allocation2 + $0x8] sm:$0xff] }
 0x15e   : > { %8523 = vst [vmem:[#allocation29_spill] sm:$0xff] %v6021_v43  ;;  %v6023_v47 = vmul.f32 -1e+30, %v621_v22  ;;  %v784_v41 = vmax.f32 %v752_v18, %v768_v44  ;;  %4900 = vset.pattern.permute.xlu2 %v8398_v59  ;;  %4901 = vset.pattern.permute.xlu0 %v8398_v59  ;;  %v6068_v44 = vld [vmem:[#allocation2 + $0x10] sm:$0xff]  ;;  %v6095_v22 = vld [vmem:[#allocation2 + $0x20] sm:$0xff] }
 0x15f   : > { %v1523_v51 = vmul.f32 0.2, %v1507_v35  ;;  %v6026_v53 = vadd.f32 %v786_v46, %v6021_v43  ;;  %4902 = vset.pattern.permute.xlu1 %v8398_v59  ;;  %8526 = vst [vmem:[#allocation32_spill] sm:$0xff] %v6052_v3  ;;  %v6072_v46 = vld [vmem:[#allocation2 + $0x18] sm:$0xff] }
 0x160   : > { %8524 = vst [vmem:[#allocation30_spill] sm:$0xff] %v6023_v47  ;;  %v6029_v54 = vadd.f32 %v784_v41, %v6023_v47 }
 0x161   : > { %v1539_v55 = vmax.f32 %v1507_v35, %v1523_v51  ;;  %v6070_v35 = vld [vmem:[#allocation2 + $0x28] sm:$0xff]  ;;  %8528 = vst [vmem:[#allocation34_spill] sm:$0xff] %v6095_v22 }
 0x162   : > { %v6042_v1 = vpop.permute.xlu2 %4881  ;;  %v6046_v2 = vpop.permute.xlu1 %4876 }
 0x163   : > { %v6034_v58 = vadd.f32 %v1539_v55, %v5908_v62  ;;  %v6050_v9 = vpop.permute.xlu0 %4891 }
 0x164   : > { %837 = vmax.xlane.f32.xlu1 %v5983_v52  ;;  %841 = vmax.xlane.f32.xlu0 %v5986_v57 }
 0x165   : > { %833 = vmax.xlane.f32.xlu2 %v5989_v0  ;;  %8525 = vst [vmem:[#allocation31_spill] sm:$0xff] %v6034_v58 }
 0x16a   : > { %v6048_v6 = vpop.permute.xlu2 %4896  ;;  %v6056_v15 = vpop.permute.xlu1 %4886 }
 0x16c   : > { %843 = vmax.xlane.f32.xlu1 %v6006_v28  ;;  %847 = vmax.xlane.f32.xlu0 %v6009_v32 }
 0x16d   : > { %839 = vmax.xlane.f32.xlu2 %v6015_v40 }
 0x174   : > { %849 = vmax.xlane.f32.xlu1 %v6026_v53 }
 0x175   : > { %845 = vmax.xlane.f32.xlu2 %v6029_v54 }
 0x17c   : > { %1588 = vmax.xlane.f32.xlu1 %v6034_v58 }
 0x1bf   : > { %v822_v18 = vpop.xlane.xlu0 %821 }
 0x1c0   : > { %v820_v23 = vpop.xlane.xlu2 %819  ;;  %v6059_v50 = vmax.f32 %v6052_v3, %v822_v18 }
 0x1c1   : > { %v851_v33 = vmax.f32 %v6054_v14, %v820_v23 }
 0x1c2   : > { %8527 = vst [vmem:[#allocation33_spill] sm:$0xff] %v6059_v50  ;;  %922 = vperm.xlu0 %4901, %v6059_v50  }
 0x1c3   : > { %1141 = vst.msk [vmem:[#allocation2 + $0x8] sm:$0xff] %vm1123_vm1, %v6059_v50  ;;  %917 = vperm.xlu2 %4900, %v851_v33   ;;  %v6152_v50 = vld [vmem:[#allocation2 + $0x50] sm:$0xff] }
 0x1c4   : > { %1140 = vst.msk [vmem:[#allocation2] sm:$0xff] %vm1123_vm1, %v851_v33 }
 0x1c5   : > { %8536 = vst [vmem:[#allocation42_spill] sm:$0xff] %v6152_v50 }
 0x1c7   : > { %v824_v41 = vpop.xlane.xlu1 %823  ;;  %v830_v51 = vpop.xlane.xlu0 %829 }
 0x1c8   : > { %v6075_v55 = vmax.f32 %v6068_v44, %v824_v41  ;;  %v6078_v18 = vmax.f32 %v6070_v35, %v830_v51  ;;  %v826_v23 = vpop.xlane.xlu2 %825  ;;  %v6091_v41 = vld [vmem:[#allocation2 + $0x30] sm:$0xff]  ;;  %v6093_v51 = vld [vmem:[#allocation2 + $0x40] sm:$0xff] }
 0x1c9   : > { %v6081_v59 = vmax.f32 %v6072_v46, %v826_v23 }
 0x1ca   : > { %1142 = vst.msk [vmem:[#allocation2 + $0x10] sm:$0xff] %vm1123_vm1, %v6075_v55  ;;  %927 = vperm.xlu1 %4902, %v6075_v55  }
 0x1cb   : > { %1145 = vst.msk [vmem:[#allocation2 + $0x28] sm:$0xff] %vm1123_vm1, %v6078_v18  ;;  %932 = vperm.xlu2 %4900, %v6081_v59  }
 0x1cc   : > { %1143 = vst.msk [vmem:[#allocation2 + $0x18] sm:$0xff] %vm1123_vm1, %v6081_v59 }
 0x1cf   : > { %v832_v23 = vpop.xlane.xlu1 %831  ;;  %v836_v62 = vpop.xlane.xlu0 %835 }
 0x1d0   : > { %v6098_v36 = vmax.f32 %v6091_v41, %v832_v23  ;;  %v6101_v38 = vmax.f32 %v6093_v51, %v836_v62  ;;  %v828_v37 = vpop.xlane.xlu2 %827  ;;  %v6119_v62 = vld [vmem:[#allocation2 + $0x58] sm:$0xff] }
 0x1d1   : > { %v6104_v17 = vmax.f32 %v6095_v22, %v828_v37  ;;  %v6117_v37 = vld [vmem:[#allocation2 + $0x48] sm:$0xff]  ;;  %v6121_v23 = vld [vmem:[#allocation2 + $0x38] sm:$0xff] }
 0x1d2   : > { %1146 = vst.msk [vmem:[#allocation2 + $0x30] sm:$0xff] %vm1123_vm1, %v6098_v36  ;;  %957 = vperm.xlu0 %4901, %v6101_v38  }
 0x1d3   : > { %8529 = vst [vmem:[#allocation35_spill] sm:$0xff] %v6104_v17  ;;  %942 = vperm.xlu2 %4900, %v6078_v18   ;;  %937 = vperm.xlu1 %4902, %v6104_v17  }
 0x1d4   : > { %1148 = vst.msk [vmem:[#allocation2 + $0x40] sm:$0xff] %vm1123_vm1, %v6101_v38 }
 0x1d5   : > { %1144 = vst.msk [vmem:[#allocation2 + $0x20] sm:$0xff] %vm1123_vm1, %v6104_v17  ;;  %v6150_v17 = vld [vmem:[#allocation2 + $0x70] sm:$0xff] }
 0x1d6   : > { %8530 = vst [vmem:[#allocation36_spill] sm:$0xff] %v6117_v37 }
 0x1d7   : > { %8531 = vst [vmem:[#allocation37_spill] sm:$0xff] %v6121_v23  ;;  %v838_v25 = vpop.xlane.xlu1 %837  ;;  %v842_v27 = vpop.xlane.xlu0 %841 }
 0x1d8   : > { %v6124_v16 = vmax.f32 %v6117_v37, %v838_v25  ;;  %v6127_v26 = vmax.f32 %v6119_v62, %v842_v27  ;;  %v834_v58 = vpop.xlane.xlu2 %833  ;;  %v867_v25 = vsub.f32 %v6054_v14, %v851_v33 }
 0x1d9   : > { %v6130_v22 = vmax.f32 %v6121_v23, %v834_v58  ;;  %v6148_v58 = vld [vmem:[#allocation2 + $0x60] sm:$0xff] }
 0x1da   : > { %8532 = vst [vmem:[#allocation38_spill] sm:$0xff] %v6124_v16  ;;  %972 = vperm.xlu0 %4901, %v6127_v26   ;;  %v883_v14 = vmul.f32 1.442695, %v867_v25 }
 0x1db   : > { %8533 = vst [vmem:[#allocation39_spill] sm:$0xff] %v6127_v26  ;;  %947 = vperm.xlu1 %4902, %v6098_v36   ;;  %952 = vperm.xlu2 %4900, %v6130_v22  }
 0x1dc   : > { %8534 = vst [vmem:[#allocation40_spill] sm:$0xff] %v6130_v22  ;;  %4995 = vpow2.f32 %v883_v14  ;;  %v6182_v14 = vld [vmem:[#allocation2 + $0x78] sm:$0xff] }
 0x1dd   : > { %1149 = vst.msk [vmem:[#allocation2 + $0x48] sm:$0xff] %vm1123_vm1, %v6124_v16 }
 0x1de   : > { %1151 = vst.msk [vmem:[#allocation2 + $0x58] sm:$0xff] %vm1123_vm1, %v6127_v26 }
 0x1df   : > { %1147 = vst.msk [vmem:[#allocation2 + $0x38] sm:$0xff] %vm1123_vm1, %v6130_v22  ;;  %v844_v33 = vpop.xlane.xlu1 %843  ;;  %v848_v37 = vpop.xlane.xlu0 %847  ;;  %v6184_v22 = vld [vmem:[#allocation2 + $0x68] sm:$0xff] }
 0x1e0   : > { %8535 = vst [vmem:[#allocation41_spill] sm:$0xff] %v6148_v58  ;;  %v6155_v3 = vmax.f32 %v6148_v58, %v844_v33  ;;  %v6158_v27 = vmax.f32 %v6150_v17, %v848_v37  ;;  %v840_v23 = vpop.xlane.xlu2 %839  ;;  %v870_v37 = vsub.f32 %v6072_v46, %v6081_v59  ;;  %v869_v33 = vsub.f32 %v6068_v44, %v6075_v55 }
 0x1e1   : > { %v6161_v26 = vmax.f32 %v6152_v50, %v840_v23  ;;  %v872_v55 = vsub.f32 %v6070_v35, %v6078_v18 }
 0x1e2   : > { %1152 = vst.msk [vmem:[#allocation2 + $0x60] sm:$0xff] %vm1123_vm1, %v6155_v3  ;;  %987 = vperm.xlu0 %4901, %v6158_v27   ;;  %v889_v59 = vmul.f32 1.442695, %v870_v37  ;;  %v887_v25 = vmul.f32 1.442695, %v869_v33  ;;  %v6189_v50 = vpop.eup %4995  ;;  %v6209_v33 = vld [vmem:[#allocation2 + $0x80] sm:$0xff] }
 0x1e3   : > { %1154 = vst.msk [vmem:[#allocation2 + $0x70] sm:$0xff] %vm1123_vm1, %v6158_v27  ;;  %962 = vperm.xlu1 %4902, %v6124_v16   ;;  %967 = vperm.xlu2 %4900, %v6161_v26  }
 0x1e4   : > { %1150 = vst.msk [vmem:[#allocation2 + $0x50] sm:$0xff] %vm1123_vm1, %v6161_v26  ;;  %4997 = vpow2.f32 %v889_v59 }
 0x1e5   : > { %8537 = vst [vmem:[#allocation43_spill] sm:$0xff] %v6189_v50  ;;  %4999 = vpow2.f32 %v887_v25 }
 0x1e6   : > { %8539 = vst [vmem:[#allocation45_spill] sm:$0xff] %v6209_v33 }
 0x1e7   : > { %v850_v46 = vpop.xlane.xlu1 %849 }
 0x1e8   : > { %v6187_v58 = vmax.f32 %v6182_v14, %v850_v46  ;;  %v846_v23 = vpop.xlane.xlu2 %845  ;;  %v893_v46 = vmul.f32 1.442695, %v872_v55 }
 0x1e9   : > { %v6192_v16 = vmax.f32 %v6184_v22, %v846_v23  ;;  %v873_v23 = vsub.f32 %v6091_v41, %v6098_v36  ;;  %v875_v36 = vsub.f32 %v6093_v51, %v6101_v38  ;;  %v4631_v38 = vld [vmem:[%s5565_s23 + $0x38] sm:$0xff]  ;;  %v4630_v51 = vld [vmem:[%s5565_s23 + $0x30] sm:$0xff] }
 0x1ea   : > { %1155 = vst.msk [vmem:[#allocation2 + $0x78] sm:$0xff] %vm1123_vm1, %v6187_v58  ;;  %1284 = vperm.xlu0 %4901, %v6189_v50   ;;  %v6214_v59 = vpop.eup %4997  ;;  %5001 = vpow2.f32 %v893_v46  ;;  %1212 = vmatpush.bf16.msra.mxu0 %v4631_v38  ;;  %v4629_v46 = vld [vmem:[%s5565_s23 + $0x28] sm:$0xff]  ;;  %v4624_v50 = vld [vmem:[%s5565_s23] sm:$0xff] }
 0x1eb   : > { %8538 = vst [vmem:[#allocation44_spill] sm:$0xff] %v6192_v16  ;;  %977 = vperm.xlu1 %4902, %v6155_v3   ;;  %982 = vperm.xlu2 %4900, %v6192_v16   ;;  %v895_v35 = vmul.f32 1.442695, %v873_v23  ;;  %v6216_v37 = vpop.eup %4999  ;;  %v899_v41 = vmul.f32 1.442695, %v875_v36  ;;  %v4868_v23 = vunpack.i.h.bf16 %v6044_v5  ;;  %v4628_v36 = vld [vmem:[%s5565_s23 + $0x20] sm:$0xff] }
 0x1ec   : > { %1153 = vst.msk [vmem:[#allocation2 + $0x68] sm:$0xff] %vm1123_vm1, %v6192_v16  ;;  %1933 = vmatpush.bf16.msra.mxu1 %v4631_v38  ;;  %2654 = vmatpush.bf16.msra.mxu2 %v4631_v38 }
 0x1ed   : > { %8540 = vst [vmem:[#allocation46_spill] sm:$0xff] %v6214_v59  ;;  %5003 = vpow2.f32 %v895_v35  ;;  %3375 = vmatpush.bf16.msra.mxu3 %v4631_v38  ;;  %v1510_v35 = vadd.f32 %v4868_v23, %v6012_v34  ;;  %v4878_v38 = vunpack.i.l.bf16 %v6046_v2 }
 0x1ee   : > { %8541 = vst [vmem:[#allocation47_spill] sm:$0xff] %v6216_v37  ;;  %5005 = vpow2.f32 %v899_v41  ;;  %1213 = vmatpush.bf16.msra.mxu0 %v4630_v51  ;;  %v4867_v41 = vunpack.i.l.bf16 %v6044_v5  ;;  %v4874_v5 = vunpack.i.h.bf16 %v6039_v60 }
 0x1ef   : > { %v1589_v44 = vpop.xlane.xlu1 %1588 }
 0x1f0   : > { %v6212_v18 = vmax.f32 %v6209_v33, %v1589_v44  ;;  %v6225_v25 = vpop.eup %5001  ;;  %1934 = vmatpush.bf16.msra.mxu1 %v4630_v51  ;;  %2655 = vmatpush.bf16.msra.mxu2 %v4630_v51  ;;  %v4627_v33 = vld [vmem:[%s5565_s23 + $0x18] sm:$0xff] }
 0x1f1   : > { %8542 = vst [vmem:[#allocation48_spill] sm:$0xff] %v6225_v25  ;;  %3376 = vmatpush.bf16.msra.mxu3 %v4630_v51  ;;  %v1526_v51 = vmul.f32 0.2, %v1510_v35 }
 0x1f2   : > { %1299 = vperm.xlu0 %4901, %v6214_v59   ;;  %1909 = vst.msk [vmem:[#allocation2 + $0x80] sm:$0xff] %vm1123_vm1, %v6212_v18  ;;  %1214 = vmatpush.bf16.msra.mxu0 %v4629_v46  ;;  %v4884_v59 = vunpack.i.h.bf16 %v6042_v1 }
 0x1f3   : > { %992 = vperm.xlu1 %4902, %v6187_v58   ;;  %1294 = vperm.xlu2 %4900, %v6216_v37   ;;  %v6227_v44 = vpop.eup %5003  ;;  %v1542_v23 = vmax.f32 %v1510_v35, %v1526_v51  ;;  %v4625_v35 = vld [vmem:[%s5565_s23 + $0x8] sm:$0xff]  ;;  %v1512_v51 = vadd.f32 %v4874_v5, %v6012_v34  ;;  %v4893_v5 = vunpack.i.l.bf16 %v6050_v9 }
 0x1f4   : > { %8543 = vst [vmem:[#allocation49_spill] sm:$0xff] %v6227_v44  ;;  %v6231_v55 = vpop.eup %5005  ;;  %1935 = vmatpush.bf16.msra.mxu1 %v4629_v46  ;;  %2656 = vmatpush.bf16.msra.mxu2 %v4629_v46 }
 0x1f5   : > { %8544 = vst [vmem:[#allocation50_spill] sm:$0xff] %v6231_v55  ;;  %3377 = vmatpush.bf16.msra.mxu3 %v4629_v46  ;;  %v1513_v46 = vadd.f32 %v4878_v38, %v6012_v34 }
 0x1f6   : > { %1215 = vmatpush.bf16.msra.mxu0 %v4628_v36 }
 0x1f8   : > { %1936 = vmatpush.bf16.msra.mxu1 %v4628_v36  ;;  %2657 = vmatpush.bf16.msra.mxu2 %v4628_v36 }
 0x1f9   : > { %3378 = vmatpush.bf16.msra.mxu3 %v4628_v36  ;;  %v4862_v36 = vunpack.i.h.bf16 %v6002_v21 }
 0x1fa   : > { %1309 = vperm.xlu0 %4901, %v6225_v25   ;;  %1216 = vmatpush.bf16.msra.mxu0 %v4627_v33 }
 0x1fb   : > { %1314 = vperm.xlu2 %4900, %v6227_v44   ;;  %v1509_v44 = vadd.f32 %v4867_v41, %v6012_v34  ;;  %v6250_v41 = vadd.f32 %v1542_v23, %v5930_v31  ;;  %v1508_v37 = vadd.f32 %v4862_v36, %v6012_v34  ;;  %v4873_v23 = vunpack.i.l.bf16 %v6039_v60 }
 0x1fc   : > { %1937 = vmatpush.bf16.msra.mxu1 %v4627_v33  ;;  %2658 = vmatpush.bf16.msra.mxu2 %v4627_v33  ;;  %v4883_v31 = vunpack.i.l.bf16 %v6042_v1 }
 0x1fd   : > { %3379 = vmatpush.bf16.msra.mxu3 %v4627_v33  ;;  %v1525_v25 = vmul.f32 0.2, %v1509_v44  ;;  %8545 = vst [vmem:[#allocation51_spill] sm:$0xff] %v6250_v41  ;;  %v1529_v33 = vmul.f32 0.2, %v1513_v46  ;;  %v1511_v1 = vadd.f32 %v4873_v23, %v6012_v34 }
 0x1fe   : > { %v1515_v60 = vadd.f32 %v4883_v31, %v6012_v34 }
 0x1ff   : > { %v1541_v38 = vmax.f32 %v1509_v44, %v1525_v25  ;;  %v1545_v21 = vmax.f32 %v1513_v46, %v1529_v33  ;;  %v1528_v25 = vmul.f32 0.2, %v1512_v51  ;;  %v1524_v44 = vmul.f32 0.2, %v1508_v37 }
 0x200   : > { %v1527_v16 = vmul.f32 0.2, %v1511_v1 }
 0x201   : > { %v6265_v46 = vadd.f32 %v1545_v21, %v5952_v63  ;;  %v1544_v36 = vmax.f32 %v1512_v51, %v1528_v25  ;;  %v1540_v33 = vmax.f32 %v1508_v37, %v1524_v44  ;;  %v4879_v21 = vunpack.i.h.bf16 %v6046_v2 }
 0x202   : > { %1324 = vperm.xlu0 %4901, %v6231_v55   ;;  %v4626_v55 = vld [vmem:[%s5565_s23 + $0x10] sm:$0xff]  ;;  %v4889_v63 = vunpack.i.h.bf16 %v6056_v15  ;;  %v1543_v51 = vmax.f32 %v1511_v1, %v1527_v16 }
 0x203   : > { %1217 = vmatpush.bf16.msra.mxu0 %v4626_v55  ;;  %1938 = vmatpush.bf16.msra.mxu1 %v4626_v55  ;;  %8547 = vst [vmem:[#allocation53_spill] sm:$0xff] %v6265_v46  ;;  %v1514_v23 = vadd.f32 %v4879_v21, %v6012_v34 }
 0x204   : > { %2659 = vmatpush.bf16.msra.mxu2 %v4626_v55  ;;  %3380 = vmatpush.bf16.msra.mxu3 %v4626_v55  ;;  %v1516_v55 = vadd.f32 %v4884_v59, %v6012_v34 }
 0x206   : > { %v1532_v59 = vmul.f32 0.2, %v1516_v55 }
 0x207   : > { %1218 = vmatpush.bf16.msra.mxu0 %v4625_v35  ;;  %1939 = vmatpush.bf16.msra.mxu1 %v4625_v35 }
 0x208   : > { %2660 = vmatpush.bf16.msra.mxu2 %v4625_v35  ;;  %3381 = vmatpush.bf16.msra.mxu3 %v4625_v35  ;;  %v1548_v35 = vmax.f32 %v1516_v55, %v1532_v59  ;;  %v1518_v55 = vadd.f32 %v4889_v63, %v6012_v34  ;;  %v4888_v59 = vunpack.i.l.bf16 %v6056_v15 }
 0x20a   : > { %v6281_v31 = vadd.f32 %v1548_v35, %v5972_v29  ;;  %v1530_v35 = vmul.f32 0.2, %v1514_v23 }
 0x20b   : > { %1219 = vmatpush.bf16.msra.mxu0 %v4624_v50  ;;  %1940 = vmatpush.bf16.msra.mxu1 %v4624_v50 }
 0x20c   : > { %2661 = vmatpush.bf16.msra.mxu2 %v4624_v50  ;;  %3382 = vmatpush.bf16.msra.mxu3 %v4624_v50  ;;  %v1546_v1 = vmax.f32 %v1514_v23, %v1530_v35 }
 0x21d   : > { %1594 = vmax.xlane.f32.xlu1 %v6250_v41  ;;  %v6261_v41 = vadd.f32 %v1541_v38, %v5928_v30  ;;  %v1519_v38 = vadd.f32 %v4893_v5, %v6012_v34  ;;  %v1531_v30 = vmul.f32 0.2, %v1515_v60  ;;  %v918_v50 = vpop.permute.xlu2 %917 }
 0x21e   : > { %v995_v44 = vsub.f32 %v5917_v13, %v918_v50  ;;  %v4894_v50 = vunpack.i.h.bf16 %v6050_v9 }
 0x21f   : > { %8546 = vst [vmem:[#allocation52_spill] sm:$0xff] %v6261_v41  ;;  %v1535_v37 = vmul.f32 0.2, %v1519_v38  ;;  %v1547_v2 = vmax.f32 %v1515_v60, %v1531_v30 }
 0x220   : > { %v1011_v16 = vmul.f32 1.442695, %v995_v44  ;;  %v1520_v9 = vadd.f32 %v4894_v50, %v6012_v34 }
 0x221   : > { %v1551_v25 = vmax.f32 %v1519_v38, %v1535_v37  ;;  %v6290_v5 = vadd.f32 %v1547_v2, %v5946_v56  ;;  %v1517_v38 = vadd.f32 %v4888_v59, %v6012_v34  ;;  %v6309_v2 = vadd.f32 %v1546_v1, %v5978_v45 }
 0x222   : > { %5007 = vpow2.f32 %v1011_v16  ;;  %v1536_v1 = vmul.f32 0.2, %v1520_v9 }
 0x223   : > { %v6297_v30 = vadd.f32 %v1551_v25, %v5994_v10 }
 0x224   : > { %1592 = vmax.xlane.f32.xlu2 %v6261_v41  ;;  %v6275_v41 = vadd.f32 %v1544_v36, %v5923_v20  ;;  %v6294_v36 = vadd.f32 %v1543_v51, %v5955_v4  ;;  %v1533_v51 = vmul.f32 0.2, %v1517_v38  ;;  %v1045_v20 = vld [vmem:[#allocation3 + $0x10] sm:$0xff]  ;;  %v6569_v4 = vld [vmem:[#allocation2 + $0xe8] sm:$0xff] }
 0x225   : > { %1600 = vmax.xlane.f32.xlu1 %v6265_v46  ;;  %v6278_v46 = vadd.f32 %v1540_v33, %v5906_v61  ;;  %v1534_v33 = vmul.f32 0.2, %v1518_v55  ;;  %v933_v63 = vpop.permute.xlu2 %932 }
 0x226   : > { %v1549_v59 = vmax.f32 %v1517_v38, %v1533_v51  ;;  %v1552_v38 = vmax.f32 %v1520_v9, %v1536_v1 }
 0x227   : > { %v1550_v15 = vmax.f32 %v1518_v55, %v1534_v33  ;;  %v998_v55 = vsub.f32 %v5942_v49, %v933_v63 }
 0x228   : > { %v5008_v25 = vpop.eup %5007 }
 0x229   : > { %v6306_v37 = vadd.f32 %v1550_v15, %v5974_v39  ;;  %v6318_v15 = vadd.f32 %v1549_v59, %v5999_v11 }
 0x22c   : > { %1598 = vmax.xlane.f32.xlu2 %v6275_v41  ;;  %1590 = vmax.xlane.f32.xlu0 %v6278_v46 }
 0x22d   : > { %1606 = vmax.xlane.f32.xlu1 %v6281_v31  ;;  %v943_v44 = vpop.permute.xlu2 %942 }
 0x234   : > { %1604 = vmax.xlane.f32.xlu2 %v6290_v5  ;;  %v923_v60 = vpop.permute.xlu0 %922  ;;  %1596 = vmax.xlane.f32.xlu0 %v6294_v36 }
 0x235   : > { %v996_v13 = vsub.f32 %v5914_v12, %v923_v60  ;;  %1612 = vmax.xlane.f32.xlu1 %v6297_v30  ;;  %v1017_v60 = vmul.f32 1.442695, %v998_v55 }
 0x237   : > { %v1013_v21 = vmul.f32 1.442695, %v996_v13  ;;  %v1000_v13 = vsub.f32 %v5936_v42, %v943_v44  ;;  %v6323_v42 = vadd.f32 %v1552_v38, %v6023_v47  ;;  %v953_v44 = vpop.permute.xlu2 %952  ;;  %v8574_v47 = vld [vmem:[#allocation43_spill] sm:$0xff] }
 0x239   : > { %5009 = vpow2.f32 %v1013_v21 }
 0x23c   : > { %1610 = vmax.xlane.f32.xlu2 %v6306_v37  ;;  %v928_v12 = vpop.permute.xlu1 %927  ;;  %1602 = vmax.xlane.f32.xlu0 %v6309_v2 }
 0x23d   : > { %v997_v23 = vsub.f32 %v5939_v48, %v928_v12  ;;  %v1021_v48 = vmul.f32 1.442695, %v1000_v13  ;;  %v1002_v13 = vsub.f32 %v5989_v0, %v953_v44 }
 0x23f   : > { %v5010_v33 = vpop.eup %5009  ;;  %v1015_v35 = vmul.f32 1.442695, %v997_v23  ;;  %v968_v38 = vpop.permute.xlu2 %967 }
 0x240   : > { %v1156_v16 = vpack.c.bf16 %v5010_v33, %v5008_v25 }
 0x241   : > { %5011 = vpow2.f32 %v1015_v35 }
 0x242   : > { %1220 = vmatmul.bf16.vlgmr.msra.gmra.mxu0 %v1156_v16  ;;  %5013 = vpow2.f32 %v1017_v60 }
 0x243   : > { %5015 = vpow2.f32 %v1021_v48 }
 0x244   : > { %1075 = vadd.xlane.f32.xlu2 %v5008_v25  ;;  %v958_v49 = vpop.permute.xlu0 %957  ;;  %1608 = vmax.xlane.f32.xlu0 %v6318_v15 }
 0x245   : > { %v938_v63 = vpop.permute.xlu1 %937  ;;  %v1003_v50 = vsub.f32 %v5960_v8, %v958_v49 }
 0x246   : > { %v999_v23 = vsub.f32 %v5967_v24, %v938_v63 }
 0x247   : > { %v5012_v21 = vpop.eup %5011  ;;  %v1027_v55 = vmul.f32 1.442695, %v1003_v50  ;;  %v1025_v50 = vmul.f32 1.442695, %v1002_v13 }
 0x248   : > { %1079 = vadd.xlane.f32.xlu1 %v5012_v21  ;;  %v5014_v51 = vpop.eup %5013  ;;  %v1019_v8 = vmul.f32 1.442695, %v999_v23 }
 0x249   : > { %v5016_v9 = vpop.eup %5015  ;;  %v1157_v16 = vpack.c.bf16 %v5014_v51, %v5012_v21  ;;  %5017 = vpow2.f32 %v1027_v55 }
 0x24c   : > { %1081 = vadd.xlane.f32.xlu2 %v5014_v51  ;;  %v973_v12 = vpop.permute.xlu0 %972  ;;  %1614 = vmax.xlane.f32.xlu0 %v6323_v42 }
 0x24d   : > { %v948_v25 = vpop.permute.xlu1 %947  ;;  %v1006_v60 = vsub.f32 %v5986_v57, %v973_v12  ;;  %v4899_v12 = vunpack.i.h.bf16 %v6048_v6 }
 0x24e   : > { %v1001_v59 = vsub.f32 %v5963_v19, %v948_v25  ;;  %v4898_v25 = vunpack.i.l.bf16 %v6048_v6 }
 0x24f   : > { %v1033_v1 = vmul.f32 1.442695, %v1006_v60  ;;  %v6331_v19 = vpop.eup %5017 }
 0x250   : > { %v1023_v35 = vmul.f32 1.442695, %v1001_v59  ;;  %1085 = vadd.xlane.f32.xlu1 %v5016_v9 }
 0x252   : > { %5019 = vpow2.f32 %v1023_v35  ;;  %1225 = vmatmul.bf16.gmra.mxu0 %v1157_v16  ;;  %v983_v16 = vpop.permute.xlu2 %982 }
 0x253   : > { %5021 = vpow2.f32 %v1019_v8  ;;  %v1008_v6 = vsub.f32 %v6029_v54, %v983_v16 }
 0x254   : > { %1077 = vadd.xlane.f32.xlu0 %v5010_v33  ;;  %v988_v49 = vpop.permute.xlu0 %987  ;;  %5023 = vpow2.f32 %v1033_v1  ;;  %v1005_v33 = vsub.f32 %v6015_v40, %v968_v38  ;;  %v1522_v40 = vadd.f32 %v4899_v12, %v6012_v34 }
 0x255   : > { %v963_v24 = vpop.permute.xlu1 %962  ;;  %v1009_v57 = vsub.f32 %v6009_v32, %v988_v49  ;;  %v1037_v49 = vmul.f32 1.442695, %v1008_v6 }
 0x256   : > { %v1004_v48 = vsub.f32 %v5983_v52, %v963_v24  ;;  %v1031_v35 = vmul.f32 1.442695, %v1005_v33  ;;  %v1538_v60 = vmul.f32 0.2, %v1522_v40 }
 0x257   : > { %v1039_v51 = vmul.f32 1.442695, %v1009_v57 }
 0x258   : > { %v5020_v63 = vpop.eup %5019  ;;  %v1029_v21 = vmul.f32 1.442695, %v1004_v48  ;;  %1091 = vadd.xlane.f32.xlu1 %v6331_v19  ;;  %v1554_v38 = vmax.f32 %v1522_v40, %v1538_v60  ;;  %v8553_v40 = vld [vmem:[#allocation34_spill] sm:$0xff]  ;;  %v8556_v60 = vsub.f32 %v6150_v17, %v6158_v27  ;;  %v8561_v17 = vld [vmem:[#allocation40_spill] sm:$0xff] }
 0x259   : > { %1087 = vadd.xlane.f32.xlu2 %v5020_v63  ;;  %v5022_v0 = vpop.eup %5021 }
 0x25a   : > { %5025 = vpow2.f32 %v1029_v21  ;;  %v6338_v23 = vpop.eup %5023  ;;  %v1158_v32 = vpack.c.bf16 %v5016_v9, %v5022_v0 }
 0x25b   : > { %5027 = vpow2.f32 %v1025_v50  ;;  %v6353_v50 = vadd.f32 %v1554_v38, %v6021_v43 }
 0x25c   : > { %1083 = vadd.xlane.f32.xlu0 %v5022_v0  ;;  %5029 = vpow2.f32 %v1039_v51  ;;  %v6365_v51 = vpop.permute.xlu0 %1284 }
 0x25d   : > { %v978_v52 = vpop.permute.xlu1 %977 }
 0x25e   : > { %v1007_v55 = vsub.f32 %v6006_v28, %v978_v52  ;;  %v1521_v28 = vadd.f32 %v4898_v25, %v6012_v34  ;;  %v8548_v52 = vld [vmem:[#allocation39_spill] sm:$0xff]  ;;  %v8550_v25 = vld [vmem:[#allocation32_spill] sm:$0xff] }
 0x25f   : > { %v8549_v12 = vsub.f32 %v6119_v62, %v8548_v52  ;;  %v911_v62 = vmul.f32 1.442695, %v8556_v60 }
 0x260   : > { %v5026_v44 = vpop.eup %5025  ;;  %v1035_v59 = vmul.f32 1.442695, %v1007_v55  ;;  %1097 = vadd.xlane.f32.xlu1 %v6338_v23  ;;  %v1537_v9 = vmul.f32 0.2, %v1521_v28 }
 0x261   : > { %1093 = vadd.xlane.f32.xlu2 %v5026_v44  ;;  %v5028_v8 = vpop.eup %5027  ;;  %v905_v55 = vmul.f32 1.442695, %v8549_v12  ;;  %v8563_v12 = vld [vmem:[#allocation41_spill] sm:$0xff] }
 0x262   : > { %5031 = vpow2.f32 %v1035_v59  ;;  %1230 = vmatmul.bf16.gmra.mxu0 %v1158_v32  ;;  %v6345_v13 = vpop.eup %5029  ;;  %v1553_v21 = vmax.f32 %v1521_v28, %v1537_v9  ;;  %v1159_v0 = vpack.c.bf16 %v5028_v8, %v5020_v63  ;;  %v8551_v63 = vld [vmem:[#allocation33_spill] sm:$0xff]  ;;  %v8557_v9 = vld [vmem:[#allocation36_spill] sm:$0xff] }
 0x263   : > { %5033 = vpow2.f32 %v1031_v35  ;;  %v8552_v59 = vsub.f32 %v8550_v25, %v8551_v63  ;;  %v1160_v35 = vpack.c.bf16 %v5026_v44, %v6331_v19  ;;  %v6404_v63 = vld [vmem:[#allocation2 + $0x98] sm:$0xff]  ;;  %8577 = vst [vmem:[#allocation36_spill] sm:$0xff] %v6569_v4 }
 0x264   : > { %1089 = vadd.xlane.f32.xlu0 %v5028_v8  ;;  %5035 = vpow2.f32 %v1037_v49  ;;  %v6356_v57 = vadd.f32 %v1553_v21, %v5996_v7  ;;  %v6375_v16 = vpop.permute.xlu0 %1299  ;;  %v8554_v8 = vld [vmem:[#allocation35_spill] sm:$0xff]  ;;  %v8558_v49 = vld [vmem:[#allocation38_spill] sm:$0xff]  ;;  %v8560_v21 = vld [vmem:[#allocation37_spill] sm:$0xff] }
 0x265   : > { %v993_v1 = vpop.permute.xlu1 %992  ;;  %v885_v32 = vmul.f32 1.442695, %v8552_v59  ;;  %v8555_v28 = vsub.f32 %v8553_v40, %v8554_v8  ;;  %v8562_v27 = vsub.f32 %v8560_v21, %v8561_v17  ;;  %v6527_v7 = vld [vmem:[#allocation2 + $0xb8] sm:$0xff] }
 0x266   : > { %v1010_v48 = vsub.f32 %v6026_v53, %v993_v1  ;;  %v6383_v1 = vpop.permute.xlu2 %1294 }
 0x267   : > { %v891_v6 = vmul.f32 1.442695, %v8555_v28 }
 0x268   : > { %v6347_v24 = vpop.eup %5031  ;;  %1103 = vadd.xlane.f32.xlu1 %v6345_v13  ;;  %v1041_v54 = vmul.f32 1.442695, %v1010_v48  ;;  %v8559_v48 = vsub.f32 %v8557_v9, %v8558_v49  ;;  %v6431_v49 = vld [vmem:[#allocation2 + $0xb0] sm:$0xff] }
 0x269   : > { %1099 = vadd.xlane.f32.xlu2 %v6347_v24  ;;  %v5034_v34 = vpop.eup %5033 }
 0x26a   : > { %5037 = vpow2.f32 %v1041_v54  ;;  %v6360_v53 = vpop.eup %5035  ;;  %v901_v38 = vmul.f32 1.442695, %v8559_v48  ;;  %v897_v54 = vmul.f32 1.442695, %v8562_v27  ;;  %v1161_v8 = vpack.c.bf16 %v6338_v23, %v5034_v34 }
 0x26b   : > { %5039 = vpow2.f32 %v905_v55  ;;  %v8564_v55 = vsub.f32 %v8563_v12, %v6155_v3  ;;  %v6456_v12 = vld [vmem:[#allocation2 + $0xa8] sm:$0xff] }
 0x26c   : > { %1095 = vadd.xlane.f32.xlu0 %v5034_v34  ;;  %5041 = vpow2.f32 %v885_v32  ;;  %v6426_v34 = vld [vmem:[#allocation2 + $0x90] sm:$0xff] }
 0x26d   : > { %5043 = vpow2.f32 %v891_v6  ;;  %v907_v25 = vmul.f32 1.442695, %v8564_v55  ;;  %v8565_v6 = vld [vmem:[#allocation42_spill] sm:$0xff]  ;;  %v6458_v55 = vld [vmem:[#allocation2 + $0x88] sm:$0xff] }
 0x26e   : > { %5045 = vpow2.f32 %v911_v62  ;;  %v6408_v32 = vpop.permute.xlu2 %1314  ;;  %v8566_v60 = vsub.f32 %v8565_v6, %v6161_v26  ;;  %v8567_v62 = vsub.f32 %v6182_v14, %v6187_v58  ;;  %v6463_v6 = vld [vmem:[#allocation2 + $0xc8] sm:$0xff]  ;;  %v1162_v58 = vpack.c.bf16 %v6360_v53, %v6347_v24 }
 0x26f   : > { %5047 = vpow2.f32 %v901_v38  ;;  %8570 = vst [vmem:[#allocation39_spill] sm:$0xff] %v6463_v6 }
 0x270   : > { %1618 = vmax.xlane.f32.xlu1 %v6353_v50  ;;  %v6363_v33 = vpop.eup %5037  ;;  %5049 = vpow2.f32 %v897_v54  ;;  %v903_v23 = vmul.f32 1.442695, %v8566_v60  ;;  %v913_v9 = vmul.f32 1.442695, %v8567_v62 }
 0x271   : > { %1616 = vmax.xlane.f32.xlu2 %v6356_v57  ;;  %v6388_v19 = vpop.eup %5039  ;;  %5051 = vpow2.f32 %v907_v25  ;;  %v8568_v25 = vld [vmem:[#allocation44_spill] sm:$0xff]  ;;  %v1163_v29 = vpack.c.bf16 %v6363_v33, %v6345_v13  ;;  %v640_v13 = vlaneseq }
 0x272   : > { %1235 = vmatmul.bf16.gmra.mxu0 %v1159_v0  ;;  %v6390_v44 = vpop.eup %5041  ;;  %v6397_v0 = vpop.permute.xlu0 %1309  ;;  %5053 = vpow2.f32 %v903_v23 }
 0x273   : > { %v6399_v52 = vpop.eup %5043  ;;  %5055 = vpow2.f32 %v913_v9  ;;  %v6551_v45 = vand.u32 127, %v640_v13  ;;  %v1264_v13 = vld [vmem:[#allocation4 + $0x30] sm:$0xff] }
 0x274   : > { %1101 = vadd.xlane.f32.xlu0 %v6360_v53  ;;  %v6406_v59 = vpop.eup %5045  ;;  %v6494_v53 = vld [vmem:[#allocation2 + $0xc0] sm:$0xff] }
 0x275   : > { %vm1262_vm2 = vcmp.lt.s32.totalorder %v6551_v45, 16  ;;  %vm1982_vm3 = vcmp.ge.s32.totalorder %v6551_v45, 16  ;;  %vm1983_vm4 = vcmp.lt.s32.totalorder %v6551_v45, 32  ;;  %vm2703_vm6 = vcmp.ge.s32.totalorder %v6551_v45, 32 }
 0x276   : > { %vm7074_vm5 = vmand %vm1982_vm3, %vm1983_vm4  ;;  %vm2704_vm7 = vcmp.lt.s32.totalorder %v6551_v45, 48  ;;  %vm3424_vm9 = vcmp.ge.s32.totalorder %v6551_v45, 48  ;;  %vm3425_vm10 = vcmp.lt.s32.totalorder %v6551_v45, 64 }
 0x277   : > { %vm7495_vm8 = vmand %vm2703_vm6, %vm2704_vm7 }
 0x278   : > { %vm7852_vm11 = vmand %vm3424_vm9, %vm3425_vm10 }
 0x279   : > { %1105 = vadd.xlane.f32.xlu2 %v6363_v33  ;;  %v6548_v33 = vld [vmem:[#allocation2 + $0xd0] sm:$0xff] }
 0x27a   : > { %v6435_v38 = vpop.permute.xlu0 %1324  ;;  %8573 = vst [vmem:[#allocation34_spill] sm:$0xff] %v6548_v33 }
 0x282   : > { %1240 = vmatmul.bf16.gmra.mxu0 %v1160_v35  ;;  %v6410_v35 = vpop.eup %5047 }
 0x283   : > { %v6433_v48 = vpop.eup %5049 }
 0x284   : > { %v6437_v17 = vpop.eup %5051 }
 0x285   : > { %v6465_v60 = vpop.eup %5053 }
 0x286   : > { %v6467_v9 = vpop.eup %5055 }
 0x288   : > { %1339 = vperm.xlu0 %4901, %v6388_v19  }
 0x289   : > { %1289 = vperm.xlu1 %4902, %v6390_v44  }
 0x290   : > { %v1595_v40 = vpop.xlane.xlu1 %1594  ;;  %1354 = vperm.xlu0 %4901, %v6406_v59  }
 0x291   : > { %v6415_v28 = vmax.f32 %v6404_v63, %v1595_v40  ;;  %1329 = vperm.xlu2 %4900, %v6410_v35   ;;  %1304 = vperm.xlu1 %4902, %v6399_v52   ;;  %v8569_v40 = vsub.f32 %v6184_v22, %v8568_v25 }
 0x292   : > { %1245 = vmatmul.bf16.gmra.mxu0 %v1161_v8 }
 0x293   : > { %1912 = vst.msk [vmem:[#allocation2 + $0x98] sm:$0xff] %vm1123_vm1, %v6415_v28  ;;  %v909_v8 = vmul.f32 1.442695, %v8569_v40 }
 0x295   : > { %5057 = vpow2.f32 %v909_v8  ;;  %v6498_v8 = vld [vmem:[#allocation2 + $0xe0] sm:$0xff] }
 0x296   : > { %8571 = vst [vmem:[#allocation32_spill] sm:$0xff] %v6498_v8 }
 0x297   : > { %v1593_v21 = vpop.xlane.xlu2 %1592 }
 0x298   : > { %v6440_v27 = vmax.f32 %v6426_v34, %v1593_v21  ;;  %v1601_v26 = vpop.xlane.xlu1 %1600  ;;  %1686 = vperm.xlu0 %4901, %v6212_v18  }
 0x299   : > { %v6444_v54 = vmax.f32 %v6431_v49, %v1601_v26  ;;  %1344 = vperm.xlu2 %4900, %v6437_v17   ;;  %1319 = vperm.xlu1 %4902, %v6433_v48  }
 0x29a   : > { %1911 = vst.msk [vmem:[#allocation2 + $0x90] sm:$0xff] %vm1123_vm1, %v6440_v27 }
 0x29b   : > { %1915 = vst.msk [vmem:[#allocation2 + $0xb0] sm:$0xff] %vm1123_vm1, %v6444_v54  ;;  %v6500_v25 = vpop.eup %5057 }
 0x29f   : > { %v1599_v23 = vpop.xlane.xlu2 %1598  ;;  %v1591_v62 = vpop.xlane.xlu0 %1590 }
 0x2a0   : > { %v6470_v21 = vmax.f32 %v6456_v12, %v1599_v23  ;;  %v6473_v26 = vmax.f32 %v6458_v55, %v1591_v62  ;;  %v1607_v14 = vpop.xlane.xlu1 %1606 }
 0x2a1   : > { %v6478_v22 = vmax.f32 %v6463_v6, %v1607_v14  ;;  %1359 = vperm.xlu2 %4900, %v6467_v9   ;;  %1334 = vperm.xlu1 %4902, %v6465_v60   ;;  %v6496_v14 = vld [vmem:[#allocation2 + $0xa0] sm:$0xff] }
 0x2a2   : > { %1914 = vst.msk [vmem:[#allocation2 + $0xa8] sm:$0xff] %vm1123_vm1, %v6470_v21  ;;  %1250 = vmatmul.bf16.gmra.mxu0 %v1162_v58 }
 0x2a3   : > { %1910 = vst.msk [vmem:[#allocation2 + $0x88] sm:$0xff] %vm1123_vm1, %v6473_v26 }
 0x2a4   : > { %1918 = vst.msk [vmem:[#allocation2 + $0xc8] sm:$0xff] %vm1123_vm1, %v6478_v22 }
 0x2a7   : > { %v1605_v23 = vpop.xlane.xlu2 %1604  ;;  %v1597_v62 = vpop.xlane.xlu0 %1596 }
 0x2a8   : > { %v6503_v58 = vmax.f32 %v6494_v53, %v1605_v23  ;;  %v6506_v3 = vmax.f32 %v6496_v14, %v1597_v62  ;;  %v1613_v24 = vpop.xlane.xlu1 %1612  ;;  %v6525_v62 = vld [vmem:[#allocation2 + $0xd8] sm:$0xff] }
 0x2a9   : > { %v6509_v40 = vmax.f32 %v6498_v8, %v1613_v24  ;;  %1691 = vperm.xlu2 %4900, %v6473_v26   ;;  %1349 = vperm.xlu1 %4902, %v6500_v25   ;;  %8572 = vst [vmem:[#allocation33_spill] sm:$0xff] %v6525_v62 }
 0x2aa   : > { %1917 = vst.msk [vmem:[#allocation2 + $0xc0] sm:$0xff] %vm1123_vm1, %v6503_v58 }
 0x2ab   : > { %1913 = vst.msk [vmem:[#allocation2 + $0xa0] sm:$0xff] %vm1123_vm1, %v6506_v3 }
 0x2ac   : > { %1921 = vst.msk [vmem:[#allocation2 + $0xe0] sm:$0xff] %vm1123_vm1, %v6509_v40 }
 0x2af   : > { %v1611_v43 = vpop.xlane.xlu2 %1610  ;;  %v1603_v10 = vpop.xlane.xlu0 %1602 }
 0x2b0   : > { %v6530_v39 = vmax.f32 %v6525_v62, %v1611_v43  ;;  %v6533_v23 = vmax.f32 %v6527_v7, %v1603_v10  ;;  %v1043_v10 = vld [vmem:[#allocation3] sm:$0xff]  ;;  %v1048_v62 = vld [vmem:[#allocation3 + $0x28] sm:$0xff] }
 0x2b1   : > { %1701 = vperm.xlu2 %4900, %v6415_v28   ;;  %1696 = vperm.xlu1 %4902, %v6440_v27   ;;  %v1059_v56 = vmul.f32 %v8574_v47, %v1043_v10  ;;  %v8576_v47 = vld [vmem:[#allocation47_spill] sm:$0xff] }
 0x2b2   : > { %1920 = vst.msk [vmem:[#allocation2 + $0xd8] sm:$0xff] %vm1123_vm1, %v6530_v39  ;;  %1721 = vperm.xlu0 %4901, %v6533_v23   ;;  %1255 = vmatmul.bf16.gmra.mxu0 %v1163_v29  ;;  %v1061_v10 = vmul.f32 %v8576_v47, %v1045_v20  ;;  %v8578_v29 = vld [vmem:[#allocation46_spill] sm:$0xff] }
 0x2b3   : > { %1916 = vst.msk [vmem:[#allocation2 + $0xb8] sm:$0xff] %vm1123_vm1, %v6533_v23 }
 0x2b7   : > { %v1076_v11 = vpop.xlane.xlu2 %1075  ;;  %v1609_v24 = vpop.xlane.xlu0 %1608 }
 0x2b8   : > { %v1107_v61 = vadd.f32 %v1076_v11, %v1059_v56  ;;  %v6554_v43 = vmax.f32 %v6548_v33, %v1609_v24  ;;  %v1046_v11 = vld [vmem:[#allocation3 + $0x18] sm:$0xff] }
 0x2b9   : > { %1711 = vperm.xlu2 %4900, %v6470_v21   ;;  %1706 = vperm.xlu1 %4902, %v6506_v3   ;;  %v1062_v8 = vmul.f32 %v8578_v29, %v1046_v11 }
 0x2ba   : > { %8575 = vst [vmem:[#allocation35_spill] sm:$0xff] %v6554_v43  ;;  %1736 = vperm.xlu0 %4901, %v6554_v43  }
 0x2bb   : > { %1124 = vst.msk [vmem:[#allocation3] sm:$0xff] %vm1123_vm1, %v1107_v61  ;;  %v1080_v56 = vpop.xlane.xlu1 %1079  ;;  %v1362_v61 = vsel %vm1262_vm2, %v6365_v51, 1.0 }
 0x2bc   : > { %1919 = vst.msk [vmem:[#allocation2 + $0xd0] sm:$0xff] %vm1123_vm1, %v6554_v43  ;;  %v1109_v24 = vadd.f32 %v1080_v56, %v1061_v10  ;;  %v1378_v43 = vmul.f32 %v1362_v61, %v1264_v13  ;;  %v1044_v13 = vld [vmem:[#allocation3 + $0x8] sm:$0xff] }
 0x2be   : > { %1126 = vst.msk [vmem:[#allocation3 + $0x10] sm:$0xff] %vm1123_vm1, %v1109_v24 }
 0x2bf   : > { %v1082_v20 = vpop.xlane.xlu2 %1081  ;;  %v1615_v47 = vpop.xlane.xlu0 %1614 }
 0x2c0   : > { %v1110_v33 = vadd.f32 %v1082_v20, %v1062_v8  ;;  %v6574_v6 = vmax.f32 %v6569_v4, %v1615_v47  ;;  %v1221_v10 = vpop.f32.mrf.mxu0  ;;  %v8580_v8 = vld [vmem:[#allocation48_spill] sm:$0xff]  ;;  %v1060_v20 = vmul.f32 %v6390_v44, %v1044_v13  ;;  %v1051_v47 = vld [vmem:[#allocation3 + $0x40] sm:$0xff]  ;;  %v1266_v13 = vld [vmem:[#allocation4 + $0x58] sm:$0xff] }
 0x2c1   : > { %v1394_v56 = vsel %vm1262_vm2, %v1221_v10, 0.0  ;;  %1726 = vperm.xlu2 %4900, %v6503_v58   ;;  %1716 = vperm.xlu1 %4902, %v6444_v54   ;;  %v1064_v11 = vmul.f32 %v8580_v8, %v1048_v62  ;;  %v8581_v62 = vld [vmem:[#allocation50_spill] sm:$0xff]  ;;  %v8582_v8 = vld [vmem:[#allocation49_spill] sm:$0xff] }
 0x2c2   : > { %8579 = vst [vmem:[#allocation38_spill] sm:$0xff] %v6574_v6  ;;  %v1410_v29 = vadd.f32 %v1394_v56, %v1378_v43  ;;  %1751 = vperm.xlu0 %4901, %v6574_v6   ;;  %v1049_v43 = vld [vmem:[#allocation3 + $0x30] sm:$0xff]  ;;  %v1067_v56 = vmul.f32 %v8581_v62, %v1051_v47  ;;  %v1054_v47 = vld [vmem:[#allocation3 + $0x58] sm:$0xff] }
 0x2c3   : > { %1127 = vst.msk [vmem:[#allocation3 + $0x18] sm:$0xff] %vm1123_vm1, %v1110_v33  ;;  %v1086_v24 = vpop.xlane.xlu1 %1085 }
 0x2c4   : > { %1922 = vst.msk [vmem:[#allocation2 + $0xe8] sm:$0xff] %vm1123_vm1, %v6574_v6  ;;  %v1112_v61 = vadd.f32 %v1086_v24, %v1064_v11  ;;  %v1065_v11 = vmul.f32 %v8582_v8, %v1049_v43  ;;  %v1047_v24 = vld [vmem:[#allocation3 + $0x20] sm:$0xff]  ;;  %v1052_v8 = vld [vmem:[#allocation3 + $0x48] sm:$0xff] }
 0x2c5   : > { %1426 = vst [vmem:[#allocation4 + $0x30] sm:$0xff] %v1410_v29  ;;  %v1063_v6 = vmul.f32 %v6399_v52, %v1047_v24  ;;  %v1068_v52 = vmul.f32 %v6410_v35, %v1052_v8  ;;  %v1050_v24 = vld [vmem:[#allocation3 + $0x38] sm:$0xff] }
 0x2c6   : > { %1129 = vst.msk [vmem:[#allocation3 + $0x28] sm:$0xff] %vm1123_vm1, %v1112_v61 }
 0x2c7   : > { %v1078_v33 = vpop.xlane.xlu0 %1077 }
 0x2c8   : > { %v1108_v10 = vadd.f32 %v1078_v33, %v1060_v20  ;;  %v6589_v51 = vpop.f32.mrf.mxu0  ;;  %v1364_v20 = vsel %vm1262_vm2, %v6383_v1, 1.0 }
 0x2c9   : > { %1741 = vperm.xlu2 %4900, %v6530_v39   ;;  %1731 = vperm.xlu1 %4902, %v6478_v22   ;;  %v1380_v62 = vmul.f32 %v1364_v20, %v1266_v13  ;;  %v1365_v13 = vsel %vm1262_vm2, %v6375_v16, 1.0 }
 0x2ca   : > { %1125 = vst.msk [vmem:[#allocation3 + $0x8] sm:$0xff] %vm1123_vm1, %v1108_v10 }
 0x2cb   : > { %v1092_v29 = vpop.xlane.xlu1 %1091 }
 0x2cc   : > { %v1115_v61 = vadd.f32 %v1092_v29, %v1067_v56  ;;  %v1088_v44 = vpop.xlane.xlu2 %1087  ;;  %v1070_v29 = vmul.f32 %v6388_v19, %v1054_v47 }
 0x2cd   : > { %v1113_v33 = vadd.f32 %v1088_v44, %v1065_v11 }
 0x2ce   : > { %1132 = vst.msk [vmem:[#allocation3 + $0x40] sm:$0xff] %vm1123_vm1, %v1115_v61 }
 0x2cf   : > { %1130 = vst.msk [vmem:[#allocation3 + $0x30] sm:$0xff] %vm1123_vm1, %v1113_v33  ;;  %v1084_v10 = vpop.xlane.xlu0 %1083  ;;  %v1057_v33 = vld [vmem:[#allocation3 + $0x70] sm:$0xff] }
 0x2d0   : > { %v1111_v4 = vadd.f32 %v1084_v10, %v1063_v6  ;;  %v1226_v43 = vpop.f32.mrf.mxu0  ;;  %v1267_v6 = vld [vmem:[#allocation4 + $0x18] sm:$0xff]  ;;  %v1073_v16 = vmul.f32 %v6406_v59, %v1057_v33  ;;  %v6627_v59 = vld [vmem:[#allocation2 + $0xf0] sm:$0xff]  ;;  %v1269_v33 = vld [vmem:[#allocation4 + $0x68] sm:$0xff] }
 0x2d1   : > { %v1396_v56 = vsel %vm1262_vm2, %v1226_v43, 0.0  ;;  %1746 = vperm.xlu1 %4902, %v6509_v40   ;;  %v1381_v10 = vmul.f32 %v1365_v13, %v1267_v6  ;;  %v6624_v13 = vld [vmem:[#allocation2 + $0xf8] sm:$0xff] }
 0x2d2   : > { %1128 = vst.msk [vmem:[#allocation3 + $0x20] sm:$0xff] %vm1123_vm1, %v1111_v4  ;;  %v1412_v1 = vadd.f32 %v1396_v56, %v1380_v62  ;;  %v1066_v4 = vmul.f32 %v6433_v48, %v1050_v24  ;;  %v1055_v62 = vld [vmem:[#allocation3 + $0x60] sm:$0xff]  ;;  %v1053_v48 = vld [vmem:[#allocation3 + $0x50] sm:$0xff] }
 0x2d3   : > { %v1098_v11 = vpop.xlane.xlu1 %1097  ;;  %v1069_v24 = vmul.f32 %v6465_v60, %v1053_v48  ;;  %v1367_v60 = vsel %vm1262_vm2, %v6397_v0, 1.0 }
 0x2d4   : > { %1428 = vst [vmem:[#allocation4 + $0x58] sm:$0xff] %v1412_v1  ;;  %v1118_v61 = vadd.f32 %v1098_v11, %v1070_v29  ;;  %v1094_v44 = vpop.xlane.xlu2 %1093  ;;  %v1071_v1 = vmul.f32 %v6437_v17, %v1055_v62 }
 0x2d5   : > { %v1116_v20 = vadd.f32 %v1094_v44, %v1068_v52 }
 0x2d6   : > { %1135 = vst.msk [vmem:[#allocation3 + $0x58] sm:$0xff] %vm1123_vm1, %v1118_v61 }
 0x2d7   : > { %1133 = vst.msk [vmem:[#allocation3 + $0x48] sm:$0xff] %vm1123_vm1, %v1116_v20  ;;  %v1090_v19 = vpop.xlane.xlu0 %1089  ;;  %v1056_v20 = vld [vmem:[#allocation3 + $0x68] sm:$0xff] }
 0x2d8   : > { %v1114_v35 = vadd.f32 %v1090_v19, %v1066_v4  ;;  %v1228_v47 = vpop.f32.mrf.mxu0 }
 0x2d9   : > { %v1397_v43 = vsel %vm1262_vm2, %v1228_v47, 0.0  ;;  %v1072_v47 = vmul.f32 %v6500_v25, %v1056_v20 }
 0x2da   : > { %1131 = vst.msk [vmem:[#allocation3 + $0x38] sm:$0xff] %vm1123_vm1, %v1114_v35  ;;  %v1413_v8 = vadd.f32 %v1397_v43, %v1381_v10  ;;  %v1383_v43 = vmul.f32 %v1367_v60, %v1269_v33  ;;  %v1265_v60 = vld [vmem:[#allocation4] sm:$0xff] }
 0x2db   : > { %v1104_v56 = vpop.xlane.xlu1 %1103 }
 0x2dc   : > { %1429 = vst [vmem:[#allocation4 + $0x18] sm:$0xff] %v1413_v8  ;;  %v1121_v29 = vadd.f32 %v1104_v56, %v1073_v16  ;;  %v1100_v11 = vpop.xlane.xlu2 %1099  ;;  %v1058_v56 = vld [vmem:[#allocation3 + $0x78] sm:$0xff] }
 0x2dd   : > { %v1119_v52 = vadd.f32 %v1100_v11, %v1071_v1  ;;  %v1074_v25 = vmul.f32 %v6467_v9, %v1058_v56  ;;  %v1270_v11 = vld [vmem:[#allocation4 + $0x8] sm:$0xff]  ;;  %v1395_v56 = vsel %vm1262_vm2, %v6589_v51, 0.0 }
 0x2de   : > { %1138 = vst.msk [vmem:[#allocation3 + $0x70] sm:$0xff] %vm1123_vm1, %v1121_v29 }
 0x2df   : > { %1136 = vst.msk [vmem:[#allocation3 + $0x60] sm:$0xff] %vm1123_vm1, %v1119_v52  ;;  %v1096_v61 = vpop.xlane.xlu0 %1095  ;;  %v1368_v52 = vsel %vm1262_vm2, %v6408_v32, 1.0  ;;  %v1272_v32 = vld [vmem:[#allocation4 + $0x40] sm:$0xff] }
 0x2e0   : > { %v1117_v44 = vadd.f32 %v1096_v61, %v1069_v24  ;;  %v6622_v6 = vpop.f32.mrf.mxu0  ;;  %v1384_v61 = vmul.f32 %v1368_v52, %v1270_v11 }
 0x2e2   : > { %1134 = vst.msk [vmem:[#allocation3 + $0x50] sm:$0xff] %vm1123_vm1, %v1117_v44 }
 0x2e3   : > { %v1619_v17 = vpop.xlane.xlu1 %1618 }
 0x2e4   : > { %v6630_v4 = vmax.f32 %v6624_v13, %v1619_v17  ;;  %v1617_v19 = vpop.xlane.xlu2 %1616 }
 0x2e5   : > { %v6636_v10 = vmax.f32 %v6627_v59, %v1617_v19 }
 0x2e6   : > { %v1651_v35 = vsub.f32 %v6624_v13, %v6630_v4  ;;  %1924 = vst.msk [vmem:[#allocation2 + $0xf8] sm:$0xff] %vm1123_vm1, %v6630_v4  ;;  %1761 = vperm.xlu1 %4902, %v6630_v4  }
 0x2e7   : > { %v1650_v62 = vsub.f32 %v6627_v59, %v6636_v10  ;;  %1923 = vst.msk [vmem:[#allocation2 + $0xf0] sm:$0xff] %vm1123_vm1, %v6636_v10  ;;  %1756 = vperm.xlu2 %4900, %v6636_v10   ;;  %v1102_v0 = vpop.xlane.xlu0 %1101 }
 0x2e8   : > { %v1120_v8 = vadd.f32 %v1102_v0, %v1072_v47  ;;  %v1233_v16 = vpop.f32.mrf.mxu0 }
 0x2e9   : > { %v1399_v1 = vsel %vm1262_vm2, %v1233_v16, 0.0 }
 0x2ea   : > { %1137 = vst.msk [vmem:[#allocation3 + $0x68] sm:$0xff] %vm1123_vm1, %v1120_v8  ;;  %v1415_v48 = vadd.f32 %v1399_v1, %v1383_v43  ;;  %v1370_v8 = vsel %vm1262_vm2, %v6435_v38, 1.0 }
 0x2ec   : > { %1431 = vst [vmem:[#allocation4 + $0x68] sm:$0xff] %v1415_v48  ;;  %v1106_v29 = vpop.xlane.xlu2 %1105  ;;  %v1386_v48 = vmul.f32 %v1370_v8, %v1272_v32 }
 0x2ed   : > { %v1122_v24 = vadd.f32 %v1106_v29, %v1074_v25 }
 0x2ef   : > { %1139 = vst.msk [vmem:[#allocation3 + $0x78] sm:$0xff] %vm1123_vm1, %v1122_v24  ;;  %v1268_v24 = vld [vmem:[#allocation4 + $0x50] sm:$0xff] }
 0x2f0   : > { %v1236_v44 = vpop.f32.mrf.mxu0 }
 0x2f1   : > { %v1400_v17 = vsel %vm1262_vm2, %v1236_v44, 0.0 }
 0x2f2   : > { %v1416_v20 = vadd.f32 %v1400_v17, %v1384_v61  ;;  %v1273_v17 = vld [vmem:[#allocation4 + $0x20] sm:$0xff] }
 0x2f4   : > { %1432 = vst [vmem:[#allocation4 + $0x8] sm:$0xff] %v1416_v20  ;;  %v1330_v19 = vpop.permute.xlu2 %1329 }
 0x2f5   : > { %v1371_v51 = vsel %vm1262_vm2, %v1330_v19, 1.0 }
 0x2f8   : > { %v1238_v33 = vpop.f32.mrf.mxu0 }
 0x2fa   : > { %v1340_v9 = vpop.permute.xlu0 %1339 }
 0x2fb   : > { %v1290_v47 = vpop.permute.xlu1 %1289 }
 0x2fc   : > { %v1363_v0 = vsel %vm1262_vm2, %v1290_v47, 1.0  ;;  %v6661_v43 = vpop.permute.xlu2 %1344 }
 0x2fd   : > { %v1379_v16 = vmul.f32 %v1363_v0, %v1265_v60  ;;  %v1398_v60 = vsel %vm1262_vm2, %v6622_v6, 0.0  ;;  %v1387_v0 = vmul.f32 %v1371_v51, %v1273_v17 }
 0x2ff   : > { %v1411_v1 = vadd.f32 %v1395_v56, %v1379_v16 }
 0x300   : > { %v1241_v25 = vpop.f32.mrf.mxu0 }
 0x301   : > { %1427 = vst [vmem:[#allocation4] sm:$0xff] %v1411_v1  ;;  %v1402_v29 = vsel %vm1262_vm2, %v1241_v25, 0.0  ;;  %v1271_v1 = vld [vmem:[#allocation4 + $0x48] sm:$0xff] }
 0x302   : > { %v1418_v11 = vadd.f32 %v1402_v29, %v1386_v48  ;;  %v6671_v52 = vpop.permute.xlu0 %1354  ;;  %v8584_v48 = vld [vmem:[#allocation31_spill] sm:$0xff] }
 0x303   : > { %v1305_v61 = vpop.permute.xlu1 %1304 }
 0x304   : > { %1434 = vst [vmem:[#allocation4 + $0x40] sm:$0xff] %v1418_v11  ;;  %v1366_v38 = vsel %vm1262_vm2, %v1305_v61, 1.0  ;;  %v6675_v44 = vpop.permute.xlu2 %1359 }
 0x305   : > { %8583 = vst [vmem:[#allocation37_spill] sm:$0xff] %v6675_v44  ;;  %v1382_v20 = vmul.f32 %v1366_v38, %v1268_v24  ;;  %v1401_v38 = vsel %vm1262_vm2, %v1238_v33, 0.0 }
 0x307   : > { %v1414_v47 = vadd.f32 %v1398_v60, %v1382_v20  ;;  %v1274_v60 = vld [vmem:[#allocation4 + $0x10] sm:$0xff] }
 0x308   : > { %v1243_v32 = vpop.f32.mrf.mxu0 }
 0x309   : > { %1430 = vst [vmem:[#allocation4 + $0x50] sm:$0xff] %v1414_v47  ;;  %v1403_v8 = vsel %vm1262_vm2, %v1243_v32, 0.0 }
 0x30a   : > { %v1419_v16 = vadd.f32 %v1403_v8, %v1387_v0  ;;  %v1687_v56 = vpop.permute.xlu0 %1686 }
 0x30b   : > { %v1764_v25 = vsub.f32 %v8584_v48, %v1687_v56  ;;  %v1320_v29 = vpop.permute.xlu1 %1319 }
 0x30c   : > { %1435 = vst [vmem:[#allocation4 + $0x20] sm:$0xff] %v1419_v16  ;;  %v1369_v19 = vsel %vm1262_vm2, %v1320_v29, 1.0  ;;  %v1692_v11 = vpop.permute.xlu2 %1691  ;;  %v1275_v16 = vld [vmem:[#allocation4 + $0x38] sm:$0xff] }
 0x30d   : > { %v1780_v24 = vmul.f32 1.442695, %v1764_v25  ;;  %v1385_v6 = vmul.f32 %v1369_v19, %v1271_v1  ;;  %v1765_v61 = vsub.f32 %v6278_v46, %v1692_v11  ;;  %v1373_v46 = vsel %vm1262_vm2, %v1340_v9, 1.0  ;;  %v8585_v1 = vld [vmem:[#allocation51_spill] sm:$0xff] }
 0x30e   : > { %v1389_v11 = vmul.f32 %v1373_v46, %v1275_v16 }
 0x30f   : > { %5059 = vpow2.f32 %v1780_v24  ;;  %v1417_v17 = vadd.f32 %v1401_v38, %v1385_v6  ;;  %v1782_v51 = vmul.f32 1.442695, %v1765_v61 }
 0x310   : > { %v1246_v20 = vpop.f32.mrf.mxu0 }
 0x311   : > { %1433 = vst [vmem:[#allocation4 + $0x48] sm:$0xff] %v1417_v17  ;;  %5061 = vpow2.f32 %v1782_v51  ;;  %v1404_v48 = vsel %vm1262_vm2, %v1246_v20, 0.0 }
 0x313   : > { %v1335_v47 = vpop.permute.xlu1 %1334 }
 0x314   : > { %v1372_v0 = vsel %vm1262_vm2, %v1335_v47, 1.0  ;;  %v1702_v32 = vpop.permute.xlu2 %1701  ;;  %v8586_v47 = vld [vmem:[#allocation52_spill] sm:$0xff] }
 0x315   : > { %v5060_v8 = vpop.eup %5059  ;;  %v1388_v56 = vmul.f32 %v1372_v0, %v1274_v60  ;;  %v1767_v33 = vsub.f32 %v8585_v1, %v1702_v32  ;;  %v1277_v32 = vld [vmem:[#allocation4 + $0x70] sm:$0xff] }
 0x316   : > { %1845 = vadd.xlane.f32.xlu0 %v5060_v8 }
 0x317   : > { %v5062_v25 = vpop.eup %5061  ;;  %v1420_v29 = vadd.f32 %v1404_v48, %v1388_v56  ;;  %v1786_v19 = vmul.f32 1.442695, %v1767_v33 }
 0x318   : > { %1847 = vadd.xlane.f32.xlu2 %v5062_v25  ;;  %v1248_v24 = vpop.f32.mrf.mxu0  ;;  %v1925_v6 = vpack.c.bf16 %v5062_v25, %v5060_v8 }
 0x319   : > { %1436 = vst [vmem:[#allocation4 + $0x10] sm:$0xff] %v1420_v29  ;;  %5063 = vpow2.f32 %v1786_v19  ;;  %v1405_v61 = vsel %vm1262_vm2, %v1248_v24, 0.0 }
 0x31a   : > { %v1421_v9 = vadd.f32 %v1405_v61, %v1389_v11  ;;  %1941 = vmatmul.bf16.vlgmr.msra.gmra.mxu1 %v1925_v6  ;;  %v1278_v6 = vld [vmem:[#allocation4 + $0x78] sm:$0xff]  ;;  %v1376_v61 = vsel %vm1262_vm2, %v6671_v52, 1.0 }
 0x31b   : > { %v1350_v38 = vpop.permute.xlu1 %1349 }
 0x31c   : > { %1437 = vst [vmem:[#allocation4 + $0x38] sm:$0xff] %v1421_v9  ;;  %v1712_v20 = vpop.permute.xlu2 %1711  ;;  %v1375_v8 = vsel %vm1262_vm2, %v1350_v38, 1.0 }
 0x31d   : > { %v1769_v46 = vsub.f32 %v6275_v41, %v1712_v20  ;;  %v1391_v56 = vmul.f32 %v1375_v8, %v1277_v32 }
 0x31f   : > { %v5064_v17 = vpop.eup %5063  ;;  %v1790_v29 = vmul.f32 1.442695, %v1769_v46  ;;  %v8587_v46 = vld [vmem:[#allocation53_spill] sm:$0xff] }
 0x320   : > { %1851 = vadd.xlane.f32.xlu0 %v5064_v17  ;;  %v6699_v51 = vpop.f32.mrf.mxu0 }
 0x323   : > { %v1697_v60 = vpop.permute.xlu1 %1696 }
 0x324   : > { %v1766_v0 = vsub.f32 %v8586_v47, %v1697_v60  ;;  %v1722_v1 = vpop.permute.xlu0 %1721  ;;  %v1727_v11 = vpop.permute.xlu2 %1726  ;;  %v1392_v60 = vmul.f32 %v1376_v61, %v1278_v6 }
 0x325   : > { %v1771_v38 = vsub.f32 %v6309_v2, %v1722_v1 }
 0x326   : > { %v1784_v16 = vmul.f32 1.442695, %v1766_v0  ;;  %v1772_v0 = vsub.f32 %v6290_v5, %v1727_v11 }
 0x328   : > { %5065 = vpow2.f32 %v1784_v16  ;;  %v1253_v33 = vpop.f32.mrf.mxu0  ;;  %v1794_v16 = vmul.f32 1.442695, %v1771_v38  ;;  %v1796_v2 = vmul.f32 1.442695, %v1772_v0 }
 0x329   : > { %v1407_v48 = vsel %vm1262_vm2, %v1253_v33, 0.0  ;;  %5067 = vpow2.f32 %v1790_v29 }
 0x32a   : > { %v1423_v25 = vadd.f32 %v1407_v48, %v1391_v56 }
 0x32b   : > { %v1707_v19 = vpop.permute.xlu1 %1706 }
 0x32c   : > { %1439 = vst [vmem:[#allocation4 + $0x70] sm:$0xff] %v1423_v25  ;;  %v1768_v24 = vsub.f32 %v6294_v36, %v1707_v19  ;;  %v1737_v32 = vpop.permute.xlu0 %1736 }
 0x32d   : > { %v1774_v25 = vsub.f32 %v6318_v15, %v1737_v32 }
 0x32e   : > { %v5066_v41 = vpop.eup %5065  ;;  %v1788_v9 = vmul.f32 1.442695, %v1768_v24 }
 0x32f   : > { %1849 = vadd.xlane.f32.xlu1 %v5066_v41  ;;  %v1926_v20 = vpack.c.bf16 %v5064_v17, %v5066_v41  ;;  %v5068_v33 = vpop.eup %5067  ;;  %v1742_v17 = vpop.permute.xlu2 %1741  ;;  %v1800_v29 = vmul.f32 1.442695, %v1774_v25  ;;  %v8588_v25 = vld [vmem:[#allocation7_spill] sm:$0xff] }
 0x330   : > { %5069 = vpow2.f32 %v1788_v9  ;;  %v1256_v47 = vpop.f32.mrf.mxu0  ;;  %v1775_v5 = vsub.f32 %v6306_v37, %v1742_v17 }
 0x331   : > { %v1408_v36 = vsel %vm1262_vm2, %v1256_v47, 0.0  ;;  %1946 = vmatmul.bf16.gmra.mxu1 %v1926_v20  ;;  %5071 = vpow2.f32 %v1794_v16 }
 0x332   : > { %v1424_v8 = vadd.f32 %v1408_v36, %v1392_v60  ;;  %v1802_v61 = vmul.f32 1.442695, %v1775_v5  ;;  %v8589_v5 = vld [vmem:[#allocation11_spill] sm:$0xff] }
 0x333   : > { %v1717_v52 = vpop.permute.xlu1 %1716 }
 0x334   : > { %1440 = vst [vmem:[#allocation4 + $0x78] sm:$0xff] %v1424_v8  ;;  %v1770_v56 = vsub.f32 %v8587_v46, %v1717_v52  ;;  %v1752_v11 = vpop.permute.xlu0 %1751  ;;  %v5447_v8 = vmov 70  }
 0x335   : > { %v1777_v20 = vsub.f32 %v6323_v42, %v1752_v11  ;;  %4909 = vset.pattern.permute.xlu1 %v5447_v8  ;;  %4903 = vset.pattern.permute.xlu0 %v5447_v8  ;;  %v8591_v11 = vld [vmem:[#allocation10_spill] sm:$0xff] }
 0x336   : > { %v5070_v1 = vpop.eup %5069  ;;  %v1792_v48 = vmul.f32 1.442695, %v1770_v56  ;;  %4915 = vset.pattern.permute.xlu2 %v5447_v8 }
 0x337   : > { %1853 = vadd.xlane.f32.xlu2 %v5070_v1  ;;  %1855 = vadd.xlane.f32.xlu1 %v5068_v33  ;;  %v5072_v6 = vpop.eup %5071  ;;  %v1927_v15 = vpack.c.bf16 %v5068_v33, %v5070_v1  ;;  %v1806_v47 = vmul.f32 1.442695, %v1777_v20 }
 0x338   : > { %5073 = vpow2.f32 %v1792_v48 }
 0x339   : > { %5075 = vpow2.f32 %v1796_v2 }
 0x33a   : > { %5077 = vpow2.f32 %v1800_v29 }
 0x33b   : > { %v1732_v19 = vpop.permute.xlu1 %1731 }
 0x33c   : > { %v1773_v24 = vsub.f32 %v6281_v31, %v1732_v19  ;;  %v8590_v19 = vld [vmem:[#allocation9_spill] sm:$0xff] }
 0x33e   : > { %v5074_v41 = vpop.eup %5073  ;;  %v1798_v9 = vmul.f32 1.442695, %v1773_v24  ;;  %v8592_v24 = vld [vmem:[#allocation45_spill] sm:$0xff] }
 0x33f   : > { %v5076_v38 = vpop.eup %5075  ;;  %1859 = vadd.xlane.f32.xlu2 %v5072_v6  ;;  %1857 = vadd.xlane.f32.xlu0 %v5074_v41 }
 0x340   : > { %5079 = vpow2.f32 %v1798_v9  ;;  %1861 = vadd.xlane.f32.xlu1 %v5076_v38  ;;  %v5078_v36 = vpop.eup %5077 }
 0x341   : > { %5081 = vpow2.f32 %v1802_v61  ;;  %v1757_v37 = vpop.permute.xlu2 %1756  ;;  %1951 = vmatmul.bf16.gmra.mxu1 %v1927_v15  ;;  %v8594_v61 = vld [vmem:[#allocation13_spill] sm:$0xff] }
 0x342   : > { %v1778_v60 = vsub.f32 %v6356_v57, %v1757_v37  ;;  %5083 = vpow2.f32 %v1806_v47  ;;  %v8597_v37 = vld [vmem:[#allocation12_spill] sm:$0xff]  ;;  %v8599_v47 = vsub.f32 %v6404_v63, %v6415_v28 }
 0x343   : > { %v1747_v31 = vpop.permute.xlu1 %1746 }
 0x344   : > { %v1776_v0 = vsub.f32 %v6297_v30, %v1747_v31  ;;  %v1808_v32 = vmul.f32 1.442695, %v1778_v60  ;;  %v1928_v30 = vpack.c.bf16 %v5072_v6, %v5074_v41  ;;  %v1636_v6 = vsub.f32 %v8592_v24, %v6212_v18  ;;  %v8595_v41 = vld [vmem:[#allocation14_spill] sm:$0xff] }
 0x345   : > { %v8598_v60 = vmov 0   ;;  %v1658_v31 = vmul.f32 1.442695, %v8599_v47 }
 0x346   : > { %v5080_v42 = vpop.eup %5079  ;;  %v1804_v16 = vmul.f32 1.442695, %v1776_v0  ;;  %v1652_v9 = vmul.f32 1.442695, %v1636_v6  ;;  %v1813_v0 = vld [vmem:[#allocation3 + $0x80] sm:$0xff]  ;;  %v1815_v6 = vld [vmem:[#allocation3 + $0x90] sm:$0xff] }
 0x347   : > { %v5082_v52 = vpop.eup %5081  ;;  %1865 = vadd.xlane.f32.xlu2 %v5078_v36  ;;  %1863 = vadd.xlane.f32.xlu0 %v5080_v42  ;;  %v1929_v17 = vpack.c.bf16 %v5080_v42, %v5076_v38  ;;  %v8596_v38 = vsub.f32 %v6458_v55, %v6473_v26  ;;  %v1814_v55 = vld [vmem:[#allocation3 + $0x88] sm:$0xff] }
 0x348   : > { %5085 = vpow2.f32 %v1804_v16  ;;  %1867 = vadd.xlane.f32.xlu1 %v5082_v52  ;;  %v5084_v57 = vpop.eup %5083  ;;  %v1930_v29 = vpack.c.bf16 %v5082_v52, %v5078_v36 }
 0x349   : > { %5087 = vpow2.f32 %v1808_v32  ;;  %v1654_v20 = vmul.f32 1.442695, %v8596_v38 }
 0x34e   : > { %v5086_v46 = vpop.eup %5085 }
 0x34f   : > { %v5088_v56 = vpop.eup %5087  ;;  %1871 = vadd.xlane.f32.xlu2 %v5084_v57  ;;  %1869 = vadd.xlane.f32.xlu0 %v5086_v46  ;;  %v1931_v15 = vpack.c.bf16 %v5084_v57, %v5086_v46  ;;  %v1816_v57 = vld [vmem:[#allocation3 + $0x98] sm:$0xff] }
 0x350   : > { %1873 = vadd.xlane.f32.xlu1 %v5088_v56 }
 0x351   : > { %1956 = vmatmul.bf16.gmra.mxu1 %v1928_v30 }
 0x358   : > { %v1762_v33 = vpop.permute.xlu1 %1761 }
 0x359   : > { %v1779_v2 = vsub.f32 %v6353_v50, %v1762_v33  ;;  %v8593_v50 = vld [vmem:[#allocation8_spill] sm:$0xff]  ;;  %v8600_v33 = vsub.f32 %v6426_v34, %v6440_v27 }
 0x35b   : > { %v1810_v1 = vmul.f32 1.442695, %v1779_v2  ;;  %v1656_v2 = vmul.f32 1.442695, %v8600_v33 }
 0x35d   : > { %5089 = vpow2.f32 %v1810_v1 }
 0x35e   : > { %5091 = vpow2.f32 %v1652_v9  ;;  %v8603_v9 = vsub.f32 %v6431_v49, %v6444_v54 }
 0x35f   : > { %5093 = vpow2.f32 %v1654_v20 }
 0x360   : > { %5095 = vpow2.f32 %v1658_v31  ;;  %v1664_v38 = vmul.f32 1.442695, %v8603_v9  ;;  %v1818_v31 = vld [vmem:[#allocation3 + $0xa8] sm:$0xff] }
 0x361   : > { %1961 = vmatmul.bf16.gmra.mxu1 %v1929_v17  ;;  %5097 = vpow2.f32 %v1656_v2  ;;  %v8601_v17 = vsub.f32 %v6456_v12, %v6470_v21  ;;  %v8604_v12 = vsub.f32 %v6527_v7, %v6533_v23  ;;  %v1820_v2 = vld [vmem:[#allocation3 + $0xb8] sm:$0xff] }
 0x363   : > { %v5090_v48 = vpop.eup %5089  ;;  %v1666_v21 = vmul.f32 1.442695, %v8604_v12 }
 0x364   : > { %1875 = vadd.xlane.f32.xlu0 %v5090_v48  ;;  %v6738_v18 = vpop.eup %5091  ;;  %v1932_v28 = vpack.c.bf16 %v5090_v48, %v5088_v56  ;;  %v8602_v56 = vsub.f32 %v6496_v14, %v6506_v3  ;;  %v8605_v3 = vsub.f32 %v6494_v53, %v6503_v58 }
 0x365   : > { %v6743_v36 = vpop.eup %5093  ;;  %v1829_v26 = vmul.f32 %v6738_v18, %v1813_v0  ;;  %v1817_v0 = vld [vmem:[#allocation3 + $0xa0] sm:$0xff] }
 0x366   : > { %v1830_v42 = vmul.f32 %v6743_v36, %v1814_v55  ;;  %v6750_v63 = vpop.eup %5095  ;;  %v1660_v48 = vmul.f32 1.442695, %v8602_v56  ;;  %v1668_v14 = vmul.f32 1.442695, %v8605_v3  ;;  %v8606_v55 = vld [vmem:[#allocation39_spill] sm:$0xff]  ;;  %v8616_v3 = vld [vmem:[#allocation38_spill] sm:$0xff] }
 0x367   : > { %4917 = vperm.xlu2 %4915, %v8588_v25   ;;  %v1832_v46 = vmul.f32 %v6750_v63, %v1816_v57  ;;  %v6763_v24 = vpop.eup %5097  ;;  %v8611_v57 = vld [vmem:[#allocation33_spill] sm:$0xff] }
 0x368   : > { %v1831_v34 = vmul.f32 %v6763_v24, %v1815_v6 }
 0x369   : > { %4911 = vperm.xlu1 %4909, %v8589_v5  }
 0x36f   : > { %4927 = vperm.xlu2 %4915, %v8590_v19  }
 0x371   : > { %4922 = vperm.xlu1 %4909, %v8591_v11   ;;  %1966 = vmatmul.bf16.gmra.mxu1 %v1930_v29  ;;  %v1662_v29 = vmul.f32 1.442695, %v8601_v17  ;;  %v1821_v17 = vld [vmem:[#allocation3 + $0xc0] sm:$0xff] }
 0x373   : > { %5099 = vpow2.f32 %v1662_v29 }
 0x374   : > { %5101 = vpow2.f32 %v1660_v48 }
 0x375   : > { %5103 = vpow2.f32 %v1664_v38 }
 0x376   : > { %5105 = vpow2.f32 %v1666_v21  ;;  %v8615_v21 = vld [vmem:[#allocation36_spill] sm:$0xff] }
 0x377   : > { %4942 = vperm.xlu2 %4915, %v8594_v61   ;;  %5107 = vpow2.f32 %v1668_v14  ;;  %v8617_v14 = vsub.f32 %v8615_v21, %v8616_v3 }
 0x378   : > { %4905 = vperm.xlu0 %4903, %v8593_v50  }
 0x379   : > { %4937 = vperm.xlu1 %4909, %v8595_v41   ;;  %v8627_v41 = vld [vmem:[#allocation20_spill] sm:$0xff] }
 0x37f   : > { %4946 = vset.pattern.permute.xlu2 %v8598_v60 }
 0x380   : > { %4932 = vperm.xlu0 %4903, %v8597_v37  }
 0x381   : > { %1971 = vmatmul.bf16.gmra.mxu1 %v1931_v15  ;;  %4947 = vset.pattern.permute.xlu1 %v8598_v60  ;;  %v6772_v15 = vpop.eup %5099 }
 0x382   : > { %v6778_v47 = vpop.eup %5101  ;;  %v1834_v49 = vmul.f32 %v6772_v15, %v1818_v31  ;;  %v1678_v31 = vmul.f32 1.442695, %v8617_v14 }
 0x383   : > { %v1833_v7 = vmul.f32 %v6778_v47, %v1817_v0 }
 0x388   : > { %4948 = vset.pattern.permute.xlu0 %v8598_v60 }
 0x389   : > { %v1846_v32 = vpop.xlane.xlu0 %1845 }
 0x38a   : > { %v1877_v8 = vadd.f32 %v1846_v32, %v1829_v26  ;;  %v8607_v26 = vsub.f32 %v8606_v55, %v6478_v22  ;;  %v1819_v22 = vld [vmem:[#allocation3 + $0xb0] sm:$0xff] }
 0x38b   : > { %v1848_v16 = vpop.xlane.xlu2 %1847 }
 0x38c   : > { %1893 = vst.msk [vmem:[#allocation3 + $0x80] sm:$0xff] %vm1123_vm1, %v1877_v8  ;;  %v1878_v52 = vadd.f32 %v1848_v16, %v1830_v42  ;;  %v1670_v53 = vmul.f32 1.442695, %v8607_v26  ;;  %v8608_v8 = vld [vmem:[#allocation34_spill] sm:$0xff]  ;;  %v8609_v42 = vld [vmem:[#allocation35_spill] sm:$0xff] }
 0x38d   : > { %v8610_v16 = vsub.f32 %v8608_v8, %v8609_v42  ;;  %v1824_v26 = vld [vmem:[#allocation3 + $0xd8] sm:$0xff] }
 0x38e   : > { %1894 = vst.msk [vmem:[#allocation3 + $0x88] sm:$0xff] %vm1123_vm1, %v1878_v52  ;;  %5109 = vpow2.f32 %v1670_v53 }
 0x38f   : > { %v1672_v52 = vmul.f32 1.442695, %v8610_v16 }
 0x391   : > { %1976 = vmatmul.bf16.gmra.mxu1 %v1932_v28  ;;  %v6788_v28 = vpop.eup %5103  ;;  %5111 = vpow2.f32 %v1672_v52 }
 0x392   : > { %v6794_v33 = vpop.eup %5105  ;;  %v1835_v29 = vmul.f32 %v6788_v28, %v1819_v22 }
 0x393   : > { %v1852_v30 = vpop.xlane.xlu0 %1851  ;;  %v1836_v56 = vmul.f32 %v6794_v33, %v1820_v2  ;;  %v1827_v2 = vld [vmem:[#allocation3 + $0xf0] sm:$0xff] }
 0x394   : > { %v1880_v1 = vadd.f32 %v1852_v30, %v1832_v46  ;;  %v8612_v46 = vsub.f32 %v8611_v57, %v6530_v39 }
 0x396   : > { %1896 = vst.msk [vmem:[#allocation3 + $0x98] sm:$0xff] %vm1123_vm1, %v1880_v1  ;;  %v1674_v30 = vmul.f32 1.442695, %v8612_v46  ;;  %v6797_v1 = vpop.eup %5107  ;;  %v1825_v46 = vld [vmem:[#allocation3 + $0xe0] sm:$0xff] }
 0x397   : > { %v1837_v48 = vmul.f32 %v6797_v1, %v1821_v17 }
 0x398   : > { %5113 = vpow2.f32 %v1674_v30  ;;  %v1826_v30 = vld [vmem:[#allocation3 + $0xe8] sm:$0xff] }
 0x3a2   : > { %v1850_v27 = vpop.xlane.xlu1 %1849 }
 0x3a3   : > { %v1879_v20 = vadd.f32 %v1850_v27, %v1831_v34  ;;  %v8613_v34 = vld [vmem:[#allocation32_spill] sm:$0xff] }
 0x3a4   : > { %v8614_v27 = vsub.f32 %v8613_v34, %v6509_v40  ;;  %v1822_v40 = vld [vmem:[#allocation3 + $0xc8] sm:$0xff] }
 0x3a5   : > { %1895 = vst.msk [vmem:[#allocation3 + $0x90] sm:$0xff] %vm1123_vm1, %v1879_v20 }
 0x3a6   : > { %v1676_v9 = vmul.f32 1.442695, %v8614_v27 }
 0x3a8   : > { %5115 = vpow2.f32 %v1676_v9 }
 0x3a9   : > { %5117 = vpow2.f32 %v1678_v31 }
 0x3aa   : > { %v1856_v54 = vpop.xlane.xlu1 %1855  ;;  %v1854_v23 = vpop.xlane.xlu2 %1853 }
 0x3ab   : > { %v1882_v58 = vadd.f32 %v1856_v54, %v1834_v49  ;;  %v1881_v32 = vadd.f32 %v1854_v23, %v1833_v7  ;;  %v6808_v49 = vpop.eup %5109  ;;  %v1680_v7 = vmul.f32 1.442695, %v1650_v62  ;;  %v1823_v23 = vld [vmem:[#allocation3 + $0xd0] sm:$0xff] }
 0x3ac   : > { %v6814_v54 = vpop.eup %5111  ;;  %v1838_v53 = vmul.f32 %v6808_v49, %v1822_v40 }
 0x3ad   : > { %1898 = vst.msk [vmem:[#allocation3 + $0xa8] sm:$0xff] %vm1123_vm1, %v1882_v58  ;;  %v6817_v55 = vpop.eup %5113  ;;  %5119 = vpow2.f32 %v1680_v7  ;;  %v1839_v59 = vmul.f32 %v6814_v54, %v1823_v23 }
 0x3ae   : > { %1897 = vst.msk [vmem:[#allocation3 + $0xa0] sm:$0xff] %vm1123_vm1, %v1881_v32  ;;  %v1840_v62 = vmul.f32 %v6817_v55, %v1824_v26  ;;  %v6823_v52 = vpop.eup %5115 }
 0x3af   : > { %v6826_v57 = vpop.eup %5117  ;;  %v1841_v17 = vmul.f32 %v6823_v52, %v1825_v46 }
 0x3b2   : > { %v1858_v39 = vpop.xlane.xlu0 %1857  ;;  %v1860_v6 = vpop.xlane.xlu2 %1859 }
 0x3b3   : > { %v1883_v38 = vadd.f32 %v1858_v39, %v1835_v29  ;;  %v1862_v20 = vpop.xlane.xlu1 %1861  ;;  %v1884_v12 = vadd.f32 %v1860_v6, %v1836_v56  ;;  %v6829_v22 = vpop.eup %5119  ;;  %v1842_v29 = vmul.f32 %v6826_v57, %v1826_v30 }
 0x3b4   : > { %v1885_v0 = vadd.f32 %v1862_v20, %v1837_v48  ;;  %v1843_v39 = vmul.f32 %v6829_v22, %v1827_v2  ;;  %v8619_v2 = vld [vmem:[#allocation22_spill] sm:$0xff] }
 0x3b5   : > { %1899 = vst.msk [vmem:[#allocation3 + $0xb0] sm:$0xff] %vm1123_vm1, %v1883_v38  ;;  %v1682_v38 = vmul.f32 1.442695, %v1651_v35 }
 0x3b6   : > { %1901 = vst.msk [vmem:[#allocation3 + $0xc0] sm:$0xff] %vm1123_vm1, %v1885_v0  ;;  %v5251_v0 = vld [vmem:[%s5560_s19] sm:$0xff] }
 0x3b7   : > { %1900 = vst.msk [vmem:[#allocation3 + $0xb8] sm:$0xff] %vm1123_vm1, %v1884_v12  ;;  %5121 = vpow2.f32 %v1682_v38  ;;  %v1828_v12 = vld [vmem:[#allocation3 + $0xf8] sm:$0xff]  ;;  %v6846_v7 = vperm.slane %v5251_v0, 2 }
 0x3ba   : > { %v1864_v10 = vpop.xlane.xlu0 %1863  ;;  %v1866_v58 = vpop.xlane.xlu2 %1865 }
 0x3bb   : > { %v1886_v32 = vadd.f32 %v1864_v10, %v1838_v53  ;;  %v1868_v8 = vpop.xlane.xlu1 %1867  ;;  %v1887_v42 = vadd.f32 %v1866_v58, %v1839_v59  ;;  %v8618_v58 = vld [vmem:[#allocation18_spill] sm:$0xff] }
 0x3bc   : > { %v1888_v16 = vadd.f32 %v1868_v8, %v1840_v62 }
 0x3bd   : > { %1902 = vst.msk [vmem:[#allocation3 + $0xc8] sm:$0xff] %vm1123_vm1, %v1886_v32  ;;  %v6841_v20 = vpop.eup %5121 }
 0x3be   : > { %1904 = vst.msk [vmem:[#allocation3 + $0xd8] sm:$0xff] %vm1123_vm1, %v1888_v16  ;;  %v1844_v21 = vmul.f32 %v6841_v20, %v1828_v12 }
 0x3bf   : > { %1903 = vst.msk [vmem:[#allocation3 + $0xd0] sm:$0xff] %vm1123_vm1, %v1887_v42 }
 0x3c2   : > { %v1870_v56 = vpop.xlane.xlu0 %1869  ;;  %v1872_v48 = vpop.xlane.xlu2 %1871 }
 0x3c3   : > { %v1889_v6 = vadd.f32 %v1870_v56, %v1841_v17  ;;  %v1874_v34 = vpop.xlane.xlu1 %1873  ;;  %v1890_v27 = vadd.f32 %v1872_v48, %v1842_v29 }
 0x3c4   : > { %v1891_v9 = vadd.f32 %v1874_v34, %v1843_v39 }
 0x3c5   : > { %1905 = vst.msk [vmem:[#allocation3 + $0xe0] sm:$0xff] %vm1123_vm1, %v1889_v6 }
 0x3c6   : > { %1907 = vst.msk [vmem:[#allocation3 + $0xf0] sm:$0xff] %vm1123_vm1, %v1891_v9 }
 0x3c7   : > { %1906 = vst.msk [vmem:[#allocation3 + $0xe8] sm:$0xff] %vm1123_vm1, %v1890_v27 }
 0x3ca   : > { %v4918_v31 = vpop.permute.xlu2 %4917 }
 0x3cb   : > { %v4919_v40 = vunpack.i.l.bf16 %v4918_v31  ;;  %v4920_v46 = vunpack.i.h.bf16 %v4918_v31 }
 0x3cd   : > { %v2232_v4 = vadd.f32 %v4919_v40, %v6846_v7  ;;  %v2233_v27 = vadd.f32 %v4920_v46, %v6846_v7 }
 0x3cf   : > { %v2248_v59 = vmul.f32 0.2, %v2232_v4 }
 0x3d1   : > { %v2264_v8 = vmax.f32 %v2232_v4, %v2248_v59  ;;  %v8621_v59 = vld [vmem:[#allocation15_spill] sm:$0xff] }
 0x3d3   : > { %v6856_v17 = vadd.f32 %v2264_v8, %v8619_v2 }
 0x3d7   : > { %v1876_v3 = vpop.xlane.xlu0 %1875 }
 0x3d8   : > { %v1892_v14 = vadd.f32 %v1876_v3, %v1844_v21  ;;  %v4928_v21 = vpop.permute.xlu2 %4927 }
 0x3d9   : > { %v4929_v0 = vunpack.i.l.bf16 %v4928_v21 }
 0x3da   : > { %1908 = vst.msk [vmem:[#allocation3 + $0xf8] sm:$0xff] %vm1123_vm1, %v1892_v14 }
 0x3db   : > { %v4912_v23 = vpop.permute.xlu1 %4911 }
 0x3dc   : > { %v4913_v26 = vunpack.i.l.bf16 %v4912_v23  ;;  %v4914_v16 = vunpack.i.h.bf16 %v4912_v23 }
 0x3de   : > { %v2230_v13 = vadd.f32 %v4913_v26, %v6846_v7  ;;  %v2231_v34 = vadd.f32 %v4914_v16, %v6846_v7  ;;  %v2249_v26 = vmul.f32 0.2, %v2233_v27  ;;  %v8622_v16 = vld [vmem:[#allocation25_spill] sm:$0xff] }
 0x3e0   : > { %v2246_v35 = vmul.f32 0.2, %v2230_v13  ;;  %v2247_v23 = vmul.f32 0.2, %v2231_v34 }
 0x3e2   : > { %v2262_v53 = vmax.f32 %v2230_v13, %v2246_v35  ;;  %v8620_v35 = vld [vmem:[#allocation16_spill] sm:$0xff] }
 0x3e3   : > { %v4923_v10 = vpop.permute.xlu1 %4922 }
 0x3e4   : > { %v4925_v62 = vunpack.i.h.bf16 %v4923_v10  ;;  %v6851_v32 = vadd.f32 %v2262_v53, %v8618_v58  ;;  %v4924_v13 = vunpack.i.l.bf16 %v4923_v10  ;;  %v2265_v10 = vmax.f32 %v2233_v27, %v2249_v26 }
 0x3e6   : > { %2313 = vmax.xlane.f32.xlu2 %v6851_v32  ;;  %v2235_v42 = vadd.f32 %v4925_v62, %v6846_v7 }
 0x3e8   : > { %v2251_v39 = vmul.f32 0.2, %v2235_v42 }
 0x3ea   : > { %v4906_v30 = vpop.permute.xlu0 %4905  ;;  %v2267_v12 = vmax.f32 %v2235_v42, %v2251_v39  ;;  %v2263_v39 = vmax.f32 %v2231_v34, %v2247_v23 }
 0x3eb   : > { %v4908_v29 = vunpack.i.h.bf16 %v4906_v30  ;;  %v4907_v56 = vunpack.i.l.bf16 %v4906_v30  ;;  %v4938_v3 = vpop.permute.xlu1 %4937  ;;  %v2236_v30 = vadd.f32 %v4929_v0, %v6846_v7  ;;  %v8625_v0 = vld [vmem:[#allocation28_spill] sm:$0xff] }
 0x3ec   : > { %v4940_v8 = vunpack.i.h.bf16 %v4938_v3  ;;  %v6870_v46 = vadd.f32 %v2267_v12, %v8622_v16  ;;  %v8623_v12 = vld [vmem:[#allocation17_spill] sm:$0xff]  ;;  %v8628_v16 = vld [vmem:[#allocation30_spill] sm:$0xff] }
 0x3ed   : > { %v2228_v48 = vadd.f32 %v4907_v56, %v6846_v7  ;;  %v2229_v6 = vadd.f32 %v4908_v29, %v6846_v7  ;;  %v2234_v29 = vadd.f32 %v4924_v13, %v6846_v7 }
 0x3ee   : > { %2317 = vmax.xlane.f32.xlu2 %v6856_v17 }
 0x3ef   : > { %v2244_v9 = vmul.f32 0.2, %v2228_v48  ;;  %v2245_v38 = vmul.f32 0.2, %v2229_v6  ;;  %v2250_v27 = vmul.f32 0.2, %v2234_v29 }
 0x3f1   : > { %v2260_v14 = vmax.f32 %v2228_v48, %v2244_v9  ;;  %v2261_v31 = vmax.f32 %v2229_v6, %v2245_v38  ;;  %v2241_v48 = vadd.f32 %v4940_v8, %v6846_v7  ;;  %v4930_v9 = vunpack.i.h.bf16 %v4928_v21  ;;  %v4943_v21 = vpop.permute.xlu2 %4942 }
 0x3f2   : > { %v4933_v40 = vpop.permute.xlu0 %4932  ;;  %v2252_v38 = vmul.f32 0.2, %v2236_v30 }
 0x3f3   : > { %v4934_v4 = vunpack.i.l.bf16 %v4933_v40  ;;  %v6864_v53 = vadd.f32 %v2260_v14, %v8620_v35  ;;  %v6867_v62 = vadd.f32 %v2261_v31, %v8621_v59  ;;  %v6880_v14 = vadd.f32 %v2265_v10, %v8623_v12 }
 0x3f4   : > { %v4935_v31 = vunpack.i.h.bf16 %v4933_v40  ;;  %v2257_v26 = vmul.f32 0.2, %v2241_v48  ;;  %v2237_v34 = vadd.f32 %v4930_v9, %v6846_v7  ;;  %v2266_v40 = vmax.f32 %v2234_v29, %v2250_v27 }
 0x3f5   : > { %v2238_v42 = vadd.f32 %v4934_v4, %v6846_v7  ;;  %2309 = vmax.xlane.f32.xlu0 %v6864_v53  ;;  %2311 = vmax.xlane.f32.xlu1 %v6867_v62  ;;  %v8624_v4 = vld [vmem:[#allocation19_spill] sm:$0xff]  ;;  %v2268_v13 = vmax.f32 %v2236_v30, %v2252_v38  ;;  %v4945_v9 = vunpack.i.h.bf16 %v4943_v21  ;;  %v8643_v35 = vmov 0 }
 0x3f6   : > { %2323 = vmax.xlane.f32.xlu2 %v6870_v46  ;;  %v6883_v44 = vadd.f32 %v2263_v39, %v8624_v4  ;;  %v2239_v23 = vadd.f32 %v4935_v31, %v6846_v7  ;;  %v2273_v8 = vmax.f32 %v2241_v48, %v2257_v26  ;;  %v2253_v10 = vmul.f32 0.2, %v2237_v34  ;;  %v8629_v31 = vld [vmem:[#allocation23_spill] sm:$0xff]  ;;  %v8630_v26 = vld [vmem:[#allocation24_spill] sm:$0xff] }
 0x3f7   : > { %v2254_v56 = vmul.f32 0.2, %v2238_v42  ;;  %v6897_v19 = vadd.f32 %v2268_v13, %v8627_v41  ;;  %v8644_v35 = vsel %vm7074_vm5, 4294967295, %v8643_v35 }
 0x3f8   : > { %v2255_v39 = vmul.f32 0.2, %v2239_v23  ;;  %v6900_v4 = vadd.f32 %v2273_v8, %v8628_v16  ;;  %v2269_v29 = vmax.f32 %v2237_v34, %v2253_v10  ;;  %8645 = vst [vmem:[#allocation49_spill] sm:$0xff] %v8644_v35 }
 0x3f9   : > { %v2270_v6 = vmax.f32 %v2238_v42, %v2254_v56  ;;  %v4944_v42 = vunpack.i.l.bf16 %v4943_v21  ;;  %v4939_v56 = vunpack.i.l.bf16 %v4938_v3  ;;  %v8632_v21 = vld [vmem:[#allocation27_spill] sm:$0xff] }
 0x3fa   : > { %v2271_v48 = vmax.f32 %v2239_v23, %v2255_v39  ;;  %v6908_v27 = vadd.f32 %v2269_v29, %v8629_v31  ;;  %v8633_v29 = vld [vmem:[#allocation29_spill] sm:$0xff] }
 0x3fb   : > { %v6886_v61 = vadd.f32 %v2270_v6, %v8625_v0  ;;  %v8626_v6 = vld [vmem:[#allocation21_spill] sm:$0xff]  ;;  %v2240_v30 = vadd.f32 %v4939_v56, %v6846_v7  ;;  %v2242_v3 = vadd.f32 %v4944_v42, %v6846_v7  ;;  %v2243_v56 = vadd.f32 %v4945_v9, %v6846_v7  ;;  %v8631_v42 = vld [vmem:[#allocation26_spill] sm:$0xff]  ;;  %v6930_v7 = vpop.f32.mrf.mxu1 }
 0x3fc   : > { %v6894_v0 = vadd.f32 %v2266_v40, %v8626_v6  ;;  %v6911_v40 = vadd.f32 %v2271_v48, %v8630_v26 }
 0x3fd   : > { %2315 = vmax.xlane.f32.xlu0 %v6883_v44  ;;  %2319 = vmax.xlane.f32.xlu1 %v6880_v14  ;;  %v2258_v38 = vmul.f32 0.2, %v2242_v3  ;;  %v2256_v13 = vmul.f32 0.2, %v2240_v30  ;;  %v2259_v10 = vmul.f32 0.2, %v2243_v56 }
 0x3fe   : > { %2329 = vmax.xlane.f32.xlu2 %v6886_v61 }
 0x3ff   : > { %v2272_v8 = vmax.f32 %v2240_v30, %v2256_v13  ;;  %v2274_v16 = vmax.f32 %v2242_v3, %v2258_v38  ;;  %v2275_v39 = vmax.f32 %v2243_v56, %v2259_v10 }
 0x401   : > { %v6917_v34 = vadd.f32 %v2272_v8, %v8631_v42  ;;  %v6920_v23 = vadd.f32 %v2274_v16, %v8632_v21  ;;  %v6925_v48 = vadd.f32 %v2275_v39, %v8633_v29  ;;  %v7041_v21 = vld [vmem:[#allocation2 + $0x168] sm:$0xff] }
 0x402   : > { %8637 = vst [vmem:[#allocation44_spill] sm:$0xff] %v7041_v21 }
 0x403   : > { %v6935_v16 = vpop.f32.mrf.mxu1 }
 0x405   : > { %2321 = vmax.xlane.f32.xlu0 %v6894_v0  ;;  %2325 = vmax.xlane.f32.xlu1 %v6897_v19 }
 0x406   : > { %2335 = vmax.xlane.f32.xlu2 %v6900_v4 }
 0x40b   : > { %v6940_v30 = vpop.f32.mrf.mxu1 }
 0x40d   : > { %2327 = vmax.xlane.f32.xlu0 %v6908_v27  ;;  %2331 = vmax.xlane.f32.xlu1 %v6911_v40 }
 0x415   : > { %2333 = vmax.xlane.f32.xlu0 %v6917_v34  ;;  %2337 = vmax.xlane.f32.xlu1 %v6920_v23 }
 0x41d   : > { %2339 = vmax.xlane.f32.xlu0 %v6925_v48 }
 0x41e   : > { %2005 = vperm.xlu2 %4946, %v6738_v18   ;;  %v6947_v18 = vpop.f32.mrf.mxu1 }
 0x426   : > { %2020 = vperm.xlu2 %4946, %v6750_v63   ;;  %v6954_v63 = vld [vmem:[#allocation2 + $0x110] sm:$0xff] }
 0x42e   : > { %2035 = vperm.xlu2 %4946, %v6788_v28   ;;  %2010 = vperm.xlu1 %4947, %v6743_v36   ;;  %v6951_v36 = vpop.f32.mrf.mxu1 }
 0x431   : > { %2015 = vperm.xlu0 %4948, %v6763_v24  }
 0x436   : > { %2050 = vperm.xlu2 %4946, %v6808_v49   ;;  %2030 = vperm.xlu1 %4947, %v6772_v15  }
 0x439   : > { %2025 = vperm.xlu0 %4948, %v6778_v47   ;;  %v6959_v47 = vpop.f32.mrf.mxu1 }
 0x43e   : > { %2065 = vperm.xlu2 %4946, %v6823_v52   ;;  %2045 = vperm.xlu1 %4947, %v6797_v1   ;;  %v6977_v52 = vld [vmem:[#allocation2 + $0x100] sm:$0xff] }
 0x441   : > { %2040 = vperm.xlu0 %4948, %v6794_v33   ;;  %v6966_v33 = vld [vmem:[#allocation2 + $0x120] sm:$0xff] }
 0x446   : > { %2080 = vperm.xlu2 %4946, %v6841_v20   ;;  %2060 = vperm.xlu1 %4947, %v6817_v55   ;;  %v6975_v55 = vpop.f32.mrf.mxu1 }
 0x449   : > { %2055 = vperm.xlu0 %4948, %v6814_v54  }
 0x44e   : > { %2075 = vperm.xlu1 %4947, %v6829_v22   ;;  %v6981_v22 = vld [vmem:[#allocation2 + $0x138] sm:$0xff] }
 0x451   : > { %2070 = vperm.xlu0 %4948, %v6826_v57   ;;  %v6979_v57 = vld [vmem:[#allocation2 + $0x108] sm:$0xff] }
 0x459   : > { %v2314_v24 = vpop.xlane.xlu2 %2313 }
 0x45a   : > { %v6957_v15 = vmax.f32 %v6954_v63, %v2314_v24  ;;  %v7006_v24 = vld [vmem:[#allocation2 + $0x118] sm:$0xff] }
 0x45c   : > { %2632 = vst.msk [vmem:[#allocation2 + $0x110] sm:$0xff] %vm1123_vm1, %v6957_v15  ;;  %2417 = vperm.xlu0 %4948, %v6957_v15  }
 0x461   : > { %v2318_v1 = vpop.xlane.xlu2 %2317 }
 0x462   : > { %v6969_v49 = vmax.f32 %v6966_v33, %v2318_v1  ;;  %v7008_v1 = vld [vmem:[#allocation2 + $0x128] sm:$0xff] }
 0x464   : > { %2634 = vst.msk [vmem:[#allocation2 + $0x120] sm:$0xff] %vm1123_vm1, %v6969_v49 }
 0x468   : > { %v2310_v20 = vpop.xlane.xlu0 %2309  ;;  %v2312_v3 = vpop.xlane.xlu1 %2311 }
 0x469   : > { %v6984_v9 = vmax.f32 %v6977_v52, %v2310_v20  ;;  %v6987_v38 = vmax.f32 %v6979_v57, %v2312_v3  ;;  %v2324_v13 = vpop.xlane.xlu2 %2323  ;;  %v7010_v20 = vpop.f32.mrf.mxu1  ;;  %v7012_v3 = vld [vmem:[#allocation2 + $0x150] sm:$0xff] }
 0x46a   : > { %v6990_v8 = vmax.f32 %v6981_v22, %v2324_v13  ;;  %8634 = vst [vmem:[#allocation40_spill] sm:$0xff] %v7012_v3 }
 0x46b   : > { %2630 = vst.msk [vmem:[#allocation2 + $0x100] sm:$0xff] %vm1123_vm1, %v6984_v9  ;;  %2412 = vperm.xlu1 %4947, %v6987_v38   ;;  %2407 = vperm.xlu2 %4946, %v6984_v9  }
 0x46c   : > { %2631 = vst.msk [vmem:[#allocation2 + $0x108] sm:$0xff] %vm1123_vm1, %v6987_v38 }
 0x46d   : > { %2637 = vst.msk [vmem:[#allocation2 + $0x138] sm:$0xff] %vm1123_vm1, %v6990_v8 }
 0x470   : > { %v2316_v13 = vpop.xlane.xlu0 %2315  ;;  %v2320_v54 = vpop.xlane.xlu1 %2319 }
 0x471   : > { %v7015_v10 = vmax.f32 %v7006_v24, %v2316_v13  ;;  %v7018_v28 = vmax.f32 %v7008_v1, %v2320_v54  ;;  %v2330_v39 = vpop.xlane.xlu2 %2329  ;;  %v7039_v13 = vld [vmem:[#allocation2 + $0x140] sm:$0xff]  ;;  %v7043_v26 = vpop.f32.mrf.mxu1 }
 0x472   : > { %v7021_v56 = vmax.f32 %v7012_v3, %v2330_v39  ;;  %v7037_v39 = vld [vmem:[#allocation2 + $0x130] sm:$0xff]  ;;  %8636 = vst [vmem:[#allocation42_spill] sm:$0xff] %v7039_v13 }
 0x473   : > { %2633 = vst.msk [vmem:[#allocation2 + $0x118] sm:$0xff] %vm1123_vm1, %v7015_v10  ;;  %2422 = vperm.xlu2 %4946, %v7015_v10   ;;  %2427 = vperm.xlu1 %4947, %v6969_v49  }
 0x474   : > { %2635 = vst.msk [vmem:[#allocation2 + $0x128] sm:$0xff] %vm1123_vm1, %v7018_v28 }
 0x475   : > { %2640 = vst.msk [vmem:[#allocation2 + $0x150] sm:$0xff] %vm1123_vm1, %v7021_v56 }
 0x476   : > { %8635 = vst [vmem:[#allocation41_spill] sm:$0xff] %v7037_v39 }
 0x478   : > { %v2322_v29 = vpop.xlane.xlu0 %2321  ;;  %v2326_v42 = vpop.xlane.xlu1 %2325 }
 0x479   : > { %v7046_v31 = vmax.f32 %v7037_v39, %v2322_v29  ;;  %v7049_v41 = vmax.f32 %v7039_v13, %v2326_v42  ;;  %v2336_v54 = vpop.xlane.xlu2 %2335  ;;  %v7070_v29 = vld [vmem:[#allocation2 + $0x148] sm:$0xff]  ;;  %v1964_v3 = vpop.f32.mrf.mxu1 }
 0x47a   : > { %v7052_v6 = vmax.f32 %v7041_v21, %v2336_v54  ;;  %8641 = vst [vmem:[#allocation48_spill] sm:$0xff] %v7070_v29  ;;  %v7072_v54 = vld [vmem:[#allocation2 + $0x158] sm:$0xff]  ;;  %v1985_v21 = vld [vmem:[#allocation4 + $0x30] sm:$0xff] }
 0x47b   : > { %8638 = vst [vmem:[#allocation43_spill] sm:$0xff] %v7046_v31  ;;  %2432 = vperm.xlu2 %4946, %v7018_v28   ;;  %2437 = vperm.xlu1 %4947, %v7046_v31  }
 0x47c   : > { %8639 = vst [vmem:[#allocation47_spill] sm:$0xff] %v7049_v41 }
 0x47d   : > { %8640 = vst [vmem:[#allocation46_spill] sm:$0xff] %v7052_v6 }
 0x47e   : > { %2636 = vst.msk [vmem:[#allocation2 + $0x130] sm:$0xff] %vm1123_vm1, %v7046_v31  ;;  %v7100_v31 = vld [vmem:[#allocation2 + $0x160] sm:$0xff] }
 0x47f   : > { %2638 = vst.msk [vmem:[#allocation2 + $0x140] sm:$0xff] %vm1123_vm1, %v7049_v41 }
 0x480   : > { %2643 = vst.msk [vmem:[#allocation2 + $0x168] sm:$0xff] %vm1123_vm1, %v7052_v6  ;;  %v2328_v12 = vpop.xlane.xlu0 %2327  ;;  %v2332_v2 = vpop.xlane.xlu1 %2331 }
 0x481   : > { %8642 = vst [vmem:[#allocation50_spill] sm:$0xff] %v7072_v54  ;;  %v7079_v59 = vmax.f32 %v7070_v29, %v2328_v12  ;;  %v7082_v42 = vmax.f32 %v7072_v54, %v2332_v2  ;;  %v2006_v58 = vpop.permute.xlu2 %2005  ;;  %v2115_v2 = vsel %vm7074_vm5, %v6930_v7, 0.0  ;;  %v7102_v29 = vld [vmem:[#allocation2 + $0x170] sm:$0xff] }
 0x482   : > { %v2083_v13 = vsel %vm7074_vm5, %v2006_v58, 1.0  ;;  %8648 = vst [vmem:[#allocation52_spill] sm:$0xff] %v7100_v31 }
 0x483   : > { %8646 = vst [vmem:[#allocation31_spill] sm:$0xff] %v7079_v59  ;;  %v2099_v12 = vmul.f32 %v2083_v13, %v1985_v21  ;;  %2452 = vperm.xlu0 %4948, %v7079_v59   ;;  %2447 = vperm.xlu1 %4947, %v7049_v41   ;;  %v1988_v41 = vld [vmem:[#allocation4 + $0x18] sm:$0xff] }
 0x484   : > { %8647 = vst [vmem:[#allocation51_spill] sm:$0xff] %v7082_v42  ;;  %2442 = vperm.xlu2 %4946, %v6990_v8  }
 0x485   : > { %2639 = vst.msk [vmem:[#allocation2 + $0x148] sm:$0xff] %vm1123_vm1, %v7079_v59  ;;  %v2131_v58 = vadd.f32 %v2115_v2, %v2099_v12  ;;  %v7130_v12 = vld [vmem:[#allocation2 + $0x178] sm:$0xff] }
 0x486   : > { %2641 = vst.msk [vmem:[#allocation2 + $0x158] sm:$0xff] %vm1123_vm1, %v7082_v42 }
 0x487   : > { %8649 = vst [vmem:[#allocation53_spill] sm:$0xff] %v7102_v29 }
 0x488   : > { %2147 = vst [vmem:[#allocation4 + $0x30] sm:$0xff] %v2131_v58  ;;  %v2334_v21 = vpop.xlane.xlu0 %2333  ;;  %v2338_v13 = vpop.xlane.xlu1 %2337 }
 0x489   : > { %v7105_v39 = vmax.f32 %v7100_v31, %v2334_v21  ;;  %v7108_v54 = vmax.f32 %v7102_v29, %v2338_v13  ;;  %v2021_v7 = vpop.permute.xlu2 %2020  ;;  %v2118_v21 = vsel %vm7074_vm5, %v6947_v18, 0.0  ;;  %v7126_v13 = vpop.f32.mrf.mxu1  ;;  %8653 = vst [vmem:[#allocation45_spill] sm:$0xff] %v7130_v12  ;;  %v1991_v29 = vld [vmem:[#allocation4 + $0x8] sm:$0xff] }
 0x48a   : > { %v2086_v59 = vsel %vm7074_vm5, %v2021_v7, 1.0 }
 0x48b   : > { %8650 = vst [vmem:[#allocation7_spill] sm:$0xff] %v7105_v39  ;;  %v2102_v58 = vmul.f32 %v2086_v59, %v1988_v41  ;;  %2467 = vperm.xlu0 %4948, %v7105_v39   ;;  %2462 = vperm.xlu1 %4947, %v7082_v42   ;;  %v1994_v42 = vld [vmem:[#allocation4 + $0x20] sm:$0xff] }
 0x48c   : > { %8651 = vst [vmem:[#allocation11_spill] sm:$0xff] %v7108_v54  ;;  %2457 = vperm.xlu2 %4946, %v7021_v56  }
 0x48d   : > { %2642 = vst.msk [vmem:[#allocation2 + $0x160] sm:$0xff] %vm1123_vm1, %v7105_v39  ;;  %v7128_v7 = vadd.f32 %v2118_v21, %v2102_v58  ;;  %v2121_v58 = vsel %vm7074_vm5, %v6975_v55, 0.0  ;;  %v2124_v55 = vsel %vm7074_vm5, %v1964_v3, 0.0  ;;  %v2116_v3 = vsel %vm7074_vm5, %v6935_v16, 0.0 }
 0x48e   : > { %2644 = vst.msk [vmem:[#allocation2 + $0x170] sm:$0xff] %vm1123_vm1, %v7108_v54 }
 0x48f   : > { %8652 = vst [vmem:[#allocation10_spill] sm:$0xff] %v7128_v7 }
 0x490   : > { %v2340_v41 = vpop.xlane.xlu0 %2339 }
 0x491   : > { %v7133_v59 = vmax.f32 %v7130_v12, %v2340_v41  ;;  %v2036_v2 = vpop.permute.xlu2 %2035 }
 0x492   : > { %v2089_v18 = vsel %vm7074_vm5, %v2036_v2, 1.0  ;;  %v7149_v2 = vpop.f32.mrf.mxu1 }
 0x493   : > { %8654 = vst [vmem:[#allocation8_spill] sm:$0xff] %v7133_v59  ;;  %v2105_v39 = vmul.f32 %v2089_v18, %v1991_v29  ;;  %2482 = vperm.xlu0 %4948, %v7133_v59   ;;  %2477 = vperm.xlu1 %4947, %v7108_v54   ;;  %v1276_v18 = vld [vmem:[#allocation4 + $0x60] sm:$0xff]  ;;  %v1374_v54 = vsel %vm1262_vm2, %v6661_v43, 1.0 }
 0x494   : > { %2645 = vst.msk [vmem:[#allocation2 + $0x178] sm:$0xff] %vm1123_vm1, %v7133_v59  ;;  %2472 = vperm.xlu2 %4946, %v7052_v6  }
 0x495   : > { %v7147_v21 = vadd.f32 %v2121_v58, %v2105_v39  ;;  %v1406_v39 = vsel %vm1262_vm2, %v6699_v51, 0.0  ;;  %v1390_v58 = vmul.f32 %v1374_v54, %v1276_v18  ;;  %v1987_v18 = vld [vmem:[#allocation4 + $0x58] sm:$0xff] }
 0x497   : > { %8655 = vst [vmem:[#allocation12_spill] sm:$0xff] %v7147_v21  ;;  %v1422_v12 = vadd.f32 %v1406_v39, %v1390_v58 }
 0x499   : > { %v2051_v41 = vpop.permute.xlu2 %2050 }
 0x49a   : > { %v2092_v7 = vsel %vm7074_vm5, %v2051_v41, 1.0  ;;  %v1972_v31 = vpop.f32.mrf.mxu1  ;;  %v1986_v41 = vld [vmem:[#allocation4] sm:$0xff] }
 0x49b   : > { %v2108_v29 = vmul.f32 %v2092_v7, %v1994_v42  ;;  %v2127_v51 = vsel %vm7074_vm5, %v1972_v31, 0.0 }
 0x49d   : > { %v7158_v59 = vadd.f32 %v2124_v55, %v2108_v29 }
 0x4a0   : > { %v2011_v21 = vpop.permute.xlu1 %2010 }
 0x4a1   : > { %v2084_v42 = vsel %vm7074_vm5, %v2011_v21, 1.0  ;;  %v2066_v7 = vpop.permute.xlu2 %2065 }
 0x4a2   : > { %v2100_v6 = vmul.f32 %v2084_v42, %v1986_v41  ;;  %v2095_v43 = vsel %vm7074_vm5, %v2066_v7, 1.0  ;;  %v2117_v41 = vsel %vm7074_vm5, %v6940_v30, 0.0  ;;  %v2120_v7 = vsel %vm7074_vm5, %v6959_v47, 0.0 }
 0x4a3   : > { %v2111_v29 = vmul.f32 %v2095_v43, %v1422_v12  ;;  %v2016_v55 = vpop.permute.xlu0 %2015  ;;  %v1990_v12 = vld [vmem:[#allocation4 + $0x68] sm:$0xff]  ;;  %v2119_v30 = vsel %vm7074_vm5, %v6951_v36, 0.0 }
 0x4a4   : > { %v7172_v54 = vadd.f32 %v2116_v3, %v2100_v6  ;;  %v2085_v21 = vsel %vm7074_vm5, %v2016_v55, 1.0 }
 0x4a5   : > { %v7176_v39 = vadd.f32 %v2127_v51, %v2111_v29  ;;  %v2101_v58 = vmul.f32 %v2085_v21, %v1987_v18  ;;  %v1989_v29 = vld [vmem:[#allocation4 + $0x50] sm:$0xff] }
 0x4a7   : > { %v2133_v42 = vadd.f32 %v2117_v41, %v2101_v58  ;;  %v1993_v58 = vld [vmem:[#allocation4 + $0x40] sm:$0xff] }
 0x4a8   : > { %v2031_v16 = vpop.permute.xlu1 %2030 }
 0x4a9   : > { %2149 = vst [vmem:[#allocation4 + $0x58] sm:$0xff] %v2133_v42  ;;  %v2088_v31 = vsel %vm7074_vm5, %v2031_v16, 1.0  ;;  %v2123_v42 = vsel %vm7074_vm5, %v7043_v26, 0.0 }
 0x4aa   : > { %v2104_v6 = vmul.f32 %v2088_v31, %v1990_v12  ;;  %v1992_v31 = vld [vmem:[#allocation4 + $0x48] sm:$0xff] }
 0x4ab   : > { %v2026_v43 = vpop.permute.xlu0 %2025 }
 0x4ac   : > { %v2136_v3 = vadd.f32 %v2120_v7, %v2104_v6  ;;  %v2087_v55 = vsel %vm7074_vm5, %v2026_v43, 1.0  ;;  %v2122_v7 = vsel %vm7074_vm5, %v7010_v20, 0.0 }
 0x4ad   : > { %v2103_v51 = vmul.f32 %v2087_v55, %v1989_v29  ;;  %v1996_v29 = vld [vmem:[#allocation4 + $0x38] sm:$0xff] }
 0x4ae   : > { %2152 = vst [vmem:[#allocation4 + $0x68] sm:$0xff] %v2136_v3 }
 0x4af   : > { %v2135_v18 = vadd.f32 %v2119_v30, %v2103_v51  ;;  %v2126_v51 = vsel %vm7074_vm5, %v7149_v2, 0.0 }
 0x4b0   : > { %v2046_v21 = vpop.permute.xlu1 %2045 }
 0x4b1   : > { %2151 = vst [vmem:[#allocation4 + $0x50] sm:$0xff] %v2135_v18  ;;  %v2091_v41 = vsel %vm7074_vm5, %v2046_v21, 1.0  ;;  %v1995_v21 = vld [vmem:[#allocation4 + $0x10] sm:$0xff] }
 0x4b2   : > { %v2107_v47 = vmul.f32 %v2091_v41, %v1993_v58  ;;  %v7210_v58 = vpop.permute.xlu2 %2080 }
 0x4b3   : > { %v2041_v16 = vpop.permute.xlu0 %2040 }
 0x4b4   : > { %v2139_v12 = vadd.f32 %v2123_v42, %v2107_v47  ;;  %v2090_v6 = vsel %vm7074_vm5, %v2041_v16, 1.0  ;;  %v2125_v47 = vsel %vm7074_vm5, %v7126_v13, 0.0  ;;  %v1974_v16 = vpop.f32.mrf.mxu1 }
 0x4b5   : > { %v2106_v36 = vmul.f32 %v2090_v6, %v1992_v31  ;;  %v1998_v31 = vld [vmem:[#allocation4 + $0x70] sm:$0xff] }
 0x4b6   : > { %2155 = vst [vmem:[#allocation4 + $0x40] sm:$0xff] %v2139_v12 }
 0x4b7   : > { %v2138_v43 = vadd.f32 %v2122_v7, %v2106_v36  ;;  %v2128_v7 = vsel %vm7074_vm5, %v1974_v16, 0.0 }
 0x4b8   : > { %v2061_v3 = vpop.permute.xlu1 %2060 }
 0x4b9   : > { %2154 = vst [vmem:[#allocation4 + $0x48] sm:$0xff] %v2138_v43  ;;  %v2094_v55 = vsel %vm7074_vm5, %v2061_v3, 1.0 }
 0x4ba   : > { %v2110_v26 = vmul.f32 %v2094_v55, %v1996_v29 }
 0x4bb   : > { %v2056_v30 = vpop.permute.xlu0 %2055 }
 0x4bc   : > { %v7206_v18 = vadd.f32 %v2126_v51, %v2110_v26  ;;  %v2093_v20 = vsel %vm7074_vm5, %v2056_v30, 1.0 }
 0x4bd   : > { %v2109_v41 = vmul.f32 %v2093_v20, %v1995_v21 }
 0x4bf   : > { %v2141_v42 = vadd.f32 %v2125_v47, %v2109_v41 }
 0x4c0   : > { %v7222_v41 = vpop.permute.xlu1 %2075 }
 0x4c1   : > { %2157 = vst [vmem:[#allocation4 + $0x10] sm:$0xff] %v2141_v42 }
 0x4c3   : > { %v2071_v12 = vpop.permute.xlu0 %2070 }
 0x4c4   : > { %v2096_v2 = vsel %vm7074_vm5, %v2071_v12, 1.0 }
 0x4c5   : > { %v2112_v6 = vmul.f32 %v2096_v2, %v1998_v31  ;;  %v2408_v36 = vpop.permute.xlu2 %2407 }
 0x4c6   : > { %v2485_v43 = vsub.f32 %v6864_v53, %v2408_v36 }
 0x4c7   : > { %v2144_v3 = vadd.f32 %v2128_v7, %v2112_v6 }
 0x4c8   : > { %v2501_v29 = vmul.f32 1.442695, %v2485_v43 }
 0x4c9   : > { %2160 = vst [vmem:[#allocation4 + $0x70] sm:$0xff] %v2144_v3 }
 0x4ca   : > { %5123 = vpow2.f32 %v2501_v29 }
 0x4cd   : > { %v2423_v13 = vpop.permute.xlu2 %2422 }
 0x4ce   : > { %v2418_v55 = vpop.permute.xlu0 %2417  ;;  %v2488_v26 = vsub.f32 %v6883_v44, %v2423_v13 }
 0x4cf   : > { %v2487_v51 = vsub.f32 %v6851_v32, %v2418_v55 }
 0x4d0   : > { %v5124_v30 = vpop.eup %5123  ;;  %v2507_v21 = vmul.f32 1.442695, %v2488_v26 }
 0x4d1   : > { %v2505_v20 = vmul.f32 1.442695, %v2487_v51  ;;  %2566 = vadd.xlane.f32.xlu2 %v5124_v30 }
 0x4d2   : > { %5125 = vpow2.f32 %v2507_v21 }
 0x4d3   : > { %5127 = vpow2.f32 %v2505_v20 }
 0x4d5   : > { %v2433_v47 = vpop.permute.xlu2 %2432 }
 0x4d6   : > { %v2490_v53 = vsub.f32 %v6880_v14, %v2433_v47 }
 0x4d8   : > { %v5126_v42 = vpop.eup %5125  ;;  %v2511_v16 = vmul.f32 1.442695, %v2490_v53 }
 0x4d9   : > { %v5128_v12 = vpop.eup %5127  ;;  %2572 = vadd.xlane.f32.xlu2 %v5126_v42 }
 0x4da   : > { %5129 = vpow2.f32 %v2511_v16  ;;  %2570 = vadd.xlane.f32.xlu0 %v5128_v12 }
 0x4dd   : > { %v2413_v44 = vpop.permute.xlu1 %2412 }
 0x4de   : > { %v2486_v32 = vsub.f32 %v6867_v62, %v2413_v44  ;;  %v2443_v6 = vpop.permute.xlu2 %2442 }
 0x4df   : > { %v2492_v3 = vsub.f32 %v6870_v46, %v2443_v6 }
 0x4e0   : > { %v7226_v31 = vpop.eup %5129  ;;  %v2503_v2 = vmul.f32 1.442695, %v2486_v32 }
 0x4e1   : > { %v2515_v62 = vmul.f32 1.442695, %v2492_v3 }
 0x4e2   : > { %5131 = vpow2.f32 %v2503_v2  ;;  %2576 = vadd.xlane.f32.xlu0 %v7226_v31 }
 0x4e5   : > { %v2428_v36 = vpop.permute.xlu1 %2427 }
 0x4e6   : > { %v2489_v7 = vsub.f32 %v6856_v17, %v2428_v36  ;;  %v2458_v13 = vpop.permute.xlu2 %2457  ;;  %v5448_v36 = vmov 71  }
 0x4e7   : > { %v2495_v20 = vsub.f32 %v6886_v61, %v2458_v13  ;;  %v2647_v61 = vpack.c.bf16 %v5126_v42, %v5128_v12  ;;  %4949 = vset.pattern.permute.xlu1 %v5448_v36  ;;  %4961 = vset.pattern.permute.xlu0 %v5448_v36 }
 0x4e8   : > { %v5132_v14 = vpop.eup %5131  ;;  %v2509_v43 = vmul.f32 1.442695, %v2489_v7  ;;  %4955 = vset.pattern.permute.xlu2 %v5448_v36 }
 0x4e9   : > { %2568 = vadd.xlane.f32.xlu1 %v5132_v14  ;;  %v2646_v29 = vpack.c.bf16 %v5132_v14, %v5124_v30  ;;  %v2521_v17 = vmul.f32 1.442695, %v2495_v20 }
 0x4ea   : > { %5133 = vpow2.f32 %v2509_v43 }
 0x4eb   : > { %2662 = vmatmul.bf16.vlgmr.msra.gmra.mxu2 %v2646_v29  ;;  %5135 = vpow2.f32 %v2515_v62 }
 0x4ed   : > { %v2438_v55 = vpop.permute.xlu1 %2437 }
 0x4ee   : > { %v2491_v26 = vsub.f32 %v6894_v0, %v2438_v55  ;;  %v2473_v46 = vpop.permute.xlu2 %2472 }
 0x4ef   : > { %v2498_v0 = vsub.f32 %v6900_v4, %v2473_v46 }
 0x4f0   : > { %v5134_v51 = vpop.eup %5133  ;;  %v2513_v21 = vmul.f32 1.442695, %v2491_v26 }
 0x4f1   : > { %2574 = vadd.xlane.f32.xlu1 %v5134_v51  ;;  %v5136_v44 = vpop.eup %5135  ;;  %v2527_v7 = vmul.f32 1.442695, %v2498_v0 }
 0x4f2   : > { %5137 = vpow2.f32 %v2513_v21 }
 0x4f3   : > { %5139 = vpow2.f32 %v2521_v17 }
 0x4f5   : > { %v2453_v47 = vpop.permute.xlu0 %2452  ;;  %v2448_v53 = vpop.permute.xlu1 %2447 }
 0x4f6   : > { %v2494_v30 = vsub.f32 %v6908_v27, %v2453_v47  ;;  %v2493_v16 = vsub.f32 %v6897_v19, %v2448_v53  ;;  %v2648_v47 = vpack.c.bf16 %v7226_v31, %v5134_v51  ;;  %v8656_v31 = vsub.f32 %v6977_v52, %v6984_v9 }
 0x4f8   : > { %v5138_v32 = vpop.eup %5137  ;;  %v2519_v2 = vmul.f32 1.442695, %v2494_v30  ;;  %v2517_v6 = vmul.f32 1.442695, %v2493_v16  ;;  %v2373_v51 = vmul.f32 1.442695, %v8656_v31 }
 0x4f9   : > { %2578 = vadd.xlane.f32.xlu2 %v5138_v32  ;;  %2580 = vadd.xlane.f32.xlu1 %v5136_v44  ;;  %v5140_v3 = vpop.eup %5139 }
 0x4fa   : > { %5141 = vpow2.f32 %v2519_v2 }
 0x4fb   : > { %5143 = vpow2.f32 %v2517_v6  ;;  %2667 = vmatmul.bf16.gmra.mxu2 %v2647_v61  ;;  %v8659_v6 = vsub.f32 %v7008_v1, %v7018_v28  ;;  %v8660_v28 = vsub.f32 %v6979_v57, %v6987_v38  ;;  %v2535_v57 = vld [vmem:[#allocation3 + $0x108] sm:$0xff] }
 0x4fc   : > { %5145 = vpow2.f32 %v2527_v7 }
 0x4fd   : > { %v2468_v27 = vpop.permute.xlu0 %2467  ;;  %v2463_v14 = vpop.permute.xlu1 %2462  ;;  %v2383_v0 = vmul.f32 1.442695, %v8659_v6  ;;  %v2375_v1 = vmul.f32 1.442695, %v8660_v28  ;;  %v8678_v28 = vld [vmem:[#allocation7_spill] sm:$0xff] }
 0x4fe   : > { %v2497_v19 = vsub.f32 %v6917_v34, %v2468_v27  ;;  %v2496_v43 = vsub.f32 %v6911_v40, %v2463_v14 }
 0x500   : > { %v5142_v29 = vpop.eup %5141  ;;  %v2525_v4 = vmul.f32 1.442695, %v2497_v19  ;;  %v2523_v13 = vmul.f32 1.442695, %v2496_v43 }
 0x501   : > { %v5144_v62 = vpop.eup %5143  ;;  %2584 = vadd.xlane.f32.xlu2 %v5142_v29  ;;  %2586 = vadd.xlane.f32.xlu1 %v5140_v3 }
 0x502   : > { %5147 = vpow2.f32 %v2525_v4  ;;  %2582 = vadd.xlane.f32.xlu0 %v5144_v62  ;;  %v5146_v34 = vpop.eup %5145  ;;  %v2650_v16 = vpack.c.bf16 %v5142_v29, %v5144_v62 }
 0x503   : > { %5149 = vpow2.f32 %v2523_v13  ;;  %v8661_v13 = vsub.f32 %v6966_v33, %v6969_v49 }
 0x505   : > { %v2483_v42 = vpop.permute.xlu0 %2482  ;;  %v2478_v12 = vpop.permute.xlu1 %2477  ;;  %v2381_v62 = vmul.f32 1.442695, %v8661_v13 }
 0x506   : > { %v2500_v55 = vsub.f32 %v6925_v48, %v2483_v42  ;;  %v2499_v26 = vsub.f32 %v6920_v23, %v2478_v12  ;;  %v2649_v23 = vpack.c.bf16 %v5136_v44, %v5138_v32 }
 0x508   : > { %v5148_v21 = vpop.eup %5147  ;;  %v2531_v40 = vmul.f32 1.442695, %v2500_v55  ;;  %v2529_v20 = vmul.f32 1.442695, %v2499_v26  ;;  %v8662_v26 = vsub.f32 %v6981_v22, %v6990_v8 }
 0x509   : > { %v5150_v17 = vpop.eup %5149  ;;  %2590 = vadd.xlane.f32.xlu2 %v5148_v21  ;;  %2592 = vadd.xlane.f32.xlu1 %v5146_v34  ;;  %v2652_v53 = vpack.c.bf16 %v5146_v34, %v5148_v21 }
 0x50a   : > { %5151 = vpow2.f32 %v2531_v40  ;;  %2588 = vadd.xlane.f32.xlu0 %v5150_v17  ;;  %v2651_v44 = vpack.c.bf16 %v5150_v17, %v5140_v3  ;;  %v2539_v3 = vld [vmem:[#allocation3 + $0x128] sm:$0xff]  ;;  %v2387_v34 = vmul.f32 1.442695, %v8662_v26  ;;  %v8663_v40 = vld [vmem:[#allocation41_spill] sm:$0xff]  ;;  %v2542_v26 = vld [vmem:[#allocation3 + $0x140] sm:$0xff] }
 0x50b   : > { %5153 = vpow2.f32 %v2529_v20  ;;  %2672 = vmatmul.bf16.gmra.mxu2 %v2648_v47  ;;  %v8664_v20 = vld [vmem:[#allocation43_spill] sm:$0xff] }
 0x50c   : > { %5155 = vpow2.f32 %v2373_v51  ;;  %v8665_v33 = vsub.f32 %v8663_v40, %v8664_v20  ;;  %v2538_v47 = vld [vmem:[#allocation3 + $0x120] sm:$0xff] }
 0x50e   : > { %v2385_v49 = vmul.f32 1.442695, %v8665_v33 }
 0x510   : > { %v5152_v46 = vpop.eup %5151 }
 0x511   : > { %v5154_v30 = vpop.eup %5153  ;;  %2596 = vadd.xlane.f32.xlu2 %v5152_v46 }
 0x512   : > { %2594 = vadd.xlane.f32.xlu0 %v5154_v30  ;;  %v2653_v48 = vpack.c.bf16 %v5152_v46, %v5154_v30  ;;  %v7257_v32 = vpop.eup %5155  ;;  %v8666_v30 = vld [vmem:[#allocation40_spill] sm:$0xff] }
 0x51b   : > { %2677 = vmatmul.bf16.gmra.mxu2 %v2649_v23  ;;  %v8668_v23 = vld [vmem:[#allocation48_spill] sm:$0xff] }
 0x522   : > { %4951 = vperm.xlu1 %4949, %v8593_v50  }
 0x526   : > { %4963 = vperm.xlu0 %4961, %v8588_v25   ;;  %v8657_v25 = vsub.f32 %v7006_v24, %v7015_v10  ;;  %v2537_v24 = vld [vmem:[#allocation3 + $0x118] sm:$0xff] }
 0x529   : > { %4957 = vperm.xlu2 %4955, %v8589_v5   ;;  %v2379_v5 = vmul.f32 1.442695, %v8657_v25  ;;  %v8671_v25 = vld [vmem:[#allocation42_spill] sm:$0xff] }
 0x52a   : > { %4968 = vperm.xlu1 %4949, %v8591_v11   ;;  %v8658_v11 = vsub.f32 %v6954_v63, %v6957_v15  ;;  %v2536_v15 = vld [vmem:[#allocation3 + $0x110] sm:$0xff] }
 0x52b   : > { %2682 = vmatmul.bf16.gmra.mxu2 %v2650_v16  ;;  %5157 = vpow2.f32 %v2379_v5  ;;  %v8669_v16 = vld [vmem:[#allocation31_spill] sm:$0xff] }
 0x52c   : > { %v2377_v50 = vmul.f32 1.442695, %v8658_v11  ;;  %v8670_v31 = vsub.f32 %v8668_v23, %v8669_v16  ;;  %v8672_v5 = vld [vmem:[#allocation47_spill] sm:$0xff]  ;;  %v8686_v16 = vld [vmem:[#allocation53_spill] sm:$0xff] }
 0x52d   : > { %v8673_v11 = vsub.f32 %v8671_v25, %v8672_v5 }
 0x52e   : > { %4977 = vset.pattern.permute.xlu0 %v8598_v60  ;;  %5159 = vpow2.f32 %v2377_v50  ;;  %v2391_v51 = vmul.f32 1.442695, %v8670_v31  ;;  %v8687_v31 = vld [vmem:[#allocation11_spill] sm:$0xff] }
 0x52f   : > { %5161 = vpow2.f32 %v2383_v0  ;;  %v2389_v50 = vmul.f32 1.442695, %v8673_v11  ;;  %v2547_v11 = vld [vmem:[#allocation3 + $0x168] sm:$0xff] }
 0x530   : > { %5163 = vpow2.f32 %v2375_v1 }
 0x531   : > { %v7264_v10 = vpop.eup %5157  ;;  %5165 = vpow2.f32 %v2381_v62 }
 0x532   : > { %4973 = vperm.xlu1 %4949, %v8597_v37   ;;  %v2534_v37 = vld [vmem:[#allocation3 + $0x100] sm:$0xff]  ;;  %v2553_v61 = vmul.f32 %v7264_v10, %v2537_v24  ;;  %5167 = vpow2.f32 %v2387_v34  ;;  %v8674_v24 = vld [vmem:[#allocation44_spill] sm:$0xff] }
 0x533   : > { %v2550_v52 = vmul.f32 %v7257_v32, %v2534_v37  ;;  %5169 = vpow2.f32 %v2385_v49 }
 0x534   : > { %v7266_v63 = vpop.eup %5159 }
 0x535   : > { %v2552_v36 = vmul.f32 %v7266_v63, %v2536_v15  ;;  %v7275_v43 = vpop.eup %5161  ;;  %v8675_v15 = vld [vmem:[#allocation46_spill] sm:$0xff] }
 0x536   : > { %v2555_v29 = vmul.f32 %v7275_v43, %v2539_v3  ;;  %v7281_v12 = vpop.eup %5163 }
 0x537   : > { %v2551_v38 = vmul.f32 %v7281_v12, %v2535_v57  ;;  %v7292_v17 = vpop.eup %5165  ;;  %v2544_v57 = vld [vmem:[#allocation3 + $0x150] sm:$0xff] }
 0x53a   : > { %4994 = vset.pattern.permute.xlu1 %v8598_v60 }
 0x53b   : > { %2687 = vmatmul.bf16.gmra.mxu2 %v2651_v44  ;;  %v7301_v44 = vpop.eup %5167 }
 0x53c   : > { %v7307_v37 = vpop.eup %5169 }
 0x544   : > { %v2567_v9 = vpop.xlane.xlu2 %2566 }
 0x545   : > { %v2598_v2 = vadd.f32 %v2567_v9, %v2550_v52  ;;  %v2541_v52 = vld [vmem:[#allocation3 + $0x138] sm:$0xff]  ;;  %v2540_v9 = vld [vmem:[#allocation3 + $0x130] sm:$0xff] }
 0x547   : > { %2614 = vst.msk [vmem:[#allocation3 + $0x100] sm:$0xff] %vm1123_vm1, %v2598_v2  ;;  %v2556_v2 = vmul.f32 %v7307_v37, %v2540_v9  ;;  %v2545_v9 = vld [vmem:[#allocation3 + $0x158] sm:$0xff] }
 0x54b   : > { %2692 = vmatmul.bf16.gmra.mxu2 %v2652_v53  ;;  %v2554_v53 = vmul.f32 %v7292_v17, %v2538_v47 }
 0x54c   : > { %v2573_v7 = vpop.xlane.xlu2 %2572 }
 0x54d   : > { %v2571_v27 = vpop.xlane.xlu0 %2570  ;;  %v2601_v14 = vadd.f32 %v2573_v7, %v2553_v61  ;;  %v8676_v61 = vsub.f32 %v8674_v24, %v8675_v15 }
 0x54e   : > { %v2600_v19 = vadd.f32 %v2571_v27, %v2552_v36 }
 0x54f   : > { %2617 = vst.msk [vmem:[#allocation3 + $0x118] sm:$0xff] %vm1123_vm1, %v2601_v14  ;;  %v2399_v36 = vmul.f32 1.442695, %v8676_v61  ;;  %v8677_v14 = vld [vmem:[#allocation52_spill] sm:$0xff] }
 0x550   : > { %2616 = vst.msk [vmem:[#allocation3 + $0x110] sm:$0xff] %vm1123_vm1, %v2600_v19  ;;  %v8679_v1 = vsub.f32 %v8677_v14, %v8678_v28  ;;  %v2549_v14 = vld [vmem:[#allocation3 + $0x178] sm:$0xff] }
 0x552   : > { %v2397_v19 = vmul.f32 1.442695, %v8679_v1  ;;  %v2548_v1 = vld [vmem:[#allocation3 + $0x170] sm:$0xff] }
 0x555   : > { %v2577_v4 = vpop.xlane.xlu0 %2576 }
 0x556   : > { %v2603_v42 = vadd.f32 %v2577_v4, %v2555_v29  ;;  %v8680_v29 = vld [vmem:[#allocation50_spill] sm:$0xff]  ;;  %v8681_v4 = vld [vmem:[#allocation51_spill] sm:$0xff] }
 0x557   : > { %v8682_v13 = vsub.f32 %v8680_v29, %v8681_v4 }
 0x558   : > { %2619 = vst.msk [vmem:[#allocation3 + $0x128] sm:$0xff] %vm1123_vm1, %v2603_v42 }
 0x559   : > { %v2395_v62 = vmul.f32 1.442695, %v8682_v13 }
 0x55b   : > { %2697 = vmatmul.bf16.gmra.mxu2 %v2653_v48  ;;  %v8667_v48 = vsub.f32 %v8666_v30, %v7021_v56  ;;  %v2557_v56 = vmul.f32 %v7301_v44, %v2541_v52  ;;  %v8684_v30 = vld [vmem:[#allocation8_spill] sm:$0xff] }
 0x55c   : > { %v2569_v55 = vpop.xlane.xlu1 %2568 }
 0x55d   : > { %v2599_v21 = vadd.f32 %v2569_v55, %v2551_v38  ;;  %v2393_v22 = vmul.f32 1.442695, %v8667_v48  ;;  %v2543_v38 = vld [vmem:[#allocation3 + $0x148] sm:$0xff] }
 0x55f   : > { %2615 = vst.msk [vmem:[#allocation3 + $0x108] sm:$0xff] %vm1123_vm1, %v2599_v21  ;;  %5171 = vpow2.f32 %v2393_v22 }
 0x560   : > { %5173 = vpow2.f32 %v2391_v51  ;;  %v8688_v51 = vsub.f32 %v8686_v16, %v8687_v31 }
 0x561   : > { %5175 = vpow2.f32 %v2389_v50  ;;  %v2546_v50 = vld [vmem:[#allocation3 + $0x160] sm:$0xff] }
 0x562   : > { %5177 = vpow2.f32 %v2399_v36  ;;  %v2401_v25 = vmul.f32 1.442695, %v8688_v51 }
 0x563   : > { %5179 = vpow2.f32 %v2397_v19 }
 0x564   : > { %v2575_v46 = vpop.xlane.xlu1 %2574  ;;  %5181 = vpow2.f32 %v2395_v62 }
 0x565   : > { %v2602_v8 = vadd.f32 %v2575_v46, %v2554_v53  ;;  %v7317_v3 = vpop.eup %5171  ;;  %v8683_v46 = vld [vmem:[#allocation45_spill] sm:$0xff] }
 0x566   : > { %v7323_v42 = vpop.eup %5173  ;;  %v2560_v34 = vmul.f32 %v7317_v3, %v2544_v57  ;;  %v8685_v48 = vsub.f32 %v8683_v46, %v8684_v30  ;;  %v8689_v46 = vld [vmem:[#allocation18_spill] sm:$0xff] }
 0x567   : > { %2618 = vst.msk [vmem:[#allocation3 + $0x120] sm:$0xff] %vm1123_vm1, %v2602_v8  ;;  %v7326_v55 = vpop.eup %5175  ;;  %v2559_v21 = vmul.f32 %v7323_v42, %v2543_v38  ;;  %v5252_v38 = vld [vmem:[%s5560_s19] sm:$0xff] }
 0x568   : > { %v2558_v40 = vmul.f32 %v7326_v55, %v2542_v26  ;;  %v2403_v22 = vmul.f32 1.442695, %v8685_v48  ;;  %v7334_v23 = vpop.eup %5177  ;;  %v7361_v26 = vperm.slane %v5252_v38, 3 }
 0x569   : > { %v7340_v5 = vpop.eup %5179 }
 0x56a   : > { %v7343_v52 = vpop.eup %5181  ;;  %5183 = vpow2.f32 %v2403_v22 }
 0x56b   : > { %5185 = vpow2.f32 %v2401_v25 }
 0x56c   : > { %v2581_v6 = vpop.xlane.xlu1 %2580  ;;  %v2579_v0 = vpop.xlane.xlu2 %2578 }
 0x56d   : > { %v2605_v7 = vadd.f32 %v2581_v6, %v2557_v56  ;;  %v2604_v27 = vadd.f32 %v2579_v0, %v2556_v2  ;;  %v2563_v56 = vmul.f32 %v7334_v23, %v2547_v11  ;;  %v2562_v2 = vmul.f32 %v7340_v5, %v2546_v50 }
 0x56e   : > { %v2561_v6 = vmul.f32 %v7343_v52, %v2545_v9 }
 0x56f   : > { %2621 = vst.msk [vmem:[#allocation3 + $0x138] sm:$0xff] %vm1123_vm1, %v2605_v7 }
 0x570   : > { %2620 = vst.msk [vmem:[#allocation3 + $0x130] sm:$0xff] %vm1123_vm1, %v2604_v27  ;;  %v7350_v27 = vpop.eup %5183 }
 0x571   : > { %v7353_v28 = vpop.eup %5185  ;;  %v2565_v19 = vmul.f32 %v7350_v27, %v2549_v14 }
 0x572   : > { %v2564_v29 = vmul.f32 %v7353_v28, %v2548_v1  ;;  %v8691_v1 = vld [vmem:[#allocation16_spill] sm:$0xff] }
 0x574   : > { %v2587_v20 = vpop.xlane.xlu1 %2586  ;;  %v2585_v33 = vpop.xlane.xlu2 %2584 }
 0x575   : > { %v2583_v49 = vpop.xlane.xlu0 %2582  ;;  %v2608_v47 = vadd.f32 %v2587_v20, %v2560_v34  ;;  %v2607_v53 = vadd.f32 %v2585_v33, %v2559_v21 }
 0x576   : > { %v2606_v8 = vadd.f32 %v2583_v49, %v2558_v40 }
 0x577   : > { %2624 = vst.msk [vmem:[#allocation3 + $0x150] sm:$0xff] %vm1123_vm1, %v2608_v47 }
 0x578   : > { %2622 = vst.msk [vmem:[#allocation3 + $0x140] sm:$0xff] %vm1123_vm1, %v2606_v8 }
 0x579   : > { %2623 = vst.msk [vmem:[#allocation3 + $0x148] sm:$0xff] %vm1123_vm1, %v2607_v53 }
 0x57c   : > { %v2593_v0 = vpop.xlane.xlu1 %2592  ;;  %v2591_v24 = vpop.xlane.xlu2 %2590 }
 0x57d   : > { %v2589_v15 = vpop.xlane.xlu0 %2588  ;;  %v2611_v61 = vadd.f32 %v2593_v0, %v2563_v56  ;;  %v2610_v36 = vadd.f32 %v2591_v24, %v2562_v2 }
 0x57e   : > { %v2609_v7 = vadd.f32 %v2589_v15, %v2561_v6 }
 0x57f   : > { %2627 = vst.msk [vmem:[#allocation3 + $0x168] sm:$0xff] %vm1123_vm1, %v2611_v61 }
 0x580   : > { %2625 = vst.msk [vmem:[#allocation3 + $0x158] sm:$0xff] %vm1123_vm1, %v2609_v7  ;;  %v8690_v7 = vld [vmem:[#allocation15_spill] sm:$0xff] }
 0x581   : > { %2626 = vst.msk [vmem:[#allocation3 + $0x160] sm:$0xff] %vm1123_vm1, %v2610_v36 }
 0x584   : > { %v2597_v4 = vpop.xlane.xlu2 %2596 }
 0x585   : > { %v2595_v13 = vpop.xlane.xlu0 %2594  ;;  %v2613_v62 = vadd.f32 %v2597_v4, %v2565_v19 }
 0x586   : > { %v2612_v57 = vadd.f32 %v2595_v13, %v2564_v29 }
 0x587   : > { %2629 = vst.msk [vmem:[#allocation3 + $0x178] sm:$0xff] %vm1123_vm1, %v2613_v62 }
 0x588   : > { %2628 = vst.msk [vmem:[#allocation3 + $0x170] sm:$0xff] %vm1123_vm1, %v2612_v57  ;;  %v8692_v57 = vld [vmem:[#allocation17_spill] sm:$0xff] }
 0x58c   : > { %v4958_v34 = vpop.permute.xlu2 %4957 }
 0x58d   : > { %v4959_v21 = vunpack.i.l.bf16 %v4958_v34  ;;  %v4960_v48 = vunpack.i.h.bf16 %v4958_v34 }
 0x58f   : > { %v2951_v40 = vadd.f32 %v4959_v21, %v7361_v26  ;;  %v2952_v50 = vadd.f32 %v4960_v48, %v7361_v26  ;;  %v8695_v48 = vld [vmem:[#allocation21_spill] sm:$0xff] }
 0x591   : > { %v2967_v20 = vmul.f32 0.2, %v2951_v40  ;;  %v2968_v61 = vmul.f32 0.2, %v2952_v50 }
 0x593   : > { %v2983_v33 = vmax.f32 %v2951_v40, %v2967_v20  ;;  %v2984_v34 = vmax.f32 %v2952_v50, %v2968_v61 }
 0x594   : > { %v4952_v49 = vpop.permute.xlu1 %4951 }
 0x595   : > { %v4954_v47 = vunpack.i.h.bf16 %v4952_v49  ;;  %v4953_v53 = vunpack.i.l.bf16 %v4952_v49  ;;  %v7365_v30 = vadd.f32 %v2983_v33, %v8689_v46  ;;  %v8693_v33 = vld [vmem:[#allocation22_spill] sm:$0xff] }
 0x597   : > { %v2950_v22 = vadd.f32 %v4954_v47, %v7361_v26  ;;  %v2949_v8 = vadd.f32 %v4953_v53, %v7361_v26  ;;  %3034 = vmax.xlane.f32.xlu2 %v7365_v30  ;;  %v8694_v47 = vld [vmem:[#allocation19_spill] sm:$0xff] }
 0x598   : > { %v4964_v16 = vpop.permute.xlu0 %4963  ;;  %v7391_v53 = vadd.f32 %v2984_v34, %v8694_v47  ;;  %v8715_v47 = vld [vmem:[#allocation29_spill] sm:$0xff] }
 0x599   : > { %v2966_v31 = vmul.f32 0.2, %v2950_v22  ;;  %v2965_v51 = vmul.f32 0.2, %v2949_v8  ;;  %v4966_v25 = vunpack.i.h.bf16 %v4964_v16  ;;  %v4965_v11 = vunpack.i.l.bf16 %v4964_v16  ;;  %v8696_v16 = vld [vmem:[#allocation25_spill] sm:$0xff] }
 0x59b   : > { %v2982_v9 = vmax.f32 %v2950_v22, %v2966_v31  ;;  %v2981_v56 = vmax.f32 %v2949_v8, %v2965_v51  ;;  %v2954_v2 = vadd.f32 %v4966_v25, %v7361_v26  ;;  %v2953_v6 = vadd.f32 %v4965_v11, %v7361_v26  ;;  %v8697_v51 = vld [vmem:[#allocation9_spill] sm:$0xff]  ;;  %v8698_v25 = vld [vmem:[#allocation14_spill] sm:$0xff] }
 0x59c   : > { %v4969_v0 = vpop.permute.xlu1 %4968  ;;  %v8699_v11 = vld [vmem:[#allocation13_spill] sm:$0xff] }
 0x59d   : > { %v2970_v24 = vmul.f32 0.2, %v2954_v2  ;;  %v4970_v15 = vunpack.i.l.bf16 %v4969_v0  ;;  %v2969_v36 = vmul.f32 0.2, %v2953_v6  ;;  %v7374_v14 = vadd.f32 %v2982_v9, %v8690_v7  ;;  %v7440_v7 = vld [vmem:[#allocation2 + $0x1a8] sm:$0xff] }
 0x59e   : > { %v7377_v19 = vadd.f32 %v2981_v56, %v8691_v1  ;;  %v4971_v13 = vunpack.i.h.bf16 %v4969_v0  ;;  %v8700_v56 = vld [vmem:[#allocation28_spill] sm:$0xff]  ;;  %v7432_v0 = vld [vmem:[#allocation2 + $0x180] sm:$0xff] }
 0x59f   : > { %v2986_v29 = vmax.f32 %v2954_v2, %v2970_v24  ;;  %v2955_v4 = vadd.f32 %v4970_v15, %v7361_v26  ;;  %3032 = vmax.xlane.f32.xlu1 %v7374_v14  ;;  %v2985_v21 = vmax.f32 %v2953_v6, %v2969_v36  ;;  %v7430_v6 = vld [vmem:[#allocation2 + $0x188] sm:$0xff] }
 0x5a0   : > { %3030 = vmax.xlane.f32.xlu0 %v7377_v19  ;;  %v2956_v40 = vadd.f32 %v4971_v13, %v7361_v26 }
 0x5a1   : > { %v2971_v62 = vmul.f32 0.2, %v2955_v4  ;;  %v7383_v38 = vadd.f32 %v2986_v29, %v8692_v57  ;;  %v7388_v49 = vadd.f32 %v2985_v21, %v8693_v33  ;;  %v7458_v57 = vld [vmem:[#allocation2 + $0x198] sm:$0xff]  ;;  %v7467_v33 = vld [vmem:[#allocation2 + $0x1b0] sm:$0xff] }
 0x5a2   : > { %v2972_v46 = vmul.f32 0.2, %v2956_v40 }
 0x5a3   : > { %3040 = vmax.xlane.f32.xlu2 %v7383_v38  ;;  %v2987_v20 = vmax.f32 %v2955_v4, %v2971_v62  ;;  %v7456_v62 = vld [vmem:[#allocation2 + $0x1a0] sm:$0xff] }
 0x5a4   : > { %v2988_v8 = vmax.f32 %v2956_v40, %v2972_v46  ;;  %v7413_v50 = vpop.permute.xlu1 %4973 }
 0x5a5   : > { %v7396_v22 = vadd.f32 %v2987_v20, %v8695_v48 }
 0x5a6   : > { %v7400_v31 = vadd.f32 %v2988_v8, %v8696_v16  ;;  %v7485_v16 = vld [vmem:[#allocation2 + $0x1b8] sm:$0xff] }
 0x5a7   : > { %3038 = vmax.xlane.f32.xlu1 %v7388_v49 }
 0x5a8   : > { %3036 = vmax.xlane.f32.xlu0 %v7391_v53 }
 0x5ab   : > { %3042 = vmax.xlane.f32.xlu2 %v7396_v22 }
 0x5b3   : > { %3044 = vmax.xlane.f32.xlu2 %v7400_v31 }
 0x5bc   : > { %2731 = vperm.xlu0 %4977, %v7281_v12  }
 0x5c4   : > { %2741 = vperm.xlu0 %4977, %v7264_v10   ;;  %v4975_v10 = vunpack.i.l.bf16 %v7413_v50 }
 0x5c6   : > { %v2959_v12 = vadd.f32 %v4975_v10, %v7361_v26 }
 0x5c8   : > { %v2975_v9 = vmul.f32 0.2, %v2959_v12 }
 0x5cb   : > { %4979 = vperm.xlu2 %4955, %v8697_v51  }
 0x5cc   : > { %2756 = vperm.xlu0 %4977, %v7307_v37   ;;  %v2991_v37 = vmax.f32 %v2959_v12, %v2975_v9  ;;  %v4976_v9 = vunpack.i.h.bf16 %v7413_v50 }
 0x5ce   : > { %v7418_v2 = vadd.f32 %v2991_v37, %v8700_v56 }
 0x5d3   : > { %4984 = vperm.xlu2 %4955, %v8698_v25  }
 0x5d4   : > { %2771 = vperm.xlu0 %4977, %v7323_v42   ;;  %v7421_v42 = vld [vmem:[#allocation2 + $0x190] sm:$0xff] }
 0x5db   : > { %4989 = vperm.xlu2 %4955, %v8699_v11  }
 0x5dc   : > { %2786 = vperm.xlu0 %4977, %v7340_v5  }
 0x5e3   : > { %4993 = vset.pattern.permute.xlu2 %v8598_v60 }
 0x5e4   : > { %2801 = vperm.xlu0 %4977, %v7350_v27  }
 0x604   : > { %3050 = vmax.xlane.f32.xlu2 %v7418_v2 }
 0x60a   : > { %v3035_v5 = vpop.xlane.xlu2 %3034 }
 0x60b   : > { %v7424_v60 = vmax.f32 %v7421_v42, %v3035_v5 }
 0x60d   : > { %3353 = vst.msk [vmem:[#allocation2 + $0x190] sm:$0xff] %vm1123_vm1, %v7424_v60 }
 0x612   : > { %v3033_v24 = vpop.xlane.xlu1 %3032 }
 0x613   : > { %v3031_v15 = vpop.xlane.xlu0 %3030  ;;  %v7435_v61 = vmax.f32 %v7430_v6, %v3033_v24 }
 0x614   : > { %v7438_v36 = vmax.f32 %v7432_v0, %v3031_v15 }
 0x615   : > { %3352 = vst.msk [vmem:[#allocation2 + $0x188] sm:$0xff] %vm1123_vm1, %v7435_v61 }
 0x616   : > { %3128 = vperm.xlu0 %4977, %v7438_v36   ;;  %v3041_v29 = vpop.xlane.xlu2 %3040  ;;  %3351 = vst.msk [vmem:[#allocation2 + $0x180] sm:$0xff] %vm1123_vm1, %v7438_v36 }
 0x617   : > { %v7450_v4 = vmax.f32 %v7440_v7, %v3041_v29 }
 0x619   : > { %3356 = vst.msk [vmem:[#allocation2 + $0x1a8] sm:$0xff] %vm1123_vm1, %v7450_v4 }
 0x61a   : > { %v3039_v34 = vpop.xlane.xlu1 %3038 }
 0x61b   : > { %v3037_v21 = vpop.xlane.xlu0 %3036  ;;  %v7461_v40 = vmax.f32 %v7456_v62, %v3039_v34 }
 0x61c   : > { %v7464_v20 = vmax.f32 %v7458_v57, %v3037_v21  ;;  %2736 = vperm.xlu2 %4993, %v7266_v63   ;;  %v7482_v63 = vpop.f32.mrf.mxu2  ;;  %v2960_v21 = vadd.f32 %v4976_v9, %v7361_v26 }
 0x61d   : > { %3355 = vst.msk [vmem:[#allocation2 + $0x1a0] sm:$0xff] %vm1123_vm1, %v7461_v40 }
 0x61e   : > { %v3043_v46 = vpop.xlane.xlu2 %3042  ;;  %3354 = vst.msk [vmem:[#allocation2 + $0x198] sm:$0xff] %vm1123_vm1, %v7464_v20 }
 0x61f   : > { %v7476_v48 = vmax.f32 %v7467_v33, %v3043_v46 }
 0x621   : > { %3357 = vst.msk [vmem:[#allocation2 + $0x1b0] sm:$0xff] %vm1123_vm1, %v7476_v48 }
 0x624   : > { %2751 = vperm.xlu2 %4993, %v7275_v43   ;;  %v2665_v11 = vpop.f32.mrf.mxu2 }
 0x625   : > { %v2837_v15 = vsel %vm7495_vm8, %v2665_v11, 0.0 }
 0x626   : > { %v3045_v51 = vpop.xlane.xlu2 %3044 }
 0x627   : > { %v7488_v25 = vmax.f32 %v7485_v16, %v3045_v51 }
 0x629   : > { %3358 = vst.msk [vmem:[#allocation2 + $0x1b8] sm:$0xff] %vm1123_vm1, %v7488_v25 }
 0x62c   : > { %2766 = vperm.xlu2 %4993, %v7326_v55  }
 0x62e   : > { %v2732_v43 = vpop.permute.xlu0 %2731  ;;  %v4980_v12 = vpop.permute.xlu2 %4979 }
 0x62f   : > { %v2805_v37 = vsel %vm7495_vm8, %v2732_v43, 1.0  ;;  %v4982_v56 = vunpack.i.h.bf16 %v4980_v12  ;;  %v4981_v5 = vunpack.i.l.bf16 %v4980_v12  ;;  %v2976_v12 = vmul.f32 0.2, %v2960_v21 }
 0x630   : > { %v2821_v24 = vmul.f32 %v2805_v37, %v7172_v54  ;;  %v8704_v37 = vld [vmem:[#allocation20_spill] sm:$0xff] }
 0x631   : > { %v2957_v55 = vadd.f32 %v4981_v5, %v7361_v26  ;;  %v2958_v34 = vadd.f32 %v4982_v56, %v7361_v26  ;;  %v8705_v5 = vld [vmem:[#allocation10_spill] sm:$0xff]  ;;  %v2992_v9 = vmax.f32 %v2960_v21, %v2976_v12  ;;  %v7537_v21 = vpop.f32.mrf.mxu1  ;;  %v1258_v12 = vpop.f32.mrf.mxu0 }
 0x632   : > { %v7506_v29 = vadd.f32 %v2837_v15, %v2821_v24  ;;  %v8706_v15 = vld [vmem:[#allocation23_spill] sm:$0xff] }
 0x633   : > { %v2973_v46 = vmul.f32 0.2, %v2957_v55  ;;  %v2974_v51 = vmul.f32 0.2, %v2958_v34 }
 0x634   : > { %8703 = vst [vmem:[#allocation39_spill] sm:$0xff] %v7506_v29  ;;  %2781 = vperm.xlu2 %4993, %v7343_v52  }
 0x635   : > { %v2989_v50 = vmax.f32 %v2957_v55, %v2973_v46  ;;  %v2990_v56 = vmax.f32 %v2958_v34, %v2974_v51 }
 0x636   : > { %v2742_v43 = vpop.permute.xlu0 %2741 }
 0x637   : > { %v2807_v54 = vsel %vm7495_vm8, %v2742_v43, 1.0  ;;  %v7514_v11 = vadd.f32 %v2989_v50, %v8704_v37  ;;  %v7522_v55 = vadd.f32 %v2990_v56, %v8706_v15  ;;  %v8707_v43 = vld [vmem:[#allocation24_spill] sm:$0xff] }
 0x638   : > { %v7517_v24 = vmul.f32 %v2807_v54, %v8705_v5  ;;  %v7527_v8 = vadd.f32 %v2992_v9, %v8707_v43  ;;  %v8708_v50 = vld [vmem:[#allocation12_spill] sm:$0xff]  ;;  %v8711_v5 = vld [vmem:[#allocation37_spill] sm:$0xff]  ;;  %v1409_v9 = vsel %vm1262_vm2, %v1258_v12, 0.0 }
 0x639   : > { %3046 = vmax.xlane.f32.xlu1 %v7514_v11  ;;  %v1279_v54 = vld [vmem:[#allocation4 + $0x28] sm:$0xff]  ;;  %v1377_v56 = vsel %vm1262_vm2, %v8711_v5, 1.0 }
 0x63c   : > { %2796 = vperm.xlu2 %4993, %v7353_v28  }
 0x63e   : > { %v2757_v52 = vpop.permute.xlu0 %2756 }
 0x63f   : > { %v2810_v46 = vsel %vm7495_vm8, %v2757_v52, 1.0  ;;  %v1393_v52 = vmul.f32 %v1377_v56, %v1279_v54 }
 0x640   : > { %v7530_v37 = vmul.f32 %v2810_v46, %v8708_v50  ;;  %3048 = vmax.xlane.f32.xlu0 %v7522_v55  ;;  %v2098_v46 = vsel %vm7074_vm5, %v7210_v58, 1.0 }
 0x641   : > { %3052 = vmax.xlane.f32.xlu1 %v7527_v8  ;;  %v1425_v43 = vadd.f32 %v1409_v9, %v1393_v52 }
 0x642   : > { %8709 = vst [vmem:[#allocation34_spill] sm:$0xff] %v7530_v37 }
 0x644   : > { %3138 = vperm.xlu2 %4993, %v7424_v60  }
 0x646   : > { %v2772_v28 = vpop.permute.xlu0 %2771 }
 0x647   : > { %v2813_v34 = vsel %vm7495_vm8, %v2772_v28, 1.0  ;;  %v1979_v28 = vpop.f32.mrf.mxu1 }
 0x648   : > { %v7540_v51 = vmul.f32 %v2813_v34, %v7158_v59  ;;  %v2114_v34 = vmul.f32 %v2098_v46, %v1425_v43  ;;  %v2130_v12 = vsel %vm7074_vm5, %v1979_v28, 0.0  ;;  %v7572_v43 = vld [vmem:[#allocation2 + $0x1d0] sm:$0xff] }
 0x64a   : > { %8710 = vst [vmem:[#allocation35_spill] sm:$0xff] %v7540_v51  ;;  %v2146_v54 = vadd.f32 %v2130_v12, %v2114_v34  ;;  %v8713_v12 = vld [vmem:[#allocation26_spill] sm:$0xff]  ;;  %v2710_v51 = vld [vmem:[#allocation4 + $0x50] sm:$0xff] }
 0x64c   : > { %3148 = vperm.xlu2 %4993, %v7461_v40  }
 0x64e   : > { %v2787_v15 = vpop.permute.xlu0 %2786 }
 0x64f   : > { %v2816_v59 = vsel %vm7495_vm8, %v2787_v15, 1.0 }
 0x650   : > { %v7554_v50 = vmul.f32 %v2816_v59, %v7176_v39  ;;  %v4985_v39 = vpop.permute.xlu2 %4984 }
 0x651   : > { %v4986_v9 = vunpack.i.l.bf16 %v4985_v39  ;;  %v4987_v1 = vunpack.i.h.bf16 %v4985_v39 }
 0x653   : > { %v2961_v15 = vadd.f32 %v4986_v9, %v7361_v26 }
 0x654   : > { %3153 = vperm.xlu2 %4993, %v7450_v4   ;;  %3158 = vperm.xlu0 %4977, %v7476_v48  }
 0x655   : > { %v2977_v46 = vmul.f32 0.2, %v2961_v15 }
 0x656   : > { %v2802_v5 = vpop.permute.xlu0 %2801 }
 0x657   : > { %v2819_v58 = vsel %vm7495_vm8, %v2802_v5, 1.0  ;;  %v2993_v34 = vmax.f32 %v2961_v15, %v2977_v46  ;;  %v2668_v5 = vpop.f32.mrf.mxu2  ;;  %v2708_v15 = vld [vmem:[#allocation4 + $0x58] sm:$0xff] }
 0x658   : > { %v7562_v56 = vmul.f32 %v2819_v58, %v2146_v54  ;;  %v7567_v52 = vpop.permute.xlu2 %4989 }
 0x659   : > { %v4992_v59 = vunpack.i.h.bf16 %v7567_v52  ;;  %v7584_v54 = vadd.f32 %v2993_v34, %v8713_v12  ;;  %v4991_v35 = vunpack.i.l.bf16 %v7567_v52 }
 0x65a   : > { %8712 = vst [vmem:[#allocation33_spill] sm:$0xff] %v7562_v56  ;;  %2726 = vperm.xlu1 %4994, %v7257_v32   ;;  %v2836_v56 = vsel %vm7495_vm8, %v7482_v63, 0.0 }
 0x65b   : > { %v2964_v32 = vadd.f32 %v4992_v59, %v7361_v26 }
 0x662   : > { %2746 = vperm.xlu1 %4994, %v7292_v17  }
 0x66a   : > { %2761 = vperm.xlu1 %4994, %v7301_v44  }
 0x672   : > { %2776 = vperm.xlu1 %4994, %v7317_v3   ;;  %v2980_v3 = vmul.f32 0.2, %v2964_v32 }
 0x674   : > { %v2996_v9 = vmax.f32 %v2964_v32, %v2980_v3 }
 0x676   : > { %v7595_v34 = vadd.f32 %v2996_v9, %v8715_v47  ;;  %v1999_v9 = vld [vmem:[#allocation4 + $0x78] sm:$0xff] }
 0x677   : > { %v3051_v28 = vpop.xlane.xlu2 %3050 }
 0x678   : > { %v7576_v17 = vmax.f32 %v7572_v43, %v3051_v28  ;;  %v2838_v28 = vsel %vm7495_vm8, %v2668_v5, 0.0  ;;  %v2097_v5 = vsel %vm7074_vm5, %v7222_v41, 1.0 }
 0x67a   : > { %3361 = vst.msk [vmem:[#allocation2 + $0x1d0] sm:$0xff] %vm1123_vm1, %v7576_v17  ;;  %2791 = vperm.xlu1 %4994, %v7334_v23  }
 0x67e   : > { %3054 = vmax.xlane.f32.xlu0 %v7584_v54 }
 0x67f   : > { %v2737_v58 = vpop.permute.xlu2 %2736 }
 0x680   : > { %v2806_v46 = vsel %vm7495_vm8, %v2737_v58, 1.0 }
 0x681   : > { %v2822_v59 = vmul.f32 %v2806_v46, %v2708_v15  ;;  %v2113_v15 = vmul.f32 %v2097_v5, %v1999_v9  ;;  %v2129_v46 = vsel %vm7074_vm5, %v7537_v21, 0.0  ;;  %v2962_v5 = vadd.f32 %v4987_v1, %v7361_v26  ;;  %v7633_v9 = vld [vmem:[#allocation2 + $0x1d8] sm:$0xff] }
 0x682   : > { %3133 = vperm.xlu1 %4994, %v7435_v61  }
 0x683   : > { %v7592_v23 = vadd.f32 %v2838_v28, %v2822_v59  ;;  %v2145_v59 = vadd.f32 %v2129_v46, %v2113_v15  ;;  %v2978_v39 = vmul.f32 0.2, %v2962_v5 }
 0x685   : > { %8714 = vst [vmem:[#allocation32_spill] sm:$0xff] %v7592_v23 }
 0x686   : > { %3060 = vmax.xlane.f32.xlu0 %v7595_v34 }
 0x687   : > { %v7598_v12 = vpop.permute.xlu2 %2751 }
 0x68a   : > { %3143 = vperm.xlu1 %4994, %v7464_v20  }
 0x68f   : > { %v7601_v32 = vpop.permute.xlu2 %2766 }
 0x690   : > { %8716 = vst [vmem:[#allocation36_spill] sm:$0xff] %v7601_v32 }
 0x692   : > { %3163 = vperm.xlu1 %4994, %v7488_v25  }
 0x697   : > { %v2782_v3 = vpop.permute.xlu2 %2781 }
 0x698   : > { %v2815_v58 = vsel %vm7495_vm8, %v2782_v3, 1.0  ;;  %v7620_v3 = vld [vmem:[#allocation2 + $0x1c0] sm:$0xff] }
 0x699   : > { %v7610_v47 = vmul.f32 %v2815_v58, %v7206_v18  ;;  %v3129_v18 = vpop.permute.xlu0 %3128 }
 0x69a   : > { %3178 = vperm.xlu0 %4977, %v7576_v17  }
 0x69b   : > { %8717 = vst [vmem:[#allocation38_spill] sm:$0xff] %v7610_v47 }
 0x69f   : > { %v2797_v28 = vpop.permute.xlu2 %2796 }
 0x6a0   : > { %v2818_v27 = vsel %vm7495_vm8, %v2797_v28, 1.0  ;;  %v2994_v28 = vmax.f32 %v2962_v5, %v2978_v39  ;;  %v7654_v5 = vpop.f32.mrf.mxu2 }
 0x6a1   : > { %v7618_v41 = vmul.f32 %v2818_v27, %v2145_v59  ;;  %v7631_v27 = vld [vmem:[#allocation2 + $0x1c8] sm:$0xff] }
 0x6a3   : > { %8718 = vst [vmem:[#allocation41_spill] sm:$0xff] %v7618_v41 }
 0x6ac   : > { %v3047_v58 = vpop.xlane.xlu1 %3046 }
 0x6ad   : > { %v7623_v44 = vmax.f32 %v7620_v3, %v3047_v58 }
 0x6af   : > { %3359 = vst.msk [vmem:[#allocation2 + $0x1c0] sm:$0xff] %vm1123_vm1, %v7623_v44  ;;  %3168 = vperm.xlu2 %4993, %v7623_v44  }
 0x6b3   : > { %v3049_v15 = vpop.xlane.xlu0 %3048 }
 0x6b4   : > { %v7636_v46 = vmax.f32 %v7631_v27, %v3049_v15  ;;  %v3053_v59 = vpop.xlane.xlu1 %3052  ;;  %v8719_v15 = vld [vmem:[#allocation30_spill] sm:$0xff] }
 0x6b5   : > { %v7639_v1 = vmax.f32 %v7633_v9, %v3053_v59  ;;  %v7651_v13 = vadd.f32 %v2994_v28, %v8719_v15  ;;  %v2706_v59 = vld [vmem:[#allocation4 + $0x30] sm:$0xff]  ;;  %v2963_v28 = vadd.f32 %v4991_v35, %v7361_v26  ;;  %v2673_v15 = vpop.f32.mrf.mxu2 }
 0x6b6   : > { %3360 = vst.msk [vmem:[#allocation2 + $0x1c8] sm:$0xff] %vm1123_vm1, %v7636_v46  ;;  %v2840_v52 = vsel %vm7495_vm8, %v2673_v15, 0.0 }
 0x6b7   : > { %3362 = vst.msk [vmem:[#allocation2 + $0x1d8] sm:$0xff] %vm1123_vm1, %v7639_v1  ;;  %3173 = vperm.xlu2 %4993, %v7636_v46  }
 0x6bc   : > { %3056 = vmax.xlane.f32.xlu1 %v7651_v13 }
 0x6cc   : > { %v2727_v39 = vpop.permute.xlu1 %2726 }
 0x6cd   : > { %v2804_v58 = vsel %vm7495_vm8, %v2727_v39, 1.0  ;;  %v2979_v39 = vmul.f32 0.2, %v2963_v28 }
 0x6ce   : > { %v2820_v21 = vmul.f32 %v2804_v58, %v2706_v59 }
 0x6cf   : > { %v2995_v63 = vmax.f32 %v2963_v28, %v2979_v39  ;;  %v3081_v39 = vsub.f32 %v7458_v57, %v7464_v20 }
 0x6d0   : > { %v7662_v41 = vadd.f32 %v2836_v56, %v2820_v21  ;;  %v8721_v21 = vld [vmem:[#allocation27_spill] sm:$0xff] }
 0x6d1   : > { %v7675_v35 = vadd.f32 %v2995_v63, %v8721_v21  ;;  %v3100_v32 = vmul.f32 1.442695, %v3081_v39 }
 0x6d4   : > { %v2747_v47 = vpop.permute.xlu1 %2746 }
 0x6d5   : > { %v2808_v37 = vsel %vm7495_vm8, %v2747_v47, 1.0  ;;  %3183 = vperm.xlu1 %4994, %v7639_v1   ;;  %v7680_v47 = vpop.permute.xlu0 %3158 }
 0x6d6   : > { %v2824_v23 = vmul.f32 %v2808_v37, %v2710_v51  ;;  %v3026_v37 = vld [vmem:[#allocation2 + $0x1e0] sm:$0xff]  ;;  %v3206_v51 = vsub.f32 %v7377_v19, %v3129_v18 }
 0x6d8   : > { %v7670_v58 = vadd.f32 %v2840_v52, %v2824_v23  ;;  %v3222_v52 = vmul.f32 1.442695, %v3206_v51 }
 0x6da   : > { %8720 = vst [vmem:[#allocation43_spill] sm:$0xff] %v7670_v58  ;;  %v7689_v58 = vld [vmem:[#allocation2 + $0x1f8] sm:$0xff]  ;;  %5187 = vpow2.f32 %v3222_v52 }
 0x6dc   : > { %v7672_v56 = vpop.permute.xlu1 %2761 }
 0x6e0   : > { %3058 = vmax.xlane.f32.xlu2 %v7675_v35  ;;  %v7699_v57 = vpop.eup %5187 }
 0x6e4   : > { %v7678_v26 = vpop.permute.xlu1 %2776 }
 0x6ec   : > { %v7682_v59 = vpop.permute.xlu1 %2791 }
 0x6ed   : > { %8722 = vst [vmem:[#allocation40_spill] sm:$0xff] %v7682_v59  ;;  %v3139_v59 = vpop.permute.xlu2 %3138 }
 0x6f1   : > { %v3055_v15 = vpop.xlane.xlu0 %3054 }
 0x6f2   : > { %v3074_v23 = vmax.f32 %v3026_v37, %v3055_v15 }
 0x6f4   : > { %3363 = vst.msk [vmem:[#allocation2 + $0x1e0] sm:$0xff] %vm1123_vm1, %v3074_v23  ;;  %3188 = vperm.xlu0 %4977, %v3074_v23   ;;  %v3134_v28 = vpop.permute.xlu1 %3133 }
 0x6f5   : > { %v3207_v63 = vsub.f32 %v7374_v14, %v3134_v28  ;;  %v8723_v28 = vsub.f32 %v7440_v7, %v7450_v4 }
 0x6f7   : > { %v3224_v21 = vmul.f32 1.442695, %v3207_v63  ;;  %v3104_v39 = vmul.f32 1.442695, %v8723_v28  ;;  %v3208_v63 = vsub.f32 %v7365_v30, %v3139_v59 }
 0x6f9   : > { %5189 = vpow2.f32 %v3224_v21  ;;  %v3061_v19 = vpop.xlane.xlu0 %3060  ;;  %v3149_v21 = vpop.permute.xlu2 %3148 }
 0x6fa   : > { %v7692_v18 = vmax.f32 %v7689_v58, %v3061_v19  ;;  %5191 = vpow2.f32 %v3100_v32 }
 0x6fb   : > { %5193 = vpow2.f32 %v3104_v39 }
 0x6fc   : > { %3366 = vst.msk [vmem:[#allocation2 + $0x1f8] sm:$0xff] %vm1123_vm1, %v7692_v18  ;;  %3203 = vperm.xlu2 %4993, %v7692_v18   ;;  %v3144_v14 = vpop.permute.xlu1 %3143 }
 0x6fd   : > { %v3209_v15 = vsub.f32 %v7391_v53, %v3144_v14  ;;  %v3085_v53 = vsub.f32 %v7485_v16, %v7488_v25  ;;  %v3226_v14 = vmul.f32 1.442695, %v3208_v63  ;;  %v8724_v16 = vsub.f32 %v7572_v43, %v7576_v17 }
 0x6fe   : > { %v3090_v63 = vsub.f32 %v3026_v37, %v3074_v23  ;;  %v3212_v37 = vsub.f32 %v7396_v22, %v7680_v47 }
 0x6ff   : > { %v7701_v20 = vpop.eup %5189  ;;  %v3228_v32 = vmul.f32 1.442695, %v3209_v15  ;;  %v3108_v51 = vmul.f32 1.442695, %v3085_v53  ;;  %v3114_v25 = vmul.f32 1.442695, %v8724_v16 }
 0x700   : > { %v3367_v52 = vpack.c.bf16 %v7701_v20, %v7699_v57  ;;  %v7710_v19 = vpop.eup %5191 }
 0x701   : > { %5195 = vpow2.f32 %v3228_v32  ;;  %v7715_v29 = vpop.eup %5193  ;;  %v3154_v7 = vpop.permute.xlu2 %3153 }
 0x702   : > { %3383 = vmatmul.bf16.vlgmr.msra.gmra.mxu3 %v3367_v52  ;;  %5197 = vpow2.f32 %v3226_v14  ;;  %v3211_v59 = vsub.f32 %v7383_v38, %v3154_v7  ;;  %v3210_v52 = vsub.f32 %v7388_v49, %v3149_v21  ;;  %v3118_v38 = vmul.f32 1.442695, %v3090_v63 }
 0x703   : > { %5199 = vpow2.f32 %v3108_v51 }
 0x704   : > { %3462 = vperm.xlu2 %4993, %v7710_v19   ;;  %v3232_v39 = vmul.f32 1.442695, %v3211_v59  ;;  %5201 = vpow2.f32 %v3114_v25  ;;  %v3230_v51 = vmul.f32 1.442695, %v3210_v52  ;;  %v3164_v53 = vpop.permute.xlu1 %3163  ;;  %v3234_v59 = vmul.f32 1.442695, %v3212_v37 }
 0x705   : > { %v3213_v17 = vsub.f32 %v7400_v31, %v3164_v53  ;;  %v7749_v31 = vld [vmem:[#allocation2 + $0x1e8] sm:$0xff]  ;;  %v7765_v53 = vpop.f32.mrf.mxu2 }
 0x706   : > { %5203 = vpow2.f32 %v3232_v39 }
 0x707   : > { %v7718_v30 = vpop.eup %5195  ;;  %5205 = vpow2.f32 %v3230_v51  ;;  %v3236_v7 = vmul.f32 1.442695, %v3213_v17 }
 0x708   : > { %v7720_v4 = vpop.eup %5197  ;;  %5207 = vpow2.f32 %v3118_v38 }
 0x709   : > { %v3368_v15 = vpack.c.bf16 %v7718_v30, %v7720_v4  ;;  %v7729_v28 = vpop.eup %5199  ;;  %v3169_v23 = vpop.permute.xlu2 %3168  ;;  %5209 = vpow2.f32 %v3236_v7 }
 0x70a   : > { %v7732_v32 = vpop.eup %5201  ;;  %5211 = vpow2.f32 %v3234_v59  ;;  %v3214_v51 = vsub.f32 %v7514_v11, %v3169_v23 }
 0x70c   : > { %3472 = vperm.xlu2 %4993, %v7715_v29   ;;  %v7735_v43 = vpop.eup %5203  ;;  %v3179_v11 = vpop.permute.xlu0 %3178 }
 0x70d   : > { %v7737_v49 = vpop.eup %5205  ;;  %v7773_v23 = vpop.f32.mrf.mxu2  ;;  %v3216_v7 = vsub.f32 %v7418_v2, %v3179_v11 }
 0x70e   : > { %v3369_v21 = vpack.c.bf16 %v7735_v43, %v7737_v49  ;;  %v7744_v14 = vpop.eup %5207 }
 0x70f   : > { %8725 = vst [vmem:[#allocation48_spill] sm:$0xff] %v7744_v14  ;;  %v7747_v16 = vpop.eup %5209  ;;  %v3242_v59 = vmul.f32 1.442695, %v3216_v7 }
 0x710   : > { %v7751_v25 = vpop.eup %5211 }
 0x711   : > { %v3370_v39 = vpack.c.bf16 %v7747_v16, %v7751_v25 }
 0x712   : > { %3388 = vmatmul.bf16.gmra.mxu3 %v3368_v15  ;;  %v3174_v15 = vpop.permute.xlu2 %3173 }
 0x713   : > { %v3215_v52 = vsub.f32 %v7522_v55, %v3174_v15  ;;  %v3238_v55 = vmul.f32 1.442695, %v3214_v51 }
 0x714   : > { %3482 = vperm.xlu2 %4993, %v7729_v28  }
 0x715   : > { %v3240_v38 = vmul.f32 1.442695, %v3215_v52 }
 0x717   : > { %5213 = vpow2.f32 %v3240_v38  ;;  %v3028_v38 = vld [vmem:[#allocation2 + $0x1f0] sm:$0xff] }
 0x718   : > { %5215 = vpow2.f32 %v3238_v55 }
 0x719   : > { %5217 = vpow2.f32 %v3242_v59  ;;  %v3079_v59 = vsub.f32 %v7430_v6, %v7435_v61  ;;  %v8727_v6 = vsub.f32 %v7421_v42, %v7424_v60  ;;  %v8730_v60 = vsub.f32 %v7467_v33, %v7476_v48 }
 0x71b   : > { %v3098_v61 = vmul.f32 1.442695, %v8727_v6 }
 0x71c   : > { %3497 = vperm.xlu2 %4993, %v7732_v32  }
 0x71d   : > { %v7767_v17 = vpop.eup %5213 }
 0x722   : > { %3393 = vmatmul.bf16.gmra.mxu3 %v3369_v21  ;;  %v7769_v21 = vpop.eup %5215 }
 0x723   : > { %v3371_v37 = vpack.c.bf16 %v7767_v17, %v7769_v21  ;;  %v7779_v51 = vpop.eup %5217 }
 0x724   : > { %3507 = vperm.xlu2 %4993, %v7744_v14  }
 0x72f   : > { %v3057_v22 = vpop.xlane.xlu1 %3056 }
 0x730   : > { %v7755_v47 = vmax.f32 %v7749_v31, %v3057_v22 }
 0x732   : > { %3364 = vst.msk [vmem:[#allocation2 + $0x1e8] sm:$0xff] %vm1123_vm1, %v7755_v47  ;;  %3193 = vperm.xlu1 %4994, %v7755_v47   ;;  %3398 = vmatmul.bf16.gmra.mxu3 %v3370_v39  ;;  %v7777_v39 = vpop.f32.mrf.mxu2 }
 0x73a   : > { %v7789_v7 = vpop.f32.mrf.mxu2 }
 0x742   : > { %3403 = vmatmul.bf16.gmra.mxu3 %v3371_v37  ;;  %v8726_v37 = vsub.f32 %v7432_v0, %v7438_v36  ;;  %v3096_v0 = vmul.f32 1.442695, %v3079_v59 }
 0x744   : > { %v3094_v63 = vmul.f32 1.442695, %v8726_v37 }
 0x747   : > { %v3184_v15 = vpop.permute.xlu1 %3183 }
 0x748   : > { %v3217_v52 = vsub.f32 %v7527_v8, %v3184_v15 }
 0x74a   : > { %v3244_v22 = vmul.f32 1.442695, %v3217_v52 }
 0x74c   : > { %5219 = vpow2.f32 %v3244_v22  ;;  %v7801_v22 = vpop.f32.mrf.mxu2 }
 0x74d   : > { %5221 = vpow2.f32 %v3094_v63 }
 0x752   : > { %v7781_v55 = vpop.eup %5219 }
 0x753   : > { %v3059_v14 = vpop.xlane.xlu2 %3058  ;;  %v3372_v2 = vpack.c.bf16 %v7781_v55, %v7779_v51  ;;  %v7796_v52 = vpop.eup %5221 }
 0x754   : > { %v3076_v11 = vmax.f32 %v3028_v38, %v3059_v14 }
 0x755   : > { %3408 = vmatmul.bf16.gmra.mxu3 %v3372_v2  ;;  %v7813_v2 = vpop.f32.mrf.mxu2 }
 0x756   : > { %v3092_v8 = vsub.f32 %v3028_v38, %v3076_v11  ;;  %3365 = vst.msk [vmem:[#allocation2 + $0x1f0] sm:$0xff] %vm1123_vm1, %v3076_v11  ;;  %3198 = vperm.xlu0 %4977, %v3076_v11   ;;  %v8729_v11 = vsub.f32 %v7456_v62, %v7461_v40  ;;  %v8731_v40 = vsub.f32 %v7631_v27, %v7636_v46 }
 0x757   : > { %v8732_v27 = vsub.f32 %v7633_v9, %v7639_v1 }
 0x758   : > { %v3122_v15 = vmul.f32 1.442695, %v3092_v8  ;;  %v3102_v8 = vmul.f32 1.442695, %v8729_v11  ;;  %v3112_v6 = vmul.f32 1.442695, %v8731_v40 }
 0x759   : > { %v3116_v46 = vmul.f32 1.442695, %v8732_v27 }
 0x75a   : > { %5223 = vpow2.f32 %v3122_v15  ;;  %v3106_v15 = vmul.f32 1.442695, %v8730_v60 }
 0x75b   : > { %v7793_v36 = vpop.permute.xlu2 %3203  ;;  %5225 = vpow2.f32 %v3096_v0 }
 0x75c   : > { %3287 = vadd.xlane.f32.xlu1 %v7699_v57  ;;  %5227 = vpow2.f32 %v3098_v61  ;;  %v8728_v57 = vsub.f32 %v7620_v3, %v7623_v44 }
 0x75d   : > { %v7832_v62 = vpop.f32.mrf.mxu2 }
 0x75e   : > { %3447 = vperm.xlu0 %4977, %v7796_v52   ;;  %v3110_v37 = vmul.f32 1.442695, %v8728_v57 }
 0x760   : > { %v7799_v14 = vpop.eup %5223  ;;  %5229 = vpow2.f32 %v3110_v37 }
 0x761   : > { %3517 = vperm.xlu2 %4993, %v7799_v14   ;;  %v7807_v38 = vpop.eup %5225  ;;  %5231 = vpow2.f32 %v3102_v8 }
 0x762   : > { %v7820_v42 = vpop.eup %5227  ;;  %5233 = vpow2.f32 %v3106_v15 }
 0x763   : > { %v3463_v63 = vpop.permute.xlu2 %3462  ;;  %5235 = vpow2.f32 %v3112_v6 }
 0x764   : > { %5237 = vpow2.f32 %v3116_v46 }
 0x765   : > { %v2693_v48 = vpop.f32.mrf.mxu2 }
 0x766   : > { %3452 = vperm.xlu0 %4977, %v7807_v38   ;;  %v7828_v3 = vpop.eup %5229  ;;  %v2848_v57 = vsel %vm7495_vm8, %v2693_v48, 0.0  ;;  %v3189_v46 = vpop.permute.xlu0 %3188 }
 0x767   : > { %v7830_v0 = vpop.eup %5231  ;;  %v2864_v37 = vadd.f32 %v2848_v57, %v7554_v50  ;;  %v8735_v50 = vsub.f32 %v7749_v31, %v7755_v47  ;;  %v8736_v57 = vsub.f32 %v7689_v58, %v7692_v18  ;;  %v2839_v31 = vsel %vm7495_vm8, %v7654_v5, 0.0 }
 0x768   : > { %v7841_v33 = vpop.eup %5233  ;;  %v3528_v47 = vsel %vm7852_vm11, %v3463_v63, 1.0  ;;  %v3218_v5 = vsub.f32 %v7584_v54, %v3189_v46  ;;  %v2841_v54 = vsel %vm7495_vm8, %v7765_v53, 0.0  ;;  %v2811_v53 = vsel %vm7495_vm8, %v7672_v56, 1.0 }
 0x769   : > { %v7858_v15 = vpop.eup %5235  ;;  %v3120_v9 = vmul.f32 1.442695, %v8735_v50 }
 0x76a   : > { %v7869_v1 = vpop.eup %5237 }
 0x76b   : > { %v7818_v59 = vpop.permute.xlu2 %3472  ;;  %5239 = vpow2.f32 %v3120_v9 }
 0x76e   : > { %3457 = vperm.xlu0 %4977, %v7820_v42  }
 0x771   : > { %v7878_v27 = vpop.eup %5239 }
 0x773   : > { %v7826_v44 = vpop.permute.xlu2 %3482 }
 0x775   : > { %3487 = vperm.xlu1 %4994, %v7828_v3  }
 0x776   : > { %3467 = vperm.xlu0 %4977, %v7830_v0  }
 0x77b   : > { %v7839_v61 = vpop.permute.xlu2 %3497 }
 0x77e   : > { %3477 = vperm.xlu0 %4977, %v7841_v33  }
 0x783   : > { %v3508_v8 = vpop.permute.xlu2 %3507 }
 0x784   : > { %v3537_v60 = vsel %vm7852_vm11, %v3508_v8, 1.0 }
 0x785   : > { %v7860_v40 = vmul.f32 %v3537_v60, %v2864_v37  ;;  %v7862_v6 = vpop.f32.mrf.mxu3  ;;  %v3124_v37 = vmul.f32 1.442695, %v8736_v57 }
 0x786   : > { %3492 = vperm.xlu0 %4977, %v7858_v15  }
 0x787   : > { %5241 = vpow2.f32 %v3124_v37  ;;  %v2711_v37 = vld [vmem:[#allocation4 + $0x68] sm:$0xff] }
 0x78a   : > { %3291 = vadd.xlane.f32.xlu2 %v7720_v4 }
 0x78d   : > { %v7871_v48 = vpop.f32.mrf.mxu3  ;;  %v7890_v58 = vpop.eup %5241 }
 0x78e   : > { %3502 = vperm.xlu0 %4977, %v7869_v1  }
 0x792   : > { %3297 = vadd.xlane.f32.xlu2 %v7735_v43  ;;  %v2855_v43 = vadd.f32 %v2839_v31, %v7517_v24  ;;  %v2809_v24 = vsel %vm7495_vm8, %v7598_v12, 1.0  ;;  %v3530_v12 = vsel %vm7852_vm11, %v7818_v59, 1.0 }
 0x793   : > { %v2825_v31 = vmul.f32 %v2809_v24, %v2711_v37 }
 0x794   : > { %v3544_v18 = vmul.f32 %v3528_v47, %v2855_v43 }
 0x795   : > { %v7880_v4 = vpop.f32.mrf.mxu3 }
 0x796   : > { %3512 = vperm.xlu0 %4977, %v7878_v27  }
 0x79a   : > { %3303 = vadd.xlane.f32.xlu2 %v7769_v21  ;;  %v3246_v21 = vmul.f32 1.442695, %v3218_v5  ;;  %v2843_v5 = vsel %vm7495_vm8, %v7777_v39, 0.0 }
 0x79c   : > { %5243 = vpow2.f32 %v3246_v21 }
 0x79d   : > { %v3391_v8 = vpop.f32.mrf.mxu3 }
 0x79e   : > { %v3560_v60 = vsel %vm7852_vm11, %v3391_v8, 0.0  ;;  %3522 = vperm.xlu0 %4977, %v7890_v58  }
 0x79f   : > { %v3576_v50 = vadd.f32 %v3560_v60, %v3544_v18  ;;  %3289 = vadd.xlane.f32.xlu1 %v7701_v20  ;;  %v2857_v20 = vadd.f32 %v2841_v54, %v2825_v31  ;;  %v2713_v60 = vld [vmem:[#allocation4 + $0x48] sm:$0xff]  ;;  %v3255_v54 = vld [vmem:[#allocation3 + $0x180] sm:$0xff] }
 0x7a1   : > { %3592 = vst [vmem:[#allocation4 + $0x18] sm:$0xff] %v3576_v50  ;;  %v2827_v50 = vmul.f32 %v2811_v53, %v2713_v60  ;;  %v3535_v60 = vsel %vm7852_vm11, %v7839_v61, 1.0  ;;  %v3558_v61 = vsel %vm7852_vm11, %v7871_v48, 0.0  ;;  %v3559_v48 = vsel %vm7852_vm11, %v7880_v4, 0.0 }
 0x7a2   : > { %3309 = vadd.xlane.f32.xlu2 %v7781_v55  ;;  %v3546_v55 = vmul.f32 %v3530_v12, %v2857_v20  ;;  %v7911_v43 = vpop.eup %5243  ;;  %v3271_v12 = vmul.f32 %v7796_v52, %v3255_v54  ;;  %v2814_v20 = vsel %vm7495_vm8, %v7678_v26, 1.0  ;;  %v3557_v26 = vsel %vm7852_vm11, %v7862_v6, 0.0 }
 0x7a3   : > { %v2859_v24 = vadd.f32 %v2843_v5, %v2827_v50 }
 0x7a4   : > { %v3194_v63 = vpop.permute.xlu1 %3193 }
 0x7a5   : > { %v3219_v9 = vsub.f32 %v7651_v13, %v3194_v63  ;;  %v7902_v57 = vpop.f32.mrf.mxu3 }
 0x7a7   : > { %v3248_v47 = vmul.f32 1.442695, %v3219_v9  ;;  %3295 = vadd.xlane.f32.xlu1 %v7737_v49 }
 0x7a9   : > { %5245 = vpow2.f32 %v3248_v47 }
 0x7ad   : > { %v3396_v13 = vpop.f32.mrf.mxu3 }
 0x7ae   : > { %v3562_v18 = vsel %vm7852_vm11, %v3396_v13, 0.0 }
 0x7af   : > { %v5246_v46 = vpop.eup %5245  ;;  %v3578_v49 = vadd.f32 %v3562_v18, %v3546_v55  ;;  %3301 = vadd.xlane.f32.xlu1 %v7747_v16  ;;  %v3532_v16 = vsel %vm7852_vm11, %v7826_v44, 1.0 }
 0x7b0   : > { %v3373_v8 = vpack.c.bf16 %v5246_v46, %v7911_v43  ;;  %v3548_v21 = vmul.f32 %v3532_v16, %v2859_v24 }
 0x7b1   : > { %3594 = vst [vmem:[#allocation4 + $0x68] sm:$0xff] %v3578_v49 }
 0x7b2   : > { %3413 = vmatmul.bf16.gmra.mxu3 %v3373_v8 }
 0x7b5   : > { %v7920_v59 = vpop.f32.mrf.mxu3 }
 0x7b7   : > { %3307 = vadd.xlane.f32.xlu1 %v7779_v51  ;;  %v3221_v51 = vsub.f32 %v7595_v34, %v7793_v36 }
 0x7b9   : > { %v3252_v31 = vmul.f32 1.442695, %v3221_v51 }
 0x7bb   : > { %5247 = vpow2.f32 %v3252_v31 }
 0x7bd   : > { %v3401_v63 = vpop.f32.mrf.mxu3 }
 0x7be   : > { %v3564_v56 = vsel %vm7852_vm11, %v3401_v63, 0.0 }
 0x7bf   : > { %v3580_v9 = vadd.f32 %v3564_v56, %v3548_v21  ;;  %3313 = vadd.xlane.f32.xlu1 %v5246_v46  ;;  %v8737_v21 = vld [vmem:[#allocation39_spill] sm:$0xff] }
 0x7c1   : > { %3596 = vst [vmem:[#allocation4 + $0x48] sm:$0xff] %v3580_v9  ;;  %v5248_v18 = vpop.eup %5247  ;;  %v8738_v9 = vld [vmem:[#allocation36_spill] sm:$0xff] }
 0x7c5   : > { %v7933_v37 = vpop.f32.mrf.mxu3 }
 0x7c6   : > { %v3565_v4 = vsel %vm7852_vm11, %v7933_v37, 0.0 }
 0x7c8   : > { %v3199_v39 = vpop.permute.xlu0 %3198  ;;  %3293 = vadd.xlane.f32.xlu0 %v7718_v30  ;;  %v2716_v30 = vld [vmem:[#allocation4 + $0x10] sm:$0xff] }
 0x7c9   : > { %v3220_v44 = vsub.f32 %v7675_v35, %v3199_v39  ;;  %v2830_v46 = vmul.f32 %v2814_v20, %v2716_v30  ;;  %v2714_v39 = vld [vmem:[#allocation4 + $0x40] sm:$0xff]  ;;  %v2844_v20 = vsel %vm7495_vm8, %v7789_v7, 0.0  ;;  %v3561_v7 = vsel %vm7852_vm11, %v7902_v57, 0.0 }
 0x7cb   : > { %v3250_v47 = vmul.f32 1.442695, %v3220_v44  ;;  %v8739_v44 = vld [vmem:[#allocation32_spill] sm:$0xff] }
 0x7cd   : > { %5249 = vpow2.f32 %v3250_v47  ;;  %v7941_v34 = vpop.f32.mrf.mxu3 }
 0x7cf   : > { %v3288_v55 = vpop.xlane.xlu1 %3287 }
 0x7d0   : > { %v3319_v36 = vadd.f32 %v3288_v55, %v3271_v12  ;;  %v3448_v13 = vpop.permute.xlu0 %3447  ;;  %3299 = vadd.xlane.f32.xlu0 %v7751_v25  ;;  %v2846_v25 = vsel %vm7495_vm8, %v7813_v2, 0.0 }
 0x7d1   : > { %v3525_v35 = vsel %vm7852_vm11, %v3448_v13, 1.0  ;;  %v2862_v50 = vadd.f32 %v2846_v25, %v2830_v46  ;;  %v8740_v46 = vld [vmem:[#allocation43_spill] sm:$0xff] }
 0x7d2   : > { %3335 = vst.msk [vmem:[#allocation3 + $0x180] sm:$0xff] %vm1123_vm1, %v3319_v36  ;;  %v3541_v52 = vmul.f32 %v3525_v35, %v7662_v41 }
 0x7d3   : > { %v5250_v49 = vpop.eup %5249  ;;  %v3551_v41 = vmul.f32 %v3535_v60, %v2862_v50  ;;  %v3563_v50 = vsel %vm7852_vm11, %v7920_v59, 0.0  ;;  %v3566_v59 = vsel %vm7852_vm11, %v7941_v34, 0.0  ;;  %v3260_v34 = vld [vmem:[#allocation3 + $0x1a8] sm:$0xff] }
 0x7d4   : > { %v3573_v8 = vadd.f32 %v3557_v26, %v3541_v52  ;;  %3315 = vadd.xlane.f32.xlu2 %v5250_v49  ;;  %v3374_v53 = vpack.c.bf16 %v5248_v18, %v5250_v49 }
 0x7d6   : > { %3589 = vst [vmem:[#allocation4 + $0x30] sm:$0xff] %v3573_v8  ;;  %3418 = vmatmul.bf16.gmra.mxu3 %v3374_v53  ;;  %v8741_v8 = vld [vmem:[#allocation34_spill] sm:$0xff] }
 0x7d8   : > { %v3453_v5 = vpop.permute.xlu0 %3452  ;;  %3305 = vadd.xlane.f32.xlu0 %v7767_v17  ;;  %v3409_v16 = vpop.f32.mrf.mxu3  ;;  %v2812_v17 = vsel %vm7495_vm8, %v8738_v9, 1.0 }
 0x7d9   : > { %v3526_v6 = vsel %vm7852_vm11, %v3453_v5, 1.0  ;;  %v3567_v24 = vsel %vm7852_vm11, %v3409_v16, 0.0  ;;  %v2828_v54 = vmul.f32 %v2812_v17, %v2714_v39  ;;  %v2845_v5 = vsel %vm7495_vm8, %v7801_v22, 0.0  ;;  %v8743_v17 = vld [vmem:[#allocation38_spill] sm:$0xff] }
 0x7da   : > { %v3542_v2 = vmul.f32 %v3526_v6, %v8737_v21  ;;  %v3583_v63 = vadd.f32 %v3567_v24, %v3551_v41  ;;  %v7999_v41 = vpop.permute.xlu2 %3517  ;;  %v3257_v21 = vld [vmem:[#allocation3 + $0x190] sm:$0xff]  ;;  %v2847_v22 = vsel %vm7495_vm8, %v7832_v62, 0.0 }
 0x7db   : > { %v2860_v55 = vadd.f32 %v2844_v20, %v2828_v54  ;;  %v3263_v20 = vld [vmem:[#allocation3 + $0x1c0] sm:$0xff] }
 0x7dc   : > { %v3574_v56 = vadd.f32 %v3558_v61, %v3542_v2  ;;  %3599 = vst [vmem:[#allocation4 + $0x10] sm:$0xff] %v3583_v63  ;;  %v3273_v61 = vmul.f32 %v7820_v42, %v3257_v21 }
 0x7de   : > { %3590 = vst [vmem:[#allocation4] sm:$0xff] %v3574_v56 }
 0x7e0   : > { %v3458_v51 = vpop.permute.xlu0 %3457  ;;  %3311 = vadd.xlane.f32.xlu0 %v7911_v43 }
 0x7e1   : > { %v3527_v31 = vsel %vm7852_vm11, %v3458_v51, 1.0  ;;  %v2863_v51 = vadd.f32 %v2847_v22, %v8743_v17 }
 0x7e2   : > { %v3543_v47 = vmul.f32 %v3527_v31, %v8739_v44  ;;  %v3411_v31 = vpop.f32.mrf.mxu3 }
 0x7e3   : > { %v3568_v42 = vsel %vm7852_vm11, %v3411_v31, 0.0 }
 0x7e4   : > { %v3575_v12 = vadd.f32 %v3559_v48, %v3543_v47  ;;  %v3276_v48 = vmul.f32 %v7715_v29, %v3260_v34 }
 0x7e6   : > { %3591 = vst [vmem:[#allocation4 + $0x58] sm:$0xff] %v3575_v12 }
 0x7e7   : > { %v3488_v36 = vpop.permute.xlu1 %3487 }
 0x7e8   : > { %v3533_v43 = vsel %vm7852_vm11, %v3488_v36, 1.0  ;;  %v3468_v13 = vpop.permute.xlu0 %3467  ;;  %3317 = vadd.xlane.f32.xlu0 %v5248_v18  ;;  %v2842_v18 = vsel %vm7495_vm8, %v7773_v23, 0.0  ;;  %v8742_v23 = vld [vmem:[#allocation35_spill] sm:$0xff] }
 0x7e9   : > { %v3549_v30 = vmul.f32 %v3533_v43, %v2860_v55  ;;  %v3529_v35 = vsel %vm7852_vm11, %v3468_v13, 1.0  ;;  %v2858_v53 = vadd.f32 %v2842_v18, %v8741_v8  ;;  %v2861_v16 = vadd.f32 %v2845_v5, %v8742_v23  ;;  %v3256_v13 = vld [vmem:[#allocation3 + $0x188] sm:$0xff]  ;;  %v3262_v8 = vld [vmem:[#allocation3 + $0x1b8] sm:$0xff] }
 0x7ea   : > { %v3545_v52 = vmul.f32 %v3529_v35, %v8740_v46  ;;  %v3279_v55 = vmul.f32 %v7828_v3, %v3263_v20  ;;  %v3266_v35 = vld [vmem:[#allocation3 + $0x1d8] sm:$0xff]  ;;  %v3264_v20 = vld [vmem:[#allocation3 + $0x1c8] sm:$0xff] }
 0x7eb   : > { %v3581_v49 = vadd.f32 %v3565_v4, %v3549_v30  ;;  %v3272_v30 = vmul.f32 %v7807_v38, %v3256_v13  ;;  %v3282_v29 = vmul.f32 %v7869_v1, %v3266_v35  ;;  %v3278_v38 = vmul.f32 %v7729_v28, %v3262_v8  ;;  %v3265_v1 = vld [vmem:[#allocation3 + $0x1d0] sm:$0xff]  ;;  %v8744_v28 = vld [vmem:[#allocation40_spill] sm:$0xff] }
 0x7ec   : > { %v3577_v26 = vadd.f32 %v3561_v7, %v3545_v52  ;;  %v8745_v35 = vld [vmem:[#allocation48_spill] sm:$0xff] }
 0x7ed   : > { %3597 = vst [vmem:[#allocation4 + $0x40] sm:$0xff] %v3581_v49  ;;  %v3259_v49 = vld [vmem:[#allocation3 + $0x1a0] sm:$0xff] }
 0x7ee   : > { %3593 = vst [vmem:[#allocation4 + $0x50] sm:$0xff] %v3577_v26  ;;  %v3275_v3 = vmul.f32 %v7830_v0, %v3259_v49  ;;  %v3268_v0 = vld [vmem:[#allocation3 + $0x1e8] sm:$0xff]  ;;  %v3270_v49 = vld [vmem:[#allocation3 + $0x1f8] sm:$0xff] }
 0x7ef   : > { %v3284_v5 = vmul.f32 %v7878_v27, %v3268_v0  ;;  %v3258_v27 = vld [vmem:[#allocation3 + $0x198] sm:$0xff]  ;;  %v3286_v8 = vmul.f32 %v7890_v58, %v3270_v49 }
 0x7f0   : > { %v3478_v25 = vpop.permute.xlu0 %3477  ;;  %v3274_v22 = vmul.f32 %v7710_v19, %v3258_v27 }
 0x7f1   : > { %v3531_v37 = vsel %vm7852_vm11, %v3478_v25, 1.0 }
 0x7f2   : > { %v3547_v60 = vmul.f32 %v3531_v37, %v2858_v53 }
 0x7f4   : > { %v3579_v57 = vadd.f32 %v3563_v50, %v3547_v60  ;;  %v3281_v60 = vmul.f32 %v7732_v32, %v3265_v1 }
 0x7f6   : > { %3595 = vst [vmem:[#allocation4 + $0x8] sm:$0xff] %v3579_v57 }
 0x7f8   : > { %v3493_v6 = vpop.permute.xlu0 %3492 }
 0x7f9   : > { %v3534_v24 = vsel %vm7852_vm11, %v3493_v6, 1.0 }
 0x7fa   : > { %v3550_v2 = vmul.f32 %v3534_v24, %v2861_v16  ;;  %v2817_v24 = vsel %vm7495_vm8, %v8744_v28, 1.0 }
 0x7fc   : > { %v3582_v63 = vadd.f32 %v3566_v59, %v3550_v2  ;;  %v2719_v2 = vld [vmem:[#allocation4 + $0x70] sm:$0xff]  ;;  %v2695_v59 = vpop.f32.mrf.mxu2 }
 0x7fd   : > { %v3292_v56 = vpop.xlane.xlu2 %3291 }
 0x7fe   : > { %3598 = vst [vmem:[#allocation4 + $0x20] sm:$0xff] %v3582_v63  ;;  %v3321_v9 = vadd.f32 %v3292_v56, %v3273_v61  ;;  %v2833_v63 = vmul.f32 %v2817_v24, %v2719_v2  ;;  %v2849_v56 = vsel %vm7495_vm8, %v2695_v59, 0.0 }
 0x800   : > { %3337 = vst.msk [vmem:[#allocation3 + $0x190] sm:$0xff] %vm1123_vm1, %v3321_v9  ;;  %v3503_v39 = vpop.permute.xlu0 %3502  ;;  %v2865_v17 = vadd.f32 %v2849_v56, %v2833_v63 }
 0x801   : > { %v3536_v44 = vsel %vm7852_vm11, %v3503_v39, 1.0 }
 0x802   : > { %v3552_v47 = vmul.f32 %v3536_v44, %v2863_v51 }
 0x804   : > { %v3584_v54 = vadd.f32 %v3568_v42, %v3552_v47  ;;  %v3261_v47 = vld [vmem:[#allocation3 + $0x1b0] sm:$0xff] }
 0x805   : > { %v3298_v12 = vpop.xlane.xlu2 %3297  ;;  %v3277_v42 = vmul.f32 %v7841_v33, %v3261_v47  ;;  %v2698_v33 = vpop.f32.mrf.mxu2 }
 0x806   : > { %3600 = vst [vmem:[#allocation4 + $0x38] sm:$0xff] %v3584_v54  ;;  %v3324_v62 = vadd.f32 %v3298_v12, %v3276_v48  ;;  %v3269_v48 = vld [vmem:[#allocation3 + $0x1f0] sm:$0xff] }
 0x807   : > { %v3285_v19 = vmul.f32 %v7799_v14, %v3269_v48  ;;  %v2850_v14 = vsel %vm7495_vm8, %v2698_v33, 0.0 }
 0x808   : > { %3340 = vst.msk [vmem:[#allocation3 + $0x1a8] sm:$0xff] %vm1123_vm1, %v3324_v62  ;;  %v3513_v37 = vpop.permute.xlu0 %3512 }
 0x809   : > { %v3538_v9 = vsel %vm7852_vm11, %v3513_v37, 1.0 }
 0x80a   : > { %v3554_v39 = vmul.f32 %v3538_v9, %v2865_v17 }
 0x80d   : > { %v3304_v36 = vpop.xlane.xlu2 %3303 }
 0x80e   : > { %v3327_v43 = vadd.f32 %v3304_v36, %v3279_v55  ;;  %v3280_v36 = vmul.f32 %v7858_v15, %v3264_v20  ;;  %v8746_v15 = vld [vmem:[#allocation41_spill] sm:$0xff] }
 0x810   : > { %3343 = vst.msk [vmem:[#allocation3 + $0x1c0] sm:$0xff] %vm1123_vm1, %v3327_v43  ;;  %v8035_v16 = vpop.permute.xlu0 %3522 }
 0x811   : > { %v3540_v37 = vsel %vm7852_vm11, %v8035_v16, 1.0 }
 0x812   : > { %v3290_v4 = vpop.xlane.xlu1 %3289 }
 0x813   : > { %v3320_v46 = vadd.f32 %v3290_v4, %v3272_v30  ;;  %v3267_v30 = vld [vmem:[#allocation3 + $0x1e0] sm:$0xff] }
 0x814   : > { %v3283_v4 = vmul.f32 %v8745_v35, %v3267_v30 }
 0x815   : > { %3336 = vst.msk [vmem:[#allocation3 + $0x188] sm:$0xff] %vm1123_vm1, %v3320_v46  ;;  %v3310_v52 = vpop.xlane.xlu2 %3309 }
 0x816   : > { %v3330_v7 = vadd.f32 %v3310_v52, %v3282_v29  ;;  %v3539_v52 = vsel %vm7852_vm11, %v7999_v41, 1.0 }
 0x818   : > { %3346 = vst.msk [vmem:[#allocation3 + $0x1d8] sm:$0xff] %vm1123_vm1, %v3330_v7  ;;  %v2866_v7 = vadd.f32 %v2850_v14, %v8746_v15 }
 0x81a   : > { %v3296_v26 = vpop.xlane.xlu1 %3295 }
 0x81b   : > { %v3323_v18 = vadd.f32 %v3296_v26, %v3275_v3  ;;  %v3555_v3 = vmul.f32 %v3539_v52, %v2866_v7 }
 0x81d   : > { %3339 = vst.msk [vmem:[#allocation3 + $0x1a0] sm:$0xff] %vm1123_vm1, %v3323_v18 }
 0x822   : > { %v3302_v53 = vpop.xlane.xlu1 %3301 }
 0x823   : > { %v3326_v25 = vadd.f32 %v3302_v53, %v3278_v38  ;;  %v2700_v38 = vpop.f32.mrf.mxu2 }
 0x824   : > { %v2851_v41 = vsel %vm7495_vm8, %v2700_v38, 0.0 }
 0x825   : > { %3342 = vst.msk [vmem:[#allocation3 + $0x1b8] sm:$0xff] %vm1123_vm1, %v3326_v25 }
 0x82a   : > { %v3308_v50 = vpop.xlane.xlu1 %3307 }
 0x82b   : > { %v3329_v57 = vadd.f32 %v3308_v50, %v3281_v60  ;;  %v8747_v60 = vld [vmem:[#allocation33_spill] sm:$0xff] }
 0x82c   : > { %v2867_v50 = vadd.f32 %v2851_v41, %v8747_v60 }
 0x82d   : > { %3345 = vst.msk [vmem:[#allocation3 + $0x1d0] sm:$0xff] %vm1123_vm1, %v3329_v57 }
 0x82e   : > { %v3556_v57 = vmul.f32 %v3540_v37, %v2867_v50 }
 0x832   : > { %v3314_v23 = vpop.xlane.xlu1 %3313 }
 0x833   : > { %v3332_v6 = vadd.f32 %v3314_v23, %v3284_v5 }
 0x835   : > { %3348 = vst.msk [vmem:[#allocation3 + $0x1e8] sm:$0xff] %vm1123_vm1, %v3332_v6  ;;  %v3414_v21 = vpop.f32.mrf.mxu3 }
 0x836   : > { %v3569_v32 = vsel %vm7852_vm11, %v3414_v21, 0.0 }
 0x837   : > { %v3585_v61 = vadd.f32 %v3569_v32, %v7860_v40 }
 0x839   : > { %3601 = vst [vmem:[#allocation4 + $0x60] sm:$0xff] %v3585_v61 }
 0x83b   : > { %v3294_v51 = vpop.xlane.xlu0 %3293 }
 0x83c   : > { %v3322_v31 = vadd.f32 %v3294_v51, %v3274_v22 }
 0x83d   : > { %v3416_v44 = vpop.f32.mrf.mxu3 }
 0x83e   : > { %3338 = vst.msk [vmem:[#allocation3 + $0x198] sm:$0xff] %vm1123_vm1, %v3322_v31  ;;  %v3570_v40 = vsel %vm7852_vm11, %v3416_v44, 0.0 }
 0x83f   : > { %v3586_v34 = vadd.f32 %v3570_v40, %v3554_v39 }
 0x841   : > { %3602 = vst [vmem:[#allocation4 + $0x70] sm:$0xff] %v3586_v34 }
 0x843   : > { %v3300_v54 = vpop.xlane.xlu0 %3299 }
 0x844   : > { %v3325_v12 = vadd.f32 %v3300_v54, %v3277_v42 }
 0x846   : > { %3341 = vst.msk [vmem:[#allocation3 + $0x1b0] sm:$0xff] %vm1123_vm1, %v3325_v12 }
 0x847   : > { %v3316_v62 = vpop.xlane.xlu2 %3315 }
 0x848   : > { %v3333_v55 = vadd.f32 %v3316_v62, %v3285_v19 }
 0x84a   : > { %3349 = vst.msk [vmem:[#allocation3 + $0x1f0] sm:$0xff] %vm1123_vm1, %v3333_v55 }
 0x84b   : > { %v3306_v43 = vpop.xlane.xlu0 %3305 }
 0x84c   : > { %v3328_v13 = vadd.f32 %v3306_v43, %v3280_v36 }
 0x84e   : > { %3344 = vst.msk [vmem:[#allocation3 + $0x1c8] sm:$0xff] %vm1123_vm1, %v3328_v13 }
 0x853   : > { %v3312_v46 = vpop.xlane.xlu0 %3311 }
 0x854   : > { %v3331_v29 = vadd.f32 %v3312_v46, %v3283_v4 }
 0x856   : > { %3347 = vst.msk [vmem:[#allocation3 + $0x1e0] sm:$0xff] %vm1123_vm1, %v3331_v29 }
 0x859   : > { %v3419_v26 = vpop.f32.mrf.mxu3 }
 0x85a   : > { %v3571_v18 = vsel %vm7852_vm11, %v3419_v26, 0.0 }
 0x85b   : > { %v3587_v53 = vadd.f32 %v3571_v18, %v3555_v3  ;;  %v3318_v25 = vpop.xlane.xlu0 %3317 }
 0x85c   : > { %v3334_v1 = vadd.f32 %v3318_v25, %v3286_v8 }
 0x85d   : > { %3603 = vst [vmem:[#allocation4 + $0x78] sm:$0xff] %v3587_v53 }
 0x85e   : > { %3350 = vst.msk [vmem:[#allocation3 + $0x1f8] sm:$0xff] %vm1123_vm1, %v3334_v1 }
 0x861   : > { %v3421_v0 = vpop.f32.mrf.mxu3  ;;  %3608 = sbr.rel (%p4588_p0) target bundleno = 2593 (0xa21), region = 94 }
 0x862   : > { %v3572_v58 = vsel %vm7852_vm11, %v3421_v0, 0.0 }
 0x863   : > { %v3588_v5 = vadd.f32 %v3572_v58, %v3556_v57 }
 0x865   : > { %3604 = vst [vmem:[#allocation4 + $0x28] sm:$0xff] %v3588_v5 }
 0x866   : > { %v3613_v23 = vld [vmem:[#allocation3 + $0x20] sm:$0xff]  ;;  %v3611_v6 = vld [vmem:[#allocation3 + $0x10] sm:$0xff]  ;;  %v5449_v24 = vmov 0   ;;  %v3614_v16 = vld [vmem:[#allocation3 + $0x28] sm:$0xff] }
 0x867   : > { %v3609_v28 = vld [vmem:[#allocation3] sm:$0xff]  ;;  %5255 = vset.pattern.permute.xlu2 %v5449_v24  ;;  %5254 = vset.pattern.permute.xlu1 %v5449_v24  ;;  %5258 = vrcp.f32 %v3613_v23  ;;  %v3612_v21 = vld [vmem:[#allocation3 + $0x18] sm:$0xff]  ;;  %v3610_v2 = vld [vmem:[#allocation3 + $0x8] sm:$0xff] }
 0x868   : > { %5253 = vset.pattern.permute.xlu0 %v5449_v24  ;;  %5260 = vrcp.f32 %v3611_v6  ;;  %v3617_v61 = vld [vmem:[#allocation3 + $0x40] sm:$0xff]  ;;  %v3616_v56 = vld [vmem:[#allocation3 + $0x38] sm:$0xff]  ;;  %v3615_v22 = vld [vmem:[#allocation3 + $0x30] sm:$0xff] }
 0x869   : > { %5262 = vrcp.f32 %v3609_v28  ;;  %v3620_v51 = vld [vmem:[#allocation3 + $0x58] sm:$0xff]  ;;  %v3619_v39 = vld [vmem:[#allocation3 + $0x50] sm:$0xff]  ;;  %v3618_v40 = vld [vmem:[#allocation3 + $0x48] sm:$0xff] }
 0x86a   : > { %5264 = vrcp.f32 %v3614_v16  ;;  %v3623_v47 = vld [vmem:[#allocation3 + $0x70] sm:$0xff]  ;;  %v3622_v54 = vld [vmem:[#allocation3 + $0x68] sm:$0xff]  ;;  %v3621_v12 = vld [vmem:[#allocation3 + $0x60] sm:$0xff] }
 0x86b   : > { %5266 = vrcp.f32 %v3612_v21  ;;  %v3754_v62 = vld [vmem:[#allocation3 + $0x88] sm:$0xff]  ;;  %v3753_v55 = vld [vmem:[#allocation3 + $0x80] sm:$0xff]  ;;  %v3624_v43 = vld [vmem:[#allocation3 + $0x78] sm:$0xff] }
 0x86c   : > { %5268 = vrcp.f32 %v3610_v2  ;;  %v3757_v30 = vld [vmem:[#allocation3 + $0xa0] sm:$0xff]  ;;  %v3756_v35 = vld [vmem:[#allocation3 + $0x98] sm:$0xff]  ;;  %v3755_v46 = vld [vmem:[#allocation3 + $0x90] sm:$0xff] }
 0x86d   : > { %v5259_v32 = vpop.eup %5258  ;;  %5270 = vrcp.f32 %v3617_v61  ;;  %v3760_v14 = vld [vmem:[#allocation3 + $0xb8] sm:$0xff]  ;;  %v3759_v15 = vld [vmem:[#allocation3 + $0xb0] sm:$0xff]  ;;  %v3758_v49 = vld [vmem:[#allocation3 + $0xa8] sm:$0xff] }
 0x86e   : > { %v5261_v59 = vpop.eup %5260  ;;  %3663 = vperm.xlu2 %5255, %v5259_v32   ;;  %5272 = vrcp.f32 %v3616_v56  ;;  %v3763_v26 = vld [vmem:[#allocation3 + $0xd0] sm:$0xff]  ;;  %v3762_v8 = vld [vmem:[#allocation3 + $0xc8] sm:$0xff]  ;;  %v3761_v53 = vld [vmem:[#allocation3 + $0xc0] sm:$0xff] }
 0x86f   : > { %v5263_v63 = vpop.eup %5262  ;;  %3653 = vperm.xlu1 %5254, %v5261_v59   ;;  %5274 = vrcp.f32 %v3615_v22  ;;  %v3766_v1 = vld [vmem:[#allocation3 + $0xe8] sm:$0xff]  ;;  %v3765_v37 = vld [vmem:[#allocation3 + $0xe0] sm:$0xff]  ;;  %v3764_v50 = vld [vmem:[#allocation3 + $0xd8] sm:$0xff] }
 0x870   : > { %3643 = vperm.xlu0 %5253, %v5263_v63   ;;  %v5265_v27 = vpop.eup %5264  ;;  %5276 = vrcp.f32 %v3620_v51  ;;  %v3909_v0 = vld [vmem:[#allocation3 + $0x160] sm:$0xff]  ;;  %v3906_v5 = vld [vmem:[#allocation3 + $0x148] sm:$0xff] }
 0x871   : > { %v5267_v9 = vpop.eup %5266  ;;  %5278 = vrcp.f32 %v3619_v39  ;;  %v3905_v6 = vld [vmem:[#allocation3 + $0x140] sm:$0xff]  ;;  %v4050_v24 = vld [vmem:[#allocation3 + $0x1c8] sm:$0xff] }
 0x872   : > { %v5269_v17 = vpop.eup %5268  ;;  %5280 = vrcp.f32 %v3618_v40  ;;  %v4049_v21 = vld [vmem:[#allocation3 + $0x1c0] sm:$0xff]  ;;  %v3910_v32 = vld [vmem:[#allocation3 + $0x168] sm:$0xff] }
 0x873   : > { %v5271_v31 = vpop.eup %5270  ;;  %5282 = vrcp.f32 %v3623_v47  ;;  %v3897_v63 = vld [vmem:[#allocation3 + $0x100] sm:$0xff]  ;;  %v3902_v51 = vld [vmem:[#allocation3 + $0x128] sm:$0xff] }
 0x874   : > { %v5273_v44 = vpop.eup %5272  ;;  %5284 = vrcp.f32 %v3622_v54  ;;  %v3901_v39 = vld [vmem:[#allocation3 + $0x120] sm:$0xff]  ;;  %v3898_v40 = vld [vmem:[#allocation3 + $0x108] sm:$0xff] }
 0x875   : > { %v5275_v34 = vpop.eup %5274  ;;  %5286 = vrcp.f32 %v3621_v12 }
 0x876   : > { %3668 = vperm.xlu2 %5255, %v5265_v27   ;;  %v5277_v42 = vpop.eup %5276  ;;  %5288 = vrcp.f32 %v3754_v62  ;;  %v4054_v27 = vld [vmem:[#allocation3 + $0x1e8] sm:$0xff] }
 0x877   : > { %3658 = vperm.xlu1 %5254, %v5267_v9   ;;  %v5279_v48 = vpop.eup %5278  ;;  %5290 = vrcp.f32 %v3753_v55  ;;  %v4053_v9 = vld [vmem:[#allocation3 + $0x1e0] sm:$0xff]  ;;  %v3768_v55 = vld [vmem:[#allocation3 + $0xf8] sm:$0xff] }
 0x878   : > { %3648 = vperm.xlu0 %5253, %v5269_v17   ;;  %v5281_v19 = vpop.eup %5280  ;;  %5292 = vrcp.f32 %v3624_v43  ;;  %v3767_v43 = vld [vmem:[#allocation3 + $0xf0] sm:$0xff] }
 0x879   : > { %v5283_v20 = vpop.eup %5282  ;;  %5294 = vrcp.f32 %v3757_v30  ;;  %v4046_v30 = vld [vmem:[#allocation3 + $0x1a8] sm:$0xff] }
 0x87a   : > { %v5285_v36 = vpop.eup %5284  ;;  %5296 = vrcp.f32 %v3756_v35 }
 0x87b   : > { %v5287_v13 = vpop.eup %5286  ;;  %5298 = vrcp.f32 %v3755_v46 }
 0x87c   : > { %v5289_v33 = vpop.eup %5288  ;;  %5300 = vrcp.f32 %v3760_v14 }
 0x87d   : > { %v5291_v4 = vpop.eup %5290  ;;  %5302 = vrcp.f32 %v3759_v15 }
 0x87e   : > { %3683 = vperm.xlu2 %5255, %v5271_v31   ;;  %v5293_v29 = vpop.eup %5292  ;;  %5304 = vrcp.f32 %v3758_v49 }
 0x87f   : > { %3678 = vperm.xlu1 %5254, %v5273_v44   ;;  %v5295_v52 = vpop.eup %5294  ;;  %5306 = vrcp.f32 %v3763_v26 }
 0x880   : > { %3673 = vperm.xlu0 %5253, %v5275_v34   ;;  %v5297_v7 = vpop.eup %5296  ;;  %5308 = vrcp.f32 %v3762_v8  ;;  %v4052_v8 = vld [vmem:[#allocation3 + $0x1d8] sm:$0xff] }
 0x881   : > { %v5299_v3 = vpop.eup %5298  ;;  %5310 = vrcp.f32 %v3761_v53  ;;  %v4051_v53 = vld [vmem:[#allocation3 + $0x1d0] sm:$0xff] }
 0x882   : > { %v5301_v18 = vpop.eup %5300  ;;  %5312 = vrcp.f32 %v3766_v1  ;;  %v3912_v1 = vld [vmem:[#allocation3 + $0x178] sm:$0xff] }
 0x883   : > { %v5303_v38 = vpop.eup %5302  ;;  %5314 = vrcp.f32 %v3765_v37 }
 0x884   : > { %v5305_v25 = vpop.eup %5304  ;;  %5316 = vrcp.f32 %v3764_v50 }
 0x885   : > { %v5307_v41 = vpop.eup %5306  ;;  %5318 = vrcp.f32 %v3909_v0 }
 0x886   : > { %3698 = vperm.xlu2 %5255, %v5277_v42   ;;  %v5309_v60 = vpop.eup %5308  ;;  %5320 = vrcp.f32 %v3906_v5  ;;  %v4045_v42 = vld [vmem:[#allocation3 + $0x1a0] sm:$0xff] }
 0x887   : > { %3693 = vperm.xlu1 %5254, %v5279_v48   ;;  %v5311_v57 = vpop.eup %5310  ;;  %5322 = vrcp.f32 %v3905_v6  ;;  %v4042_v48 = vld [vmem:[#allocation3 + $0x188] sm:$0xff] }
 0x888   : > { %3688 = vperm.xlu0 %5253, %v5281_v19   ;;  %v5313_v58 = vpop.eup %5312  ;;  %5324 = vrcp.f32 %v4050_v24  ;;  %v4041_v19 = vld [vmem:[#allocation3 + $0x180] sm:$0xff] }
 0x889   : > { %v5315_v23 = vpop.eup %5314  ;;  %5326 = vrcp.f32 %v4049_v21 }
 0x88a   : > { %v5317_v28 = vpop.eup %5316  ;;  %5328 = vrcp.f32 %v3910_v32 }
 0x88b   : > { %v5319_v16 = vpop.eup %5318  ;;  %5330 = vrcp.f32 %v3897_v63 }
 0x88c   : > { %v5321_v2 = vpop.eup %5320  ;;  %5332 = vrcp.f32 %v4054_v27 }
 0x88d   : > { %v5323_v59 = vpop.eup %5322  ;;  %5334 = vrcp.f32 %v4053_v9 }
 0x88e   : > { %3713 = vperm.xlu2 %5255, %v5283_v20   ;;  %v5325_v61 = vpop.eup %5324  ;;  %5336 = vrcp.f32 %v3902_v51 }
 0x88f   : > { %3708 = vperm.xlu1 %5254, %v5285_v36   ;;  %v5327_v56 = vpop.eup %5326  ;;  %5338 = vrcp.f32 %v3901_v39 }
 0x890   : > { %3703 = vperm.xlu0 %5253, %v5287_v13   ;;  %v5329_v22 = vpop.eup %5328  ;;  %5340 = vrcp.f32 %v3898_v40 }
 0x891   : > { %v5331_v31 = vpop.eup %5330  ;;  %5342 = vrcp.f32 %v4045_v42 }
 0x892   : > { %v5333_v44 = vpop.eup %5332  ;;  %5344 = vrcp.f32 %v4042_v48  ;;  %v4047_v48 = vld [vmem:[#allocation3 + $0x1b0] sm:$0xff] }
 0x893   : > { %v5335_v34 = vpop.eup %5334  ;;  %5346 = vrcp.f32 %v4041_v19  ;;  %v4044_v19 = vld [vmem:[#allocation3 + $0x198] sm:$0xff] }
 0x894   : > { %v5337_v54 = vpop.eup %5336  ;;  %5348 = vrcp.f32 %v3768_v55  ;;  %v4043_v55 = vld [vmem:[#allocation3 + $0x190] sm:$0xff] }
 0x895   : > { %v5339_v12 = vpop.eup %5338  ;;  %5350 = vrcp.f32 %v3767_v43 }
 0x896   : > { %3792 = vperm.xlu2 %5255, %v5289_v33   ;;  %v5341_v62 = vpop.eup %5340  ;;  %5352 = vrcp.f32 %v4046_v30 }
 0x897   : > { %3787 = vperm.xlu1 %5254, %v5291_v4   ;;  %v5343_v36 = vpop.eup %5342 }
 0x898   : > { %3718 = vperm.xlu0 %5253, %v5293_v29   ;;  %v5345_v13 = vpop.eup %5344  ;;  %v3911_v29 = vld [vmem:[#allocation3 + $0x170] sm:$0xff] }
 0x899   : > { %v5347_v33 = vpop.eup %5346  ;;  %5354 = vrcp.f32 %v3911_v29 }
 0x89a   : > { %v5349_v14 = vpop.eup %5348 }
 0x89b   : > { %v5351_v15 = vpop.eup %5350 }
 0x89c   : > { %v5353_v49 = vpop.eup %5352 }
 0x89e   : > { %3807 = vperm.xlu2 %5255, %v5295_v52   ;;  %v3908_v52 = vld [vmem:[#allocation3 + $0x158] sm:$0xff] }
 0x89f   : > { %3802 = vperm.xlu1 %5254, %v5297_v7   ;;  %v3907_v7 = vld [vmem:[#allocation3 + $0x150] sm:$0xff]  ;;  %5356 = vrcp.f32 %v3908_v52 }
 0x8a0   : > { %3797 = vperm.xlu0 %5253, %v5299_v3   ;;  %5358 = vrcp.f32 %v3907_v7 }
 0x8a1   : > { %5360 = vrcp.f32 %v4052_v8  ;;  %v4638_v8 = vld [vmem:[%s8395_s6 + $0x30] sm:$0xff] }
 0x8a2   : > { %5362 = vrcp.f32 %v4051_v53  ;;  %v4048_v53 = vld [vmem:[#allocation3 + $0x1b8] sm:$0xff] }
 0x8a3   : > { %5364 = vrcp.f32 %v3912_v1 }
 0x8a6   : > { %3822 = vperm.xlu2 %5255, %v5301_v18  }
 0x8a7   : > { %3817 = vperm.xlu1 %5254, %v5303_v38   ;;  %v5355_v38 = vpop.eup %5354 }
 0x8a8   : > { %3812 = vperm.xlu0 %5253, %v5305_v25   ;;  %v5357_v25 = vpop.eup %5356 }
 0x8ae   : > { %3837 = vperm.xlu2 %5255, %v5307_v41   ;;  %v5359_v41 = vpop.eup %5358 }
 0x8af   : > { %3832 = vperm.xlu1 %5254, %v5309_v60   ;;  %v5361_v6 = vpop.eup %5360 }
 0x8b0   : > { %3827 = vperm.xlu0 %5253, %v5311_v57   ;;  %v5363_v24 = vpop.eup %5362 }
 0x8b1   : > { %v5365_v21 = vpop.eup %5364 }
 0x8b6   : > { %3852 = vperm.xlu2 %5255, %v5313_v58  }
 0x8b7   : > { %3847 = vperm.xlu1 %5254, %v5315_v23   ;;  %v3899_v23 = vld [vmem:[#allocation3 + $0x110] sm:$0xff] }
 0x8b8   : > { %3842 = vperm.xlu0 %5253, %v5317_v28   ;;  %v4056_v28 = vld [vmem:[#allocation3 + $0x1f8] sm:$0xff]  ;;  %5366 = vrcp.f32 %v3899_v23 }
 0x8b9   : > { %5368 = vrcp.f32 %v4056_v28  ;;  %v4636_v28 = vld [vmem:[%s8395_s6 + $0x20] sm:$0xff] }
 0x8be   : > { %3991 = vperm.xlu2 %5255, %v5319_v16   ;;  %v4055_v16 = vld [vmem:[#allocation3 + $0x1f0] sm:$0xff]  ;;  %v5367_v9 = vpop.eup %5366 }
 0x8bf   : > { %3976 = vperm.xlu1 %5254, %v5321_v2   ;;  %5370 = vrcp.f32 %v4055_v16  ;;  %v5369_v51 = vpop.eup %5368 }
 0x8c0   : > { %3971 = vperm.xlu0 %5253, %v5323_v59  }
 0x8c5   : > { %v5371_v39 = vpop.eup %5370 }
 0x8c6   : > { %4120 = vperm.xlu2 %5255, %v5325_v61  }
 0x8c7   : > { %4115 = vperm.xlu1 %5254, %v5327_v56   ;;  %v3904_v56 = vld [vmem:[#allocation3 + $0x138] sm:$0xff] }
 0x8c8   : > { %3996 = vperm.xlu0 %5253, %v5329_v22   ;;  %v8079_v17 = vpop.permute.xlu2 %3663  ;;  %v3903_v22 = vld [vmem:[#allocation3 + $0x130] sm:$0xff]  ;;  %5372 = vrcp.f32 %v3904_v56 }
 0x8c9   : > { %v3725_v32 = vsel %vm1262_vm2, %v8079_v17, 0.0  ;;  %5374 = vrcp.f32 %v3903_v22  ;;  %v4634_v56 = vld [vmem:[%s8395_s6 + $0x10] sm:$0xff] }
 0x8ce   : > { %3931 = vperm.xlu2 %5255, %v5331_v31   ;;  %v3900_v31 = vld [vmem:[#allocation3 + $0x118] sm:$0xff] }
 0x8cf   : > { %4140 = vperm.xlu1 %5254, %v5333_v44   ;;  %5376 = vrcp.f32 %v3900_v31 }
 0x8d0   : > { %4135 = vperm.xlu0 %5253, %v5335_v34   ;;  %v8081_v47 = vpop.permute.xlu2 %3668  ;;  %5378 = vrcp.f32 %v4047_v48 }
 0x8d1   : > { %5380 = vrcp.f32 %v4044_v19 }
 0x8d2   : > { %5382 = vrcp.f32 %v4043_v55 }
 0x8d3   : > { %5384 = vrcp.f32 %v4048_v53 }
 0x8d6   : > { %3956 = vperm.xlu2 %5255, %v5337_v54  }
 0x8d7   : > { %3951 = vperm.xlu1 %5254, %v5339_v12   ;;  %v5373_v12 = vpop.eup %5372 }
 0x8d8   : > { %3936 = vperm.xlu0 %5253, %v5341_v62   ;;  %v8083_v20 = vpop.permute.xlu2 %3683  ;;  %v5375_v62 = vpop.eup %5374 }
 0x8d9   : > { %v5377_v43 = vpop.eup %5376 }
 0x8de   : > { %4095 = vperm.xlu2 %5255, %v5343_v36   ;;  %v4639_v36 = vld [vmem:[%s8395_s6 + $0x38] sm:$0xff] }
 0x8df   : > { %4080 = vperm.xlu1 %5254, %v5345_v13   ;;  %4727 = vmatpush.bf16.msra.mxu2 %v4639_v36 }
 0x8e0   : > { %4075 = vperm.xlu0 %5253, %v5347_v33   ;;  %v8085_v35 = vpop.permute.xlu2 %3698  ;;  %4728 = vmatpush.bf16.msra.mxu3 %v4639_v36 }
 0x8e1   : > { %v8087_v4 = vpop.permute.xlu1 %3653  ;;  %4345 = vmatpush.bf16.msra.mxu0 %v4639_v36  ;;  %4726 = vmatpush.bf16.msra.mxu1 %v4639_v36 }
 0x8e2   : > { %v8089_v46 = vpop.permute.xlu0 %3643 }
 0x8e3   : > { %4730 = vmatpush.bf16.msra.mxu2 %v4638_v8 }
 0x8e4   : > { %4731 = vmatpush.bf16.msra.mxu3 %v4638_v8 }
 0x8e5   : > { %4346 = vmatpush.bf16.msra.mxu0 %v4638_v8  ;;  %4729 = vmatpush.bf16.msra.mxu1 %v4638_v8 }
 0x8e6   : > { %3862 = vperm.xlu2 %5255, %v5349_v14   ;;  %v3721_v14 = vsel %vm1262_vm2, %v8089_v46, 0.0  ;;  %v4637_v46 = vld [vmem:[%s8395_s6 + $0x28] sm:$0xff] }
 0x8e7   : > { %3857 = vperm.xlu1 %5254, %v5351_v15   ;;  %4733 = vmatpush.bf16.msra.mxu2 %v4637_v46 }
 0x8e8   : > { %4100 = vperm.xlu0 %5253, %v5353_v49   ;;  %v8091_v3 = vpop.permute.xlu2 %3713  ;;  %v5379_v49 = vpop.eup %5378  ;;  %4734 = vmatpush.bf16.msra.mxu3 %v4637_v46 }
 0x8e9   : > { %v8093_v26 = vpop.permute.xlu1 %3658  ;;  %4347 = vmatpush.bf16.msra.mxu0 %v4637_v46  ;;  %4732 = vmatpush.bf16.msra.mxu1 %v4637_v46 }
 0x8ea   : > { %v3649_v18 = vpop.permute.xlu0 %3648 }
 0x8eb   : > { %v3722_v60 = vsel %vm1262_vm2, %v3649_v18, 0.0  ;;  %4736 = vmatpush.bf16.msra.mxu2 %v4636_v28 }
 0x8ec   : > { %4737 = vmatpush.bf16.msra.mxu3 %v4636_v28 }
 0x8ed   : > { %4348 = vmatpush.bf16.msra.mxu0 %v4636_v28  ;;  %4735 = vmatpush.bf16.msra.mxu1 %v4636_v28 }
 0x8ee   : > { %4001 = vperm.xlu2 %5255, %v5355_v38   ;;  %v5381_v38 = vpop.eup %5380 }
 0x8ef   : > { %3986 = vperm.xlu1 %5254, %v5357_v25   ;;  %v5383_v25 = vpop.eup %5382 }
 0x8f0   : > { %3981 = vperm.xlu0 %5253, %v5359_v41   ;;  %v3793_v37 = vpop.permute.xlu2 %3792 }
 0x8f1   : > { %v3866_v57 = vsel %vm7074_vm5, %v3793_v37, 0.0  ;;  %v3679_v0 = vpop.permute.xlu1 %3678  ;;  %v3724_v37 = vsel %vm1262_vm2, %v8093_v26, 0.0 }
 0x8f2   : > { %v8099_v58 = vadd.f32 %v3866_v57, %v3722_v60  ;;  %v8101_v5 = vpop.permute.xlu0 %3673  ;;  %v3728_v44 = vsel %vm1262_vm2, %v3679_v0, 0.0  ;;  %v3723_v0 = vsel %vm1262_vm2, %v8087_v4, 0.0  ;;  %v4635_v4 = vld [vmem:[%s8395_s6 + $0x18] sm:$0xff] }
 0x8f3   : > { %4739 = vmatpush.bf16.msra.mxu2 %v4635_v4  ;;  %4740 = vmatpush.bf16.msra.mxu3 %v4635_v4 }
 0x8f4   : > { %4349 = vmatpush.bf16.msra.mxu0 %v4635_v4  ;;  %4738 = vmatpush.bf16.msra.mxu1 %v4635_v4 }
 0x8f6   : > { %4130 = vperm.xlu2 %5255, %v5361_v6  }
 0x8f7   : > { %4125 = vperm.xlu1 %5254, %v5363_v24   ;;  %v5385_v24 = vpop.eup %5384  ;;  %4742 = vmatpush.bf16.msra.mxu2 %v4634_v56 }
 0x8f8   : > { %4006 = vperm.xlu0 %5253, %v5365_v21   ;;  %v3808_v2 = vpop.permute.xlu2 %3807  ;;  %v3727_v21 = vsel %vm1262_vm2, %v8101_v5, 0.0  ;;  %4743 = vmatpush.bf16.msra.mxu3 %v4634_v56  ;;  %v4633_v5 = vld [vmem:[%s8395_s6 + $0x8] sm:$0xff] }
 0x8f9   : > { %v3869_v59 = vsel %vm7074_vm5, %v3808_v2, 0.0  ;;  %v3694_v63 = vpop.permute.xlu1 %3693  ;;  %4350 = vmatpush.bf16.msra.mxu0 %v4634_v56  ;;  %4741 = vmatpush.bf16.msra.mxu1 %v4634_v56 }
 0x8fa   : > { %v8108_v61 = vadd.f32 %v3869_v59, %v3725_v32  ;;  %v8110_v27 = vpop.permute.xlu0 %3688  ;;  %v3731_v30 = vsel %vm1262_vm2, %v3694_v63, 0.0 }
 0x8fb   : > { %4745 = vmatpush.bf16.msra.mxu2 %v4633_v5  ;;  %v3730_v48 = vsel %vm1262_vm2, %v8110_v27, 0.0 }
 0x8fc   : > { %4746 = vmatpush.bf16.msra.mxu3 %v4633_v5 }
 0x8fd   : > { %4351 = vmatpush.bf16.msra.mxu0 %v4633_v5  ;;  %4744 = vmatpush.bf16.msra.mxu1 %v4633_v5 }
 0x8fe   : > { %3941 = vperm.xlu2 %5255, %v5367_v9  }
 0x8ff   : > { %4150 = vperm.xlu1 %5254, %v5369_v51   ;;  %v4632_v51 = vld [vmem:[%s8395_s6] sm:$0xff] }
 0x900   : > { %4145 = vperm.xlu0 %5253, %v5371_v39   ;;  %v3823_v17 = vpop.permute.xlu2 %3822  ;;  %4748 = vmatpush.bf16.msra.mxu2 %v4632_v51 }
 0x901   : > { %v3872_v40 = vsel %vm7074_vm5, %v3823_v17, 0.0  ;;  %v8116_v34 = vpop.permute.xlu1 %3708  ;;  %4749 = vmatpush.bf16.msra.mxu3 %v4632_v51  ;;  %4352 = vmatpush.bf16.msra.mxu0 %v4632_v51 }
 0x902   : > { %v8118_v42 = vadd.f32 %v3872_v40, %v3728_v44  ;;  %v8120_v54 = vpop.permute.xlu0 %3703  ;;  %4747 = vmatpush.bf16.msra.mxu1 %v4632_v51 }
 0x906   : > { %3966 = vperm.xlu2 %5255, %v5373_v12  }
 0x907   : > { %3961 = vperm.xlu1 %5254, %v5375_v62  }
 0x908   : > { %3946 = vperm.xlu0 %5253, %v5377_v43   ;;  %v3838_v13 = vpop.permute.xlu2 %3837 }
 0x909   : > { %v3875_v33 = vsel %vm7074_vm5, %v3838_v13, 0.0  ;;  %v3788_v29 = vpop.permute.xlu1 %3787 }
 0x90a   : > { %v8132_v52 = vadd.f32 %v3875_v33, %v3731_v30  ;;  %v3865_v15 = vsel %vm7074_vm5, %v3788_v29, 0.0  ;;  %v8136_v7 = vpop.permute.xlu0 %3718  ;;  %v4194_v30 = vld [vmem:[#allocation4 + $0x20] sm:$0xff]  ;;  %v3729_v29 = vsel %vm1262_vm2, %v8083_v20, 0.0 }
 0x90b   : > { %v8138_v18 = vadd.f32 %v3865_v15, %v3721_v14 }
 0x90e   : > { %4105 = vperm.xlu2 %5255, %v5379_v49   ;;  %v8211_v49 = vld [vmem:[%s8393_s4] ss:$0 sm:$0xff] }
 0x90f   : > { %4090 = vperm.xlu1 %5254, %v5381_v38  }
 0x910   : > { %4085 = vperm.xlu0 %5253, %v5383_v25   ;;  %v8146_v1 = vpop.permute.xlu2 %3852  ;;  %v4193_v25 = vld [vmem:[#allocation4 + $0x40] sm:$0xff] }
 0x911   : > { %v3803_v41 = vpop.permute.xlu1 %3802 }
 0x912   : > { %v3868_v60 = vsel %vm7074_vm5, %v3803_v41, 0.0  ;;  %v3798_v57 = vpop.permute.xlu0 %3797 }
 0x913   : > { %v8156_v23 = vadd.f32 %v3868_v60, %v3724_v37  ;;  %v3867_v6 = vsel %vm7074_vm5, %v3798_v57, 0.0  ;;  %v8223_v57 = vld [vmem:[%s8394_s5] ss:$0 sm:$0xff] }
 0x914   : > { %v8163_v26 = vadd.f32 %v3867_v6, %v3723_v0  ;;  %v3878_v0 = vsel %vm7074_vm5, %v8146_v1, 0.0  ;;  %v3733_v6 = vsel %vm1262_vm2, %v8120_v54, 0.0 }
 0x918   : > { %4110 = vperm.xlu0 %5253, %v5385_v24   ;;  %v8175_v59 = vpop.permute.xlu2 %3991  ;;  %v3734_v24 = vsel %vm1262_vm2, %v8116_v34, 0.0 }
 0x919   : > { %v3818_v16 = vpop.permute.xlu1 %3817  ;;  %v4021_v1 = vsel %vm7495_vm8, %v8175_v59, 0.0 }
 0x91a   : > { %v3871_v2 = vsel %vm7074_vm5, %v3818_v16, 0.0  ;;  %v8173_v32 = vpop.permute.xlu0 %3812 }
 0x91b   : > { %v8177_v63 = vadd.f32 %v3871_v2, %v3727_v21  ;;  %v3894_v21 = vadd.f32 %v3878_v0, %v3734_v24 }
 0x920   : > { %v4121_v31 = vpop.permute.xlu2 %4120 }
 0x921   : > { %v3833_v9 = vpop.permute.xlu1 %3832  ;;  %v4162_v43 = vsel %vm7852_vm11, %v4121_v31, 0.0 }
 0x922   : > { %v3828_v22 = vpop.permute.xlu0 %3827  ;;  %v3874_v44 = vsel %vm7074_vm5, %v3833_v9, 0.0 }
 0x923   : > { %v3890_v12 = vadd.f32 %v3874_v44, %v3730_v48  ;;  %v3873_v13 = vsel %vm7074_vm5, %v3828_v22, 0.0  ;;  %v4198_v22 = vld [vmem:[#allocation4 + $0x70] sm:$0xff]  ;;  %v4197_v48 = vld [vmem:[#allocation4 + $0x60] sm:$0xff] }
 0x924   : > { %v3889_v14 = vadd.f32 %v3873_v13, %v3729_v29 }
 0x928   : > { %v8192_v40 = vpop.permute.xlu2 %3931 }
 0x929   : > { %v3848_v39 = vpop.permute.xlu1 %3847 }
 0x92a   : > { %v8188_v17 = vpop.permute.xlu0 %3842  ;;  %v3877_v20 = vsel %vm7074_vm5, %v3848_v39, 0.0 }
 0x92b   : > { %v3893_v4 = vadd.f32 %v3877_v20, %v3733_v6  ;;  %v4009_v20 = vsel %vm7495_vm8, %v8192_v40, 0.0 }
 0x92c   : > { %v4025_v6 = vadd.f32 %v4009_v20, %v8138_v18  ;;  %v4189_v18 = vld [vmem:[#allocation4 + $0x50] sm:$0xff] }
 0x92d   : > { %v4037_v51 = vadd.f32 %v4021_v1, %v3893_v4 }
 0x930   : > { %v8213_v8 = vpop.permute.xlu2 %3956 }
 0x931   : > { %v3977_v19 = vpop.permute.xlu1 %3976 }
 0x932   : > { %v4018_v62 = vsel %vm7495_vm8, %v3977_v19, 0.0  ;;  %v3972_v55 = vpop.permute.xlu0 %3971 }
 0x933   : > { %v4034_v36 = vadd.f32 %v4018_v62, %v3890_v12  ;;  %v4017_v27 = vsel %vm7495_vm8, %v3972_v55, 0.0 }
 0x934   : > { %v4033_v38 = vadd.f32 %v4017_v27, %v3889_v14 }
 0x935   : > { %v4178_v33 = vadd.f32 %v4162_v43, %v4034_v36 }
 0x937   : > { %v4210_v15 = vmul.f32 %v4194_v30, %v4178_v33 }
 0x938   : > { %v4096_v39 = vpop.permute.xlu2 %4095 }
 0x939   : > { %v4116_v53 = vpop.permute.xlu1 %4115  ;;  %v4230_v60 = vmul.f32 %v8211_v49, %v4210_v15 }
 0x93a   : > { %v4161_v46 = vsel %vm7852_vm11, %v4116_v53, 0.0  ;;  %v3997_v41 = vpop.permute.xlu0 %3996 }
 0x93b   : > { %v4177_v37 = vadd.f32 %v4161_v46, %v4033_v38  ;;  %v4022_v16 = vsel %vm7495_vm8, %v3997_v41, 0.0  ;;  %v4250_v56 = vadd.f32 %v8223_v57, %v4230_v60 }
 0x93c   : > { %v4038_v5 = vadd.f32 %v4022_v16, %v3894_v21  ;;  %v4157_v16 = vsel %vm7852_vm11, %v4096_v39, 0.0 }
 0x93d   : > { %v4209_v28 = vmul.f32 %v4193_v25, %v4177_v37  ;;  %v4266_v62 = vmax.f32 %v4250_v56, 0.0 }
 0x93f   : > { %v4229_v2 = vmul.f32 %v8211_v49, %v4209_v28  ;;  %v4186_v28 = vld [vmem:[#allocation4] sm:$0xff] }
 0x940   : > { %v8250_v53 = vpop.permute.xlu2 %3862 }
 0x941   : > { %v4141_v54 = vpop.permute.xlu1 %4140  ;;  %v4249_v9 = vadd.f32 %v8223_v57, %v4229_v2  ;;  %v4185_v2 = vld [vmem:[#allocation4 + $0x30] sm:$0xff] }
 0x942   : > { %v4166_v34 = vsel %vm7852_vm11, %v4141_v54, 0.0  ;;  %v4136_v31 = vpop.permute.xlu0 %4135  ;;  %v3726_v54 = vsel %vm1262_vm2, %v8081_v47, 0.0  ;;  %v4190_v47 = vld [vmem:[#allocation4 + $0x68] sm:$0xff] }
 0x943   : > { %v4182_v44 = vadd.f32 %v4166_v34, %v4038_v5  ;;  %v4165_v12 = vsel %vm7852_vm11, %v4136_v31, 0.0  ;;  %v4265_v19 = vmax.f32 %v4249_v9, 0.0  ;;  %v4014_v9 = vsel %vm7495_vm8, %v8213_v8, 0.0 }
 0x944   : > { %v4181_v55 = vadd.f32 %v4165_v12, %v4037_v51 }
 0x945   : > { %v4214_v59 = vmul.f32 %v4198_v22, %v4182_v44  ;;  %v4277_v36 = vpack.c.bf16 %v4266_v62, %v4265_v19 }
 0x946   : > { %v4213_v43 = vmul.f32 %v4197_v48, %v4181_v55 }
 0x947   : > { %v4234_v13 = vmul.f32 %v8211_v49, %v4214_v59  ;;  %4373 = vmatmul.bf16.vlgmr.msra.gmra.mxu2 %v4277_v36 }
 0x948   : > { %v4233_v30 = vmul.f32 %v8211_v49, %v4213_v43  ;;  %v8277_v22 = vpop.permute.xlu2 %4001  ;;  %v3876_v43 = vsel %vm7074_vm5, %v8188_v17, 0.0 }
 0x949   : > { %v3952_v33 = vpop.permute.xlu1 %3951  ;;  %v4254_v29 = vadd.f32 %v8223_v57, %v4234_v13 }
 0x94a   : > { %v3937_v27 = vpop.permute.xlu0 %3936  ;;  %v4253_v14 = vadd.f32 %v8223_v57, %v4233_v30  ;;  %v4013_v25 = vsel %vm7495_vm8, %v3952_v33, 0.0  ;;  %v3732_v33 = vsel %vm1262_vm2, %v8085_v35, 0.0 }
 0x94b   : > { %v4270_v15 = vmax.f32 %v4254_v29, 0.0  ;;  %v4010_v46 = vsel %vm7495_vm8, %v3937_v27, 0.0  ;;  %v4029_v37 = vadd.f32 %v4013_v25, %v8108_v61 }
 0x94c   : > { %v4269_v38 = vmax.f32 %v4253_v14, 0.0  ;;  %v4026_v60 = vadd.f32 %v4010_v46, %v8099_v58  ;;  %v3870_v58 = vsel %vm7074_vm5, %v8173_v32, 0.0  ;;  %v3892_v14 = vadd.f32 %v3876_v43, %v3732_v33 }
 0x94d   : > { %v4173_v61 = vadd.f32 %v4157_v16, %v4029_v37  ;;  %v3886_v51 = vadd.f32 %v3870_v58, %v3726_v54  ;;  %v4196_v37 = vld [vmem:[#allocation4 + $0x38] sm:$0xff]  ;;  %v3736_v54 = vsel %vm1262_vm2, %v8136_v7, 0.0 }
 0x94e   : > { %v4279_v41 = vpack.c.bf16 %v4270_v15, %v4269_v38 }
 0x94f   : > { %v4205_v31 = vmul.f32 %v4189_v18, %v4173_v61  ;;  %v4030_v48 = vadd.f32 %v4014_v9, %v3886_v51  ;;  %v3880_v18 = vsel %vm7074_vm5, %v8250_v53, 0.0  ;;  %v4023_v53 = vsel %vm7495_vm8, %v8277_v22, 0.0 }
 0x950   : > { %4383 = vmatmul.bf16.vlgmr.msra.gmra.mxu3 %v4279_v41  ;;  %v4131_v15 = vpop.permute.xlu2 %4130  ;;  %v3896_v51 = vadd.f32 %v3880_v18, %v3736_v54 }
 0x951   : > { %v4081_v0 = vpop.permute.xlu1 %4080  ;;  %v4225_v36 = vmul.f32 %v8211_v49, %v4205_v31  ;;  %v4164_v20 = vsel %vm7852_vm11, %v4131_v15, 0.0 }
 0x952   : > { %v4154_v24 = vsel %vm7852_vm11, %v4081_v0, 0.0  ;;  %v4076_v4 = vpop.permute.xlu0 %4075 }
 0x953   : > { %v4170_v21 = vadd.f32 %v4154_v24, %v4026_v60  ;;  %v4153_v40 = vsel %vm7852_vm11, %v4076_v4, 0.0  ;;  %v4245_v27 = vadd.f32 %v8223_v57, %v4225_v36 }
 0x954   : > { %v4169_v56 = vadd.f32 %v4153_v40, %v4025_v6 }
 0x955   : > { %v4202_v1 = vmul.f32 %v4186_v28, %v4170_v21  ;;  %v4261_v35 = vmax.f32 %v4245_v27, 0.0  ;;  %v4195_v21 = vld [vmem:[#allocation4 + $0x10] sm:$0xff] }
 0x956   : > { %v4201_v5 = vmul.f32 %v4185_v2, %v4169_v56 }
 0x957   : > { %v4222_v34 = vmul.f32 %v8211_v49, %v4202_v1 }
 0x958   : > { %v4221_v39 = vmul.f32 %v8211_v49, %v4201_v5  ;;  %v3942_v1 = vpop.permute.xlu2 %3941 }
 0x959   : > { %v3858_v32 = vpop.permute.xlu1 %3857  ;;  %v4242_v44 = vadd.f32 %v8223_v57, %v4222_v34 }
 0x95a   : > { %v4101_v12 = vpop.permute.xlu0 %4100  ;;  %v4241_v19 = vadd.f32 %v8223_v57, %v4221_v39  ;;  %v3879_v61 = vsel %vm7074_vm5, %v3858_v32, 0.0 }
 0x95b   : > { %v4158_v62 = vsel %vm7852_vm11, %v4101_v12, 0.0  ;;  %v4258_v8 = vmax.f32 %v4242_v44, 0.0  ;;  %v4200_v44 = vld [vmem:[#allocation4 + $0x28] sm:$0xff] }
 0x95c   : > { %v4174_v55 = vadd.f32 %v4158_v62, %v4030_v48  ;;  %v4257_v59 = vmax.f32 %v4241_v19, 0.0  ;;  %v4199_v19 = vld [vmem:[#allocation4 + $0x78] sm:$0xff] }
 0x95e   : > { %v4206_v13 = vmul.f32 %v4190_v47, %v4174_v55  ;;  %v4273_v30 = vpack.c.bf16 %v4258_v8, %v4257_v59 }
 0x960   : > { %v4226_v29 = vmul.f32 %v8211_v49, %v4206_v13  ;;  %4353 = vmatmul.bf16.vlgmr.msra.gmra.mxu0 %v4273_v30  ;;  %v3967_v36 = vpop.permute.xlu2 %3966 }
 0x961   : > { %v3987_v38 = vpop.permute.xlu1 %3986 }
 0x962   : > { %v4020_v25 = vsel %vm7495_vm8, %v3987_v38, 0.0  ;;  %v3982_v46 = vpop.permute.xlu0 %3981  ;;  %v4246_v17 = vadd.f32 %v8223_v57, %v4226_v29 }
 0x963   : > { %v4036_v41 = vadd.f32 %v4020_v25, %v3892_v14  ;;  %v4019_v6 = vsel %vm7495_vm8, %v3982_v46, 0.0 }
 0x964   : > { %v4262_v60 = vmax.f32 %v4246_v17, 0.0  ;;  %v4035_v4 = vadd.f32 %v4019_v6, %v8132_v52  ;;  %v3735_v52 = vsel %vm1262_vm2, %v8091_v3, 0.0  ;;  %v4188_v6 = vld [vmem:[#allocation4 + $0x18] sm:$0xff] }
 0x965   : > { %v4180_v0 = vadd.f32 %v4164_v20, %v4036_v41  ;;  %v3895_v9 = vadd.f32 %v3879_v61, %v3735_v52  ;;  %v4011_v41 = vsel %vm7495_vm8, %v3942_v1, 0.0  ;;  %v4191_v61 = vld [vmem:[#allocation4 + $0x8] sm:$0xff] }
 0x966   : > { %v4275_v28 = vpack.c.bf16 %v4262_v60, %v4261_v35 }
 0x967   : > { %v4212_v24 = vmul.f32 %v4196_v37, %v4180_v0  ;;  %v4039_v7 = vadd.f32 %v4023_v53, %v3895_v9  ;;  %v4027_v0 = vadd.f32 %v4011_v41, %v8163_v26  ;;  %v4016_v26 = vsel %vm7495_vm8, %v3967_v36, 0.0 }
 0x968   : > { %4363 = vmatmul.bf16.vlgmr.msra.gmra.mxu1 %v4275_v28  ;;  %v4106_v20 = vpop.permute.xlu2 %4105 }
 0x969   : > { %v4126_v16 = vpop.permute.xlu1 %4125  ;;  %v4232_v58 = vmul.f32 %v8211_v49, %v4212_v24 }
 0x96a   : > { %v4163_v2 = vsel %vm7852_vm11, %v4126_v16, 0.0  ;;  %v4007_v40 = vpop.permute.xlu0 %4006 }
 0x96b   : > { %v4179_v56 = vadd.f32 %v4163_v2, %v4035_v4  ;;  %v4024_v34 = vsel %vm7495_vm8, %v4007_v40, 0.0  ;;  %v4252_v50 = vadd.f32 %v8223_v57, %v4232_v58  ;;  %v4159_v4 = vsel %vm7852_vm11, %v4106_v20, 0.0 }
 0x96c   : > { %v4040_v39 = vadd.f32 %v4024_v34, %v3896_v51  ;;  %v4192_v34 = vld [vmem:[#allocation4 + $0x48] sm:$0xff] }
 0x96d   : > { %v4211_v5 = vmul.f32 %v4195_v21, %v4179_v56  ;;  %v4268_v8 = vmax.f32 %v4252_v50, 0.0  ;;  %v4187_v21 = vld [vmem:[#allocation4 + $0x58] sm:$0xff] }
 0x96f   : > { %v4231_v31 = vmul.f32 %v8211_v49, %v4211_v5  ;;  %v4032_v5 = vadd.f32 %v4016_v26, %v8118_v42 }
 0x971   : > { %v4151_v3 = vpop.permute.xlu1 %4150  ;;  %v4251_v32 = vadd.f32 %v8223_v57, %v4231_v31 }
 0x972   : > { %v4168_v45 = vsel %vm7852_vm11, %v4151_v3, 0.0  ;;  %v4146_v48 = vpop.permute.xlu0 %4145 }
 0x973   : > { %v4184_v12 = vadd.f32 %v4168_v45, %v4040_v39  ;;  %v4167_v47 = vsel %vm7852_vm11, %v4146_v48, 0.0  ;;  %v4267_v62 = vmax.f32 %v4251_v32, 0.0 }
 0x974   : > { %v4183_v55 = vadd.f32 %v4167_v47, %v4039_v7 }
 0x975   : > { %v4216_v59 = vmul.f32 %v4200_v44, %v4184_v12  ;;  %v4278_v22 = vpack.c.bf16 %v4268_v8, %v4267_v62 }
 0x976   : > { %v4215_v43 = vmul.f32 %v4199_v19, %v4183_v55 }
 0x977   : > { %v4236_v13 = vmul.f32 %v8211_v49, %v4216_v59  ;;  %4378 = vmatmul.bf16.gmra.mxu2 %v4278_v22 }
 0x978   : > { %v4235_v30 = vmul.f32 %v8211_v49, %v4215_v43 }
 0x979   : > { %v3962_v33 = vpop.permute.xlu1 %3961  ;;  %v4256_v29 = vadd.f32 %v8223_v57, %v4236_v13 }
 0x97a   : > { %v3947_v27 = vpop.permute.xlu0 %3946  ;;  %v4255_v14 = vadd.f32 %v8223_v57, %v4235_v30  ;;  %v4015_v25 = vsel %vm7495_vm8, %v3962_v33, 0.0 }
 0x97b   : > { %v4272_v15 = vmax.f32 %v4256_v29, 0.0  ;;  %v4012_v46 = vsel %vm7495_vm8, %v3947_v27, 0.0  ;;  %v4031_v37 = vadd.f32 %v4015_v25, %v8177_v63 }
 0x97c   : > { %v4271_v38 = vmax.f32 %v4255_v14, 0.0  ;;  %v4028_v35 = vadd.f32 %v4012_v46, %v8156_v23 }
 0x97d   : > { %v4175_v63 = vadd.f32 %v4159_v4, %v4031_v37 }
 0x97e   : > { %v4280_v17 = vpack.c.bf16 %v4272_v15, %v4271_v38 }
 0x97f   : > { %v4207_v18 = vmul.f32 %v4191_v61, %v4175_v63 }
 0x980   : > { %4388 = vmatmul.bf16.gmra.mxu3 %v4280_v17 }
 0x981   : > { %v4091_v60 = vpop.permute.xlu1 %4090  ;;  %v4227_v53 = vmul.f32 %v8211_v49, %v4207_v18 }
 0x982   : > { %v4156_v28 = vsel %vm7852_vm11, %v4091_v60, 0.0  ;;  %v4086_v24 = vpop.permute.xlu0 %4085 }
 0x983   : > { %v4172_v16 = vadd.f32 %v4156_v28, %v4028_v35  ;;  %v4155_v2 = vsel %vm7852_vm11, %v4086_v24, 0.0  ;;  %v4247_v42 = vadd.f32 %v8223_v57, %v4227_v53 }
 0x984   : > { %v4171_v40 = vadd.f32 %v4155_v2, %v4027_v0 }
 0x985   : > { %v4204_v23 = vmul.f32 %v4188_v6, %v4172_v16  ;;  %v4263_v45 = vmax.f32 %v4247_v42, 0.0 }
 0x986   : > { %v4203_v56 = vmul.f32 %v4187_v21, %v4171_v40 }
 0x987   : > { %v4224_v58 = vmul.f32 %v8211_v49, %v4204_v23 }
 0x988   : > { %v4223_v1 = vmul.f32 %v8211_v49, %v4203_v56 }
 0x989   : > { %v4244_v52 = vadd.f32 %v8223_v57, %v4224_v58 }
 0x98a   : > { %v4111_v54 = vpop.permute.xlu0 %4110  ;;  %v4243_v9 = vadd.f32 %v8223_v57, %v4223_v1 }
 0x98b   : > { %v4160_v51 = vsel %vm7852_vm11, %v4111_v54, 0.0  ;;  %v4260_v31 = vmax.f32 %v4244_v52, 0.0 }
 0x98c   : > { %v4176_v50 = vadd.f32 %v4160_v51, %v4032_v5  ;;  %v4259_v10 = vmax.f32 %v4243_v9, 0.0 }
 0x98e   : > { %v4208_v39 = vmul.f32 %v4192_v34, %v4176_v50  ;;  %v4274_v3 = vpack.c.bf16 %v4260_v31, %v4259_v10 }
 0x990   : > { %v4228_v32 = vmul.f32 %v8211_v49, %v4208_v39  ;;  %4358 = vmatmul.bf16.gmra.mxu0 %v4274_v3 }
 0x992   : > { %v4248_v44 = vadd.f32 %v8223_v57, %v4228_v32 }
 0x994   : > { %v4264_v11 = vmax.f32 %v4248_v44, 0.0 }
 0x996   : > { %v4276_v7 = vpack.c.bf16 %v4264_v11, %v4263_v45 }
 0x998   : > { %4368 = vmatmul.bf16.gmra.mxu1 %v4276_v7 }
 0x9ca   : > { %v4374_v48 = vpop.f32.mrf.mxu2 }
 0x9d2   : > { %v4376_v12 = vpop.f32.mrf.mxu2 }
 0x9d3   : > { %v4695_v19 = vpack.c.bf16 %v4376_v12, %v4374_v48  ;;  %v4384_v47 = vpop.f32.mrf.mxu3 }
 0x9d5   : > { %4722 = vst [vmem:[%s5575_s17 + $0x20] sm:$0xff] %v4695_v19  }
 0x9db   : > { %v4386_v62 = vpop.f32.mrf.mxu3 }
 0x9dc   : > { %v4705_v49 = vpack.c.bf16 %v4386_v62, %v4384_v47 }
 0x9dd   : > { %v4354_v8 = vpop.f32.mrf.mxu0 }
 0x9de   : > { %4724 = vst [vmem:[%s5575_s17 + $0x30] sm:$0xff] %v4705_v49  }
 0x9e5   : > { %v4356_v55 = vpop.f32.mrf.mxu0  ;;  %v4364_v59 = vpop.f32.mrf.mxu1 }
 0x9e6   : > { %v4675_v57 = vpack.c.bf16 %v4356_v55, %v4354_v8 }
 0x9e8   : > { %4676 = vst [vmem:[%s5575_s17] sm:$0xff] %v4675_v57  }
 0x9ed   : > { %v4366_v22 = vpop.f32.mrf.mxu1 }
 0x9ee   : > { %v4685_v36 = vpack.c.bf16 %v4366_v22, %v4364_v59 }
 0x9f0   : > { %4720 = vst [vmem:[%s5575_s17 + $0x10] sm:$0xff] %v4685_v36  }
 0x9fa   : > { %v4379_v43 = vpop.f32.mrf.mxu2 }
 0xa02   : > { %v4381_v13 = vpop.f32.mrf.mxu2 }
 0xa03   : > { %v4700_v30 = vpack.c.bf16 %v4381_v13, %v4379_v43  ;;  %v4389_v33 = vpop.f32.mrf.mxu3 }
 0xa05   : > { %4723 = vst [vmem:[%s5575_s17 + $0x28] sm:$0xff] %v4700_v30  }
 0xa0b   : > { %v4391_v29 = vpop.f32.mrf.mxu3 }
 0xa0c   : > { %v4710_v27 = vpack.c.bf16 %v4391_v29, %v4389_v33 }
 0xa0d   : > { %v4359_v14 = vpop.f32.mrf.mxu0 }
 0xa0e   : > { %4725 = vst [vmem:[%s5575_s17 + $0x38] sm:$0xff] %v4710_v27  }
 0xa15   : > { %v4361_v15 = vpop.f32.mrf.mxu0  ;;  %v4369_v38 = vpop.f32.mrf.mxu1 }
 0xa16   : > { %v4680_v25 = vpack.c.bf16 %v4361_v15, %v4359_v14 }
 0xa18   : > { %4719 = vst [vmem:[%s5575_s17 + $0x8] sm:$0xff] %v4680_v25  }
 0xa1d   : > { %v4371_v46 = vpop.f32.mrf.mxu1 }
 0xa1e   : > { %v4690_v17 = vpack.c.bf16 %v4371_v46, %v4369_v38 }
 0xa20   : > { %4721 = vst [vmem:[%s5575_s17 + $0x18] sm:$0xff] %v4690_v17  }
 0xa21 PF: > { %s17_s30 = sadd.s32 1, %s5440_s30   ;;  %s8749_s11 = sld [smem:[#allocation6_spill]] }
 0xa22   : > { %p14_p1 = scmp.ge.s32.totalorder %s17_s30, 6   ;;  %s8750_s24 = smov %s5420_s25 }
 0xa23   : > { %s8751_s25 = smov %s5541_s14  ;;  %s8752_s26 = smov %s5432_s28 }
 0xa24   : > { %s8753_s27 = smov %s5436_s29  ;;  %s8754_s28 = smov %s8757_s8 }
 0xa25   :  { %16 = sbr.rel (!%p14_p1) target bundleno = 6 (0x6), region = 144 }
 0xa27   : > { %s8755_s29 = smov %s8749_s11 }

</bundles_post_ra>
